<compile_context>
chip_gen: v7x
topology: tpu7x:2x2x1
jax: 0.10.0
libtpu: 0.0.40
codegen_flags: <defaults>
</compile_context>

<pallas_src>
import math
import functools

import jax
import jax.numpy as jnp
from jax.experimental import pallas as pl
from jax.experimental.pallas import tpu as pltpu

# ----------------------------- config (hparams) ------------------------------
HPARAMS = dict(
    enc_layers=2,
    dec_layers=2,
    hidden_size=32,
    audio_num_mel_bins=16,
    drop_out=0.0,
)
VOCAB_SIZE = 16          # len(dictionary)
PADDING_IDX = 0          # dictionary.pad()
NUM_HEADS = 2
FFN_MULT = 4
PRENET_KERNEL = 5
PRENET_LAYERS = 3
MAX_POSITIONS = 256      # stands in for DEFAULT_MAX_TARGET_POSITIONS (only needs >= T)
NEG_INF = -1e9           # stands in for fill_with_neg_inf / masked_fill(-inf)
BN_SCALE = 1.0 / math.sqrt(1.0 + 1e-5)   # eval-mode BN with init running stats (TODO below)


# --------------------------- generation / grid choice ---------------------------
def _use_batch_grid():
    """Batch-parallel grid on multi-TensorCore parts (v7x, v4/v5p megacore); single
    fused grid step with batch folded into the kernel loop on single-TC v5e / v6e."""
    try:
        kind = jax.devices()[0].device_kind.lower()
    except Exception:
        return True
    single_tc = any(t in kind for t in ("v5 lite", "v5e", "v5litepod", "v6 lite", "v6e"))
    return not single_tc


# ----------------------------- BlockSpec helpers ------------------------------
def _full_spec(shape):
    """Whole-array block, same block for every grid step (weights / tables)."""
    nd = len(shape)
    return pl.BlockSpec(tuple(shape), lambda i, _n=nd: (0,) * _n)


def _batch_spec(shape, bb):
    """Batch-tiled block: leading dim tiled by the grid in chunks of bb, rest full."""
    nd = len(shape)
    return pl.BlockSpec((bb,) + tuple(shape[1:]),
                        lambda i, _n=nd: (i,) + (0,) * (_n - 1))


_PARALLEL = pltpu.CompilerParams(dimension_semantics=("parallel",))


# ------------------------------ in-kernel helpers ------------------------------
def _layer_norm(x, g, b):
    mean = jnp.mean(x, axis=-1, keepdims=True)
    xc = x - mean
    var = jnp.mean(xc * xc, axis=-1, keepdims=True)
    return xc * jax.lax.rsqrt(var + 1e-5) * g + b


def _col_to_rows(col, n_rows):
    """Broadcast a [Tk, 1] column along a new leading row axis -> [n_rows, Tk].
    Implemented as a ones @ col^T outer product (avoids an in-kernel transpose)."""
    ones = jnp.ones((n_rows, 1), jnp.float32)
    return jax.lax.dot_general(ones, col, (((1,), (1,)), ((), ())),
                               preferred_element_type=jnp.float32)


def _positions_embed(nonpad_col, pos_tab):
    """fairseq make_positions + sinusoidal table lookup, fully in-kernel.
    Inclusive cumsum via a lower-triangular matmul, table gather via a one-hot matmul."""
    T = nonpad_col.shape[0]
    P = pos_tab.shape[0]
    row = jax.lax.broadcasted_iota(jnp.int32, (T, T), 0)
    col = jax.lax.broadcasted_iota(jnp.int32, (T, T), 1)
    tril = (row >= col).astype(jnp.float32)
    pos = jnp.dot(tril, nonpad_col, preferred_element_type=jnp.float32) * nonpad_col
    pidx = jax.lax.broadcasted_iota(jnp.int32, (T, P), 1).astype(jnp.float32)
    onehot = (pidx == pos).astype(jnp.float32)
    return jnp.dot(onehot, pos_tab, preferred_element_type=jnp.float32)


def _shifted_rows(x, d):
    """y[t] = x[t + d] if 0 <= t + d < S else 0  (row shift of a [S, C] block,
    done with an XLU sublane rotate + masked edge rows; no scratch / unaligned refs)."""
    if d == 0:
        return x
    S = x.shape[0]
    rows = jax.lax.broadcasted_iota(jnp.int32, (S, 1), 0)
    y = pltpu.roll(x, shift=(-d) % S, axis=0)
    valid = jnp.logical_and(rows >= -d, rows < S - d)
    return jnp.where(valid, y, 0.0)


def _prenet_conv(x, get_w, bias, nonpad, K):
    # TODO(synk): Prenet class not provided; conv1d(k=5, 'same') + eval-mode BN with
    # init running stats (scale 1/sqrt(1+eps)) + ReLU + nonpadding mask reconstruction.
    pad = K // 2
    acc = None
    for k in range(K):
        xt = _shifted_rows(x, k - pad).astype(jnp.bfloat16)
        t = jnp.dot(xt, get_w(k), preferred_element_type=jnp.float32)
        acc = t if acc is None else acc + t
    return jnp.maximum(acc + bias, 0.0) * BN_SCALE * nonpad


def _attend(q_bf, k_bf, v_bf, bias, num_heads, dh, logits_sink=None):
    """Per-head masked softmax attention on bf16 inputs with heads concatenated along
    the lane axis.  Returns the concatenated [Tq, nh*dh] context (f32)."""
    outs = []
    for h in range(num_heads):
        sl = slice(h * dh, (h + 1) * dh)
        # A @ B^T via dot_general dimension numbers -> transposed operand stays in the
        # MXU push (no separate XLU transpose of k).
        s = jax.lax.dot_general(q_bf[:, sl], k_bf[:, sl], (((1,), (1,)), ((), ())),
                                preferred_element_type=jnp.float32) + bias
        if logits_sink is not None:
            logits_sink(h, s)                          # pre-softmax attention logits
        m = jnp.max(s, axis=-1, keepdims=True)
        p = jnp.exp(s - m)
        p = p * pl.reciprocal(jnp.sum(p, axis=-1, keepdims=True), approx=True)
        outs.append(jnp.dot(p.astype(jnp.bfloat16), v_bf[:, sl],
                            preferred_element_type=jnp.float32))
    return jnp.concatenate(outs, axis=-1)


def _mha_self(h_bf, wqkv, bqkv, wo, bo, bias, num_heads, dh):
    """Self attention with one fused [H, 3H] qkv slab (softmax q-scale folded in)."""
    H = num_heads * dh
    qkv = (jnp.dot(h_bf, wqkv, preferred_element_type=jnp.float32) + bqkv
           ).astype(jnp.bfloat16)
    ctx = _attend(qkv[:, :H], qkv[:, H:2 * H], qkv[:, 2 * H:], bias, num_heads, dh)
    return jnp.dot(ctx.astype(jnp.bfloat16), wo, preferred_element_type=jnp.float32) + bo


def _mha_cross(h_bf, enc_bf, wq, bq, wkv, bkv, wo, bo, bias, num_heads, dh,
               logits_sink=None):
    """Encoder-decoder attention: [H,H] q slab + fused [H,2H] kv slab."""
    H = num_heads * dh
    q = (jnp.dot(h_bf, wq, preferred_element_type=jnp.float32) + bq).astype(jnp.bfloat16)
    kv = (jnp.dot(enc_bf, wkv, preferred_element_type=jnp.float32) + bkv
          ).astype(jnp.bfloat16)
    ctx = _attend(q, kv[:, :H], kv[:, H:], bias, num_heads, dh, logits_sink)
    return jnp.dot(ctx.astype(jnp.bfloat16), wo, preferred_element_type=jnp.float32) + bo


def _ffn(h_bf, w1, b1, w2, b2):
    a = jnp.maximum(jnp.dot(h_bf, w1, preferred_element_type=jnp.float32) + b1, 0.0)
    return jnp.dot(a.astype(jnp.bfloat16), w2, preferred_element_type=jnp.float32) + b2


# --------------------------------- fused kernels --------------------------------
def _encoder_fused_kernel(spec_ref, pos_ref,
                          pre_w0, pre_w12, pre_b, pre_ow, pre_ob,
                          ln1g, ln1b, ln2g, ln2b,
                          wqkv, bqkv, wo, wob,
                          w1, b1, w2, b2,
                          lnfg, lnfb,
                          o_ref, *, num_heads):
    """Whole encoder path: mel prenet -> +positions -> FFT layers -> final LN -> mask."""
    bb, S, _ = spec_ref.shape
    H = o_ref.shape[-1]
    dh = H // num_heads
    L = ln1g.shape[0]
    K = pre_w0.shape[0]
    pos_tab = pos_ref[...]
    for b in range(bb):
        spec_b = spec_ref[b]                                        # [S, MEL]
        spec_pad = (jnp.sum(jnp.abs(spec_b), axis=-1, keepdims=True) == 0
                    ).astype(jnp.float32)                           # [S, 1]
        nonpad = 1.0 - spec_pad
        # ---- mel prenet (3x conv k=5 + BN/ReLU/mask + output Linear) ----
        h = _prenet_conv(spec_b, lambda k: pre_w0[k], pre_b[0], nonpad, K)
        h = _prenet_conv(h, lambda k: pre_w12[0, k], pre_b[1], nonpad, K)
        h = _prenet_conv(h, lambda k: pre_w12[1, k], pre_b[2], nonpad, K)
        x = (jnp.dot(h.astype(jnp.bfloat16), pre_ow[...],
                     preferred_element_type=jnp.float32) + pre_ob[...]) * nonpad
        # ---- FFTBlocks ----
        # TODO(synk): FFTBlocks class not provided; pre-LN self-attn + FFN with
        # nonpadding re-masking after each sublayer (reconstruction).
        pad_col = (jnp.sum(jnp.abs(x), axis=-1, keepdims=True) == 0).astype(jnp.float32)
        np_col = 1.0 - pad_col
        x = (x + _positions_embed(np_col, pos_tab)) * np_col
        kp_bias = _col_to_rows(pad_col, S) * NEG_INF                # [S, S] key padding
        for l in range(L):
            h_bf = _layer_norm(x, ln1g[l], ln1b[l]).astype(jnp.bfloat16)
            a = _mha_self(h_bf, wqkv[l], bqkv[l], wo[l], wob[l], kp_bias, num_heads, dh)
            x = (x + a) * np_col
            h_bf = _layer_norm(x, ln2g[l], ln2b[l]).astype(jnp.bfloat16)
            x = (x + _ffn(h_bf, w1[l], b1[l], w2[l], b2[l])) * np_col
        x = _layer_norm(x, lnfg[...], lnfb[...])
        # forward_encoder: `encoder_out * encoder_padding_mask` -- reproduced verbatim
        # from the reference module (it multiplies by the PADDING mask as written there).
        o_ref[b] = x * spec_pad


def _decoder_fused_kernel(dec_ref, enc_ref, pos_ref,
                          ln1g, ln1b, ln2g, ln2b, ln3g, ln3b,
                          s_wqkv, s_bqkv, s_wo, s_wob,
                          e_wq, e_bq, e_wkv, e_bkv, e_wo, e_wob,
                          w1, b1, w2, b2,
                          lnfg, lnfb, projw,
                          o_ref, logits_ref, *, num_heads):
    """Whole decoder path: +positions -> decoder layers -> final LN -> project_out."""
    bb, T, H = dec_ref.shape
    S = enc_ref.shape[1]
    dh = H // num_heads
    L = ln1g.shape[0]
    pos_tab = pos_ref[...]
    row = jax.lax.broadcasted_iota(jnp.int32, (T, T), 0)
    col = jax.lax.broadcasted_iota(jnp.int32, (T, T), 1)
    causal = jnp.where(col > row, NEG_INF, 0.0)                     # buffered_future_mask
    for b in range(bb):
        dec_in = dec_ref[b]                                         # [T, H]
        enc = enc_ref[b]                                            # [S, H]
        enc_bf = enc.astype(jnp.bfloat16)
        pad_t = (jnp.sum(jnp.abs(dec_in), axis=-1, keepdims=True) == 0
                 ).astype(jnp.float32)                              # self_attn_padding_mask
        np_t = 1.0 - pad_t
        pad_s = (jnp.sum(jnp.abs(enc), axis=-1, keepdims=True) == 0
                 ).astype(jnp.float32)                              # encoder_padding_mask
        self_bias = causal + _col_to_rows(pad_t, T) * NEG_INF       # [T, T]
        enc_bias = _col_to_rows(pad_s, T) * NEG_INF                 # [T, S]
        # x = dec_inputs + positions ; F.dropout(p=0.0) is the identity.
        x = dec_in + _positions_embed(np_t, pos_tab)
        # TODO(synk): TransformerDecoderLayer not provided; NATSpeech DecSALayer-style
        # pre-LN self-attn / enc-dec attn / FFN reconstruction.
        for l in range(L):
            h_bf = _layer_norm(x, ln1g[l], ln1b[l]).astype(jnp.bfloat16)
            x = x + _mha_self(h_bf, s_wqkv[l], s_bqkv[l], s_wo[l], s_wob[l],
                              self_bias, num_heads, dh)
            h_bf = _layer_norm(x, ln2g[l], ln2b[l]).astype(jnp.bfloat16)

            def _sink(hh, s, _b=b, _l=l):
                logits_ref[_b, _l, hh] = s                          # pre-softmax logits

            x = x + _mha_cross(h_bf, enc_bf, e_wq[l], e_bq[l], e_wkv[l], e_bkv[l],
                               e_wo[l], e_wob[l], enc_bias, num_heads, dh,
                               logits_sink=_sink)
            h_bf = _layer_norm(x, ln3g[l], ln3b[l]).astype(jnp.bfloat16)
            x = x + _ffn(h_bf, w1[l], b1[l], w2[l], b2[l])
        x = _layer_norm(x, lnfg[...], lnfb[...])
        o_ref[b] = jnp.dot(x.astype(jnp.bfloat16), projw[...],
                           preferred_element_type=jnp.float32)      # project_out_dim


# ------------------------------ pallas_call wrappers ----------------------------
def encoder_call(spec, p, *, num_heads, batch_grid):
    B, S, _ = spec.shape
    H = p['pre_ow'].shape[-1]
    nb = B if batch_grid else 1
    bb = B // nb
    pos = p['pos_table'][:S + 1]             # positions <= S; padding_idx row 0 is zero
    ins = (spec, pos,
           p['pre_w0'], p['pre_w12'], p['pre_b'], p['pre_ow'], p['pre_ob'],
           p['ln1_g'], p['ln1_b'], p['ln2_g'], p['ln2_b'],
           p['wqkv'], p['bqkv'], p['wo'], p['wob'],
           p['w1'], p['b1'], p['w2'], p['b2'],
           p['lnf_g'], p['lnf_b'])
    in_specs = [_batch_spec(spec.shape, bb)] + [_full_spec(a.shape) for a in ins[1:]]
    return pl.pallas_call(
        functools.partial(_encoder_fused_kernel, num_heads=num_heads),
        out_shape=jax.ShapeDtypeStruct((B, S, H), jnp.float32),
        grid=(nb,),
        in_specs=in_specs,
        out_specs=_batch_spec((B, S, H), bb),
        compiler_params=_PARALLEL,
    )(*ins)


def decoder_call(dec_inputs, encoder_out, p, *, num_heads, batch_grid):
    B, T, H = dec_inputs.shape
    S = encoder_out.shape[1]
    V = p['proj_w'].shape[-1]
    L = p['ln1_g'].shape[0]
    nb = B if batch_grid else 1
    bb = B // nb
    pos = p['pos_table'][:T + 1]
    ins = (dec_inputs, encoder_out, pos,
           p['ln1_g'], p['ln1_b'], p['ln2_g'], p['ln2_b'], p['ln3_g'], p['ln3_b'],
           p['s_wqkv'], p['s_bqkv'], p['s_wo'], p['s_wob'],
           p['e_wq'], p['e_bq'], p['e_wkv'], p['e_bkv'], p['e_wo'], p['e_wob'],
           p['w1'], p['b1'], p['w2'], p['b2'],
           p['lnf_g'], p['lnf_b'], p['proj_w'])
    in_specs = ([_batch_spec(dec_inputs.shape, bb), _batch_spec(encoder_out.shape, bb)]
                + [_full_spec(a.shape) for a in ins[2:]])
    return pl.pallas_call(
        functools.partial(_decoder_fused_kernel, num_heads=num_heads),
        out_shape=(jax.ShapeDtypeStruct((B, T, V), jnp.float32),
                   jax.ShapeDtypeStruct((B, L, num_heads, T, S), jnp.float32)),
        grid=(nb,),
        in_specs=in_specs,
        out_specs=(_batch_spec((B, T, V), bb),
                   _batch_spec((B, L, num_heads, T, S), bb)),
        compiler_params=_PARALLEL,
    )(*ins)


def transformer_asr_forward(params, spec, prev_tokens, *, batch_grid):
    """TransformerASR.forward: spec [B,S,mel] f32, prev_tokens [B,T] int32."""
    encoder_out = encoder_call(spec, params['encoder'],
                               num_heads=NUM_HEADS, batch_grid=batch_grid)
    dec_inputs = jnp.take(params['token_embed'], prev_tokens, axis=0)  # tiny gather
    dec_out, logits = decoder_call(dec_inputs, encoder_out, params['decoder'],
                                   num_heads=NUM_HEADS, batch_grid=batch_grid)
    all_attn_logits = [logits[:, l] for l in range(logits.shape[1])]
    return dec_out, all_attn_logits


# ------------------------------- parameter init --------------------------------
class ParamInit:
    def __init__(self, seed):
        self.key = jax.random.PRNGKey(seed)

    def __call__(self, shape, scale=0.1):
        self.key, sub = jax.random.split(self.key)
        return scale * jax.random.normal(sub, shape, jnp.float32)


def sinusoidal_table(num_embeddings, dim, padding_idx):
    half = dim // 2
    emb_scale = math.log(10000.0) / (half - 1)
    freqs = jnp.exp(jnp.arange(half, dtype=jnp.float32) * -emb_scale)
    pos = jnp.arange(num_embeddings, dtype=jnp.float32)[:, None] * freqs[None, :]
    tab = jnp.concatenate([jnp.sin(pos), jnp.cos(pos)], axis=1)
    if dim % 2 == 1:
        tab = jnp.concatenate([tab, jnp.zeros((num_embeddings, 1), jnp.float32)], axis=1)
    return tab.at[padding_idx].set(0.0)


def make_params(init, H, mel, vocab, enc_layers, dec_layers, ffn_mult, num_heads):
    dh = H // num_heads
    F = ffn_mult * H
    q_scale = dh ** -0.5
    bf = jnp.bfloat16

    def ln():
        return 1.0 + init((1, H)), init((1, H))

    def self_slab():
        wq, wk, wv, wo = init((H, H)), init((H, H)), init((H, H)), init((H, H))
        bq, bk, bv, bo = init((H,)), init((H,)), init((H,)), init((H,))
        wqkv = jnp.concatenate([wq * q_scale, wk, wv], axis=1)   # fold softmax q-scale
        bqkv = jnp.concatenate([bq * q_scale, bk, bv])[None, :]
        return wqkv.astype(bf), bqkv, wo.astype(bf), bo[None, :]

    def cross_slab():
        wq, wk, wv, wo = init((H, H)), init((H, H)), init((H, H)), init((H, H))
        bq, bk, bv, bo = init((H,)), init((H,)), init((H,)), init((H,))
        wkv = jnp.concatenate([wk, wv], axis=1)
        bkv = jnp.concatenate([bk, bv])[None, :]
        return ((wq * q_scale).astype(bf), (bq * q_scale)[None, :],
                wkv.astype(bf), bkv, wo.astype(bf), bo[None, :])

    def ffn():
        return (init((H, F)).astype(bf), init((1, F)),
                init((F, H)).astype(bf), init((1, H)))

    def stack(xs, i):
        return jnp.stack([x[i] for x in xs])

    token_embed = init((vocab, H), scale=H ** -0.5).at[PADDING_IDX].set(0.0)
    pos_table = sinusoidal_table(MAX_POSITIONS, H, PADDING_IDX)

    # -------- encoder pack (prenet + stacked FFT layers + final LN) --------
    e_ln1 = [ln() for _ in range(enc_layers)]
    e_ln2 = [ln() for _ in range(enc_layers)]
    e_att = [self_slab() for _ in range(enc_layers)]
    e_ffn = [ffn() for _ in range(enc_layers)]
    e_lnf = ln()
    encoder = dict(
        pre_w0=init((PRENET_KERNEL, mel, H)).astype(bf),
        pre_w12=jnp.stack([init((PRENET_KERNEL, H, H)) for _ in range(2)]).astype(bf),
        pre_b=jnp.stack([init((1, H)) for _ in range(PRENET_LAYERS)]),
        pre_ow=init((H, H)).astype(bf), pre_ob=init((1, H)),
        ln1_g=stack(e_ln1, 0), ln1_b=stack(e_ln1, 1),
        ln2_g=stack(e_ln2, 0), ln2_b=stack(e_ln2, 1),
        wqkv=stack(e_att, 0), bqkv=stack(e_att, 1),
        wo=stack(e_att, 2), wob=stack(e_att, 3),
        w1=stack(e_ffn, 0), b1=stack(e_ffn, 1), w2=stack(e_ffn, 2), b2=stack(e_ffn, 3),
        lnf_g=e_lnf[0], lnf_b=e_lnf[1],
        pos_table=pos_table)

    # -------- decoder pack (stacked layers + final LN + project_out) --------
    d_ln1 = [ln() for _ in range(dec_layers)]
    d_ln2 = [ln() for _ in range(dec_layers)]
    d_ln3 = [ln() for _ in range(dec_layers)]
    d_self = [self_slab() for _ in range(dec_layers)]
    d_cross = [cross_slab() for _ in range(dec_layers)]
    d_ffn = [ffn() for _ in range(dec_layers)]
    d_lnf = ln()
    decoder = dict(
        ln1_g=stack(d_ln1, 0), ln1_b=stack(d_ln1, 1),
        ln2_g=stack(d_ln2, 0), ln2_b=stack(d_ln2, 1),
        ln3_g=stack(d_ln3, 0), ln3_b=stack(d_ln3, 1),
        s_wqkv=stack(d_self, 0), s_bqkv=stack(d_self, 1),
        s_wo=stack(d_self, 2), s_wob=stack(d_self, 3),
        e_wq=stack(d_cross, 0), e_bq=stack(d_cross, 1),
        e_wkv=stack(d_cross, 2), e_bkv=stack(d_cross, 3),
        e_wo=stack(d_cross, 4), e_wob=stack(d_cross, 5),
        w1=stack(d_ffn, 0), b1=stack(d_ffn, 1), w2=stack(d_ffn, 2), b2=stack(d_ffn, 3),
        lnf_g=d_lnf[0], lnf_b=d_lnf[1],
        proj_w=init((H, vocab)).astype(bf),
        pos_table=pos_table)

    return dict(token_embed=token_embed, encoder=encoder, decoder=decoder)


# ------------------------------------ main --------------------------------------
if __name__ == "__main__":
    H = HPARAMS['hidden_size']
    MEL = HPARAMS['audio_num_mel_bins']
    B, S, T = 2, 16, 8

    params = make_params(ParamInit(seed=42), H, MEL, VOCAB_SIZE,
                         HPARAMS['enc_layers'], HPARAMS['dec_layers'],
                         FFN_MULT, NUM_HEADS)

    key = jax.random.PRNGKey(0)
    k_spec, k_tok = jax.random.split(key)
    spec = jax.random.normal(k_spec, (B, S, MEL), jnp.float32)
    spec = spec.at[:, 12:, :].set(0.0)                      # last 4 frames = padding
    prev_tokens = jax.random.randint(k_tok, (B, T), 1, VOCAB_SIZE, jnp.int32)

    batch_grid = _use_batch_grid()
    fwd = jax.jit(functools.partial(transformer_asr_forward, params,
                                    batch_grid=batch_grid))
    dec_out, attn_logits = fwd(spec, prev_tokens)
    (dec_out, attn_logits) = jax.block_until_ready((dec_out, attn_logits))

    assert dec_out.shape == (B, T, VOCAB_SIZE)
    assert len(attn_logits) == HPARAMS['dec_layers']
    assert attn_logits[0].shape == (B, NUM_HEADS, T, S)
    assert bool(jnp.isfinite(dec_out).all())
    assert all(bool(jnp.isfinite(a).all()) for a in attn_logits)
    print("KERNEL_OK")
</pallas_src>

<mosaic_0001>
module attributes {stable_mosaic.version = 11 : i64} {
  func.func @_encoder_fused_kernel(%arg0: i32, %arg1: memref<1x16x16xf32, #tpu.memory_space<vmem>>, %arg2: memref<17x32xf32, #tpu.memory_space<vmem>>, %arg3: memref<5x16x32xbf16, #tpu.memory_space<vmem>>, %arg4: memref<2x5x32x32xbf16, #tpu.memory_space<vmem>>, %arg5: memref<3x1x32xf32, #tpu.memory_space<vmem>>, %arg6: memref<32x32xbf16, #tpu.memory_space<vmem>>, %arg7: memref<1x32xf32, #tpu.memory_space<vmem>>, %arg8: memref<2x1x32xf32, #tpu.memory_space<vmem>>, %arg9: memref<2x1x32xf32, #tpu.memory_space<vmem>>, %arg10: memref<2x1x32xf32, #tpu.memory_space<vmem>>, %arg11: memref<2x1x32xf32, #tpu.memory_space<vmem>>, %arg12: memref<2x32x96xbf16, #tpu.memory_space<vmem>>, %arg13: memref<2x1x96xf32, #tpu.memory_space<vmem>>, %arg14: memref<2x32x32xbf16, #tpu.memory_space<vmem>>, %arg15: memref<2x1x32xf32, #tpu.memory_space<vmem>>, %arg16: memref<2x32x128xbf16, #tpu.memory_space<vmem>>, %arg17: memref<2x1x128xf32, #tpu.memory_space<vmem>>, %arg18: memref<2x128x32xbf16, #tpu.memory_space<vmem>>, %arg19: memref<2x1x32xf32, #tpu.memory_space<vmem>>, %arg20: memref<1x32xf32, #tpu.memory_space<vmem>>, %arg21: memref<1x32xf32, #tpu.memory_space<vmem>>, %arg22: memref<1x16x32xf32, #tpu.memory_space<vmem>>) attributes {dimension_semantics = [#tpu.dimension_semantics<parallel>], iteration_bounds = array<i64: 2>, scalar_prefetch = 0 : i64, scratch_operands = 0 : i64, tpu.core_type = #tpu.core_type<tc>, window_params = [{transform_indices = @transform_0, window_bounds = array<i64: 1, 16, 16>}, {pipeline_mode = #tpu.pipeline_mode<synchronous>, transform_indices = @transform_1, window_bounds = array<i64: 17, 32>}, {pipeline_mode = #tpu.pipeline_mode<synchronous>, transform_indices = @transform_2, window_bounds = array<i64: 5, 16, 32>}, {pipeline_mode = #tpu.pipeline_mode<synchronous>, transform_indices = @transform_3, window_bounds = array<i64: 2, 5, 32, 32>}, {pipeline_mode = #tpu.pipeline_mode<synchronous>, transform_indices = @transform_4, window_bounds = array<i64: 3, 1, 32>}, {pipeline_mode = #tpu.pipeline_mode<synchronous>, transform_indices = @transform_5, window_bounds = array<i64: 32, 32>}, {pipeline_mode = #tpu.pipeline_mode<synchronous>, transform_indices = @transform_6, window_bounds = array<i64: 1, 32>}, {pipeline_mode = #tpu.pipeline_mode<synchronous>, transform_indices = @transform_7, window_bounds = array<i64: 2, 1, 32>}, {pipeline_mode = #tpu.pipeline_mode<synchronous>, transform_indices = @transform_8, window_bounds = array<i64: 2, 1, 32>}, {pipeline_mode = #tpu.pipeline_mode<synchronous>, transform_indices = @transform_9, window_bounds = array<i64: 2, 1, 32>}, {pipeline_mode = #tpu.pipeline_mode<synchronous>, transform_indices = @transform_10, window_bounds = array<i64: 2, 1, 32>}, {pipeline_mode = #tpu.pipeline_mode<synchronous>, transform_indices = @transform_11, window_bounds = array<i64: 2, 32, 96>}, {pipeline_mode = #tpu.pipeline_mode<synchronous>, transform_indices = @transform_12, window_bounds = array<i64: 2, 1, 96>}, {pipeline_mode = #tpu.pipeline_mode<synchronous>, transform_indices = @transform_13, window_bounds = array<i64: 2, 32, 32>}, {pipeline_mode = #tpu.pipeline_mode<synchronous>, transform_indices = @transform_14, window_bounds = array<i64: 2, 1, 32>}, {pipeline_mode = #tpu.pipeline_mode<synchronous>, transform_indices = @transform_15, window_bounds = array<i64: 2, 32, 128>}, {pipeline_mode = #tpu.pipeline_mode<synchronous>, transform_indices = @transform_16, window_bounds = array<i64: 2, 1, 128>}, {pipeline_mode = #tpu.pipeline_mode<synchronous>, transform_indices = @transform_17, window_bounds = array<i64: 2, 128, 32>}, {pipeline_mode = #tpu.pipeline_mode<synchronous>, transform_indices = @transform_18, window_bounds = array<i64: 2, 1, 32>}, {pipeline_mode = #tpu.pipeline_mode<synchronous>, transform_indices = @transform_19, window_bounds = array<i64: 1, 32>}, {pipeline_mode = #tpu.pipeline_mode<synchronous>, transform_indices = @transform_20, window_bounds = array<i64: 1, 32>}, {transform_indices = @transform_21, window_bounds = array<i64: 1, 16, 32>}]} {
    %c0 = arith.constant 0 : index
    %c0_0 = arith.constant 0 : index
    %0 = vector.load %arg2[%c0, %c0_0] : memref<17x32xf32, #tpu.memory_space<vmem>>, vector<17x32xf32>
    %c0_1 = arith.constant 0 : index
    %c0_2 = arith.constant 0 : index
    %c0_3 = arith.constant 0 : index
    %1 = vector.load %arg1[%c0_1, %c0_2, %c0_3] : memref<1x16x16xf32, #tpu.memory_space<vmem>>, vector<1x16x16xf32>
    %2 = vector.shape_cast %1 : vector<1x16x16xf32> to vector<16x16xf32>
    %3 = math.absf %2 : vector<16x16xf32>
    %cst = arith.constant dense<0.000000e+00> : vector<16xf32>
    %4 = vector.multi_reduction <add>, %3, %cst [1] : vector<16x16xf32> to vector<16xf32>
    %5 = vector.shape_cast %4 : vector<16xf32> to vector<16x1xf32>
    %cst_4 = arith.constant 0.000000e+00 : f32
    %6 = vector.broadcast %cst_4 : f32 to vector<16x1xf32>
    %7 = arith.cmpf oeq, %5, %6 : vector<16x1xf32>
    %8 = arith.extui %7 : vector<16x1xi1> to vector<16x1xi32>
    %9 = arith.sitofp %8 : vector<16x1xi32> to vector<16x1xf32>
    %cst_5 = arith.constant 1.000000e+00 : f32
    %10 = vector.broadcast %cst_5 : f32 to vector<16x1xf32>
    %11 = arith.subf %10, %9 : vector<16x1xf32>
    %c0_6 = arith.constant 0 : index
    %c0_7 = arith.constant 0 : index
    %c0_8 = arith.constant 0 : index
    %12 = vector.load %arg5[%c0_6, %c0_7, %c0_8] : memref<3x1x32xf32, #tpu.memory_space<vmem>>, vector<1x1x32xf32>
    %13 = vector.shape_cast %12 : vector<1x1x32xf32> to vector<1x32xf32>
    %14 = tpu.iota {dimensions = array<i32: 0>} : vector<16x1xi32>
    %c2_i32 = arith.constant 2 : i32
    %15 = tpu.dynamic_rotate %2 by %c2_i32 dim 0 : vector<16x16xf32>, i32 -> vector<16x16xf32>
    %c2_i32_9 = arith.constant 2 : i32
    %16 = vector.broadcast %c2_i32_9 : i32 to vector<16x1xi32>
    %17 = arith.cmpi sge, %14, %16 : vector<16x1xi32>
    %c18_i32 = arith.constant 18 : i32
    %18 = vector.broadcast %c18_i32 : i32 to vector<16x1xi32>
    %19 = arith.cmpi slt, %14, %18 : vector<16x1xi32>
    %20 = arith.andi %17, %19 : vector<16x1xi1>
    %cst_10 = arith.constant 0.000000e+00 : f32
    %21 = vector.shape_cast %20 : vector<16x1xi1> to vector<16x1xi1>
    %22 = vector.broadcast %21 : vector<16x1xi1> to vector<16x16xi1>
    %23 = vector.broadcast %cst_10 : f32 to vector<16x16xf32>
    %24 = arith.select %22, %15, %23 : vector<16x16xi1>, vector<16x16xf32>
    %25 = arith.truncf %24 : vector<16x16xf32> to vector<16x16xbf16>
    %c0_11 = arith.constant 0 : index
    %c0_12 = arith.constant 0 : index
    %c0_13 = arith.constant 0 : index
    %26 = vector.load %arg3[%c0_11, %c0_12, %c0_13] : memref<5x16x32xbf16, #tpu.memory_space<vmem>>, vector<1x16x32xbf16>
    %27 = vector.shape_cast %26 : vector<1x16x32xbf16> to vector<16x32xbf16>
    %cst_14 = arith.constant dense<0.000000e+00> : vector<16x32xf32>
    %28 = tpu.matmul %25, %27, %cst_14 {dimension_numbers = #tpu.dot_dimension_numbers<[1], [0], [0], [1], [0, 0, 1, 1], [], []>} : vector<16x16xbf16>, vector<16x32xbf16>, vector<16x32xf32> -> vector<16x32xf32>
    %29 = tpu.iota {dimensions = array<i32: 0>} : vector<16x1xi32>
    %c1_i32 = arith.constant 1 : i32
    %30 = tpu.dynamic_rotate %2 by %c1_i32 dim 0 : vector<16x16xf32>, i32 -> vector<16x16xf32>
    %c1_i32_15 = arith.constant 1 : i32
    %31 = vector.broadcast %c1_i32_15 : i32 to vector<16x1xi32>
    %32 = arith.cmpi sge, %29, %31 : vector<16x1xi32>
    %c17_i32 = arith.constant 17 : i32
    %33 = vector.broadcast %c17_i32 : i32 to vector<16x1xi32>
    %34 = arith.cmpi slt, %29, %33 : vector<16x1xi32>
    %35 = arith.andi %32, %34 : vector<16x1xi1>
    %cst_16 = arith.constant 0.000000e+00 : f32
    %36 = vector.shape_cast %35 : vector<16x1xi1> to vector<16x1xi1>
    %37 = vector.broadcast %36 : vector<16x1xi1> to vector<16x16xi1>
    %38 = vector.broadcast %cst_16 : f32 to vector<16x16xf32>
    %39 = arith.select %37, %30, %38 : vector<16x16xi1>, vector<16x16xf32>
    %40 = arith.truncf %39 : vector<16x16xf32> to vector<16x16xbf16>
    %c1 = arith.constant 1 : index
    %c0_17 = arith.constant 0 : index
    %c0_18 = arith.constant 0 : index
    %41 = vector.load %arg3[%c1, %c0_17, %c0_18] : memref<5x16x32xbf16, #tpu.memory_space<vmem>>, vector<1x16x32xbf16>
    %42 = vector.shape_cast %41 : vector<1x16x32xbf16> to vector<16x32xbf16>
    %cst_19 = arith.constant dense<0.000000e+00> : vector<16x32xf32>
    %43 = tpu.matmul %40, %42, %cst_19 {dimension_numbers = #tpu.dot_dimension_numbers<[1], [0], [0], [1], [0, 0, 1, 1], [], []>} : vector<16x16xbf16>, vector<16x32xbf16>, vector<16x32xf32> -> vector<16x32xf32>
    %44 = arith.addf %28, %43 : vector<16x32xf32>
    %45 = arith.truncf %2 : vector<16x16xf32> to vector<16x16xbf16>
    %c2 = arith.constant 2 : index
    %c0_20 = arith.constant 0 : index
    %c0_21 = arith.constant 0 : index
    %46 = vector.load %arg3[%c2, %c0_20, %c0_21] : memref<5x16x32xbf16, #tpu.memory_space<vmem>>, vector<1x16x32xbf16>
    %47 = vector.shape_cast %46 : vector<1x16x32xbf16> to vector<16x32xbf16>
    %cst_22 = arith.constant dense<0.000000e+00> : vector<16x32xf32>
    %48 = tpu.matmul %45, %47, %cst_22 {dimension_numbers = #tpu.dot_dimension_numbers<[1], [0], [0], [1], [0, 0, 1, 1], [], []>} : vector<16x16xbf16>, vector<16x32xbf16>, vector<16x32xf32> -> vector<16x32xf32>
    %49 = arith.addf %44, %48 : vector<16x32xf32>
    %50 = tpu.iota {dimensions = array<i32: 0>} : vector<16x1xi32>
    %c15_i32 = arith.constant 15 : i32
    %51 = tpu.dynamic_rotate %2 by %c15_i32 dim 0 : vector<16x16xf32>, i32 -> vector<16x16xf32>
    %c-1_i32 = arith.constant -1 : i32
    %52 = vector.broadcast %c-1_i32 : i32 to vector<16x1xi32>
    %53 = arith.cmpi sge, %50, %52 : vector<16x1xi32>
    %c15_i32_23 = arith.constant 15 : i32
    %54 = vector.broadcast %c15_i32_23 : i32 to vector<16x1xi32>
    %55 = arith.cmpi slt, %50, %54 : vector<16x1xi32>
    %56 = arith.andi %53, %55 : vector<16x1xi1>
    %cst_24 = arith.constant 0.000000e+00 : f32
    %57 = vector.shape_cast %56 : vector<16x1xi1> to vector<16x1xi1>
    %58 = vector.broadcast %57 : vector<16x1xi1> to vector<16x16xi1>
    %59 = vector.broadcast %cst_24 : f32 to vector<16x16xf32>
    %60 = arith.select %58, %51, %59 : vector<16x16xi1>, vector<16x16xf32>
    %61 = arith.truncf %60 : vector<16x16xf32> to vector<16x16xbf16>
    %c3 = arith.constant 3 : index
    %c0_25 = arith.constant 0 : index
    %c0_26 = arith.constant 0 : index
    %62 = vector.load %arg3[%c3, %c0_25, %c0_26] : memref<5x16x32xbf16, #tpu.memory_space<vmem>>, vector<1x16x32xbf16>
    %63 = vector.shape_cast %62 : vector<1x16x32xbf16> to vector<16x32xbf16>
    %cst_27 = arith.constant dense<0.000000e+00> : vector<16x32xf32>
    %64 = tpu.matmul %61, %63, %cst_27 {dimension_numbers = #tpu.dot_dimension_numbers<[1], [0], [0], [1], [0, 0, 1, 1], [], []>} : vector<16x16xbf16>, vector<16x32xbf16>, vector<16x32xf32> -> vector<16x32xf32>
    %65 = arith.addf %49, %64 : vector<16x32xf32>
    %66 = tpu.iota {dimensions = array<i32: 0>} : vector<16x1xi32>
    %c14_i32 = arith.constant 14 : i32
    %67 = tpu.dynamic_rotate %2 by %c14_i32 dim 0 : vector<16x16xf32>, i32 -> vector<16x16xf32>
    %c-2_i32 = arith.constant -2 : i32
    %68 = vector.broadcast %c-2_i32 : i32 to vector<16x1xi32>
    %69 = arith.cmpi sge, %66, %68 : vector<16x1xi32>
    %c14_i32_28 = arith.constant 14 : i32
    %70 = vector.broadcast %c14_i32_28 : i32 to vector<16x1xi32>
    %71 = arith.cmpi slt, %66, %70 : vector<16x1xi32>
    %72 = arith.andi %69, %71 : vector<16x1xi1>
    %cst_29 = arith.constant 0.000000e+00 : f32
    %73 = vector.shape_cast %72 : vector<16x1xi1> to vector<16x1xi1>
    %74 = vector.broadcast %73 : vector<16x1xi1> to vector<16x16xi1>
    %75 = vector.broadcast %cst_29 : f32 to vector<16x16xf32>
    %76 = arith.select %74, %67, %75 : vector<16x16xi1>, vector<16x16xf32>
    %77 = arith.truncf %76 : vector<16x16xf32> to vector<16x16xbf16>
    %c4 = arith.constant 4 : index
    %c0_30 = arith.constant 0 : index
    %c0_31 = arith.constant 0 : index
    %78 = vector.load %arg3[%c4, %c0_30, %c0_31] : memref<5x16x32xbf16, #tpu.memory_space<vmem>>, vector<1x16x32xbf16>
    %79 = vector.shape_cast %78 : vector<1x16x32xbf16> to vector<16x32xbf16>
    %cst_32 = arith.constant dense<0.000000e+00> : vector<16x32xf32>
    %80 = tpu.matmul %77, %79, %cst_32 {dimension_numbers = #tpu.dot_dimension_numbers<[1], [0], [0], [1], [0, 0, 1, 1], [], []>} : vector<16x16xbf16>, vector<16x32xbf16>, vector<16x32xf32> -> vector<16x32xf32>
    %81 = arith.addf %65, %80 : vector<16x32xf32>
    %82 = vector.broadcast %13 : vector<1x32xf32> to vector<16x32xf32>
    %83 = arith.addf %81, %82 : vector<16x32xf32>
    %cst_33 = arith.constant 0.000000e+00 : f32
    %84 = vector.broadcast %cst_33 : f32 to vector<16x32xf32>
    %85 = arith.maximumf %83, %84 : vector<16x32xf32>
    %cst_34 = arith.constant 0.999994993 : f32
    %86 = vector.broadcast %cst_34 : f32 to vector<16x32xf32>
    %87 = arith.mulf %85, %86 : vector<16x32xf32>
    %88 = vector.broadcast %11 : vector<16x1xf32> to vector<16x32xf32>
    %89 = arith.mulf %87, %88 : vector<16x32xf32>
    %c1_35 = arith.constant 1 : index
    %c0_36 = arith.constant 0 : index
    %c0_37 = arith.constant 0 : index
    %90 = vector.load %arg5[%c1_35, %c0_36, %c0_37] : memref<3x1x32xf32, #tpu.memory_space<vmem>>, vector<1x1x32xf32>
    %91 = vector.shape_cast %90 : vector<1x1x32xf32> to vector<1x32xf32>
    %92 = tpu.iota {dimensions = array<i32: 0>} : vector<16x1xi32>
    %c2_i32_38 = arith.constant 2 : i32
    %93 = tpu.dynamic_rotate %89 by %c2_i32_38 dim 0 : vector<16x32xf32>, i32 -> vector<16x32xf32>
    %c2_i32_39 = arith.constant 2 : i32
    %94 = vector.broadcast %c2_i32_39 : i32 to vector<16x1xi32>
    %95 = arith.cmpi sge, %92, %94 : vector<16x1xi32>
    %c18_i32_40 = arith.constant 18 : i32
    %96 = vector.broadcast %c18_i32_40 : i32 to vector<16x1xi32>
    %97 = arith.cmpi slt, %92, %96 : vector<16x1xi32>
    %98 = arith.andi %95, %97 : vector<16x1xi1>
    %cst_41 = arith.constant 0.000000e+00 : f32
    %99 = vector.shape_cast %98 : vector<16x1xi1> to vector<16x1xi1>
    %100 = vector.broadcast %99 : vector<16x1xi1> to vector<16x32xi1>
    %101 = vector.broadcast %cst_41 : f32 to vector<16x32xf32>
    %102 = arith.select %100, %93, %101 : vector<16x32xi1>, vector<16x32xf32>
    %103 = arith.truncf %102 : vector<16x32xf32> to vector<16x32xbf16>
    %c0_42 = arith.constant 0 : index
    %c0_43 = arith.constant 0 : index
    %c0_44 = arith.constant 0 : index
    %c0_45 = arith.constant 0 : index
    %104 = vector.load %arg4[%c0_42, %c0_43, %c0_44, %c0_45] : memref<2x5x32x32xbf16, #tpu.memory_space<vmem>>, vector<1x1x32x32xbf16>
    %105 = vector.shape_cast %104 : vector<1x1x32x32xbf16> to vector<32x32xbf16>
    %cst_46 = arith.constant dense<0.000000e+00> : vector<16x32xf32>
    %106 = tpu.matmul %103, %105, %cst_46 {dimension_numbers = #tpu.dot_dimension_numbers<[1], [0], [0], [1], [0, 0, 1, 1], [], []>} : vector<16x32xbf16>, vector<32x32xbf16>, vector<16x32xf32> -> vector<16x32xf32>
    %107 = tpu.iota {dimensions = array<i32: 0>} : vector<16x1xi32>
    %c1_i32_47 = arith.constant 1 : i32
    %108 = tpu.dynamic_rotate %89 by %c1_i32_47 dim 0 : vector<16x32xf32>, i32 -> vector<16x32xf32>
    %c1_i32_48 = arith.constant 1 : i32
    %109 = vector.broadcast %c1_i32_48 : i32 to vector<16x1xi32>
    %110 = arith.cmpi sge, %107, %109 : vector<16x1xi32>
    %c17_i32_49 = arith.constant 17 : i32
    %111 = vector.broadcast %c17_i32_49 : i32 to vector<16x1xi32>
    %112 = arith.cmpi slt, %107, %111 : vector<16x1xi32>
    %113 = arith.andi %110, %112 : vector<16x1xi1>
    %cst_50 = arith.constant 0.000000e+00 : f32
    %114 = vector.shape_cast %113 : vector<16x1xi1> to vector<16x1xi1>
    %115 = vector.broadcast %114 : vector<16x1xi1> to vector<16x32xi1>
    %116 = vector.broadcast %cst_50 : f32 to vector<16x32xf32>
    %117 = arith.select %115, %108, %116 : vector<16x32xi1>, vector<16x32xf32>
    %118 = arith.truncf %117 : vector<16x32xf32> to vector<16x32xbf16>
    %c0_51 = arith.constant 0 : index
    %c1_52 = arith.constant 1 : index
    %c0_53 = arith.constant 0 : index
    %c0_54 = arith.constant 0 : index
    %119 = vector.load %arg4[%c0_51, %c1_52, %c0_53, %c0_54] : memref<2x5x32x32xbf16, #tpu.memory_space<vmem>>, vector<1x1x32x32xbf16>
    %120 = vector.shape_cast %119 : vector<1x1x32x32xbf16> to vector<32x32xbf16>
    %cst_55 = arith.constant dense<0.000000e+00> : vector<16x32xf32>
    %121 = tpu.matmul %118, %120, %cst_55 {dimension_numbers = #tpu.dot_dimension_numbers<[1], [0], [0], [1], [0, 0, 1, 1], [], []>} : vector<16x32xbf16>, vector<32x32xbf16>, vector<16x32xf32> -> vector<16x32xf32>
    %122 = arith.addf %106, %121 : vector<16x32xf32>
    %123 = arith.truncf %89 : vector<16x32xf32> to vector<16x32xbf16>
    %c0_56 = arith.constant 0 : index
    %c2_57 = arith.constant 2 : index
    %c0_58 = arith.constant 0 : index
    %c0_59 = arith.constant 0 : index
    %124 = vector.load %arg4[%c0_56, %c2_57, %c0_58, %c0_59] : memref<2x5x32x32xbf16, #tpu.memory_space<vmem>>, vector<1x1x32x32xbf16>
    %125 = vector.shape_cast %124 : vector<1x1x32x32xbf16> to vector<32x32xbf16>
    %cst_60 = arith.constant dense<0.000000e+00> : vector<16x32xf32>
    %126 = tpu.matmul %123, %125, %cst_60 {dimension_numbers = #tpu.dot_dimension_numbers<[1], [0], [0], [1], [0, 0, 1, 1], [], []>} : vector<16x32xbf16>, vector<32x32xbf16>, vector<16x32xf32> -> vector<16x32xf32>
    %127 = arith.addf %122, %126 : vector<16x32xf32>
    %128 = tpu.iota {dimensions = array<i32: 0>} : vector<16x1xi32>
    %c15_i32_61 = arith.constant 15 : i32
    %129 = tpu.dynamic_rotate %89 by %c15_i32_61 dim 0 : vector<16x32xf32>, i32 -> vector<16x32xf32>
    %c-1_i32_62 = arith.constant -1 : i32
    %130 = vector.broadcast %c-1_i32_62 : i32 to vector<16x1xi32>
    %131 = arith.cmpi sge, %128, %130 : vector<16x1xi32>
    %c15_i32_63 = arith.constant 15 : i32
    %132 = vector.broadcast %c15_i32_63 : i32 to vector<16x1xi32>
    %133 = arith.cmpi slt, %128, %132 : vector<16x1xi32>
    %134 = arith.andi %131, %133 : vector<16x1xi1>
    %cst_64 = arith.constant 0.000000e+00 : f32
    %135 = vector.shape_cast %134 : vector<16x1xi1> to vector<16x1xi1>
    %136 = vector.broadcast %135 : vector<16x1xi1> to vector<16x32xi1>
    %137 = vector.broadcast %cst_64 : f32 to vector<16x32xf32>
    %138 = arith.select %136, %129, %137 : vector<16x32xi1>, vector<16x32xf32>
    %139 = arith.truncf %138 : vector<16x32xf32> to vector<16x32xbf16>
    %c0_65 = arith.constant 0 : index
    %c3_66 = arith.constant 3 : index
    %c0_67 = arith.constant 0 : index
    %c0_68 = arith.constant 0 : index
    %140 = vector.load %arg4[%c0_65, %c3_66, %c0_67, %c0_68] : memref<2x5x32x32xbf16, #tpu.memory_space<vmem>>, vector<1x1x32x32xbf16>
    %141 = vector.shape_cast %140 : vector<1x1x32x32xbf16> to vector<32x32xbf16>
    %cst_69 = arith.constant dense<0.000000e+00> : vector<16x32xf32>
    %142 = tpu.matmul %139, %141, %cst_69 {dimension_numbers = #tpu.dot_dimension_numbers<[1], [0], [0], [1], [0, 0, 1, 1], [], []>} : vector<16x32xbf16>, vector<32x32xbf16>, vector<16x32xf32> -> vector<16x32xf32>
    %143 = arith.addf %127, %142 : vector<16x32xf32>
    %144 = tpu.iota {dimensions = array<i32: 0>} : vector<16x1xi32>
    %c14_i32_70 = arith.constant 14 : i32
    %145 = tpu.dynamic_rotate %89 by %c14_i32_70 dim 0 : vector<16x32xf32>, i32 -> vector<16x32xf32>
    %c-2_i32_71 = arith.constant -2 : i32
    %146 = vector.broadcast %c-2_i32_71 : i32 to vector<16x1xi32>
    %147 = arith.cmpi sge, %144, %146 : vector<16x1xi32>
    %c14_i32_72 = arith.constant 14 : i32
    %148 = vector.broadcast %c14_i32_72 : i32 to vector<16x1xi32>
    %149 = arith.cmpi slt, %144, %148 : vector<16x1xi32>
    %150 = arith.andi %147, %149 : vector<16x1xi1>
    %cst_73 = arith.constant 0.000000e+00 : f32
    %151 = vector.shape_cast %150 : vector<16x1xi1> to vector<16x1xi1>
    %152 = vector.broadcast %151 : vector<16x1xi1> to vector<16x32xi1>
    %153 = vector.broadcast %cst_73 : f32 to vector<16x32xf32>
    %154 = arith.select %152, %145, %153 : vector<16x32xi1>, vector<16x32xf32>
    %155 = arith.truncf %154 : vector<16x32xf32> to vector<16x32xbf16>
    %c0_74 = arith.constant 0 : index
    %c4_75 = arith.constant 4 : index
    %c0_76 = arith.constant 0 : index
    %c0_77 = arith.constant 0 : index
    %156 = vector.load %arg4[%c0_74, %c4_75, %c0_76, %c0_77] : memref<2x5x32x32xbf16, #tpu.memory_space<vmem>>, vector<1x1x32x32xbf16>
    %157 = vector.shape_cast %156 : vector<1x1x32x32xbf16> to vector<32x32xbf16>
    %cst_78 = arith.constant dense<0.000000e+00> : vector<16x32xf32>
    %158 = tpu.matmul %155, %157, %cst_78 {dimension_numbers = #tpu.dot_dimension_numbers<[1], [0], [0], [1], [0, 0, 1, 1], [], []>} : vector<16x32xbf16>, vector<32x32xbf16>, vector<16x32xf32> -> vector<16x32xf32>
    %159 = arith.addf %143, %158 : vector<16x32xf32>
    %160 = vector.broadcast %91 : vector<1x32xf32> to vector<16x32xf32>
    %161 = arith.addf %159, %160 : vector<16x32xf32>
    %cst_79 = arith.constant 0.000000e+00 : f32
    %162 = vector.broadcast %cst_79 : f32 to vector<16x32xf32>
    %163 = arith.maximumf %161, %162 : vector<16x32xf32>
    %cst_80 = arith.constant 0.999994993 : f32
    %164 = vector.broadcast %cst_80 : f32 to vector<16x32xf32>
    %165 = arith.mulf %163, %164 : vector<16x32xf32>
    %166 = vector.broadcast %11 : vector<16x1xf32> to vector<16x32xf32>
    %167 = arith.mulf %165, %166 : vector<16x32xf32>
    %c2_81 = arith.constant 2 : index
    %c0_82 = arith.constant 0 : index
    %c0_83 = arith.constant 0 : index
    %168 = vector.load %arg5[%c2_81, %c0_82, %c0_83] : memref<3x1x32xf32, #tpu.memory_space<vmem>>, vector<1x1x32xf32>
    %169 = vector.shape_cast %168 : vector<1x1x32xf32> to vector<1x32xf32>
    %170 = tpu.iota {dimensions = array<i32: 0>} : vector<16x1xi32>
    %c2_i32_84 = arith.constant 2 : i32
    %171 = tpu.dynamic_rotate %167 by %c2_i32_84 dim 0 : vector<16x32xf32>, i32 -> vector<16x32xf32>
    %c2_i32_85 = arith.constant 2 : i32
    %172 = vector.broadcast %c2_i32_85 : i32 to vector<16x1xi32>
    %173 = arith.cmpi sge, %170, %172 : vector<16x1xi32>
    %c18_i32_86 = arith.constant 18 : i32
    %174 = vector.broadcast %c18_i32_86 : i32 to vector<16x1xi32>
    %175 = arith.cmpi slt, %170, %174 : vector<16x1xi32>
    %176 = arith.andi %173, %175 : vector<16x1xi1>
    %cst_87 = arith.constant 0.000000e+00 : f32
    %177 = vector.shape_cast %176 : vector<16x1xi1> to vector<16x1xi1>
    %178 = vector.broadcast %177 : vector<16x1xi1> to vector<16x32xi1>
    %179 = vector.broadcast %cst_87 : f32 to vector<16x32xf32>
    %180 = arith.select %178, %171, %179 : vector<16x32xi1>, vector<16x32xf32>
    %181 = arith.truncf %180 : vector<16x32xf32> to vector<16x32xbf16>
    %c1_88 = arith.constant 1 : index
    %c0_89 = arith.constant 0 : index
    %c0_90 = arith.constant 0 : index
    %c0_91 = arith.constant 0 : index
    %182 = vector.load %arg4[%c1_88, %c0_89, %c0_90, %c0_91] : memref<2x5x32x32xbf16, #tpu.memory_space<vmem>>, vector<1x1x32x32xbf16>
    %183 = vector.shape_cast %182 : vector<1x1x32x32xbf16> to vector<32x32xbf16>
    %cst_92 = arith.constant dense<0.000000e+00> : vector<16x32xf32>
    %184 = tpu.matmul %181, %183, %cst_92 {dimension_numbers = #tpu.dot_dimension_numbers<[1], [0], [0], [1], [0, 0, 1, 1], [], []>} : vector<16x32xbf16>, vector<32x32xbf16>, vector<16x32xf32> -> vector<16x32xf32>
    %185 = tpu.iota {dimensions = array<i32: 0>} : vector<16x1xi32>
    %c1_i32_93 = arith.constant 1 : i32
    %186 = tpu.dynamic_rotate %167 by %c1_i32_93 dim 0 : vector<16x32xf32>, i32 -> vector<16x32xf32>
    %c1_i32_94 = arith.constant 1 : i32
    %187 = vector.broadcast %c1_i32_94 : i32 to vector<16x1xi32>
    %188 = arith.cmpi sge, %185, %187 : vector<16x1xi32>
    %c17_i32_95 = arith.constant 17 : i32
    %189 = vector.broadcast %c17_i32_95 : i32 to vector<16x1xi32>
    %190 = arith.cmpi slt, %185, %189 : vector<16x1xi32>
    %191 = arith.andi %188, %190 : vector<16x1xi1>
    %cst_96 = arith.constant 0.000000e+00 : f32
    %192 = vector.shape_cast %191 : vector<16x1xi1> to vector<16x1xi1>
    %193 = vector.broadcast %192 : vector<16x1xi1> to vector<16x32xi1>
    %194 = vector.broadcast %cst_96 : f32 to vector<16x32xf32>
    %195 = arith.select %193, %186, %194 : vector<16x32xi1>, vector<16x32xf32>
    %196 = arith.truncf %195 : vector<16x32xf32> to vector<16x32xbf16>
    %c1_97 = arith.constant 1 : index
    %c1_98 = arith.constant 1 : index
    %c0_99 = arith.constant 0 : index
    %c0_100 = arith.constant 0 : index
    %197 = vector.load %arg4[%c1_97, %c1_98, %c0_99, %c0_100] : memref<2x5x32x32xbf16, #tpu.memory_space<vmem>>, vector<1x1x32x32xbf16>
    %198 = vector.shape_cast %197 : vector<1x1x32x32xbf16> to vector<32x32xbf16>
    %cst_101 = arith.constant dense<0.000000e+00> : vector<16x32xf32>
    %199 = tpu.matmul %196, %198, %cst_101 {dimension_numbers = #tpu.dot_dimension_numbers<[1], [0], [0], [1], [0, 0, 1, 1], [], []>} : vector<16x32xbf16>, vector<32x32xbf16>, vector<16x32xf32> -> vector<16x32xf32>
    %200 = arith.addf %184, %199 : vector<16x32xf32>
    %201 = arith.truncf %167 : vector<16x32xf32> to vector<16x32xbf16>
    %c1_102 = arith.constant 1 : index
    %c2_103 = arith.constant 2 : index
    %c0_104 = arith.constant 0 : index
    %c0_105 = arith.constant 0 : index
    %202 = vector.load %arg4[%c1_102, %c2_103, %c0_104, %c0_105] : memref<2x5x32x32xbf16, #tpu.memory_space<vmem>>, vector<1x1x32x32xbf16>
    %203 = vector.shape_cast %202 : vector<1x1x32x32xbf16> to vector<32x32xbf16>
    %cst_106 = arith.constant dense<0.000000e+00> : vector<16x32xf32>
    %204 = tpu.matmul %201, %203, %cst_106 {dimension_numbers = #tpu.dot_dimension_numbers<[1], [0], [0], [1], [0, 0, 1, 1], [], []>} : vector<16x32xbf16>, vector<32x32xbf16>, vector<16x32xf32> -> vector<16x32xf32>
    %205 = arith.addf %200, %204 : vector<16x32xf32>
    %206 = tpu.iota {dimensions = array<i32: 0>} : vector<16x1xi32>
    %c15_i32_107 = arith.constant 15 : i32
    %207 = tpu.dynamic_rotate %167 by %c15_i32_107 dim 0 : vector<16x32xf32>, i32 -> vector<16x32xf32>
    %c-1_i32_108 = arith.constant -1 : i32
    %208 = vector.broadcast %c-1_i32_108 : i32 to vector<16x1xi32>
    %209 = arith.cmpi sge, %206, %208 : vector<16x1xi32>
    %c15_i32_109 = arith.constant 15 : i32
    %210 = vector.broadcast %c15_i32_109 : i32 to vector<16x1xi32>
    %211 = arith.cmpi slt, %206, %210 : vector<16x1xi32>
    %212 = arith.andi %209, %211 : vector<16x1xi1>
    %cst_110 = arith.constant 0.000000e+00 : f32
    %213 = vector.shape_cast %212 : vector<16x1xi1> to vector<16x1xi1>
    %214 = vector.broadcast %213 : vector<16x1xi1> to vector<16x32xi1>
    %215 = vector.broadcast %cst_110 : f32 to vector<16x32xf32>
    %216 = arith.select %214, %207, %215 : vector<16x32xi1>, vector<16x32xf32>
    %217 = arith.truncf %216 : vector<16x32xf32> to vector<16x32xbf16>
    %c1_111 = arith.constant 1 : index
    %c3_112 = arith.constant 3 : index
    %c0_113 = arith.constant 0 : index
    %c0_114 = arith.constant 0 : index
    %218 = vector.load %arg4[%c1_111, %c3_112, %c0_113, %c0_114] : memref<2x5x32x32xbf16, #tpu.memory_space<vmem>>, vector<1x1x32x32xbf16>
    %219 = vector.shape_cast %218 : vector<1x1x32x32xbf16> to vector<32x32xbf16>
    %cst_115 = arith.constant dense<0.000000e+00> : vector<16x32xf32>
    %220 = tpu.matmul %217, %219, %cst_115 {dimension_numbers = #tpu.dot_dimension_numbers<[1], [0], [0], [1], [0, 0, 1, 1], [], []>} : vector<16x32xbf16>, vector<32x32xbf16>, vector<16x32xf32> -> vector<16x32xf32>
    %221 = arith.addf %205, %220 : vector<16x32xf32>
    %222 = tpu.iota {dimensions = array<i32: 0>} : vector<16x1xi32>
    %c14_i32_116 = arith.constant 14 : i32
    %223 = tpu.dynamic_rotate %167 by %c14_i32_116 dim 0 : vector<16x32xf32>, i32 -> vector<16x32xf32>
    %c-2_i32_117 = arith.constant -2 : i32
    %224 = vector.broadcast %c-2_i32_117 : i32 to vector<16x1xi32>
    %225 = arith.cmpi sge, %222, %224 : vector<16x1xi32>
    %c14_i32_118 = arith.constant 14 : i32
    %226 = vector.broadcast %c14_i32_118 : i32 to vector<16x1xi32>
    %227 = arith.cmpi slt, %222, %226 : vector<16x1xi32>
    %228 = arith.andi %225, %227 : vector<16x1xi1>
    %cst_119 = arith.constant 0.000000e+00 : f32
    %229 = vector.shape_cast %228 : vector<16x1xi1> to vector<16x1xi1>
    %230 = vector.broadcast %229 : vector<16x1xi1> to vector<16x32xi1>
    %231 = vector.broadcast %cst_119 : f32 to vector<16x32xf32>
    %232 = arith.select %230, %223, %231 : vector<16x32xi1>, vector<16x32xf32>
    %233 = arith.truncf %232 : vector<16x32xf32> to vector<16x32xbf16>
    %c1_120 = arith.constant 1 : index
    %c4_121 = arith.constant 4 : index
    %c0_122 = arith.constant 0 : index
    %c0_123 = arith.constant 0 : index
    %234 = vector.load %arg4[%c1_120, %c4_121, %c0_122, %c0_123] : memref<2x5x32x32xbf16, #tpu.memory_space<vmem>>, vector<1x1x32x32xbf16>
    %235 = vector.shape_cast %234 : vector<1x1x32x32xbf16> to vector<32x32xbf16>
    %cst_124 = arith.constant dense<0.000000e+00> : vector<16x32xf32>
    %236 = tpu.matmul %233, %235, %cst_124 {dimension_numbers = #tpu.dot_dimension_numbers<[1], [0], [0], [1], [0, 0, 1, 1], [], []>} : vector<16x32xbf16>, vector<32x32xbf16>, vector<16x32xf32> -> vector<16x32xf32>
    %237 = arith.addf %221, %236 : vector<16x32xf32>
    %238 = vector.broadcast %169 : vector<1x32xf32> to vector<16x32xf32>
    %239 = arith.addf %237, %238 : vector<16x32xf32>
    %cst_125 = arith.constant 0.000000e+00 : f32
    %240 = vector.broadcast %cst_125 : f32 to vector<16x32xf32>
    %241 = arith.maximumf %239, %240 : vector<16x32xf32>
    %cst_126 = arith.constant 0.999994993 : f32
    %242 = vector.broadcast %cst_126 : f32 to vector<16x32xf32>
    %243 = arith.mulf %241, %242 : vector<16x32xf32>
    %244 = vector.broadcast %11 : vector<16x1xf32> to vector<16x32xf32>
    %245 = arith.mulf %243, %244 : vector<16x32xf32>
    %246 = arith.truncf %245 : vector<16x32xf32> to vector<16x32xbf16>
    %c0_127 = arith.constant 0 : index
    %c0_128 = arith.constant 0 : index
    %247 = vector.load %arg6[%c0_127, %c0_128] : memref<32x32xbf16, #tpu.memory_space<vmem>>, vector<32x32xbf16>
    %cst_129 = arith.constant dense<0.000000e+00> : vector<16x32xf32>
    %248 = tpu.matmul %246, %247, %cst_129 {dimension_numbers = #tpu.dot_dimension_numbers<[1], [0], [0], [1], [0, 0, 1, 1], [], []>} : vector<16x32xbf16>, vector<32x32xbf16>, vector<16x32xf32> -> vector<16x32xf32>
    %c0_130 = arith.constant 0 : index
    %c0_131 = arith.constant 0 : index
    %249 = vector.load %arg7[%c0_130, %c0_131] : memref<1x32xf32, #tpu.memory_space<vmem>>, vector<1x32xf32>
    %250 = vector.broadcast %249 : vector<1x32xf32> to vector<16x32xf32>
    %251 = arith.addf %248, %250 : vector<16x32xf32>
    %252 = vector.broadcast %11 : vector<16x1xf32> to vector<16x32xf32>
    %253 = arith.mulf %251, %252 : vector<16x32xf32>
    %254 = math.absf %253 : vector<16x32xf32>
    %cst_132 = arith.constant dense<0.000000e+00> : vector<16xf32>
    %255 = vector.multi_reduction <add>, %254, %cst_132 [1] : vector<16x32xf32> to vector<16xf32>
    %256 = vector.shape_cast %255 : vector<16xf32> to vector<16x1xf32>
    %cst_133 = arith.constant 0.000000e+00 : f32
    %257 = vector.broadcast %cst_133 : f32 to vector<16x1xf32>
    %258 = arith.cmpf oeq, %256, %257 : vector<16x1xf32>
    %259 = arith.extui %258 : vector<16x1xi1> to vector<16x1xi32>
    %260 = arith.sitofp %259 : vector<16x1xi32> to vector<16x1xf32>
    %cst_134 = arith.constant 1.000000e+00 : f32
    %261 = vector.broadcast %cst_134 : f32 to vector<16x1xf32>
    %262 = arith.subf %261, %260 : vector<16x1xf32>
    %263 = tpu.iota {dimensions = array<i32: 0>} : vector<16x16xi32>
    %264 = tpu.iota {dimensions = array<i32: 1>} : vector<16x16xi32>
    %265 = arith.cmpi sge, %263, %264 : vector<16x16xi32>
    %266 = arith.extui %265 : vector<16x16xi1> to vector<16x16xi32>
    %267 = arith.sitofp %266 : vector<16x16xi32> to vector<16x16xf32>
    %cst_135 = arith.constant dense<0.000000e+00> : vector<16x1xf32>
    %268 = tpu.matmul %267, %262, %cst_135 {dimension_numbers = #tpu.dot_dimension_numbers<[1], [0], [0], [1], [0, 0, 1, 1], [], []>} : vector<16x16xf32>, vector<16x1xf32>, vector<16x1xf32> -> vector<16x1xf32>
    %269 = arith.mulf %268, %262 : vector<16x1xf32>
    %270 = tpu.iota {dimensions = array<i32: 1>} : vector<16x17xi32>
    %271 = arith.sitofp %270 : vector<16x17xi32> to vector<16x17xf32>
    %272 = vector.broadcast %269 : vector<16x1xf32> to vector<16x17xf32>
    %273 = arith.cmpf oeq, %271, %272 : vector<16x17xf32>
    %274 = arith.extui %273 : vector<16x17xi1> to vector<16x17xi32>
    %275 = arith.sitofp %274 : vector<16x17xi32> to vector<16x17xf32>
    %cst_136 = arith.constant dense<0.000000e+00> : vector<16x32xf32>
    %276 = tpu.matmul %275, %0, %cst_136 {dimension_numbers = #tpu.dot_dimension_numbers<[1], [0], [0], [1], [0, 0, 1, 1], [], []>} : vector<16x17xf32>, vector<17x32xf32>, vector<16x32xf32> -> vector<16x32xf32>
    %277 = arith.addf %253, %276 : vector<16x32xf32>
    %278 = vector.broadcast %262 : vector<16x1xf32> to vector<16x32xf32>
    %279 = arith.mulf %277, %278 : vector<16x32xf32>
    %cst_137 = arith.constant 1.000000e+00 : f32
    %280 = vector.broadcast %cst_137 : f32 to vector<16x1xf32>
    %cst_138 = arith.constant dense<0.000000e+00> : vector<16x16xf32>
    %281 = tpu.matmul %280, %260, %cst_138 {dimension_numbers = #tpu.dot_dimension_numbers<[1], [1], [0], [0], [0, 0, 1, 0], [], []>} : vector<16x1xf32>, vector<16x1xf32>, vector<16x16xf32> -> vector<16x16xf32>
    %cst_139 = arith.constant -1.000000e+09 : f32
    %282 = vector.broadcast %cst_139 : f32 to vector<16x16xf32>
    %283 = arith.mulf %281, %282 : vector<16x16xf32>
    %c0_140 = arith.constant 0 : index
    %c0_141 = arith.constant 0 : index
    %c0_142 = arith.constant 0 : index
    %284 = vector.load %arg8[%c0_140, %c0_141, %c0_142] : memref<2x1x32xf32, #tpu.memory_space<vmem>>, vector<1x1x32xf32>
    %285 = vector.shape_cast %284 : vector<1x1x32xf32> to vector<1x32xf32>
    %c0_143 = arith.constant 0 : index
    %c0_144 = arith.constant 0 : index
    %c0_145 = arith.constant 0 : index
    %286 = vector.load %arg9[%c0_143, %c0_144, %c0_145] : memref<2x1x32xf32, #tpu.memory_space<vmem>>, vector<1x1x32xf32>
    %287 = vector.shape_cast %286 : vector<1x1x32xf32> to vector<1x32xf32>
    %cst_146 = arith.constant dense<0.000000e+00> : vector<16xf32>
    %288 = vector.multi_reduction <add>, %279, %cst_146 [1] : vector<16x32xf32> to vector<16xf32>
    %289 = vector.shape_cast %288 : vector<16xf32> to vector<16x1xf32>
    %cst_147 = arith.constant 3.200000e+01 : f32
    %290 = vector.broadcast %cst_147 : f32 to vector<16x1xf32>
    %291 = arith.divf %289, %290 : vector<16x1xf32>
    %292 = vector.broadcast %291 : vector<16x1xf32> to vector<16x32xf32>
    %293 = arith.subf %279, %292 : vector<16x32xf32>
    %294 = arith.mulf %293, %293 : vector<16x32xf32>
    %cst_148 = arith.constant dense<0.000000e+00> : vector<16xf32>
    %295 = vector.multi_reduction <add>, %294, %cst_148 [1] : vector<16x32xf32> to vector<16xf32>
    %296 = vector.shape_cast %295 : vector<16xf32> to vector<16x1xf32>
    %cst_149 = arith.constant 3.200000e+01 : f32
    %297 = vector.broadcast %cst_149 : f32 to vector<16x1xf32>
    %298 = arith.divf %296, %297 : vector<16x1xf32>
    %cst_150 = arith.constant 9.99999974E-6 : f32
    %299 = vector.broadcast %cst_150 : f32 to vector<16x1xf32>
    %300 = arith.addf %298, %299 : vector<16x1xf32>
    %301 = math.rsqrt %300 : vector<16x1xf32>
    %302 = vector.broadcast %301 : vector<16x1xf32> to vector<16x32xf32>
    %303 = arith.mulf %293, %302 : vector<16x32xf32>
    %304 = vector.broadcast %285 : vector<1x32xf32> to vector<16x32xf32>
    %305 = arith.mulf %303, %304 : vector<16x32xf32>
    %306 = vector.broadcast %287 : vector<1x32xf32> to vector<16x32xf32>
    %307 = arith.addf %305, %306 : vector<16x32xf32>
    %308 = arith.truncf %307 : vector<16x32xf32> to vector<16x32xbf16>
    %c0_151 = arith.constant 0 : index
    %c0_152 = arith.constant 0 : index
    %c0_153 = arith.constant 0 : index
    %309 = vector.load %arg12[%c0_151, %c0_152, %c0_153] : memref<2x32x96xbf16, #tpu.memory_space<vmem>>, vector<1x32x96xbf16>
    %310 = vector.shape_cast %309 : vector<1x32x96xbf16> to vector<32x96xbf16>
    %c0_154 = arith.constant 0 : index
    %c0_155 = arith.constant 0 : index
    %c0_156 = arith.constant 0 : index
    %311 = vector.load %arg13[%c0_154, %c0_155, %c0_156] : memref<2x1x96xf32, #tpu.memory_space<vmem>>, vector<1x1x96xf32>
    %312 = vector.shape_cast %311 : vector<1x1x96xf32> to vector<1x96xf32>
    %c0_157 = arith.constant 0 : index
    %c0_158 = arith.constant 0 : index
    %c0_159 = arith.constant 0 : index
    %313 = vector.load %arg14[%c0_157, %c0_158, %c0_159] : memref<2x32x32xbf16, #tpu.memory_space<vmem>>, vector<1x32x32xbf16>
    %314 = vector.shape_cast %313 : vector<1x32x32xbf16> to vector<32x32xbf16>
    %c0_160 = arith.constant 0 : index
    %c0_161 = arith.constant 0 : index
    %c0_162 = arith.constant 0 : index
    %315 = vector.load %arg15[%c0_160, %c0_161, %c0_162] : memref<2x1x32xf32, #tpu.memory_space<vmem>>, vector<1x1x32xf32>
    %316 = vector.shape_cast %315 : vector<1x1x32xf32> to vector<1x32xf32>
    %cst_163 = arith.constant dense<0.000000e+00> : vector<16x96xf32>
    %317 = tpu.matmul %308, %310, %cst_163 {dimension_numbers = #tpu.dot_dimension_numbers<[1], [0], [0], [1], [0, 0, 1, 1], [], []>} : vector<16x32xbf16>, vector<32x96xbf16>, vector<16x96xf32> -> vector<16x96xf32>
    %318 = vector.broadcast %312 : vector<1x96xf32> to vector<16x96xf32>
    %319 = arith.addf %317, %318 : vector<16x96xf32>
    %320 = arith.truncf %319 : vector<16x96xf32> to vector<16x96xbf16>
    %321 = vector.extract_strided_slice %320 {offsets = [0, 0], sizes = [16, 32], strides = [1, 1]} : vector<16x96xbf16> to vector<16x32xbf16>
    %322 = vector.extract_strided_slice %320 {offsets = [0, 32], sizes = [16, 32], strides = [1, 1]} : vector<16x96xbf16> to vector<16x32xbf16>
    %323 = vector.extract_strided_slice %320 {offsets = [0, 64], sizes = [16, 32], strides = [1, 1]} : vector<16x96xbf16> to vector<16x32xbf16>
    %324 = vector.extract_strided_slice %321 {offsets = [0, 0], sizes = [16, 16], strides = [1, 1]} : vector<16x32xbf16> to vector<16x16xbf16>
    %325 = vector.extract_strided_slice %322 {offsets = [0, 0], sizes = [16, 16], strides = [1, 1]} : vector<16x32xbf16> to vector<16x16xbf16>
    %cst_164 = arith.constant dense<0.000000e+00> : vector<16x16xf32>
    %326 = tpu.matmul %324, %325, %cst_164 {dimension_numbers = #tpu.dot_dimension_numbers<[1], [1], [0], [0], [0, 0, 1, 0], [], []>} : vector<16x16xbf16>, vector<16x16xbf16>, vector<16x16xf32> -> vector<16x16xf32>
    %327 = arith.addf %326, %283 : vector<16x16xf32>
    %cst_165 = arith.constant dense<0xFF800000> : vector<16xf32>
    %328 = vector.multi_reduction <maximumf>, %327, %cst_165 [1] : vector<16x16xf32> to vector<16xf32>
    %329 = vector.shape_cast %328 : vector<16xf32> to vector<16x1xf32>
    %330 = vector.broadcast %329 : vector<16x1xf32> to vector<16x16xf32>
    %331 = arith.subf %327, %330 : vector<16x16xf32>
    %332 = math.exp %331 : vector<16x16xf32>
    %cst_166 = arith.constant dense<0.000000e+00> : vector<16xf32>
    %333 = vector.multi_reduction <add>, %332, %cst_166 [1] : vector<16x16xf32> to vector<16xf32>
    %334 = vector.shape_cast %333 : vector<16xf32> to vector<16x1xf32>
    %335 = tpu.reciprocal %334 {approx = true} : vector<16x1xf32> -> vector<16x1xf32>
    %336 = vector.broadcast %335 : vector<16x1xf32> to vector<16x16xf32>
    %337 = arith.mulf %332, %336 : vector<16x16xf32>
    %338 = arith.truncf %337 : vector<16x16xf32> to vector<16x16xbf16>
    %339 = vector.extract_strided_slice %323 {offsets = [0, 0], sizes = [16, 16], strides = [1, 1]} : vector<16x32xbf16> to vector<16x16xbf16>
    %cst_167 = arith.constant dense<0.000000e+00> : vector<16x16xf32>
    %340 = tpu.matmul %338, %339, %cst_167 {dimension_numbers = #tpu.dot_dimension_numbers<[1], [0], [0], [1], [0, 0, 1, 1], [], []>} : vector<16x16xbf16>, vector<16x16xbf16>, vector<16x16xf32> -> vector<16x16xf32>
    %341 = vector.extract_strided_slice %321 {offsets = [0, 16], sizes = [16, 16], strides = [1, 1]} : vector<16x32xbf16> to vector<16x16xbf16>
    %342 = vector.extract_strided_slice %322 {offsets = [0, 16], sizes = [16, 16], strides = [1, 1]} : vector<16x32xbf16> to vector<16x16xbf16>
    %cst_168 = arith.constant dense<0.000000e+00> : vector<16x16xf32>
    %343 = tpu.matmul %341, %342, %cst_168 {dimension_numbers = #tpu.dot_dimension_numbers<[1], [1], [0], [0], [0, 0, 1, 0], [], []>} : vector<16x16xbf16>, vector<16x16xbf16>, vector<16x16xf32> -> vector<16x16xf32>
    %344 = arith.addf %343, %283 : vector<16x16xf32>
    %cst_169 = arith.constant dense<0xFF800000> : vector<16xf32>
    %345 = vector.multi_reduction <maximumf>, %344, %cst_169 [1] : vector<16x16xf32> to vector<16xf32>
    %346 = vector.shape_cast %345 : vector<16xf32> to vector<16x1xf32>
    %347 = vector.broadcast %346 : vector<16x1xf32> to vector<16x16xf32>
    %348 = arith.subf %344, %347 : vector<16x16xf32>
    %349 = math.exp %348 : vector<16x16xf32>
    %cst_170 = arith.constant dense<0.000000e+00> : vector<16xf32>
    %350 = vector.multi_reduction <add>, %349, %cst_170 [1] : vector<16x16xf32> to vector<16xf32>
    %351 = vector.shape_cast %350 : vector<16xf32> to vector<16x1xf32>
    %352 = tpu.reciprocal %351 {approx = true} : vector<16x1xf32> -> vector<16x1xf32>
    %353 = vector.broadcast %352 : vector<16x1xf32> to vector<16x16xf32>
    %354 = arith.mulf %349, %353 : vector<16x16xf32>
    %355 = arith.truncf %354 : vector<16x16xf32> to vector<16x16xbf16>
    %356 = vector.extract_strided_slice %323 {offsets = [0, 16], sizes = [16, 16], strides = [1, 1]} : vector<16x32xbf16> to vector<16x16xbf16>
    %cst_171 = arith.constant dense<0.000000e+00> : vector<16x16xf32>
    %357 = tpu.matmul %355, %356, %cst_171 {dimension_numbers = #tpu.dot_dimension_numbers<[1], [0], [0], [1], [0, 0, 1, 1], [], []>} : vector<16x16xbf16>, vector<16x16xbf16>, vector<16x16xf32> -> vector<16x16xf32>
    %358 = tpu.concatenate %340, %357 in 1 : vector<16x16xf32>, vector<16x16xf32> -> vector<16x32xf32>
    %359 = arith.truncf %358 : vector<16x32xf32> to vector<16x32xbf16>
    %cst_172 = arith.constant dense<0.000000e+00> : vector<16x32xf32>
    %360 = tpu.matmul %359, %314, %cst_172 {dimension_numbers = #tpu.dot_dimension_numbers<[1], [0], [0], [1], [0, 0, 1, 1], [], []>} : vector<16x32xbf16>, vector<32x32xbf16>, vector<16x32xf32> -> vector<16x32xf32>
    %361 = vector.broadcast %316 : vector<1x32xf32> to vector<16x32xf32>
    %362 = arith.addf %360, %361 : vector<16x32xf32>
    %363 = arith.addf %279, %362 : vector<16x32xf32>
    %364 = vector.broadcast %262 : vector<16x1xf32> to vector<16x32xf32>
    %365 = arith.mulf %363, %364 : vector<16x32xf32>
    %c0_173 = arith.constant 0 : index
    %c0_174 = arith.constant 0 : index
    %c0_175 = arith.constant 0 : index
    %366 = vector.load %arg10[%c0_173, %c0_174, %c0_175] : memref<2x1x32xf32, #tpu.memory_space<vmem>>, vector<1x1x32xf32>
    %367 = vector.shape_cast %366 : vector<1x1x32xf32> to vector<1x32xf32>
    %c0_176 = arith.constant 0 : index
    %c0_177 = arith.constant 0 : index
    %c0_178 = arith.constant 0 : index
    %368 = vector.load %arg11[%c0_176, %c0_177, %c0_178] : memref<2x1x32xf32, #tpu.memory_space<vmem>>, vector<1x1x32xf32>
    %369 = vector.shape_cast %368 : vector<1x1x32xf32> to vector<1x32xf32>
    %cst_179 = arith.constant dense<0.000000e+00> : vector<16xf32>
    %370 = vector.multi_reduction <add>, %365, %cst_179 [1] : vector<16x32xf32> to vector<16xf32>
    %371 = vector.shape_cast %370 : vector<16xf32> to vector<16x1xf32>
    %cst_180 = arith.constant 3.200000e+01 : f32
    %372 = vector.broadcast %cst_180 : f32 to vector<16x1xf32>
    %373 = arith.divf %371, %372 : vector<16x1xf32>
    %374 = vector.broadcast %373 : vector<16x1xf32> to vector<16x32xf32>
    %375 = arith.subf %365, %374 : vector<16x32xf32>
    %376 = arith.mulf %375, %375 : vector<16x32xf32>
    %cst_181 = arith.constant dense<0.000000e+00> : vector<16xf32>
    %377 = vector.multi_reduction <add>, %376, %cst_181 [1] : vector<16x32xf32> to vector<16xf32>
    %378 = vector.shape_cast %377 : vector<16xf32> to vector<16x1xf32>
    %cst_182 = arith.constant 3.200000e+01 : f32
    %379 = vector.broadcast %cst_182 : f32 to vector<16x1xf32>
    %380 = arith.divf %378, %379 : vector<16x1xf32>
    %cst_183 = arith.constant 9.99999974E-6 : f32
    %381 = vector.broadcast %cst_183 : f32 to vector<16x1xf32>
    %382 = arith.addf %380, %381 : vector<16x1xf32>
    %383 = math.rsqrt %382 : vector<16x1xf32>
    %384 = vector.broadcast %383 : vector<16x1xf32> to vector<16x32xf32>
    %385 = arith.mulf %375, %384 : vector<16x32xf32>
    %386 = vector.broadcast %367 : vector<1x32xf32> to vector<16x32xf32>
    %387 = arith.mulf %385, %386 : vector<16x32xf32>
    %388 = vector.broadcast %369 : vector<1x32xf32> to vector<16x32xf32>
    %389 = arith.addf %387, %388 : vector<16x32xf32>
    %390 = arith.truncf %389 : vector<16x32xf32> to vector<16x32xbf16>
    %c0_184 = arith.constant 0 : index
    %c0_185 = arith.constant 0 : index
    %c0_186 = arith.constant 0 : index
    %391 = vector.load %arg16[%c0_184, %c0_185, %c0_186] : memref<2x32x128xbf16, #tpu.memory_space<vmem>>, vector<1x32x128xbf16>
    %392 = vector.shape_cast %391 : vector<1x32x128xbf16> to vector<32x128xbf16>
    %c0_187 = arith.constant 0 : index
    %c0_188 = arith.constant 0 : index
    %c0_189 = arith.constant 0 : index
    %393 = vector.load %arg17[%c0_187, %c0_188, %c0_189] : memref<2x1x128xf32, #tpu.memory_space<vmem>>, vector<1x1x128xf32>
    %394 = vector.shape_cast %393 : vector<1x1x128xf32> to vector<1x128xf32>
    %c0_190 = arith.constant 0 : index
    %c0_191 = arith.constant 0 : index
    %c0_192 = arith.constant 0 : index
    %395 = vector.load %arg18[%c0_190, %c0_191, %c0_192] : memref<2x128x32xbf16, #tpu.memory_space<vmem>>, vector<1x128x32xbf16>
    %396 = vector.shape_cast %395 : vector<1x128x32xbf16> to vector<128x32xbf16>
    %c0_193 = arith.constant 0 : index
    %c0_194 = arith.constant 0 : index
    %c0_195 = arith.constant 0 : index
    %397 = vector.load %arg19[%c0_193, %c0_194, %c0_195] : memref<2x1x32xf32, #tpu.memory_space<vmem>>, vector<1x1x32xf32>
    %398 = vector.shape_cast %397 : vector<1x1x32xf32> to vector<1x32xf32>
    %cst_196 = arith.constant dense<0.000000e+00> : vector<16x128xf32>
    %399 = tpu.matmul %390, %392, %cst_196 {dimension_numbers = #tpu.dot_dimension_numbers<[1], [0], [0], [1], [0, 0, 1, 1], [], []>} : vector<16x32xbf16>, vector<32x128xbf16>, vector<16x128xf32> -> vector<16x128xf32>
    %400 = vector.broadcast %394 : vector<1x128xf32> to vector<16x128xf32>
    %401 = arith.addf %399, %400 : vector<16x128xf32>
    %cst_197 = arith.constant 0.000000e+00 : f32
    %402 = vector.broadcast %cst_197 : f32 to vector<16x128xf32>
    %403 = arith.maximumf %401, %402 : vector<16x128xf32>
    %404 = arith.truncf %403 : vector<16x128xf32> to vector<16x128xbf16>
    %cst_198 = arith.constant dense<0.000000e+00> : vector<16x32xf32>
    %405 = tpu.matmul %404, %396, %cst_198 {dimension_numbers = #tpu.dot_dimension_numbers<[1], [0], [0], [1], [0, 0, 1, 1], [], []>} : vector<16x128xbf16>, vector<128x32xbf16>, vector<16x32xf32> -> vector<16x32xf32>
    %406 = vector.broadcast %398 : vector<1x32xf32> to vector<16x32xf32>
    %407 = arith.addf %405, %406 : vector<16x32xf32>
    %408 = arith.addf %365, %407 : vector<16x32xf32>
    %409 = vector.broadcast %262 : vector<16x1xf32> to vector<16x32xf32>
    %410 = arith.mulf %408, %409 : vector<16x32xf32>
    %c1_199 = arith.constant 1 : index
    %c0_200 = arith.constant 0 : index
    %c0_201 = arith.constant 0 : index
    %411 = vector.load %arg8[%c1_199, %c0_200, %c0_201] : memref<2x1x32xf32, #tpu.memory_space<vmem>>, vector<1x1x32xf32>
    %412 = vector.shape_cast %411 : vector<1x1x32xf32> to vector<1x32xf32>
    %c1_202 = arith.constant 1 : index
    %c0_203 = arith.constant 0 : index
    %c0_204 = arith.constant 0 : index
    %413 = vector.load %arg9[%c1_202, %c0_203, %c0_204] : memref<2x1x32xf32, #tpu.memory_space<vmem>>, vector<1x1x32xf32>
    %414 = vector.shape_cast %413 : vector<1x1x32xf32> to vector<1x32xf32>
    %cst_205 = arith.constant dense<0.000000e+00> : vector<16xf32>
    %415 = vector.multi_reduction <add>, %410, %cst_205 [1] : vector<16x32xf32> to vector<16xf32>
    %416 = vector.shape_cast %415 : vector<16xf32> to vector<16x1xf32>
    %cst_206 = arith.constant 3.200000e+01 : f32
    %417 = vector.broadcast %cst_206 : f32 to vector<16x1xf32>
    %418 = arith.divf %416, %417 : vector<16x1xf32>
    %419 = vector.broadcast %418 : vector<16x1xf32> to vector<16x32xf32>
    %420 = arith.subf %410, %419 : vector<16x32xf32>
    %421 = arith.mulf %420, %420 : vector<16x32xf32>
    %cst_207 = arith.constant dense<0.000000e+00> : vector<16xf32>
    %422 = vector.multi_reduction <add>, %421, %cst_207 [1] : vector<16x32xf32> to vector<16xf32>
    %423 = vector.shape_cast %422 : vector<16xf32> to vector<16x1xf32>
    %cst_208 = arith.constant 3.200000e+01 : f32
    %424 = vector.broadcast %cst_208 : f32 to vector<16x1xf32>
    %425 = arith.divf %423, %424 : vector<16x1xf32>
    %cst_209 = arith.constant 9.99999974E-6 : f32
    %426 = vector.broadcast %cst_209 : f32 to vector<16x1xf32>
    %427 = arith.addf %425, %426 : vector<16x1xf32>
    %428 = math.rsqrt %427 : vector<16x1xf32>
    %429 = vector.broadcast %428 : vector<16x1xf32> to vector<16x32xf32>
    %430 = arith.mulf %420, %429 : vector<16x32xf32>
    %431 = vector.broadcast %412 : vector<1x32xf32> to vector<16x32xf32>
    %432 = arith.mulf %430, %431 : vector<16x32xf32>
    %433 = vector.broadcast %414 : vector<1x32xf32> to vector<16x32xf32>
    %434 = arith.addf %432, %433 : vector<16x32xf32>
    %435 = arith.truncf %434 : vector<16x32xf32> to vector<16x32xbf16>
    %c1_210 = arith.constant 1 : index
    %c0_211 = arith.constant 0 : index
    %c0_212 = arith.constant 0 : index
    %436 = vector.load %arg12[%c1_210, %c0_211, %c0_212] : memref<2x32x96xbf16, #tpu.memory_space<vmem>>, vector<1x32x96xbf16>
    %437 = vector.shape_cast %436 : vector<1x32x96xbf16> to vector<32x96xbf16>
    %c1_213 = arith.constant 1 : index
    %c0_214 = arith.constant 0 : index
    %c0_215 = arith.constant 0 : index
    %438 = vector.load %arg13[%c1_213, %c0_214, %c0_215] : memref<2x1x96xf32, #tpu.memory_space<vmem>>, vector<1x1x96xf32>
    %439 = vector.shape_cast %438 : vector<1x1x96xf32> to vector<1x96xf32>
    %c1_216 = arith.constant 1 : index
    %c0_217 = arith.constant 0 : index
    %c0_218 = arith.constant 0 : index
    %440 = vector.load %arg14[%c1_216, %c0_217, %c0_218] : memref<2x32x32xbf16, #tpu.memory_space<vmem>>, vector<1x32x32xbf16>
    %441 = vector.shape_cast %440 : vector<1x32x32xbf16> to vector<32x32xbf16>
    %c1_219 = arith.constant 1 : index
    %c0_220 = arith.constant 0 : index
    %c0_221 = arith.constant 0 : index
    %442 = vector.load %arg15[%c1_219, %c0_220, %c0_221] : memref<2x1x32xf32, #tpu.memory_space<vmem>>, vector<1x1x32xf32>
    %443 = vector.shape_cast %442 : vector<1x1x32xf32> to vector<1x32xf32>
    %cst_222 = arith.constant dense<0.000000e+00> : vector<16x96xf32>
    %444 = tpu.matmul %435, %437, %cst_222 {dimension_numbers = #tpu.dot_dimension_numbers<[1], [0], [0], [1], [0, 0, 1, 1], [], []>} : vector<16x32xbf16>, vector<32x96xbf16>, vector<16x96xf32> -> vector<16x96xf32>
    %445 = vector.broadcast %439 : vector<1x96xf32> to vector<16x96xf32>
    %446 = arith.addf %444, %445 : vector<16x96xf32>
    %447 = arith.truncf %446 : vector<16x96xf32> to vector<16x96xbf16>
    %448 = vector.extract_strided_slice %447 {offsets = [0, 0], sizes = [16, 32], strides = [1, 1]} : vector<16x96xbf16> to vector<16x32xbf16>
    %449 = vector.extract_strided_slice %447 {offsets = [0, 32], sizes = [16, 32], strides = [1, 1]} : vector<16x96xbf16> to vector<16x32xbf16>
    %450 = vector.extract_strided_slice %447 {offsets = [0, 64], sizes = [16, 32], strides = [1, 1]} : vector<16x96xbf16> to vector<16x32xbf16>
    %451 = vector.extract_strided_slice %448 {offsets = [0, 0], sizes = [16, 16], strides = [1, 1]} : vector<16x32xbf16> to vector<16x16xbf16>
    %452 = vector.extract_strided_slice %449 {offsets = [0, 0], sizes = [16, 16], strides = [1, 1]} : vector<16x32xbf16> to vector<16x16xbf16>
    %cst_223 = arith.constant dense<0.000000e+00> : vector<16x16xf32>
    %453 = tpu.matmul %451, %452, %cst_223 {dimension_numbers = #tpu.dot_dimension_numbers<[1], [1], [0], [0], [0, 0, 1, 0], [], []>} : vector<16x16xbf16>, vector<16x16xbf16>, vector<16x16xf32> -> vector<16x16xf32>
    %454 = arith.addf %453, %283 : vector<16x16xf32>
    %cst_224 = arith.constant dense<0xFF800000> : vector<16xf32>
    %455 = vector.multi_reduction <maximumf>, %454, %cst_224 [1] : vector<16x16xf32> to vector<16xf32>
    %456 = vector.shape_cast %455 : vector<16xf32> to vector<16x1xf32>
    %457 = vector.broadcast %456 : vector<16x1xf32> to vector<16x16xf32>
    %458 = arith.subf %454, %457 : vector<16x16xf32>
    %459 = math.exp %458 : vector<16x16xf32>
    %cst_225 = arith.constant dense<0.000000e+00> : vector<16xf32>
    %460 = vector.multi_reduction <add>, %459, %cst_225 [1] : vector<16x16xf32> to vector<16xf32>
    %461 = vector.shape_cast %460 : vector<16xf32> to vector<16x1xf32>
    %462 = tpu.reciprocal %461 {approx = true} : vector<16x1xf32> -> vector<16x1xf32>
    %463 = vector.broadcast %462 : vector<16x1xf32> to vector<16x16xf32>
    %464 = arith.mulf %459, %463 : vector<16x16xf32>
    %465 = arith.truncf %464 : vector<16x16xf32> to vector<16x16xbf16>
    %466 = vector.extract_strided_slice %450 {offsets = [0, 0], sizes = [16, 16], strides = [1, 1]} : vector<16x32xbf16> to vector<16x16xbf16>
    %cst_226 = arith.constant dense<0.000000e+00> : vector<16x16xf32>
    %467 = tpu.matmul %465, %466, %cst_226 {dimension_numbers = #tpu.dot_dimension_numbers<[1], [0], [0], [1], [0, 0, 1, 1], [], []>} : vector<16x16xbf16>, vector<16x16xbf16>, vector<16x16xf32> -> vector<16x16xf32>
    %468 = vector.extract_strided_slice %448 {offsets = [0, 16], sizes = [16, 16], strides = [1, 1]} : vector<16x32xbf16> to vector<16x16xbf16>
    %469 = vector.extract_strided_slice %449 {offsets = [0, 16], sizes = [16, 16], strides = [1, 1]} : vector<16x32xbf16> to vector<16x16xbf16>
    %cst_227 = arith.constant dense<0.000000e+00> : vector<16x16xf32>
    %470 = tpu.matmul %468, %469, %cst_227 {dimension_numbers = #tpu.dot_dimension_numbers<[1], [1], [0], [0], [0, 0, 1, 0], [], []>} : vector<16x16xbf16>, vector<16x16xbf16>, vector<16x16xf32> -> vector<16x16xf32>
    %471 = arith.addf %470, %283 : vector<16x16xf32>
    %cst_228 = arith.constant dense<0xFF800000> : vector<16xf32>
    %472 = vector.multi_reduction <maximumf>, %471, %cst_228 [1] : vector<16x16xf32> to vector<16xf32>
    %473 = vector.shape_cast %472 : vector<16xf32> to vector<16x1xf32>
    %474 = vector.broadcast %473 : vector<16x1xf32> to vector<16x16xf32>
    %475 = arith.subf %471, %474 : vector<16x16xf32>
    %476 = math.exp %475 : vector<16x16xf32>
    %cst_229 = arith.constant dense<0.000000e+00> : vector<16xf32>
    %477 = vector.multi_reduction <add>, %476, %cst_229 [1] : vector<16x16xf32> to vector<16xf32>
    %478 = vector.shape_cast %477 : vector<16xf32> to vector<16x1xf32>
    %479 = tpu.reciprocal %478 {approx = true} : vector<16x1xf32> -> vector<16x1xf32>
    %480 = vector.broadcast %479 : vector<16x1xf32> to vector<16x16xf32>
    %481 = arith.mulf %476, %480 : vector<16x16xf32>
    %482 = arith.truncf %481 : vector<16x16xf32> to vector<16x16xbf16>
    %483 = vector.extract_strided_slice %450 {offsets = [0, 16], sizes = [16, 16], strides = [1, 1]} : vector<16x32xbf16> to vector<16x16xbf16>
    %cst_230 = arith.constant dense<0.000000e+00> : vector<16x16xf32>
    %484 = tpu.matmul %482, %483, %cst_230 {dimension_numbers = #tpu.dot_dimension_numbers<[1], [0], [0], [1], [0, 0, 1, 1], [], []>} : vector<16x16xbf16>, vector<16x16xbf16>, vector<16x16xf32> -> vector<16x16xf32>
    %485 = tpu.concatenate %467, %484 in 1 : vector<16x16xf32>, vector<16x16xf32> -> vector<16x32xf32>
    %486 = arith.truncf %485 : vector<16x32xf32> to vector<16x32xbf16>
    %cst_231 = arith.constant dense<0.000000e+00> : vector<16x32xf32>
    %487 = tpu.matmul %486, %441, %cst_231 {dimension_numbers = #tpu.dot_dimension_numbers<[1], [0], [0], [1], [0, 0, 1, 1], [], []>} : vector<16x32xbf16>, vector<32x32xbf16>, vector<16x32xf32> -> vector<16x32xf32>
    %488 = vector.broadcast %443 : vector<1x32xf32> to vector<16x32xf32>
    %489 = arith.addf %487, %488 : vector<16x32xf32>
    %490 = arith.addf %410, %489 : vector<16x32xf32>
    %491 = vector.broadcast %262 : vector<16x1xf32> to vector<16x32xf32>
    %492 = arith.mulf %490, %491 : vector<16x32xf32>
    %c1_232 = arith.constant 1 : index
    %c0_233 = arith.constant 0 : index
    %c0_234 = arith.constant 0 : index
    %493 = vector.load %arg10[%c1_232, %c0_233, %c0_234] : memref<2x1x32xf32, #tpu.memory_space<vmem>>, vector<1x1x32xf32>
    %494 = vector.shape_cast %493 : vector<1x1x32xf32> to vector<1x32xf32>
    %c1_235 = arith.constant 1 : index
    %c0_236 = arith.constant 0 : index
    %c0_237 = arith.constant 0 : index
    %495 = vector.load %arg11[%c1_235, %c0_236, %c0_237] : memref<2x1x32xf32, #tpu.memory_space<vmem>>, vector<1x1x32xf32>
    %496 = vector.shape_cast %495 : vector<1x1x32xf32> to vector<1x32xf32>
    %cst_238 = arith.constant dense<0.000000e+00> : vector<16xf32>
    %497 = vector.multi_reduction <add>, %492, %cst_238 [1] : vector<16x32xf32> to vector<16xf32>
    %498 = vector.shape_cast %497 : vector<16xf32> to vector<16x1xf32>
    %cst_239 = arith.constant 3.200000e+01 : f32
    %499 = vector.broadcast %cst_239 : f32 to vector<16x1xf32>
    %500 = arith.divf %498, %499 : vector<16x1xf32>
    %501 = vector.broadcast %500 : vector<16x1xf32> to vector<16x32xf32>
    %502 = arith.subf %492, %501 : vector<16x32xf32>
    %503 = arith.mulf %502, %502 : vector<16x32xf32>
    %cst_240 = arith.constant dense<0.000000e+00> : vector<16xf32>
    %504 = vector.multi_reduction <add>, %503, %cst_240 [1] : vector<16x32xf32> to vector<16xf32>
    %505 = vector.shape_cast %504 : vector<16xf32> to vector<16x1xf32>
    %cst_241 = arith.constant 3.200000e+01 : f32
    %506 = vector.broadcast %cst_241 : f32 to vector<16x1xf32>
    %507 = arith.divf %505, %506 : vector<16x1xf32>
    %cst_242 = arith.constant 9.99999974E-6 : f32
    %508 = vector.broadcast %cst_242 : f32 to vector<16x1xf32>
    %509 = arith.addf %507, %508 : vector<16x1xf32>
    %510 = math.rsqrt %509 : vector<16x1xf32>
    %511 = vector.broadcast %510 : vector<16x1xf32> to vector<16x32xf32>
    %512 = arith.mulf %502, %511 : vector<16x32xf32>
    %513 = vector.broadcast %494 : vector<1x32xf32> to vector<16x32xf32>
    %514 = arith.mulf %512, %513 : vector<16x32xf32>
    %515 = vector.broadcast %496 : vector<1x32xf32> to vector<16x32xf32>
    %516 = arith.addf %514, %515 : vector<16x32xf32>
    %517 = arith.truncf %516 : vector<16x32xf32> to vector<16x32xbf16>
    %c1_243 = arith.constant 1 : index
    %c0_244 = arith.constant 0 : index
    %c0_245 = arith.constant 0 : index
    %518 = vector.load %arg16[%c1_243, %c0_244, %c0_245] : memref<2x32x128xbf16, #tpu.memory_space<vmem>>, vector<1x32x128xbf16>
    %519 = vector.shape_cast %518 : vector<1x32x128xbf16> to vector<32x128xbf16>
    %c1_246 = arith.constant 1 : index
    %c0_247 = arith.constant 0 : index
    %c0_248 = arith.constant 0 : index
    %520 = vector.load %arg17[%c1_246, %c0_247, %c0_248] : memref<2x1x128xf32, #tpu.memory_space<vmem>>, vector<1x1x128xf32>
    %521 = vector.shape_cast %520 : vector<1x1x128xf32> to vector<1x128xf32>
    %c1_249 = arith.constant 1 : index
    %c0_250 = arith.constant 0 : index
    %c0_251 = arith.constant 0 : index
    %522 = vector.load %arg18[%c1_249, %c0_250, %c0_251] : memref<2x128x32xbf16, #tpu.memory_space<vmem>>, vector<1x128x32xbf16>
    %523 = vector.shape_cast %522 : vector<1x128x32xbf16> to vector<128x32xbf16>
    %c1_252 = arith.constant 1 : index
    %c0_253 = arith.constant 0 : index
    %c0_254 = arith.constant 0 : index
    %524 = vector.load %arg19[%c1_252, %c0_253, %c0_254] : memref<2x1x32xf32, #tpu.memory_space<vmem>>, vector<1x1x32xf32>
    %525 = vector.shape_cast %524 : vector<1x1x32xf32> to vector<1x32xf32>
    %cst_255 = arith.constant dense<0.000000e+00> : vector<16x128xf32>
    %526 = tpu.matmul %517, %519, %cst_255 {dimension_numbers = #tpu.dot_dimension_numbers<[1], [0], [0], [1], [0, 0, 1, 1], [], []>} : vector<16x32xbf16>, vector<32x128xbf16>, vector<16x128xf32> -> vector<16x128xf32>
    %527 = vector.broadcast %521 : vector<1x128xf32> to vector<16x128xf32>
    %528 = arith.addf %526, %527 : vector<16x128xf32>
    %cst_256 = arith.constant 0.000000e+00 : f32
    %529 = vector.broadcast %cst_256 : f32 to vector<16x128xf32>
    %530 = arith.maximumf %528, %529 : vector<16x128xf32>
    %531 = arith.truncf %530 : vector<16x128xf32> to vector<16x128xbf16>
    %cst_257 = arith.constant dense<0.000000e+00> : vector<16x32xf32>
    %532 = tpu.matmul %531, %523, %cst_257 {dimension_numbers = #tpu.dot_dimension_numbers<[1], [0], [0], [1], [0, 0, 1, 1], [], []>} : vector<16x128xbf16>, vector<128x32xbf16>, vector<16x32xf32> -> vector<16x32xf32>
    %533 = vector.broadcast %525 : vector<1x32xf32> to vector<16x32xf32>
    %534 = arith.addf %532, %533 : vector<16x32xf32>
    %535 = arith.addf %492, %534 : vector<16x32xf32>
    %536 = vector.broadcast %262 : vector<16x1xf32> to vector<16x32xf32>
    %537 = arith.mulf %535, %536 : vector<16x32xf32>
    %c0_258 = arith.constant 0 : index
    %c0_259 = arith.constant 0 : index
    %538 = vector.load %arg20[%c0_258, %c0_259] : memref<1x32xf32, #tpu.memory_space<vmem>>, vector<1x32xf32>
    %c0_260 = arith.constant 0 : index
    %c0_261 = arith.constant 0 : index
    %539 = vector.load %arg21[%c0_260, %c0_261] : memref<1x32xf32, #tpu.memory_space<vmem>>, vector<1x32xf32>
    %cst_262 = arith.constant dense<0.000000e+00> : vector<16xf32>
    %540 = vector.multi_reduction <add>, %537, %cst_262 [1] : vector<16x32xf32> to vector<16xf32>
    %541 = vector.shape_cast %540 : vector<16xf32> to vector<16x1xf32>
    %cst_263 = arith.constant 3.200000e+01 : f32
    %542 = vector.broadcast %cst_263 : f32 to vector<16x1xf32>
    %543 = arith.divf %541, %542 : vector<16x1xf32>
    %544 = vector.broadcast %543 : vector<16x1xf32> to vector<16x32xf32>
    %545 = arith.subf %537, %544 : vector<16x32xf32>
    %546 = arith.mulf %545, %545 : vector<16x32xf32>
    %cst_264 = arith.constant dense<0.000000e+00> : vector<16xf32>
    %547 = vector.multi_reduction <add>, %546, %cst_264 [1] : vector<16x32xf32> to vector<16xf32>
    %548 = vector.shape_cast %547 : vector<16xf32> to vector<16x1xf32>
    %cst_265 = arith.constant 3.200000e+01 : f32
    %549 = vector.broadcast %cst_265 : f32 to vector<16x1xf32>
    %550 = arith.divf %548, %549 : vector<16x1xf32>
    %cst_266 = arith.constant 9.99999974E-6 : f32
    %551 = vector.broadcast %cst_266 : f32 to vector<16x1xf32>
    %552 = arith.addf %550, %551 : vector<16x1xf32>
    %553 = math.rsqrt %552 : vector<16x1xf32>
    %554 = vector.broadcast %553 : vector<16x1xf32> to vector<16x32xf32>
    %555 = arith.mulf %545, %554 : vector<16x32xf32>
    %556 = vector.broadcast %538 : vector<1x32xf32> to vector<16x32xf32>
    %557 = arith.mulf %555, %556 : vector<16x32xf32>
    %558 = vector.broadcast %539 : vector<1x32xf32> to vector<16x32xf32>
    %559 = arith.addf %557, %558 : vector<16x32xf32>
    %560 = vector.broadcast %9 : vector<16x1xf32> to vector<16x32xf32>
    %561 = arith.mulf %559, %560 : vector<16x32xf32>
    %c0_267 = arith.constant 0 : index
    %c0_268 = arith.constant 0 : index
    %c0_269 = arith.constant 0 : index
    %562 = vector.load %arg22[%c0_267, %c0_268, %c0_269] : memref<1x16x32xf32, #tpu.memory_space<vmem>>, vector<1x16x32xf32>
    %563 = vector.shape_cast %562 : vector<1x16x32xf32> to vector<16x32xf32>
    %564 = vector.shape_cast %561 : vector<16x32xf32> to vector<1x16x32xf32>
    tpu.vector_store %arg22[%c0_267, %c0_268, %c0_269], %564 {strides = array<i32>} : memref<1x16x32xf32, #tpu.memory_space<vmem>>, vector<1x16x32xf32>,
    return
  }
  func.func @transform_0(%arg0: i32) -> (i32, i32, i32) {
    %c0_i32 = arith.constant 0 : i32
    %c0_i32_0 = arith.constant 0 : i32
    %c0_i32_1 = arith.constant 0 : i32
    return %arg0, %c0_i32, %c0_i32_0 : i32, i32, i32
  }
  func.func @transform_1(%arg0: i32) -> (i32, i32) {
    %c0_i32 = arith.constant 0 : i32
    %c0_i32_0 = arith.constant 0 : i32
    %c0_i32_1 = arith.constant 0 : i32
    return %c0_i32, %c0_i32_0 : i32, i32
  }
  func.func @transform_2(%arg0: i32) -> (i32, i32, i32) {
    %c0_i32 = arith.constant 0 : i32
    %c0_i32_0 = arith.constant 0 : i32
    %c0_i32_1 = arith.constant 0 : i32
    %c0_i32_2 = arith.constant 0 : i32
    return %c0_i32, %c0_i32_0, %c0_i32_1 : i32, i32, i32
  }
  func.func @transform_3(%arg0: i32) -> (i32, i32, i32, i32) {
    %c0_i32 = arith.constant 0 : i32
    %c0_i32_0 = arith.constant 0 : i32
    %c0_i32_1 = arith.constant 0 : i32
    %c0_i32_2 = arith.constant 0 : i32
    %c0_i32_3 = arith.constant 0 : i32
    return %c0_i32, %c0_i32_0, %c0_i32_1, %c0_i32_2 : i32, i32, i32, i32
  }
  func.func @transform_4(%arg0: i32) -> (i32, i32, i32) {
    %c0_i32 = arith.constant 0 : i32
    %c0_i32_0 = arith.constant 0 : i32
    %c0_i32_1 = arith.constant 0 : i32
    %c0_i32_2 = arith.constant 0 : i32
    return %c0_i32, %c0_i32_0, %c0_i32_1 : i32, i32, i32
  }
  func.func @transform_5(%arg0: i32) -> (i32, i32) {
    %c0_i32 = arith.constant 0 : i32
    %c0_i32_0 = arith.constant 0 : i32
    %c0_i32_1 = arith.constant 0 : i32
    return %c0_i32, %c0_i32_0 : i32, i32
  }
  func.func @transform_6(%arg0: i32) -> (i32, i32) {
    %c0_i32 = arith.constant 0 : i32
    %c0_i32_0 = arith.constant 0 : i32
    %c0_i32_1 = arith.constant 0 : i32
    return %c0_i32, %c0_i32_0 : i32, i32
  }
  func.func @transform_7(%arg0: i32) -> (i32, i32, i32) {
    %c0_i32 = arith.constant 0 : i32
    %c0_i32_0 = arith.constant 0 : i32
    %c0_i32_1 = arith.constant 0 : i32
    %c0_i32_2 = arith.constant 0 : i32
    return %c0_i32, %c0_i32_0, %c0_i32_1 : i32, i32, i32
  }
  func.func @transform_8(%arg0: i32) -> (i32, i32, i32) {
    %c0_i32 = arith.constant 0 : i32
    %c0_i32_0 = arith.constant 0 : i32
    %c0_i32_1 = arith.constant 0 : i32
    %c0_i32_2 = arith.constant 0 : i32
    return %c0_i32, %c0_i32_0, %c0_i32_1 : i32, i32, i32
  }
  func.func @transform_9(%arg0: i32) -> (i32, i32, i32) {
    %c0_i32 = arith.constant 0 : i32
    %c0_i32_0 = arith.constant 0 : i32
    %c0_i32_1 = arith.constant 0 : i32
    %c0_i32_2 = arith.constant 0 : i32
    return %c0_i32, %c0_i32_0, %c0_i32_1 : i32, i32, i32
  }
  func.func @transform_10(%arg0: i32) -> (i32, i32, i32) {
    %c0_i32 = arith.constant 0 : i32
    %c0_i32_0 = arith.constant 0 : i32
    %c0_i32_1 = arith.constant 0 : i32
    %c0_i32_2 = arith.constant 0 : i32
    return %c0_i32, %c0_i32_0, %c0_i32_1 : i32, i32, i32
  }
  func.func @transform_11(%arg0: i32) -> (i32, i32, i32) {
    %c0_i32 = arith.constant 0 : i32
    %c0_i32_0 = arith.constant 0 : i32
    %c0_i32_1 = arith.constant 0 : i32
    %c0_i32_2 = arith.constant 0 : i32
    return %c0_i32, %c0_i32_0, %c0_i32_1 : i32, i32, i32
  }
  func.func @transform_12(%arg0: i32) -> (i32, i32, i32) {
    %c0_i32 = arith.constant 0 : i32
    %c0_i32_0 = arith.constant 0 : i32
    %c0_i32_1 = arith.constant 0 : i32
    %c0_i32_2 = arith.constant 0 : i32
    return %c0_i32, %c0_i32_0, %c0_i32_1 : i32, i32, i32
  }
  func.func @transform_13(%arg0: i32) -> (i32, i32, i32) {
    %c0_i32 = arith.constant 0 : i32
    %c0_i32_0 = arith.constant 0 : i32
    %c0_i32_1 = arith.constant 0 : i32
    %c0_i32_2 = arith.constant 0 : i32
    return %c0_i32, %c0_i32_0, %c0_i32_1 : i32, i32, i32
  }
  func.func @transform_14(%arg0: i32) -> (i32, i32, i32) {
    %c0_i32 = arith.constant 0 : i32
    %c0_i32_0 = arith.constant 0 : i32
    %c0_i32_1 = arith.constant 0 : i32
    %c0_i32_2 = arith.constant 0 : i32
    return %c0_i32, %c0_i32_0, %c0_i32_1 : i32, i32, i32
  }
  func.func @transform_15(%arg0: i32) -> (i32, i32, i32) {
    %c0_i32 = arith.constant 0 : i32
    %c0_i32_0 = arith.constant 0 : i32
    %c0_i32_1 = arith.constant 0 : i32
    %c0_i32_2 = arith.constant 0 : i32
    return %c0_i32, %c0_i32_0, %c0_i32_1 : i32, i32, i32
  }
  func.func @transform_16(%arg0: i32) -> (i32, i32, i32) {
    %c0_i32 = arith.constant 0 : i32
    %c0_i32_0 = arith.constant 0 : i32
    %c0_i32_1 = arith.constant 0 : i32
    %c0_i32_2 = arith.constant 0 : i32
    return %c0_i32, %c0_i32_0, %c0_i32_1 : i32, i32, i32
  }
  func.func @transform_17(%arg0: i32) -> (i32, i32, i32) {
    %c0_i32 = arith.constant 0 : i32
    %c0_i32_0 = arith.constant 0 : i32
    %c0_i32_1 = arith.constant 0 : i32
    %c0_i32_2 = arith.constant 0 : i32
    return %c0_i32, %c0_i32_0, %c0_i32_1 : i32, i32, i32
  }
  func.func @transform_18(%arg0: i32) -> (i32, i32, i32) {
    %c0_i32 = arith.constant 0 : i32
    %c0_i32_0 = arith.constant 0 : i32
    %c0_i32_1 = arith.constant 0 : i32
    %c0_i32_2 = arith.constant 0 : i32
    return %c0_i32, %c0_i32_0, %c0_i32_1 : i32, i32, i32
  }
  func.func @transform_19(%arg0: i32) -> (i32, i32) {
    %c0_i32 = arith.constant 0 : i32
    %c0_i32_0 = arith.constant 0 : i32
    %c0_i32_1 = arith.constant 0 : i32
    return %c0_i32, %c0_i32_0 : i32, i32
  }
  func.func @transform_20(%arg0: i32) -> (i32, i32) {
    %c0_i32 = arith.constant 0 : i32
    %c0_i32_0 = arith.constant 0 : i32
    %c0_i32_1 = arith.constant 0 : i32
    return %c0_i32, %c0_i32_0 : i32, i32
  }
  func.func @transform_21(%arg0: i32) -> (i32, i32, i32) {
    %c0_i32 = arith.constant 0 : i32
    %c0_i32_0 = arith.constant 0 : i32
    %c0_i32_1 = arith.constant 0 : i32
    return %arg0, %c0_i32, %c0_i32_0 : i32, i32, i32
  }
}

module attributes {stable_mosaic.version = 11 : i64} {
  func.func @_decoder_fused_kernel(%arg0: i32, %arg1: memref<1x8x32xf32, #tpu.memory_space<vmem>>, %arg2: memref<1x16x32xf32, #tpu.memory_space<vmem>>, %arg3: memref<9x32xf32, #tpu.memory_space<vmem>>, %arg4: memref<2x1x32xf32, #tpu.memory_space<vmem>>, %arg5: memref<2x1x32xf32, #tpu.memory_space<vmem>>, %arg6: memref<2x1x32xf32, #tpu.memory_space<vmem>>, %arg7: memref<2x1x32xf32, #tpu.memory_space<vmem>>, %arg8: memref<2x1x32xf32, #tpu.memory_space<vmem>>, %arg9: memref<2x1x32xf32, #tpu.memory_space<vmem>>, %arg10: memref<2x32x96xbf16, #tpu.memory_space<vmem>>, %arg11: memref<2x1x96xf32, #tpu.memory_space<vmem>>, %arg12: memref<2x32x32xbf16, #tpu.memory_space<vmem>>, %arg13: memref<2x1x32xf32, #tpu.memory_space<vmem>>, %arg14: memref<2x32x32xbf16, #tpu.memory_space<vmem>>, %arg15: memref<2x1x32xf32, #tpu.memory_space<vmem>>, %arg16: memref<2x32x64xbf16, #tpu.memory_space<vmem>>, %arg17: memref<2x1x64xf32, #tpu.memory_space<vmem>>, %arg18: memref<2x32x32xbf16, #tpu.memory_space<vmem>>, %arg19: memref<2x1x32xf32, #tpu.memory_space<vmem>>, %arg20: memref<2x32x128xbf16, #tpu.memory_space<vmem>>, %arg21: memref<2x1x128xf32, #tpu.memory_space<vmem>>, %arg22: memref<2x128x32xbf16, #tpu.memory_space<vmem>>, %arg23: memref<2x1x32xf32, #tpu.memory_space<vmem>>, %arg24: memref<1x32xf32, #tpu.memory_space<vmem>>, %arg25: memref<1x32xf32, #tpu.memory_space<vmem>>, %arg26: memref<32x16xbf16, #tpu.memory_space<vmem>>, %arg27: memref<1x8x16xf32, #tpu.memory_space<vmem>>, %arg28: memref<1x2x2x8x16xf32, #tpu.memory_space<vmem>>) attributes {dimension_semantics = [#tpu.dimension_semantics<parallel>], iteration_bounds = array<i64: 2>, scalar_prefetch = 0 : i64, scratch_operands = 0 : i64, tpu.core_type = #tpu.core_type<tc>, window_params = [{transform_indices = @transform_0, window_bounds = array<i64: 1, 8, 32>}, {transform_indices = @transform_1, window_bounds = array<i64: 1, 16, 32>}, {pipeline_mode = #tpu.pipeline_mode<synchronous>, transform_indices = @transform_2, window_bounds = array<i64: 9, 32>}, {pipeline_mode = #tpu.pipeline_mode<synchronous>, transform_indices = @transform_3, window_bounds = array<i64: 2, 1, 32>}, {pipeline_mode = #tpu.pipeline_mode<synchronous>, transform_indices = @transform_4, window_bounds = array<i64: 2, 1, 32>}, {pipeline_mode = #tpu.pipeline_mode<synchronous>, transform_indices = @transform_5, window_bounds = array<i64: 2, 1, 32>}, {pipeline_mode = #tpu.pipeline_mode<synchronous>, transform_indices = @transform_6, window_bounds = array<i64: 2, 1, 32>}, {pipeline_mode = #tpu.pipeline_mode<synchronous>, transform_indices = @transform_7, window_bounds = array<i64: 2, 1, 32>}, {pipeline_mode = #tpu.pipeline_mode<synchronous>, transform_indices = @transform_8, window_bounds = array<i64: 2, 1, 32>}, {pipeline_mode = #tpu.pipeline_mode<synchronous>, transform_indices = @transform_9, window_bounds = array<i64: 2, 32, 96>}, {pipeline_mode = #tpu.pipeline_mode<synchronous>, transform_indices = @transform_10, window_bounds = array<i64: 2, 1, 96>}, {pipeline_mode = #tpu.pipeline_mode<synchronous>, transform_indices = @transform_11, window_bounds = array<i64: 2, 32, 32>}, {pipeline_mode = #tpu.pipeline_mode<synchronous>, transform_indices = @transform_12, window_bounds = array<i64: 2, 1, 32>}, {pipeline_mode = #tpu.pipeline_mode<synchronous>, transform_indices = @transform_13, window_bounds = array<i64: 2, 32, 32>}, {pipeline_mode = #tpu.pipeline_mode<synchronous>, transform_indices = @transform_14, window_bounds = array<i64: 2, 1, 32>}, {pipeline_mode = #tpu.pipeline_mode<synchronous>, transform_indices = @transform_15, window_bounds = array<i64: 2, 32, 64>}, {pipeline_mode = #tpu.pipeline_mode<synchronous>, transform_indices = @transform_16, window_bounds = array<i64: 2, 1, 64>}, {pipeline_mode = #tpu.pipeline_mode<synchronous>, transform_indices = @transform_17, window_bounds = array<i64: 2, 32, 32>}, {pipeline_mode = #tpu.pipeline_mode<synchronous>, transform_indices = @transform_18, window_bounds = array<i64: 2, 1, 32>}, {pipeline_mode = #tpu.pipeline_mode<synchronous>, transform_indices = @transform_19, window_bounds = array<i64: 2, 32, 128>}, {pipeline_mode = #tpu.pipeline_mode<synchronous>, transform_indices = @transform_20, window_bounds = array<i64: 2, 1, 128>}, {pipeline_mode = #tpu.pipeline_mode<synchronous>, transform_indices = @transform_21, window_bounds = array<i64: 2, 128, 32>}, {pipeline_mode = #tpu.pipeline_mode<synchronous>, transform_indices = @transform_22, window_bounds = array<i64: 2, 1, 32>}, {pipeline_mode = #tpu.pipeline_mode<synchronous>, transform_indices = @transform_23, window_bounds = array<i64: 1, 32>}, {pipeline_mode = #tpu.pipeline_mode<synchronous>, transform_indices = @transform_24, window_bounds = array<i64: 1, 32>}, {pipeline_mode = #tpu.pipeline_mode<synchronous>, transform_indices = @transform_25, window_bounds = array<i64: 32, 16>}, {transform_indices = @transform_26, window_bounds = array<i64: 1, 8, 16>}, {transform_indices = @transform_27, window_bounds = array<i64: 1, 2, 2, 8, 16>}]} {
    %c0 = arith.constant 0 : index
    %c0_0 = arith.constant 0 : index
    %0 = vector.load %arg3[%c0, %c0_0] : memref<9x32xf32, #tpu.memory_space<vmem>>, vector<9x32xf32>
    %1 = tpu.iota {dimensions = array<i32: 0>} : vector<8x8xi32>
    %2 = tpu.iota {dimensions = array<i32: 1>} : vector<8x8xi32>
    %3 = arith.cmpi sgt, %2, %1 : vector<8x8xi32>
    %cst = arith.constant -1.000000e+09 : f32
    %cst_1 = arith.constant 0.000000e+00 : f32
    %4 = vector.broadcast %cst : f32 to vector<8x8xf32>
    %5 = vector.broadcast %cst_1 : f32 to vector<8x8xf32>
    %6 = arith.select %3, %4, %5 : vector<8x8xi1>, vector<8x8xf32>
    %c0_2 = arith.constant 0 : index
    %c0_3 = arith.constant 0 : index
    %c0_4 = arith.constant 0 : index
    %7 = vector.load %arg1[%c0_2, %c0_3, %c0_4] : memref<1x8x32xf32, #tpu.memory_space<vmem>>, vector<1x8x32xf32>
    %8 = vector.shape_cast %7 : vector<1x8x32xf32> to vector<8x32xf32>
    %c0_5 = arith.constant 0 : index
    %c0_6 = arith.constant 0 : index
    %c0_7 = arith.constant 0 : index
    %9 = vector.load %arg2[%c0_5, %c0_6, %c0_7] : memref<1x16x32xf32, #tpu.memory_space<vmem>>, vector<1x16x32xf32>
    %10 = vector.shape_cast %9 : vector<1x16x32xf32> to vector<16x32xf32>
    %11 = arith.truncf %10 : vector<16x32xf32> to vector<16x32xbf16>
    %12 = math.absf %8 : vector<8x32xf32>
    %cst_8 = arith.constant dense<0.000000e+00> : vector<8xf32>
    %13 = vector.multi_reduction <add>, %12, %cst_8 [1] : vector<8x32xf32> to vector<8xf32>
    %14 = vector.shape_cast %13 : vector<8xf32> to vector<8x1xf32>
    %cst_9 = arith.constant 0.000000e+00 : f32
    %15 = vector.broadcast %cst_9 : f32 to vector<8x1xf32>
    %16 = arith.cmpf oeq, %14, %15 : vector<8x1xf32>
    %17 = arith.extui %16 : vector<8x1xi1> to vector<8x1xi32>
    %18 = arith.sitofp %17 : vector<8x1xi32> to vector<8x1xf32>
    %cst_10 = arith.constant 1.000000e+00 : f32
    %19 = vector.broadcast %cst_10 : f32 to vector<8x1xf32>
    %20 = arith.subf %19, %18 : vector<8x1xf32>
    %21 = math.absf %10 : vector<16x32xf32>
    %cst_11 = arith.constant dense<0.000000e+00> : vector<16xf32>
    %22 = vector.multi_reduction <add>, %21, %cst_11 [1] : vector<16x32xf32> to vector<16xf32>
    %23 = vector.shape_cast %22 : vector<16xf32> to vector<16x1xf32>
    %cst_12 = arith.constant 0.000000e+00 : f32
    %24 = vector.broadcast %cst_12 : f32 to vector<16x1xf32>
    %25 = arith.cmpf oeq, %23, %24 : vector<16x1xf32>
    %26 = arith.extui %25 : vector<16x1xi1> to vector<16x1xi32>
    %27 = arith.sitofp %26 : vector<16x1xi32> to vector<16x1xf32>
    %cst_13 = arith.constant 1.000000e+00 : f32
    %28 = vector.broadcast %cst_13 : f32 to vector<8x1xf32>
    %cst_14 = arith.constant dense<0.000000e+00> : vector<8x8xf32>
    %29 = tpu.matmul %28, %18, %cst_14 {dimension_numbers = #tpu.dot_dimension_numbers<[1], [1], [0], [0], [0, 0, 1, 0], [], []>} : vector<8x1xf32>, vector<8x1xf32>, vector<8x8xf32> -> vector<8x8xf32>
    %cst_15 = arith.constant -1.000000e+09 : f32
    %30 = vector.broadcast %cst_15 : f32 to vector<8x8xf32>
    %31 = arith.mulf %29, %30 : vector<8x8xf32>
    %32 = arith.addf %6, %31 : vector<8x8xf32>
    %cst_16 = arith.constant 1.000000e+00 : f32
    %33 = vector.broadcast %cst_16 : f32 to vector<8x1xf32>
    %cst_17 = arith.constant dense<0.000000e+00> : vector<8x16xf32>
    %34 = tpu.matmul %33, %27, %cst_17 {dimension_numbers = #tpu.dot_dimension_numbers<[1], [1], [0], [0], [0, 0, 1, 0], [], []>} : vector<8x1xf32>, vector<16x1xf32>, vector<8x16xf32> -> vector<8x16xf32>
    %cst_18 = arith.constant -1.000000e+09 : f32
    %35 = vector.broadcast %cst_18 : f32 to vector<8x16xf32>
    %36 = arith.mulf %34, %35 : vector<8x16xf32>
    %37 = tpu.iota {dimensions = array<i32: 0>} : vector<8x8xi32>
    %38 = tpu.iota {dimensions = array<i32: 1>} : vector<8x8xi32>
    %39 = arith.cmpi sge, %37, %38 : vector<8x8xi32>
    %40 = arith.extui %39 : vector<8x8xi1> to vector<8x8xi32>
    %41 = arith.sitofp %40 : vector<8x8xi32> to vector<8x8xf32>
    %cst_19 = arith.constant dense<0.000000e+00> : vector<8x1xf32>
    %42 = tpu.matmul %41, %20, %cst_19 {dimension_numbers = #tpu.dot_dimension_numbers<[1], [0], [0], [1], [0, 0, 1, 1], [], []>} : vector<8x8xf32>, vector<8x1xf32>, vector<8x1xf32> -> vector<8x1xf32>
    %43 = arith.mulf %42, %20 : vector<8x1xf32>
    %44 = tpu.iota {dimensions = array<i32: 1>} : vector<8x9xi32>
    %45 = arith.sitofp %44 : vector<8x9xi32> to vector<8x9xf32>
    %46 = vector.broadcast %43 : vector<8x1xf32> to vector<8x9xf32>
    %47 = arith.cmpf oeq, %45, %46 : vector<8x9xf32>
    %48 = arith.extui %47 : vector<8x9xi1> to vector<8x9xi32>
    %49 = arith.sitofp %48 : vector<8x9xi32> to vector<8x9xf32>
    %cst_20 = arith.constant dense<0.000000e+00> : vector<8x32xf32>
    %50 = tpu.matmul %49, %0, %cst_20 {dimension_numbers = #tpu.dot_dimension_numbers<[1], [0], [0], [1], [0, 0, 1, 1], [], []>} : vector<8x9xf32>, vector<9x32xf32>, vector<8x32xf32> -> vector<8x32xf32>
    %51 = arith.addf %8, %50 : vector<8x32xf32>
    %c0_21 = arith.constant 0 : index
    %c0_22 = arith.constant 0 : index
    %c0_23 = arith.constant 0 : index
    %52 = vector.load %arg4[%c0_21, %c0_22, %c0_23] : memref<2x1x32xf32, #tpu.memory_space<vmem>>, vector<1x1x32xf32>
    %53 = vector.shape_cast %52 : vector<1x1x32xf32> to vector<1x32xf32>
    %c0_24 = arith.constant 0 : index
    %c0_25 = arith.constant 0 : index
    %c0_26 = arith.constant 0 : index
    %54 = vector.load %arg5[%c0_24, %c0_25, %c0_26] : memref<2x1x32xf32, #tpu.memory_space<vmem>>, vector<1x1x32xf32>
    %55 = vector.shape_cast %54 : vector<1x1x32xf32> to vector<1x32xf32>
    %cst_27 = arith.constant dense<0.000000e+00> : vector<8xf32>
    %56 = vector.multi_reduction <add>, %51, %cst_27 [1] : vector<8x32xf32> to vector<8xf32>
    %57 = vector.shape_cast %56 : vector<8xf32> to vector<8x1xf32>
    %cst_28 = arith.constant 3.200000e+01 : f32
    %58 = vector.broadcast %cst_28 : f32 to vector<8x1xf32>
    %59 = arith.divf %57, %58 : vector<8x1xf32>
    %60 = vector.broadcast %59 : vector<8x1xf32> to vector<8x32xf32>
    %61 = arith.subf %51, %60 : vector<8x32xf32>
    %62 = arith.mulf %61, %61 : vector<8x32xf32>
    %cst_29 = arith.constant dense<0.000000e+00> : vector<8xf32>
    %63 = vector.multi_reduction <add>, %62, %cst_29 [1] : vector<8x32xf32> to vector<8xf32>
    %64 = vector.shape_cast %63 : vector<8xf32> to vector<8x1xf32>
    %cst_30 = arith.constant 3.200000e+01 : f32
    %65 = vector.broadcast %cst_30 : f32 to vector<8x1xf32>
    %66 = arith.divf %64, %65 : vector<8x1xf32>
    %cst_31 = arith.constant 9.99999974E-6 : f32
    %67 = vector.broadcast %cst_31 : f32 to vector<8x1xf32>
    %68 = arith.addf %66, %67 : vector<8x1xf32>
    %69 = math.rsqrt %68 : vector<8x1xf32>
    %70 = vector.broadcast %69 : vector<8x1xf32> to vector<8x32xf32>
    %71 = arith.mulf %61, %70 : vector<8x32xf32>
    %72 = vector.broadcast %53 : vector<1x32xf32> to vector<8x32xf32>
    %73 = arith.mulf %71, %72 : vector<8x32xf32>
    %74 = vector.broadcast %55 : vector<1x32xf32> to vector<8x32xf32>
    %75 = arith.addf %73, %74 : vector<8x32xf32>
    %76 = arith.truncf %75 : vector<8x32xf32> to vector<8x32xbf16>
    %c0_32 = arith.constant 0 : index
    %c0_33 = arith.constant 0 : index
    %c0_34 = arith.constant 0 : index
    %77 = vector.load %arg10[%c0_32, %c0_33, %c0_34] : memref<2x32x96xbf16, #tpu.memory_space<vmem>>, vector<1x32x96xbf16>
    %78 = vector.shape_cast %77 : vector<1x32x96xbf16> to vector<32x96xbf16>
    %c0_35 = arith.constant 0 : index
    %c0_36 = arith.constant 0 : index
    %c0_37 = arith.constant 0 : index
    %79 = vector.load %arg11[%c0_35, %c0_36, %c0_37] : memref<2x1x96xf32, #tpu.memory_space<vmem>>, vector<1x1x96xf32>
    %80 = vector.shape_cast %79 : vector<1x1x96xf32> to vector<1x96xf32>
    %c0_38 = arith.constant 0 : index
    %c0_39 = arith.constant 0 : index
    %c0_40 = arith.constant 0 : index
    %81 = vector.load %arg12[%c0_38, %c0_39, %c0_40] : memref<2x32x32xbf16, #tpu.memory_space<vmem>>, vector<1x32x32xbf16>
    %82 = vector.shape_cast %81 : vector<1x32x32xbf16> to vector<32x32xbf16>
    %c0_41 = arith.constant 0 : index
    %c0_42 = arith.constant 0 : index
    %c0_43 = arith.constant 0 : index
    %83 = vector.load %arg13[%c0_41, %c0_42, %c0_43] : memref<2x1x32xf32, #tpu.memory_space<vmem>>, vector<1x1x32xf32>
    %84 = vector.shape_cast %83 : vector<1x1x32xf32> to vector<1x32xf32>
    %cst_44 = arith.constant dense<0.000000e+00> : vector<8x96xf32>
    %85 = tpu.matmul %76, %78, %cst_44 {dimension_numbers = #tpu.dot_dimension_numbers<[1], [0], [0], [1], [0, 0, 1, 1], [], []>} : vector<8x32xbf16>, vector<32x96xbf16>, vector<8x96xf32> -> vector<8x96xf32>
    %86 = vector.broadcast %80 : vector<1x96xf32> to vector<8x96xf32>
    %87 = arith.addf %85, %86 : vector<8x96xf32>
    %88 = arith.truncf %87 : vector<8x96xf32> to vector<8x96xbf16>
    %89 = vector.extract_strided_slice %88 {offsets = [0, 0], sizes = [8, 32], strides = [1, 1]} : vector<8x96xbf16> to vector<8x32xbf16>
    %90 = vector.extract_strided_slice %88 {offsets = [0, 32], sizes = [8, 32], strides = [1, 1]} : vector<8x96xbf16> to vector<8x32xbf16>
    %91 = vector.extract_strided_slice %88 {offsets = [0, 64], sizes = [8, 32], strides = [1, 1]} : vector<8x96xbf16> to vector<8x32xbf16>
    %92 = vector.extract_strided_slice %89 {offsets = [0, 0], sizes = [8, 16], strides = [1, 1]} : vector<8x32xbf16> to vector<8x16xbf16>
    %93 = vector.extract_strided_slice %90 {offsets = [0, 0], sizes = [8, 16], strides = [1, 1]} : vector<8x32xbf16> to vector<8x16xbf16>
    %cst_45 = arith.constant dense<0.000000e+00> : vector<8x8xf32>
    %94 = tpu.matmul %92, %93, %cst_45 {dimension_numbers = #tpu.dot_dimension_numbers<[1], [1], [0], [0], [0, 0, 1, 0], [], []>} : vector<8x16xbf16>, vector<8x16xbf16>, vector<8x8xf32> -> vector<8x8xf32>
    %95 = arith.addf %94, %32 : vector<8x8xf32>
    %cst_46 = arith.constant dense<0xFF800000> : vector<8xf32>
    %96 = vector.multi_reduction <maximumf>, %95, %cst_46 [1] : vector<8x8xf32> to vector<8xf32>
    %97 = vector.shape_cast %96 : vector<8xf32> to vector<8x1xf32>
    %98 = vector.broadcast %97 : vector<8x1xf32> to vector<8x8xf32>
    %99 = arith.subf %95, %98 : vector<8x8xf32>
    %100 = math.exp %99 : vector<8x8xf32>
    %cst_47 = arith.constant dense<0.000000e+00> : vector<8xf32>
    %101 = vector.multi_reduction <add>, %100, %cst_47 [1] : vector<8x8xf32> to vector<8xf32>
    %102 = vector.shape_cast %101 : vector<8xf32> to vector<8x1xf32>
    %103 = tpu.reciprocal %102 {approx = true} : vector<8x1xf32> -> vector<8x1xf32>
    %104 = vector.broadcast %103 : vector<8x1xf32> to vector<8x8xf32>
    %105 = arith.mulf %100, %104 : vector<8x8xf32>
    %106 = arith.truncf %105 : vector<8x8xf32> to vector<8x8xbf16>
    %107 = vector.extract_strided_slice %91 {offsets = [0, 0], sizes = [8, 16], strides = [1, 1]} : vector<8x32xbf16> to vector<8x16xbf16>
    %cst_48 = arith.constant dense<0.000000e+00> : vector<8x16xf32>
    %108 = tpu.matmul %106, %107, %cst_48 {dimension_numbers = #tpu.dot_dimension_numbers<[1], [0], [0], [1], [0, 0, 1, 1], [], []>} : vector<8x8xbf16>, vector<8x16xbf16>, vector<8x16xf32> -> vector<8x16xf32>
    %109 = vector.extract_strided_slice %89 {offsets = [0, 16], sizes = [8, 16], strides = [1, 1]} : vector<8x32xbf16> to vector<8x16xbf16>
    %110 = vector.extract_strided_slice %90 {offsets = [0, 16], sizes = [8, 16], strides = [1, 1]} : vector<8x32xbf16> to vector<8x16xbf16>
    %cst_49 = arith.constant dense<0.000000e+00> : vector<8x8xf32>
    %111 = tpu.matmul %109, %110, %cst_49 {dimension_numbers = #tpu.dot_dimension_numbers<[1], [1], [0], [0], [0, 0, 1, 0], [], []>} : vector<8x16xbf16>, vector<8x16xbf16>, vector<8x8xf32> -> vector<8x8xf32>
    %112 = arith.addf %111, %32 : vector<8x8xf32>
    %cst_50 = arith.constant dense<0xFF800000> : vector<8xf32>
    %113 = vector.multi_reduction <maximumf>, %112, %cst_50 [1] : vector<8x8xf32> to vector<8xf32>
    %114 = vector.shape_cast %113 : vector<8xf32> to vector<8x1xf32>
    %115 = vector.broadcast %114 : vector<8x1xf32> to vector<8x8xf32>
    %116 = arith.subf %112, %115 : vector<8x8xf32>
    %117 = math.exp %116 : vector<8x8xf32>
    %cst_51 = arith.constant dense<0.000000e+00> : vector<8xf32>
    %118 = vector.multi_reduction <add>, %117, %cst_51 [1] : vector<8x8xf32> to vector<8xf32>
    %119 = vector.shape_cast %118 : vector<8xf32> to vector<8x1xf32>
    %120 = tpu.reciprocal %119 {approx = true} : vector<8x1xf32> -> vector<8x1xf32>
    %121 = vector.broadcast %120 : vector<8x1xf32> to vector<8x8xf32>
    %122 = arith.mulf %117, %121 : vector<8x8xf32>
    %123 = arith.truncf %122 : vector<8x8xf32> to vector<8x8xbf16>
    %124 = vector.extract_strided_slice %91 {offsets = [0, 16], sizes = [8, 16], strides = [1, 1]} : vector<8x32xbf16> to vector<8x16xbf16>
    %cst_52 = arith.constant dense<0.000000e+00> : vector<8x16xf32>
    %125 = tpu.matmul %123, %124, %cst_52 {dimension_numbers = #tpu.dot_dimension_numbers<[1], [0], [0], [1], [0, 0, 1, 1], [], []>} : vector<8x8xbf16>, vector<8x16xbf16>, vector<8x16xf32> -> vector<8x16xf32>
    %126 = tpu.concatenate %108, %125 in 1 : vector<8x16xf32>, vector<8x16xf32> -> vector<8x32xf32>
    %127 = arith.truncf %126 : vector<8x32xf32> to vector<8x32xbf16>
    %cst_53 = arith.constant dense<0.000000e+00> : vector<8x32xf32>
    %128 = tpu.matmul %127, %82, %cst_53 {dimension_numbers = #tpu.dot_dimension_numbers<[1], [0], [0], [1], [0, 0, 1, 1], [], []>} : vector<8x32xbf16>, vector<32x32xbf16>, vector<8x32xf32> -> vector<8x32xf32>
    %129 = vector.broadcast %84 : vector<1x32xf32> to vector<8x32xf32>
    %130 = arith.addf %128, %129 : vector<8x32xf32>
    %131 = arith.addf %51, %130 : vector<8x32xf32>
    %c0_54 = arith.constant 0 : index
    %c0_55 = arith.constant 0 : index
    %c0_56 = arith.constant 0 : index
    %132 = vector.load %arg6[%c0_54, %c0_55, %c0_56] : memref<2x1x32xf32, #tpu.memory_space<vmem>>, vector<1x1x32xf32>
    %133 = vector.shape_cast %132 : vector<1x1x32xf32> to vector<1x32xf32>
    %c0_57 = arith.constant 0 : index
    %c0_58 = arith.constant 0 : index
    %c0_59 = arith.constant 0 : index
    %134 = vector.load %arg7[%c0_57, %c0_58, %c0_59] : memref<2x1x32xf32, #tpu.memory_space<vmem>>, vector<1x1x32xf32>
    %135 = vector.shape_cast %134 : vector<1x1x32xf32> to vector<1x32xf32>
    %cst_60 = arith.constant dense<0.000000e+00> : vector<8xf32>
    %136 = vector.multi_reduction <add>, %131, %cst_60 [1] : vector<8x32xf32> to vector<8xf32>
    %137 = vector.shape_cast %136 : vector<8xf32> to vector<8x1xf32>
    %cst_61 = arith.constant 3.200000e+01 : f32
    %138 = vector.broadcast %cst_61 : f32 to vector<8x1xf32>
    %139 = arith.divf %137, %138 : vector<8x1xf32>
    %140 = vector.broadcast %139 : vector<8x1xf32> to vector<8x32xf32>
    %141 = arith.subf %131, %140 : vector<8x32xf32>
    %142 = arith.mulf %141, %141 : vector<8x32xf32>
    %cst_62 = arith.constant dense<0.000000e+00> : vector<8xf32>
    %143 = vector.multi_reduction <add>, %142, %cst_62 [1] : vector<8x32xf32> to vector<8xf32>
    %144 = vector.shape_cast %143 : vector<8xf32> to vector<8x1xf32>
    %cst_63 = arith.constant 3.200000e+01 : f32
    %145 = vector.broadcast %cst_63 : f32 to vector<8x1xf32>
    %146 = arith.divf %144, %145 : vector<8x1xf32>
    %cst_64 = arith.constant 9.99999974E-6 : f32
    %147 = vector.broadcast %cst_64 : f32 to vector<8x1xf32>
    %148 = arith.addf %146, %147 : vector<8x1xf32>
    %149 = math.rsqrt %148 : vector<8x1xf32>
    %150 = vector.broadcast %149 : vector<8x1xf32> to vector<8x32xf32>
    %151 = arith.mulf %141, %150 : vector<8x32xf32>
    %152 = vector.broadcast %133 : vector<1x32xf32> to vector<8x32xf32>
    %153 = arith.mulf %151, %152 : vector<8x32xf32>
    %154 = vector.broadcast %135 : vector<1x32xf32> to vector<8x32xf32>
    %155 = arith.addf %153, %154 : vector<8x32xf32>
    %156 = arith.truncf %155 : vector<8x32xf32> to vector<8x32xbf16>
    %c0_65 = arith.constant 0 : index
    %c0_66 = arith.constant 0 : index
    %c0_67 = arith.constant 0 : index
    %157 = vector.load %arg14[%c0_65, %c0_66, %c0_67] : memref<2x32x32xbf16, #tpu.memory_space<vmem>>, vector<1x32x32xbf16>
    %158 = vector.shape_cast %157 : vector<1x32x32xbf16> to vector<32x32xbf16>
    %c0_68 = arith.constant 0 : index
    %c0_69 = arith.constant 0 : index
    %c0_70 = arith.constant 0 : index
    %159 = vector.load %arg15[%c0_68, %c0_69, %c0_70] : memref<2x1x32xf32, #tpu.memory_space<vmem>>, vector<1x1x32xf32>
    %160 = vector.shape_cast %159 : vector<1x1x32xf32> to vector<1x32xf32>
    %c0_71 = arith.constant 0 : index
    %c0_72 = arith.constant 0 : index
    %c0_73 = arith.constant 0 : index
    %161 = vector.load %arg16[%c0_71, %c0_72, %c0_73] : memref<2x32x64xbf16, #tpu.memory_space<vmem>>, vector<1x32x64xbf16>
    %162 = vector.shape_cast %161 : vector<1x32x64xbf16> to vector<32x64xbf16>
    %c0_74 = arith.constant 0 : index
    %c0_75 = arith.constant 0 : index
    %c0_76 = arith.constant 0 : index
    %163 = vector.load %arg17[%c0_74, %c0_75, %c0_76] : memref<2x1x64xf32, #tpu.memory_space<vmem>>, vector<1x1x64xf32>
    %164 = vector.shape_cast %163 : vector<1x1x64xf32> to vector<1x64xf32>
    %c0_77 = arith.constant 0 : index
    %c0_78 = arith.constant 0 : index
    %c0_79 = arith.constant 0 : index
    %165 = vector.load %arg18[%c0_77, %c0_78, %c0_79] : memref<2x32x32xbf16, #tpu.memory_space<vmem>>, vector<1x32x32xbf16>
    %166 = vector.shape_cast %165 : vector<1x32x32xbf16> to vector<32x32xbf16>
    %c0_80 = arith.constant 0 : index
    %c0_81 = arith.constant 0 : index
    %c0_82 = arith.constant 0 : index
    %167 = vector.load %arg19[%c0_80, %c0_81, %c0_82] : memref<2x1x32xf32, #tpu.memory_space<vmem>>, vector<1x1x32xf32>
    %168 = vector.shape_cast %167 : vector<1x1x32xf32> to vector<1x32xf32>
    %cst_83 = arith.constant dense<0.000000e+00> : vector<8x32xf32>
    %169 = tpu.matmul %156, %158, %cst_83 {dimension_numbers = #tpu.dot_dimension_numbers<[1], [0], [0], [1], [0, 0, 1, 1], [], []>} : vector<8x32xbf16>, vector<32x32xbf16>, vector<8x32xf32> -> vector<8x32xf32>
    %170 = vector.broadcast %160 : vector<1x32xf32> to vector<8x32xf32>
    %171 = arith.addf %169, %170 : vector<8x32xf32>
    %172 = arith.truncf %171 : vector<8x32xf32> to vector<8x32xbf16>
    %cst_84 = arith.constant dense<0.000000e+00> : vector<16x64xf32>
    %173 = tpu.matmul %11, %162, %cst_84 {dimension_numbers = #tpu.dot_dimension_numbers<[1], [0], [0], [1], [0, 0, 1, 1], [], []>} : vector<16x32xbf16>, vector<32x64xbf16>, vector<16x64xf32> -> vector<16x64xf32>
    %174 = vector.broadcast %164 : vector<1x64xf32> to vector<16x64xf32>
    %175 = arith.addf %173, %174 : vector<16x64xf32>
    %176 = arith.truncf %175 : vector<16x64xf32> to vector<16x64xbf16>
    %177 = vector.extract_strided_slice %176 {offsets = [0, 0], sizes = [16, 32], strides = [1, 1]} : vector<16x64xbf16> to vector<16x32xbf16>
    %178 = vector.extract_strided_slice %176 {offsets = [0, 32], sizes = [16, 32], strides = [1, 1]} : vector<16x64xbf16> to vector<16x32xbf16>
    %179 = vector.extract_strided_slice %172 {offsets = [0, 0], sizes = [8, 16], strides = [1, 1]} : vector<8x32xbf16> to vector<8x16xbf16>
    %180 = vector.extract_strided_slice %177 {offsets = [0, 0], sizes = [16, 16], strides = [1, 1]} : vector<16x32xbf16> to vector<16x16xbf16>
    %cst_85 = arith.constant dense<0.000000e+00> : vector<8x16xf32>
    %181 = tpu.matmul %179, %180, %cst_85 {dimension_numbers = #tpu.dot_dimension_numbers<[1], [1], [0], [0], [0, 0, 1, 0], [], []>} : vector<8x16xbf16>, vector<16x16xbf16>, vector<8x16xf32> -> vector<8x16xf32>
    %182 = arith.addf %181, %36 : vector<8x16xf32>
    %c0_86 = arith.constant 0 : index
    %c0_87 = arith.constant 0 : index
    %c0_88 = arith.constant 0 : index
    %c0_89 = arith.constant 0 : index
    %c0_90 = arith.constant 0 : index
    %183 = vector.load %arg28[%c0_86, %c0_87, %c0_88, %c0_89, %c0_90] : memref<1x2x2x8x16xf32, #tpu.memory_space<vmem>>, vector<1x1x1x8x16xf32>
    %184 = vector.shape_cast %183 : vector<1x1x1x8x16xf32> to vector<8x16xf32>
    %185 = vector.shape_cast %182 : vector<8x16xf32> to vector<1x1x1x8x16xf32>
    tpu.vector_store %arg28[%c0_86, %c0_87, %c0_88, %c0_89, %c0_90], %185 {strides = array<i32>} : memref<1x2x2x8x16xf32, #tpu.memory_space<vmem>>, vector<1x1x1x8x16xf32>,
    %cst_91 = arith.constant dense<0xFF800000> : vector<8xf32>
    %186 = vector.multi_reduction <maximumf>, %182, %cst_91 [1] : vector<8x16xf32> to vector<8xf32>
    %187 = vector.shape_cast %186 : vector<8xf32> to vector<8x1xf32>
    %188 = vector.broadcast %187 : vector<8x1xf32> to vector<8x16xf32>
    %189 = arith.subf %182, %188 : vector<8x16xf32>
    %190 = math.exp %189 : vector<8x16xf32>
    %cst_92 = arith.constant dense<0.000000e+00> : vector<8xf32>
    %191 = vector.multi_reduction <add>, %190, %cst_92 [1] : vector<8x16xf32> to vector<8xf32>
    %192 = vector.shape_cast %191 : vector<8xf32> to vector<8x1xf32>
    %193 = tpu.reciprocal %192 {approx = true} : vector<8x1xf32> -> vector<8x1xf32>
    %194 = vector.broadcast %193 : vector<8x1xf32> to vector<8x16xf32>
    %195 = arith.mulf %190, %194 : vector<8x16xf32>
    %196 = arith.truncf %195 : vector<8x16xf32> to vector<8x16xbf16>
    %197 = vector.extract_strided_slice %178 {offsets = [0, 0], sizes = [16, 16], strides = [1, 1]} : vector<16x32xbf16> to vector<16x16xbf16>
    %cst_93 = arith.constant dense<0.000000e+00> : vector<8x16xf32>
    %198 = tpu.matmul %196, %197, %cst_93 {dimension_numbers = #tpu.dot_dimension_numbers<[1], [0], [0], [1], [0, 0, 1, 1], [], []>} : vector<8x16xbf16>, vector<16x16xbf16>, vector<8x16xf32> -> vector<8x16xf32>
    %199 = vector.extract_strided_slice %172 {offsets = [0, 16], sizes = [8, 16], strides = [1, 1]} : vector<8x32xbf16> to vector<8x16xbf16>
    %200 = vector.extract_strided_slice %177 {offsets = [0, 16], sizes = [16, 16], strides = [1, 1]} : vector<16x32xbf16> to vector<16x16xbf16>
    %cst_94 = arith.constant dense<0.000000e+00> : vector<8x16xf32>
    %201 = tpu.matmul %199, %200, %cst_94 {dimension_numbers = #tpu.dot_dimension_numbers<[1], [1], [0], [0], [0, 0, 1, 0], [], []>} : vector<8x16xbf16>, vector<16x16xbf16>, vector<8x16xf32> -> vector<8x16xf32>
    %202 = arith.addf %201, %36 : vector<8x16xf32>
    %c0_95 = arith.constant 0 : index
    %c0_96 = arith.constant 0 : index
    %c1 = arith.constant 1 : index
    %c0_97 = arith.constant 0 : index
    %c0_98 = arith.constant 0 : index
    %203 = vector.load %arg28[%c0_95, %c0_96, %c1, %c0_97, %c0_98] : memref<1x2x2x8x16xf32, #tpu.memory_space<vmem>>, vector<1x1x1x8x16xf32>
    %204 = vector.shape_cast %203 : vector<1x1x1x8x16xf32> to vector<8x16xf32>
    %205 = vector.shape_cast %202 : vector<8x16xf32> to vector<1x1x1x8x16xf32>
    tpu.vector_store %arg28[%c0_95, %c0_96, %c1, %c0_97, %c0_98], %205 {strides = array<i32>} : memref<1x2x2x8x16xf32, #tpu.memory_space<vmem>>, vector<1x1x1x8x16xf32>,
    %cst_99 = arith.constant dense<0xFF800000> : vector<8xf32>
    %206 = vector.multi_reduction <maximumf>, %202, %cst_99 [1] : vector<8x16xf32> to vector<8xf32>
    %207 = vector.shape_cast %206 : vector<8xf32> to vector<8x1xf32>
    %208 = vector.broadcast %207 : vector<8x1xf32> to vector<8x16xf32>
    %209 = arith.subf %202, %208 : vector<8x16xf32>
    %210 = math.exp %209 : vector<8x16xf32>
    %cst_100 = arith.constant dense<0.000000e+00> : vector<8xf32>
    %211 = vector.multi_reduction <add>, %210, %cst_100 [1] : vector<8x16xf32> to vector<8xf32>
    %212 = vector.shape_cast %211 : vector<8xf32> to vector<8x1xf32>
    %213 = tpu.reciprocal %212 {approx = true} : vector<8x1xf32> -> vector<8x1xf32>
    %214 = vector.broadcast %213 : vector<8x1xf32> to vector<8x16xf32>
    %215 = arith.mulf %210, %214 : vector<8x16xf32>
    %216 = arith.truncf %215 : vector<8x16xf32> to vector<8x16xbf16>
    %217 = vector.extract_strided_slice %178 {offsets = [0, 16], sizes = [16, 16], strides = [1, 1]} : vector<16x32xbf16> to vector<16x16xbf16>
    %cst_101 = arith.constant dense<0.000000e+00> : vector<8x16xf32>
    %218 = tpu.matmul %216, %217, %cst_101 {dimension_numbers = #tpu.dot_dimension_numbers<[1], [0], [0], [1], [0, 0, 1, 1], [], []>} : vector<8x16xbf16>, vector<16x16xbf16>, vector<8x16xf32> -> vector<8x16xf32>
    %219 = tpu.concatenate %198, %218 in 1 : vector<8x16xf32>, vector<8x16xf32> -> vector<8x32xf32>
    %220 = arith.truncf %219 : vector<8x32xf32> to vector<8x32xbf16>
    %cst_102 = arith.constant dense<0.000000e+00> : vector<8x32xf32>
    %221 = tpu.matmul %220, %166, %cst_102 {dimension_numbers = #tpu.dot_dimension_numbers<[1], [0], [0], [1], [0, 0, 1, 1], [], []>} : vector<8x32xbf16>, vector<32x32xbf16>, vector<8x32xf32> -> vector<8x32xf32>
    %222 = vector.broadcast %168 : vector<1x32xf32> to vector<8x32xf32>
    %223 = arith.addf %221, %222 : vector<8x32xf32>
    %224 = arith.addf %131, %223 : vector<8x32xf32>
    %c0_103 = arith.constant 0 : index
    %c0_104 = arith.constant 0 : index
    %c0_105 = arith.constant 0 : index
    %225 = vector.load %arg8[%c0_103, %c0_104, %c0_105] : memref<2x1x32xf32, #tpu.memory_space<vmem>>, vector<1x1x32xf32>
    %226 = vector.shape_cast %225 : vector<1x1x32xf32> to vector<1x32xf32>
    %c0_106 = arith.constant 0 : index
    %c0_107 = arith.constant 0 : index
    %c0_108 = arith.constant 0 : index
    %227 = vector.load %arg9[%c0_106, %c0_107, %c0_108] : memref<2x1x32xf32, #tpu.memory_space<vmem>>, vector<1x1x32xf32>
    %228 = vector.shape_cast %227 : vector<1x1x32xf32> to vector<1x32xf32>
    %cst_109 = arith.constant dense<0.000000e+00> : vector<8xf32>
    %229 = vector.multi_reduction <add>, %224, %cst_109 [1] : vector<8x32xf32> to vector<8xf32>
    %230 = vector.shape_cast %229 : vector<8xf32> to vector<8x1xf32>
    %cst_110 = arith.constant 3.200000e+01 : f32
    %231 = vector.broadcast %cst_110 : f32 to vector<8x1xf32>
    %232 = arith.divf %230, %231 : vector<8x1xf32>
    %233 = vector.broadcast %232 : vector<8x1xf32> to vector<8x32xf32>
    %234 = arith.subf %224, %233 : vector<8x32xf32>
    %235 = arith.mulf %234, %234 : vector<8x32xf32>
    %cst_111 = arith.constant dense<0.000000e+00> : vector<8xf32>
    %236 = vector.multi_reduction <add>, %235, %cst_111 [1] : vector<8x32xf32> to vector<8xf32>
    %237 = vector.shape_cast %236 : vector<8xf32> to vector<8x1xf32>
    %cst_112 = arith.constant 3.200000e+01 : f32
    %238 = vector.broadcast %cst_112 : f32 to vector<8x1xf32>
    %239 = arith.divf %237, %238 : vector<8x1xf32>
    %cst_113 = arith.constant 9.99999974E-6 : f32
    %240 = vector.broadcast %cst_113 : f32 to vector<8x1xf32>
    %241 = arith.addf %239, %240 : vector<8x1xf32>
    %242 = math.rsqrt %241 : vector<8x1xf32>
    %243 = vector.broadcast %242 : vector<8x1xf32> to vector<8x32xf32>
    %244 = arith.mulf %234, %243 : vector<8x32xf32>
    %245 = vector.broadcast %226 : vector<1x32xf32> to vector<8x32xf32>
    %246 = arith.mulf %244, %245 : vector<8x32xf32>
    %247 = vector.broadcast %228 : vector<1x32xf32> to vector<8x32xf32>
    %248 = arith.addf %246, %247 : vector<8x32xf32>
    %249 = arith.truncf %248 : vector<8x32xf32> to vector<8x32xbf16>
    %c0_114 = arith.constant 0 : index
    %c0_115 = arith.constant 0 : index
    %c0_116 = arith.constant 0 : index
    %250 = vector.load %arg20[%c0_114, %c0_115, %c0_116] : memref<2x32x128xbf16, #tpu.memory_space<vmem>>, vector<1x32x128xbf16>
    %251 = vector.shape_cast %250 : vector<1x32x128xbf16> to vector<32x128xbf16>
    %c0_117 = arith.constant 0 : index
    %c0_118 = arith.constant 0 : index
    %c0_119 = arith.constant 0 : index
    %252 = vector.load %arg21[%c0_117, %c0_118, %c0_119] : memref<2x1x128xf32, #tpu.memory_space<vmem>>, vector<1x1x128xf32>
    %253 = vector.shape_cast %252 : vector<1x1x128xf32> to vector<1x128xf32>
    %c0_120 = arith.constant 0 : index
    %c0_121 = arith.constant 0 : index
    %c0_122 = arith.constant 0 : index
    %254 = vector.load %arg22[%c0_120, %c0_121, %c0_122] : memref<2x128x32xbf16, #tpu.memory_space<vmem>>, vector<1x128x32xbf16>
    %255 = vector.shape_cast %254 : vector<1x128x32xbf16> to vector<128x32xbf16>
    %c0_123 = arith.constant 0 : index
    %c0_124 = arith.constant 0 : index
    %c0_125 = arith.constant 0 : index
    %256 = vector.load %arg23[%c0_123, %c0_124, %c0_125] : memref<2x1x32xf32, #tpu.memory_space<vmem>>, vector<1x1x32xf32>
    %257 = vector.shape_cast %256 : vector<1x1x32xf32> to vector<1x32xf32>
    %cst_126 = arith.constant dense<0.000000e+00> : vector<8x128xf32>
    %258 = tpu.matmul %249, %251, %cst_126 {dimension_numbers = #tpu.dot_dimension_numbers<[1], [0], [0], [1], [0, 0, 1, 1], [], []>} : vector<8x32xbf16>, vector<32x128xbf16>, vector<8x128xf32> -> vector<8x128xf32>
    %259 = vector.broadcast %253 : vector<1x128xf32> to vector<8x128xf32>
    %260 = arith.addf %258, %259 : vector<8x128xf32>
    %cst_127 = arith.constant 0.000000e+00 : f32
    %261 = vector.broadcast %cst_127 : f32 to vector<8x128xf32>
    %262 = arith.maximumf %260, %261 : vector<8x128xf32>
    %263 = arith.truncf %262 : vector<8x128xf32> to vector<8x128xbf16>
    %cst_128 = arith.constant dense<0.000000e+00> : vector<8x32xf32>
    %264 = tpu.matmul %263, %255, %cst_128 {dimension_numbers = #tpu.dot_dimension_numbers<[1], [0], [0], [1], [0, 0, 1, 1], [], []>} : vector<8x128xbf16>, vector<128x32xbf16>, vector<8x32xf32> -> vector<8x32xf32>
    %265 = vector.broadcast %257 : vector<1x32xf32> to vector<8x32xf32>
    %266 = arith.addf %264, %265 : vector<8x32xf32>
    %267 = arith.addf %224, %266 : vector<8x32xf32>
    %c1_129 = arith.constant 1 : index
    %c0_130 = arith.constant 0 : index
    %c0_131 = arith.constant 0 : index
    %268 = vector.load %arg4[%c1_129, %c0_130, %c0_131] : memref<2x1x32xf32, #tpu.memory_space<vmem>>, vector<1x1x32xf32>
    %269 = vector.shape_cast %268 : vector<1x1x32xf32> to vector<1x32xf32>
    %c1_132 = arith.constant 1 : index
    %c0_133 = arith.constant 0 : index
    %c0_134 = arith.constant 0 : index
    %270 = vector.load %arg5[%c1_132, %c0_133, %c0_134] : memref<2x1x32xf32, #tpu.memory_space<vmem>>, vector<1x1x32xf32>
    %271 = vector.shape_cast %270 : vector<1x1x32xf32> to vector<1x32xf32>
    %cst_135 = arith.constant dense<0.000000e+00> : vector<8xf32>
    %272 = vector.multi_reduction <add>, %267, %cst_135 [1] : vector<8x32xf32> to vector<8xf32>
    %273 = vector.shape_cast %272 : vector<8xf32> to vector<8x1xf32>
    %cst_136 = arith.constant 3.200000e+01 : f32
    %274 = vector.broadcast %cst_136 : f32 to vector<8x1xf32>
    %275 = arith.divf %273, %274 : vector<8x1xf32>
    %276 = vector.broadcast %275 : vector<8x1xf32> to vector<8x32xf32>
    %277 = arith.subf %267, %276 : vector<8x32xf32>
    %278 = arith.mulf %277, %277 : vector<8x32xf32>
    %cst_137 = arith.constant dense<0.000000e+00> : vector<8xf32>
    %279 = vector.multi_reduction <add>, %278, %cst_137 [1] : vector<8x32xf32> to vector<8xf32>
    %280 = vector.shape_cast %279 : vector<8xf32> to vector<8x1xf32>
    %cst_138 = arith.constant 3.200000e+01 : f32
    %281 = vector.broadcast %cst_138 : f32 to vector<8x1xf32>
    %282 = arith.divf %280, %281 : vector<8x1xf32>
    %cst_139 = arith.constant 9.99999974E-6 : f32
    %283 = vector.broadcast %cst_139 : f32 to vector<8x1xf32>
    %284 = arith.addf %282, %283 : vector<8x1xf32>
    %285 = math.rsqrt %284 : vector<8x1xf32>
    %286 = vector.broadcast %285 : vector<8x1xf32> to vector<8x32xf32>
    %287 = arith.mulf %277, %286 : vector<8x32xf32>
    %288 = vector.broadcast %269 : vector<1x32xf32> to vector<8x32xf32>
    %289 = arith.mulf %287, %288 : vector<8x32xf32>
    %290 = vector.broadcast %271 : vector<1x32xf32> to vector<8x32xf32>
    %291 = arith.addf %289, %290 : vector<8x32xf32>
    %292 = arith.truncf %291 : vector<8x32xf32> to vector<8x32xbf16>
    %c1_140 = arith.constant 1 : index
    %c0_141 = arith.constant 0 : index
    %c0_142 = arith.constant 0 : index
    %293 = vector.load %arg10[%c1_140, %c0_141, %c0_142] : memref<2x32x96xbf16, #tpu.memory_space<vmem>>, vector<1x32x96xbf16>
    %294 = vector.shape_cast %293 : vector<1x32x96xbf16> to vector<32x96xbf16>
    %c1_143 = arith.constant 1 : index
    %c0_144 = arith.constant 0 : index
    %c0_145 = arith.constant 0 : index
    %295 = vector.load %arg11[%c1_143, %c0_144, %c0_145] : memref<2x1x96xf32, #tpu.memory_space<vmem>>, vector<1x1x96xf32>
    %296 = vector.shape_cast %295 : vector<1x1x96xf32> to vector<1x96xf32>
    %c1_146 = arith.constant 1 : index
    %c0_147 = arith.constant 0 : index
    %c0_148 = arith.constant 0 : index
    %297 = vector.load %arg12[%c1_146, %c0_147, %c0_148] : memref<2x32x32xbf16, #tpu.memory_space<vmem>>, vector<1x32x32xbf16>
    %298 = vector.shape_cast %297 : vector<1x32x32xbf16> to vector<32x32xbf16>
    %c1_149 = arith.constant 1 : index
    %c0_150 = arith.constant 0 : index
    %c0_151 = arith.constant 0 : index
    %299 = vector.load %arg13[%c1_149, %c0_150, %c0_151] : memref<2x1x32xf32, #tpu.memory_space<vmem>>, vector<1x1x32xf32>
    %300 = vector.shape_cast %299 : vector<1x1x32xf32> to vector<1x32xf32>
    %cst_152 = arith.constant dense<0.000000e+00> : vector<8x96xf32>
    %301 = tpu.matmul %292, %294, %cst_152 {dimension_numbers = #tpu.dot_dimension_numbers<[1], [0], [0], [1], [0, 0, 1, 1], [], []>} : vector<8x32xbf16>, vector<32x96xbf16>, vector<8x96xf32> -> vector<8x96xf32>
    %302 = vector.broadcast %296 : vector<1x96xf32> to vector<8x96xf32>
    %303 = arith.addf %301, %302 : vector<8x96xf32>
    %304 = arith.truncf %303 : vector<8x96xf32> to vector<8x96xbf16>
    %305 = vector.extract_strided_slice %304 {offsets = [0, 0], sizes = [8, 32], strides = [1, 1]} : vector<8x96xbf16> to vector<8x32xbf16>
    %306 = vector.extract_strided_slice %304 {offsets = [0, 32], sizes = [8, 32], strides = [1, 1]} : vector<8x96xbf16> to vector<8x32xbf16>
    %307 = vector.extract_strided_slice %304 {offsets = [0, 64], sizes = [8, 32], strides = [1, 1]} : vector<8x96xbf16> to vector<8x32xbf16>
    %308 = vector.extract_strided_slice %305 {offsets = [0, 0], sizes = [8, 16], strides = [1, 1]} : vector<8x32xbf16> to vector<8x16xbf16>
    %309 = vector.extract_strided_slice %306 {offsets = [0, 0], sizes = [8, 16], strides = [1, 1]} : vector<8x32xbf16> to vector<8x16xbf16>
    %cst_153 = arith.constant dense<0.000000e+00> : vector<8x8xf32>
    %310 = tpu.matmul %308, %309, %cst_153 {dimension_numbers = #tpu.dot_dimension_numbers<[1], [1], [0], [0], [0, 0, 1, 0], [], []>} : vector<8x16xbf16>, vector<8x16xbf16>, vector<8x8xf32> -> vector<8x8xf32>
    %311 = arith.addf %310, %32 : vector<8x8xf32>
    %cst_154 = arith.constant dense<0xFF800000> : vector<8xf32>
    %312 = vector.multi_reduction <maximumf>, %311, %cst_154 [1] : vector<8x8xf32> to vector<8xf32>
    %313 = vector.shape_cast %312 : vector<8xf32> to vector<8x1xf32>
    %314 = vector.broadcast %313 : vector<8x1xf32> to vector<8x8xf32>
    %315 = arith.subf %311, %314 : vector<8x8xf32>
    %316 = math.exp %315 : vector<8x8xf32>
    %cst_155 = arith.constant dense<0.000000e+00> : vector<8xf32>
    %317 = vector.multi_reduction <add>, %316, %cst_155 [1] : vector<8x8xf32> to vector<8xf32>
    %318 = vector.shape_cast %317 : vector<8xf32> to vector<8x1xf32>
    %319 = tpu.reciprocal %318 {approx = true} : vector<8x1xf32> -> vector<8x1xf32>
    %320 = vector.broadcast %319 : vector<8x1xf32> to vector<8x8xf32>
    %321 = arith.mulf %316, %320 : vector<8x8xf32>
    %322 = arith.truncf %321 : vector<8x8xf32> to vector<8x8xbf16>
    %323 = vector.extract_strided_slice %307 {offsets = [0, 0], sizes = [8, 16], strides = [1, 1]} : vector<8x32xbf16> to vector<8x16xbf16>
    %cst_156 = arith.constant dense<0.000000e+00> : vector<8x16xf32>
    %324 = tpu.matmul %322, %323, %cst_156 {dimension_numbers = #tpu.dot_dimension_numbers<[1], [0], [0], [1], [0, 0, 1, 1], [], []>} : vector<8x8xbf16>, vector<8x16xbf16>, vector<8x16xf32> -> vector<8x16xf32>
    %325 = vector.extract_strided_slice %305 {offsets = [0, 16], sizes = [8, 16], strides = [1, 1]} : vector<8x32xbf16> to vector<8x16xbf16>
    %326 = vector.extract_strided_slice %306 {offsets = [0, 16], sizes = [8, 16], strides = [1, 1]} : vector<8x32xbf16> to vector<8x16xbf16>
    %cst_157 = arith.constant dense<0.000000e+00> : vector<8x8xf32>
    %327 = tpu.matmul %325, %326, %cst_157 {dimension_numbers = #tpu.dot_dimension_numbers<[1], [1], [0], [0], [0, 0, 1, 0], [], []>} : vector<8x16xbf16>, vector<8x16xbf16>, vector<8x8xf32> -> vector<8x8xf32>
    %328 = arith.addf %327, %32 : vector<8x8xf32>
    %cst_158 = arith.constant dense<0xFF800000> : vector<8xf32>
    %329 = vector.multi_reduction <maximumf>, %328, %cst_158 [1] : vector<8x8xf32> to vector<8xf32>
    %330 = vector.shape_cast %329 : vector<8xf32> to vector<8x1xf32>
    %331 = vector.broadcast %330 : vector<8x1xf32> to vector<8x8xf32>
    %332 = arith.subf %328, %331 : vector<8x8xf32>
    %333 = math.exp %332 : vector<8x8xf32>
    %cst_159 = arith.constant dense<0.000000e+00> : vector<8xf32>
    %334 = vector.multi_reduction <add>, %333, %cst_159 [1] : vector<8x8xf32> to vector<8xf32>
    %335 = vector.shape_cast %334 : vector<8xf32> to vector<8x1xf32>
    %336 = tpu.reciprocal %335 {approx = true} : vector<8x1xf32> -> vector<8x1xf32>
    %337 = vector.broadcast %336 : vector<8x1xf32> to vector<8x8xf32>
    %338 = arith.mulf %333, %337 : vector<8x8xf32>
    %339 = arith.truncf %338 : vector<8x8xf32> to vector<8x8xbf16>
    %340 = vector.extract_strided_slice %307 {offsets = [0, 16], sizes = [8, 16], strides = [1, 1]} : vector<8x32xbf16> to vector<8x16xbf16>
    %cst_160 = arith.constant dense<0.000000e+00> : vector<8x16xf32>
    %341 = tpu.matmul %339, %340, %cst_160 {dimension_numbers = #tpu.dot_dimension_numbers<[1], [0], [0], [1], [0, 0, 1, 1], [], []>} : vector<8x8xbf16>, vector<8x16xbf16>, vector<8x16xf32> -> vector<8x16xf32>
    %342 = tpu.concatenate %324, %341 in 1 : vector<8x16xf32>, vector<8x16xf32> -> vector<8x32xf32>
    %343 = arith.truncf %342 : vector<8x32xf32> to vector<8x32xbf16>
    %cst_161 = arith.constant dense<0.000000e+00> : vector<8x32xf32>
    %344 = tpu.matmul %343, %298, %cst_161 {dimension_numbers = #tpu.dot_dimension_numbers<[1], [0], [0], [1], [0, 0, 1, 1], [], []>} : vector<8x32xbf16>, vector<32x32xbf16>, vector<8x32xf32> -> vector<8x32xf32>
    %345 = vector.broadcast %300 : vector<1x32xf32> to vector<8x32xf32>
    %346 = arith.addf %344, %345 : vector<8x32xf32>
    %347 = arith.addf %267, %346 : vector<8x32xf32>
    %c1_162 = arith.constant 1 : index
    %c0_163 = arith.constant 0 : index
    %c0_164 = arith.constant 0 : index
    %348 = vector.load %arg6[%c1_162, %c0_163, %c0_164] : memref<2x1x32xf32, #tpu.memory_space<vmem>>, vector<1x1x32xf32>
    %349 = vector.shape_cast %348 : vector<1x1x32xf32> to vector<1x32xf32>
    %c1_165 = arith.constant 1 : index
    %c0_166 = arith.constant 0 : index
    %c0_167 = arith.constant 0 : index
    %350 = vector.load %arg7[%c1_165, %c0_166, %c0_167] : memref<2x1x32xf32, #tpu.memory_space<vmem>>, vector<1x1x32xf32>
    %351 = vector.shape_cast %350 : vector<1x1x32xf32> to vector<1x32xf32>
    %cst_168 = arith.constant dense<0.000000e+00> : vector<8xf32>
    %352 = vector.multi_reduction <add>, %347, %cst_168 [1] : vector<8x32xf32> to vector<8xf32>
    %353 = vector.shape_cast %352 : vector<8xf32> to vector<8x1xf32>
    %cst_169 = arith.constant 3.200000e+01 : f32
    %354 = vector.broadcast %cst_169 : f32 to vector<8x1xf32>
    %355 = arith.divf %353, %354 : vector<8x1xf32>
    %356 = vector.broadcast %355 : vector<8x1xf32> to vector<8x32xf32>
    %357 = arith.subf %347, %356 : vector<8x32xf32>
    %358 = arith.mulf %357, %357 : vector<8x32xf32>
    %cst_170 = arith.constant dense<0.000000e+00> : vector<8xf32>
    %359 = vector.multi_reduction <add>, %358, %cst_170 [1] : vector<8x32xf32> to vector<8xf32>
    %360 = vector.shape_cast %359 : vector<8xf32> to vector<8x1xf32>
    %cst_171 = arith.constant 3.200000e+01 : f32
    %361 = vector.broadcast %cst_171 : f32 to vector<8x1xf32>
    %362 = arith.divf %360, %361 : vector<8x1xf32>
    %cst_172 = arith.constant 9.99999974E-6 : f32
    %363 = vector.broadcast %cst_172 : f32 to vector<8x1xf32>
    %364 = arith.addf %362, %363 : vector<8x1xf32>
    %365 = math.rsqrt %364 : vector<8x1xf32>
    %366 = vector.broadcast %365 : vector<8x1xf32> to vector<8x32xf32>
    %367 = arith.mulf %357, %366 : vector<8x32xf32>
    %368 = vector.broadcast %349 : vector<1x32xf32> to vector<8x32xf32>
    %369 = arith.mulf %367, %368 : vector<8x32xf32>
    %370 = vector.broadcast %351 : vector<1x32xf32> to vector<8x32xf32>
    %371 = arith.addf %369, %370 : vector<8x32xf32>
    %372 = arith.truncf %371 : vector<8x32xf32> to vector<8x32xbf16>
    %c1_173 = arith.constant 1 : index
    %c0_174 = arith.constant 0 : index
    %c0_175 = arith.constant 0 : index
    %373 = vector.load %arg14[%c1_173, %c0_174, %c0_175] : memref<2x32x32xbf16, #tpu.memory_space<vmem>>, vector<1x32x32xbf16>
    %374 = vector.shape_cast %373 : vector<1x32x32xbf16> to vector<32x32xbf16>
    %c1_176 = arith.constant 1 : index
    %c0_177 = arith.constant 0 : index
    %c0_178 = arith.constant 0 : index
    %375 = vector.load %arg15[%c1_176, %c0_177, %c0_178] : memref<2x1x32xf32, #tpu.memory_space<vmem>>, vector<1x1x32xf32>
    %376 = vector.shape_cast %375 : vector<1x1x32xf32> to vector<1x32xf32>
    %c1_179 = arith.constant 1 : index
    %c0_180 = arith.constant 0 : index
    %c0_181 = arith.constant 0 : index
    %377 = vector.load %arg16[%c1_179, %c0_180, %c0_181] : memref<2x32x64xbf16, #tpu.memory_space<vmem>>, vector<1x32x64xbf16>
    %378 = vector.shape_cast %377 : vector<1x32x64xbf16> to vector<32x64xbf16>
    %c1_182 = arith.constant 1 : index
    %c0_183 = arith.constant 0 : index
    %c0_184 = arith.constant 0 : index
    %379 = vector.load %arg17[%c1_182, %c0_183, %c0_184] : memref<2x1x64xf32, #tpu.memory_space<vmem>>, vector<1x1x64xf32>
    %380 = vector.shape_cast %379 : vector<1x1x64xf32> to vector<1x64xf32>
    %c1_185 = arith.constant 1 : index
    %c0_186 = arith.constant 0 : index
    %c0_187 = arith.constant 0 : index
    %381 = vector.load %arg18[%c1_185, %c0_186, %c0_187] : memref<2x32x32xbf16, #tpu.memory_space<vmem>>, vector<1x32x32xbf16>
    %382 = vector.shape_cast %381 : vector<1x32x32xbf16> to vector<32x32xbf16>
    %c1_188 = arith.constant 1 : index
    %c0_189 = arith.constant 0 : index
    %c0_190 = arith.constant 0 : index
    %383 = vector.load %arg19[%c1_188, %c0_189, %c0_190] : memref<2x1x32xf32, #tpu.memory_space<vmem>>, vector<1x1x32xf32>
    %384 = vector.shape_cast %383 : vector<1x1x32xf32> to vector<1x32xf32>
    %cst_191 = arith.constant dense<0.000000e+00> : vector<8x32xf32>
    %385 = tpu.matmul %372, %374, %cst_191 {dimension_numbers = #tpu.dot_dimension_numbers<[1], [0], [0], [1], [0, 0, 1, 1], [], []>} : vector<8x32xbf16>, vector<32x32xbf16>, vector<8x32xf32> -> vector<8x32xf32>
    %386 = vector.broadcast %376 : vector<1x32xf32> to vector<8x32xf32>
    %387 = arith.addf %385, %386 : vector<8x32xf32>
    %388 = arith.truncf %387 : vector<8x32xf32> to vector<8x32xbf16>
    %cst_192 = arith.constant dense<0.000000e+00> : vector<16x64xf32>
    %389 = tpu.matmul %11, %378, %cst_192 {dimension_numbers = #tpu.dot_dimension_numbers<[1], [0], [0], [1], [0, 0, 1, 1], [], []>} : vector<16x32xbf16>, vector<32x64xbf16>, vector<16x64xf32> -> vector<16x64xf32>
    %390 = vector.broadcast %380 : vector<1x64xf32> to vector<16x64xf32>
    %391 = arith.addf %389, %390 : vector<16x64xf32>
    %392 = arith.truncf %391 : vector<16x64xf32> to vector<16x64xbf16>
    %393 = vector.extract_strided_slice %392 {offsets = [0, 0], sizes = [16, 32], strides = [1, 1]} : vector<16x64xbf16> to vector<16x32xbf16>
    %394 = vector.extract_strided_slice %392 {offsets = [0, 32], sizes = [16, 32], strides = [1, 1]} : vector<16x64xbf16> to vector<16x32xbf16>
    %395 = vector.extract_strided_slice %388 {offsets = [0, 0], sizes = [8, 16], strides = [1, 1]} : vector<8x32xbf16> to vector<8x16xbf16>
    %396 = vector.extract_strided_slice %393 {offsets = [0, 0], sizes = [16, 16], strides = [1, 1]} : vector<16x32xbf16> to vector<16x16xbf16>
    %cst_193 = arith.constant dense<0.000000e+00> : vector<8x16xf32>
    %397 = tpu.matmul %395, %396, %cst_193 {dimension_numbers = #tpu.dot_dimension_numbers<[1], [1], [0], [0], [0, 0, 1, 0], [], []>} : vector<8x16xbf16>, vector<16x16xbf16>, vector<8x16xf32> -> vector<8x16xf32>
    %398 = arith.addf %397, %36 : vector<8x16xf32>
    %c0_194 = arith.constant 0 : index
    %c1_195 = arith.constant 1 : index
    %c0_196 = arith.constant 0 : index
    %c0_197 = arith.constant 0 : index
    %c0_198 = arith.constant 0 : index
    %399 = vector.load %arg28[%c0_194, %c1_195, %c0_196, %c0_197, %c0_198] : memref<1x2x2x8x16xf32, #tpu.memory_space<vmem>>, vector<1x1x1x8x16xf32>
    %400 = vector.shape_cast %399 : vector<1x1x1x8x16xf32> to vector<8x16xf32>
    %401 = vector.shape_cast %398 : vector<8x16xf32> to vector<1x1x1x8x16xf32>
    tpu.vector_store %arg28[%c0_194, %c1_195, %c0_196, %c0_197, %c0_198], %401 {strides = array<i32>} : memref<1x2x2x8x16xf32, #tpu.memory_space<vmem>>, vector<1x1x1x8x16xf32>,
    %cst_199 = arith.constant dense<0xFF800000> : vector<8xf32>
    %402 = vector.multi_reduction <maximumf>, %398, %cst_199 [1] : vector<8x16xf32> to vector<8xf32>
    %403 = vector.shape_cast %402 : vector<8xf32> to vector<8x1xf32>
    %404 = vector.broadcast %403 : vector<8x1xf32> to vector<8x16xf32>
    %405 = arith.subf %398, %404 : vector<8x16xf32>
    %406 = math.exp %405 : vector<8x16xf32>
    %cst_200 = arith.constant dense<0.000000e+00> : vector<8xf32>
    %407 = vector.multi_reduction <add>, %406, %cst_200 [1] : vector<8x16xf32> to vector<8xf32>
    %408 = vector.shape_cast %407 : vector<8xf32> to vector<8x1xf32>
    %409 = tpu.reciprocal %408 {approx = true} : vector<8x1xf32> -> vector<8x1xf32>
    %410 = vector.broadcast %409 : vector<8x1xf32> to vector<8x16xf32>
    %411 = arith.mulf %406, %410 : vector<8x16xf32>
    %412 = arith.truncf %411 : vector<8x16xf32> to vector<8x16xbf16>
    %413 = vector.extract_strided_slice %394 {offsets = [0, 0], sizes = [16, 16], strides = [1, 1]} : vector<16x32xbf16> to vector<16x16xbf16>
    %cst_201 = arith.constant dense<0.000000e+00> : vector<8x16xf32>
    %414 = tpu.matmul %412, %413, %cst_201 {dimension_numbers = #tpu.dot_dimension_numbers<[1], [0], [0], [1], [0, 0, 1, 1], [], []>} : vector<8x16xbf16>, vector<16x16xbf16>, vector<8x16xf32> -> vector<8x16xf32>
    %415 = vector.extract_strided_slice %388 {offsets = [0, 16], sizes = [8, 16], strides = [1, 1]} : vector<8x32xbf16> to vector<8x16xbf16>
    %416 = vector.extract_strided_slice %393 {offsets = [0, 16], sizes = [16, 16], strides = [1, 1]} : vector<16x32xbf16> to vector<16x16xbf16>
    %cst_202 = arith.constant dense<0.000000e+00> : vector<8x16xf32>
    %417 = tpu.matmul %415, %416, %cst_202 {dimension_numbers = #tpu.dot_dimension_numbers<[1], [1], [0], [0], [0, 0, 1, 0], [], []>} : vector<8x16xbf16>, vector<16x16xbf16>, vector<8x16xf32> -> vector<8x16xf32>
    %418 = arith.addf %417, %36 : vector<8x16xf32>
    %c0_203 = arith.constant 0 : index
    %c1_204 = arith.constant 1 : index
    %c1_205 = arith.constant 1 : index
    %c0_206 = arith.constant 0 : index
    %c0_207 = arith.constant 0 : index
    %419 = vector.load %arg28[%c0_203, %c1_204, %c1_205, %c0_206, %c0_207] : memref<1x2x2x8x16xf32, #tpu.memory_space<vmem>>, vector<1x1x1x8x16xf32>
    %420 = vector.shape_cast %419 : vector<1x1x1x8x16xf32> to vector<8x16xf32>
    %421 = vector.shape_cast %418 : vector<8x16xf32> to vector<1x1x1x8x16xf32>
    tpu.vector_store %arg28[%c0_203, %c1_204, %c1_205, %c0_206, %c0_207], %421 {strides = array<i32>} : memref<1x2x2x8x16xf32, #tpu.memory_space<vmem>>, vector<1x1x1x8x16xf32>,
    %cst_208 = arith.constant dense<0xFF800000> : vector<8xf32>
    %422 = vector.multi_reduction <maximumf>, %418, %cst_208 [1] : vector<8x16xf32> to vector<8xf32>
    %423 = vector.shape_cast %422 : vector<8xf32> to vector<8x1xf32>
    %424 = vector.broadcast %423 : vector<8x1xf32> to vector<8x16xf32>
    %425 = arith.subf %418, %424 : vector<8x16xf32>
    %426 = math.exp %425 : vector<8x16xf32>
    %cst_209 = arith.constant dense<0.000000e+00> : vector<8xf32>
    %427 = vector.multi_reduction <add>, %426, %cst_209 [1] : vector<8x16xf32> to vector<8xf32>
    %428 = vector.shape_cast %427 : vector<8xf32> to vector<8x1xf32>
    %429 = tpu.reciprocal %428 {approx = true} : vector<8x1xf32> -> vector<8x1xf32>
    %430 = vector.broadcast %429 : vector<8x1xf32> to vector<8x16xf32>
    %431 = arith.mulf %426, %430 : vector<8x16xf32>
    %432 = arith.truncf %431 : vector<8x16xf32> to vector<8x16xbf16>
    %433 = vector.extract_strided_slice %394 {offsets = [0, 16], sizes = [16, 16], strides = [1, 1]} : vector<16x32xbf16> to vector<16x16xbf16>
    %cst_210 = arith.constant dense<0.000000e+00> : vector<8x16xf32>
    %434 = tpu.matmul %432, %433, %cst_210 {dimension_numbers = #tpu.dot_dimension_numbers<[1], [0], [0], [1], [0, 0, 1, 1], [], []>} : vector<8x16xbf16>, vector<16x16xbf16>, vector<8x16xf32> -> vector<8x16xf32>
    %435 = tpu.concatenate %414, %434 in 1 : vector<8x16xf32>, vector<8x16xf32> -> vector<8x32xf32>
    %436 = arith.truncf %435 : vector<8x32xf32> to vector<8x32xbf16>
    %cst_211 = arith.constant dense<0.000000e+00> : vector<8x32xf32>
    %437 = tpu.matmul %436, %382, %cst_211 {dimension_numbers = #tpu.dot_dimension_numbers<[1], [0], [0], [1], [0, 0, 1, 1], [], []>} : vector<8x32xbf16>, vector<32x32xbf16>, vector<8x32xf32> -> vector<8x32xf32>
    %438 = vector.broadcast %384 : vector<1x32xf32> to vector<8x32xf32>
    %439 = arith.addf %437, %438 : vector<8x32xf32>
    %440 = arith.addf %347, %439 : vector<8x32xf32>
    %c1_212 = arith.constant 1 : index
    %c0_213 = arith.constant 0 : index
    %c0_214 = arith.constant 0 : index
    %441 = vector.load %arg8[%c1_212, %c0_213, %c0_214] : memref<2x1x32xf32, #tpu.memory_space<vmem>>, vector<1x1x32xf32>
    %442 = vector.shape_cast %441 : vector<1x1x32xf32> to vector<1x32xf32>
    %c1_215 = arith.constant 1 : index
    %c0_216 = arith.constant 0 : index
    %c0_217 = arith.constant 0 : index
    %443 = vector.load %arg9[%c1_215, %c0_216, %c0_217] : memref<2x1x32xf32, #tpu.memory_space<vmem>>, vector<1x1x32xf32>
    %444 = vector.shape_cast %443 : vector<1x1x32xf32> to vector<1x32xf32>
    %cst_218 = arith.constant dense<0.000000e+00> : vector<8xf32>
    %445 = vector.multi_reduction <add>, %440, %cst_218 [1] : vector<8x32xf32> to vector<8xf32>
    %446 = vector.shape_cast %445 : vector<8xf32> to vector<8x1xf32>
    %cst_219 = arith.constant 3.200000e+01 : f32
    %447 = vector.broadcast %cst_219 : f32 to vector<8x1xf32>
    %448 = arith.divf %446, %447 : vector<8x1xf32>
    %449 = vector.broadcast %448 : vector<8x1xf32> to vector<8x32xf32>
    %450 = arith.subf %440, %449 : vector<8x32xf32>
    %451 = arith.mulf %450, %450 : vector<8x32xf32>
    %cst_220 = arith.constant dense<0.000000e+00> : vector<8xf32>
    %452 = vector.multi_reduction <add>, %451, %cst_220 [1] : vector<8x32xf32> to vector<8xf32>
    %453 = vector.shape_cast %452 : vector<8xf32> to vector<8x1xf32>
    %cst_221 = arith.constant 3.200000e+01 : f32
    %454 = vector.broadcast %cst_221 : f32 to vector<8x1xf32>
    %455 = arith.divf %453, %454 : vector<8x1xf32>
    %cst_222 = arith.constant 9.99999974E-6 : f32
    %456 = vector.broadcast %cst_222 : f32 to vector<8x1xf32>
    %457 = arith.addf %455, %456 : vector<8x1xf32>
    %458 = math.rsqrt %457 : vector<8x1xf32>
    %459 = vector.broadcast %458 : vector<8x1xf32> to vector<8x32xf32>
    %460 = arith.mulf %450, %459 : vector<8x32xf32>
    %461 = vector.broadcast %442 : vector<1x32xf32> to vector<8x32xf32>
    %462 = arith.mulf %460, %461 : vector<8x32xf32>
    %463 = vector.broadcast %444 : vector<1x32xf32> to vector<8x32xf32>
    %464 = arith.addf %462, %463 : vector<8x32xf32>
    %465 = arith.truncf %464 : vector<8x32xf32> to vector<8x32xbf16>
    %c1_223 = arith.constant 1 : index
    %c0_224 = arith.constant 0 : index
    %c0_225 = arith.constant 0 : index
    %466 = vector.load %arg20[%c1_223, %c0_224, %c0_225] : memref<2x32x128xbf16, #tpu.memory_space<vmem>>, vector<1x32x128xbf16>
    %467 = vector.shape_cast %466 : vector<1x32x128xbf16> to vector<32x128xbf16>
    %c1_226 = arith.constant 1 : index
    %c0_227 = arith.constant 0 : index
    %c0_228 = arith.constant 0 : index
    %468 = vector.load %arg21[%c1_226, %c0_227, %c0_228] : memref<2x1x128xf32, #tpu.memory_space<vmem>>, vector<1x1x128xf32>
    %469 = vector.shape_cast %468 : vector<1x1x128xf32> to vector<1x128xf32>
    %c1_229 = arith.constant 1 : index
    %c0_230 = arith.constant 0 : index
    %c0_231 = arith.constant 0 : index
    %470 = vector.load %arg22[%c1_229, %c0_230, %c0_231] : memref<2x128x32xbf16, #tpu.memory_space<vmem>>, vector<1x128x32xbf16>
    %471 = vector.shape_cast %470 : vector<1x128x32xbf16> to vector<128x32xbf16>
    %c1_232 = arith.constant 1 : index
    %c0_233 = arith.constant 0 : index
    %c0_234 = arith.constant 0 : index
    %472 = vector.load %arg23[%c1_232, %c0_233, %c0_234] : memref<2x1x32xf32, #tpu.memory_space<vmem>>, vector<1x1x32xf32>
    %473 = vector.shape_cast %472 : vector<1x1x32xf32> to vector<1x32xf32>
    %cst_235 = arith.constant dense<0.000000e+00> : vector<8x128xf32>
    %474 = tpu.matmul %465, %467, %cst_235 {dimension_numbers = #tpu.dot_dimension_numbers<[1], [0], [0], [1], [0, 0, 1, 1], [], []>} : vector<8x32xbf16>, vector<32x128xbf16>, vector<8x128xf32> -> vector<8x128xf32>
    %475 = vector.broadcast %469 : vector<1x128xf32> to vector<8x128xf32>
    %476 = arith.addf %474, %475 : vector<8x128xf32>
    %cst_236 = arith.constant 0.000000e+00 : f32
    %477 = vector.broadcast %cst_236 : f32 to vector<8x128xf32>
    %478 = arith.maximumf %476, %477 : vector<8x128xf32>
    %479 = arith.truncf %478 : vector<8x128xf32> to vector<8x128xbf16>
    %cst_237 = arith.constant dense<0.000000e+00> : vector<8x32xf32>
    %480 = tpu.matmul %479, %471, %cst_237 {dimension_numbers = #tpu.dot_dimension_numbers<[1], [0], [0], [1], [0, 0, 1, 1], [], []>} : vector<8x128xbf16>, vector<128x32xbf16>, vector<8x32xf32> -> vector<8x32xf32>
    %481 = vector.broadcast %473 : vector<1x32xf32> to vector<8x32xf32>
    %482 = arith.addf %480, %481 : vector<8x32xf32>
    %483 = arith.addf %440, %482 : vector<8x32xf32>
    %c0_238 = arith.constant 0 : index
    %c0_239 = arith.constant 0 : index
    %484 = vector.load %arg24[%c0_238, %c0_239] : memref<1x32xf32, #tpu.memory_space<vmem>>, vector<1x32xf32>
    %c0_240 = arith.constant 0 : index
    %c0_241 = arith.constant 0 : index
    %485 = vector.load %arg25[%c0_240, %c0_241] : memref<1x32xf32, #tpu.memory_space<vmem>>, vector<1x32xf32>
    %cst_242 = arith.constant dense<0.000000e+00> : vector<8xf32>
    %486 = vector.multi_reduction <add>, %483, %cst_242 [1] : vector<8x32xf32> to vector<8xf32>
    %487 = vector.shape_cast %486 : vector<8xf32> to vector<8x1xf32>
    %cst_243 = arith.constant 3.200000e+01 : f32
    %488 = vector.broadcast %cst_243 : f32 to vector<8x1xf32>
    %489 = arith.divf %487, %488 : vector<8x1xf32>
    %490 = vector.broadcast %489 : vector<8x1xf32> to vector<8x32xf32>
    %491 = arith.subf %483, %490 : vector<8x32xf32>
    %492 = arith.mulf %491, %491 : vector<8x32xf32>
    %cst_244 = arith.constant dense<0.000000e+00> : vector<8xf32>
    %493 = vector.multi_reduction <add>, %492, %cst_244 [1] : vector<8x32xf32> to vector<8xf32>
    %494 = vector.shape_cast %493 : vector<8xf32> to vector<8x1xf32>
    %cst_245 = arith.constant 3.200000e+01 : f32
    %495 = vector.broadcast %cst_245 : f32 to vector<8x1xf32>
    %496 = arith.divf %494, %495 : vector<8x1xf32>
    %cst_246 = arith.constant 9.99999974E-6 : f32
    %497 = vector.broadcast %cst_246 : f32 to vector<8x1xf32>
    %498 = arith.addf %496, %497 : vector<8x1xf32>
    %499 = math.rsqrt %498 : vector<8x1xf32>
    %500 = vector.broadcast %499 : vector<8x1xf32> to vector<8x32xf32>
    %501 = arith.mulf %491, %500 : vector<8x32xf32>
    %502 = vector.broadcast %484 : vector<1x32xf32> to vector<8x32xf32>
    %503 = arith.mulf %501, %502 : vector<8x32xf32>
    %504 = vector.broadcast %485 : vector<1x32xf32> to vector<8x32xf32>
    %505 = arith.addf %503, %504 : vector<8x32xf32>
    %506 = arith.truncf %505 : vector<8x32xf32> to vector<8x32xbf16>
    %c0_247 = arith.constant 0 : index
    %c0_248 = arith.constant 0 : index
    %507 = vector.load %arg26[%c0_247, %c0_248] : memref<32x16xbf16, #tpu.memory_space<vmem>>, vector<32x16xbf16>
    %cst_249 = arith.constant dense<0.000000e+00> : vector<8x16xf32>
    %508 = tpu.matmul %506, %507, %cst_249 {dimension_numbers = #tpu.dot_dimension_numbers<[1], [0], [0], [1], [0, 0, 1, 1], [], []>} : vector<8x32xbf16>, vector<32x16xbf16>, vector<8x16xf32> -> vector<8x16xf32>
    %c0_250 = arith.constant 0 : index
    %c0_251 = arith.constant 0 : index
    %c0_252 = arith.constant 0 : index
    %509 = vector.load %arg27[%c0_250, %c0_251, %c0_252] : memref<1x8x16xf32, #tpu.memory_space<vmem>>, vector<1x8x16xf32>
    %510 = vector.shape_cast %509 : vector<1x8x16xf32> to vector<8x16xf32>
    %511 = vector.shape_cast %508 : vector<8x16xf32> to vector<1x8x16xf32>
    tpu.vector_store %arg27[%c0_250, %c0_251, %c0_252], %511 {strides = array<i32>} : memref<1x8x16xf32, #tpu.memory_space<vmem>>, vector<1x8x16xf32>,
    return
  }
  func.func @transform_0(%arg0: i32) -> (i32, i32, i32) {
    %c0_i32 = arith.constant 0 : i32
    %c0_i32_0 = arith.constant 0 : i32
    %c0_i32_1 = arith.constant 0 : i32
    return %arg0, %c0_i32, %c0_i32_0 : i32, i32, i32
  }
  func.func @transform_1(%arg0: i32) -> (i32, i32, i32) {
    %c0_i32 = arith.constant 0 : i32
    %c0_i32_0 = arith.constant 0 : i32
    %c0_i32_1 = arith.constant 0 : i32
    return %arg0, %c0_i32, %c0_i32_0 : i32, i32, i32
  }
  func.func @transform_2(%arg0: i32) -> (i32, i32) {
    %c0_i32 = arith.constant 0 : i32
    %c0_i32_0 = arith.constant 0 : i32
    %c0_i32_1 = arith.constant 0 : i32
    return %c0_i32, %c0_i32_0 : i32, i32
  }
  func.func @transform_3(%arg0: i32) -> (i32, i32, i32) {
    %c0_i32 = arith.constant 0 : i32
    %c0_i32_0 = arith.constant 0 : i32
    %c0_i32_1 = arith.constant 0 : i32
    %c0_i32_2 = arith.constant 0 : i32
    return %c0_i32, %c0_i32_0, %c0_i32_1 : i32, i32, i32
  }
  func.func @transform_4(%arg0: i32) -> (i32, i32, i32) {
    %c0_i32 = arith.constant 0 : i32
    %c0_i32_0 = arith.constant 0 : i32
    %c0_i32_1 = arith.constant 0 : i32
    %c0_i32_2 = arith.constant 0 : i32
    return %c0_i32, %c0_i32_0, %c0_i32_1 : i32, i32, i32
  }
  func.func @transform_5(%arg0: i32) -> (i32, i32, i32) {
    %c0_i32 = arith.constant 0 : i32
    %c0_i32_0 = arith.constant 0 : i32
    %c0_i32_1 = arith.constant 0 : i32
    %c0_i32_2 = arith.constant 0 : i32
    return %c0_i32, %c0_i32_0, %c0_i32_1 : i32, i32, i32
  }
  func.func @transform_6(%arg0: i32) -> (i32, i32, i32) {
    %c0_i32 = arith.constant 0 : i32
    %c0_i32_0 = arith.constant 0 : i32
    %c0_i32_1 = arith.constant 0 : i32
    %c0_i32_2 = arith.constant 0 : i32
    return %c0_i32, %c0_i32_0, %c0_i32_1 : i32, i32, i32
  }
  func.func @transform_7(%arg0: i32) -> (i32, i32, i32) {
    %c0_i32 = arith.constant 0 : i32
    %c0_i32_0 = arith.constant 0 : i32
    %c0_i32_1 = arith.constant 0 : i32
    %c0_i32_2 = arith.constant 0 : i32
    return %c0_i32, %c0_i32_0, %c0_i32_1 : i32, i32, i32
  }
  func.func @transform_8(%arg0: i32) -> (i32, i32, i32) {
    %c0_i32 = arith.constant 0 : i32
    %c0_i32_0 = arith.constant 0 : i32
    %c0_i32_1 = arith.constant 0 : i32
    %c0_i32_2 = arith.constant 0 : i32
    return %c0_i32, %c0_i32_0, %c0_i32_1 : i32, i32, i32
  }
  func.func @transform_9(%arg0: i32) -> (i32, i32, i32) {
    %c0_i32 = arith.constant 0 : i32
    %c0_i32_0 = arith.constant 0 : i32
    %c0_i32_1 = arith.constant 0 : i32
    %c0_i32_2 = arith.constant 0 : i32
    return %c0_i32, %c0_i32_0, %c0_i32_1 : i32, i32, i32
  }
  func.func @transform_10(%arg0: i32) -> (i32, i32, i32) {
    %c0_i32 = arith.constant 0 : i32
    %c0_i32_0 = arith.constant 0 : i32
    %c0_i32_1 = arith.constant 0 : i32
    %c0_i32_2 = arith.constant 0 : i32
    return %c0_i32, %c0_i32_0, %c0_i32_1 : i32, i32, i32
  }
  func.func @transform_11(%arg0: i32) -> (i32, i32, i32) {
    %c0_i32 = arith.constant 0 : i32
    %c0_i32_0 = arith.constant 0 : i32
    %c0_i32_1 = arith.constant 0 : i32
    %c0_i32_2 = arith.constant 0 : i32
    return %c0_i32, %c0_i32_0, %c0_i32_1 : i32, i32, i32
  }
  func.func @transform_12(%arg0: i32) -> (i32, i32, i32) {
    %c0_i32 = arith.constant 0 : i32
    %c0_i32_0 = arith.constant 0 : i32
    %c0_i32_1 = arith.constant 0 : i32
    %c0_i32_2 = arith.constant 0 : i32
    return %c0_i32, %c0_i32_0, %c0_i32_1 : i32, i32, i32
  }
  func.func @transform_13(%arg0: i32) -> (i32, i32, i32) {
    %c0_i32 = arith.constant 0 : i32
    %c0_i32_0 = arith.constant 0 : i32
    %c0_i32_1 = arith.constant 0 : i32
    %c0_i32_2 = arith.constant 0 : i32
    return %c0_i32, %c0_i32_0, %c0_i32_1 : i32, i32, i32
  }
  func.func @transform_14(%arg0: i32) -> (i32, i32, i32) {
    %c0_i32 = arith.constant 0 : i32
    %c0_i32_0 = arith.constant 0 : i32
    %c0_i32_1 = arith.constant 0 : i32
    %c0_i32_2 = arith.constant 0 : i32
    return %c0_i32, %c0_i32_0, %c0_i32_1 : i32, i32, i32
  }
  func.func @transform_15(%arg0: i32) -> (i32, i32, i32) {
    %c0_i32 = arith.constant 0 : i32
    %c0_i32_0 = arith.constant 0 : i32
    %c0_i32_1 = arith.constant 0 : i32
    %c0_i32_2 = arith.constant 0 : i32
    return %c0_i32, %c0_i32_0, %c0_i32_1 : i32, i32, i32
  }
  func.func @transform_16(%arg0: i32) -> (i32, i32, i32) {
    %c0_i32 = arith.constant 0 : i32
    %c0_i32_0 = arith.constant 0 : i32
    %c0_i32_1 = arith.constant 0 : i32
    %c0_i32_2 = arith.constant 0 : i32
    return %c0_i32, %c0_i32_0, %c0_i32_1 : i32, i32, i32
  }
  func.func @transform_17(%arg0: i32) -> (i32, i32, i32) {
    %c0_i32 = arith.constant 0 : i32
    %c0_i32_0 = arith.constant 0 : i32
    %c0_i32_1 = arith.constant 0 : i32
    %c0_i32_2 = arith.constant 0 : i32
    return %c0_i32, %c0_i32_0, %c0_i32_1 : i32, i32, i32
  }
  func.func @transform_18(%arg0: i32) -> (i32, i32, i32) {
    %c0_i32 = arith.constant 0 : i32
    %c0_i32_0 = arith.constant 0 : i32
    %c0_i32_1 = arith.constant 0 : i32
    %c0_i32_2 = arith.constant 0 : i32
    return %c0_i32, %c0_i32_0, %c0_i32_1 : i32, i32, i32
  }
  func.func @transform_19(%arg0: i32) -> (i32, i32, i32) {
    %c0_i32 = arith.constant 0 : i32
    %c0_i32_0 = arith.constant 0 : i32
    %c0_i32_1 = arith.constant 0 : i32
    %c0_i32_2 = arith.constant 0 : i32
    return %c0_i32, %c0_i32_0, %c0_i32_1 : i32, i32, i32
  }
  func.func @transform_20(%arg0: i32) -> (i32, i32, i32) {
    %c0_i32 = arith.constant 0 : i32
    %c0_i32_0 = arith.constant 0 : i32
    %c0_i32_1 = arith.constant 0 : i32
    %c0_i32_2 = arith.constant 0 : i32
    return %c0_i32, %c0_i32_0, %c0_i32_1 : i32, i32, i32
  }
  func.func @transform_21(%arg0: i32) -> (i32, i32, i32) {
    %c0_i32 = arith.constant 0 : i32
    %c0_i32_0 = arith.constant 0 : i32
    %c0_i32_1 = arith.constant 0 : i32
    %c0_i32_2 = arith.constant 0 : i32
    return %c0_i32, %c0_i32_0, %c0_i32_1 : i32, i32, i32
  }
  func.func @transform_22(%arg0: i32) -> (i32, i32, i32) {
    %c0_i32 = arith.constant 0 : i32
    %c0_i32_0 = arith.constant 0 : i32
    %c0_i32_1 = arith.constant 0 : i32
    %c0_i32_2 = arith.constant 0 : i32
    return %c0_i32, %c0_i32_0, %c0_i32_1 : i32, i32, i32
  }
  func.func @transform_23(%arg0: i32) -> (i32, i32) {
    %c0_i32 = arith.constant 0 : i32
    %c0_i32_0 = arith.constant 0 : i32
    %c0_i32_1 = arith.constant 0 : i32
    return %c0_i32, %c0_i32_0 : i32, i32
  }
  func.func @transform_24(%arg0: i32) -> (i32, i32) {
    %c0_i32 = arith.constant 0 : i32
    %c0_i32_0 = arith.constant 0 : i32
    %c0_i32_1 = arith.constant 0 : i32
    return %c0_i32, %c0_i32_0 : i32, i32
  }
  func.func @transform_25(%arg0: i32) -> (i32, i32) {
    %c0_i32 = arith.constant 0 : i32
    %c0_i32_0 = arith.constant 0 : i32
    %c0_i32_1 = arith.constant 0 : i32
    return %c0_i32, %c0_i32_0 : i32, i32
  }
  func.func @transform_26(%arg0: i32) -> (i32, i32, i32) {
    %c0_i32 = arith.constant 0 : i32
    %c0_i32_0 = arith.constant 0 : i32
    %c0_i32_1 = arith.constant 0 : i32
    return %arg0, %c0_i32, %c0_i32_0 : i32, i32, i32
  }
  func.func @transform_27(%arg0: i32) -> (i32, i32, i32, i32, i32) {
    %c0_i32 = arith.constant 0 : i32
    %c0_i32_0 = arith.constant 0 : i32
    %c0_i32_1 = arith.constant 0 : i32
    %c0_i32_2 = arith.constant 0 : i32
    %c0_i32_3 = arith.constant 0 : i32
    return %arg0, %c0_i32, %c0_i32_0, %c0_i32_1, %c0_i32_2 : i32, i32, i32, i32, i32
  }
}

</mosaic_0001>

<bundles_post_ra>
// kernel: transformer_asr_forward.2
= control target key start
LH: loop header
LB: loop body
LE: loop exit
PB: predicated region body
PF: predicated region fallthrough
CT: control target
= control target key end

     0   :  { %s6064_s0 = inlined_call_operand.hbm [shape: f32[2,16,16], index: 0, kind: input, shape index: {}]   ;;  %s6065_s1 = inlined_call_operand.hbm [shape: f32[17,32], index: 1, kind: input, shape index: {}]   ;;  %s6066_s2 = inlined_call_operand.vmem [shape: bf16[5,16,32], index: 2, kind: input, shape index: {}]   ;;  %s6067_s3 = inlined_call_operand.vmem [shape: bf16[2,5,32,32], index: 3, kind: input, shape index: {}]   ;;  %s6068_s4 = inlined_call_operand.vmem [shape: f32[3,1,32], index: 4, kind: input, shape index: {}]   ;;  %s6069_s5 = inlined_call_operand.hbm [shape: bf16[32,32], index: 5, kind: input, shape index: {}]   ;;  %s6070_s6 = inlined_call_operand.hbm [shape: f32[1,32], index: 6, kind: input, shape index: {}]   ;;  %s6071_s7 = inlined_call_operand.hbm [shape: f32[2,1,32], index: 7, kind: input, shape index: {}]   ;;  %s6072_s8 = inlined_call_operand.hbm [shape: f32[2,1,32], index: 8, kind: input, shape index: {}]   ;;  %s6073_s9 = inlined_call_operand.hbm [shape: f32[2,1,32], index: 9, kind: input, shape index: {}]   ;;  %s6074_s10 = inlined_call_operand.vmem [shape: f32[2,1,32], index: 10, kind: input, shape index: {}]   ;;  %s6075_s11 = inlined_call_operand.hbm [shape: bf16[2,32,96], index: 11, kind: input, shape index: {}]   ;;  %s6076_s12 = inlined_call_operand.vmem [shape: f32[2,1,96], index: 12, kind: input, shape index: {}]   ;;  %s6077_s13 = inlined_call_operand.hbm [shape: bf16[2,32,32], index: 13, kind: input, shape index: {}]   ;;  %s6078_s14 = inlined_call_operand.vmem [shape: f32[2,1,32], index: 14, kind: input, shape index: {}]   ;;  %s6079_s15 = inlined_call_operand.vmem [shape: bf16[2,32,128], index: 15, kind: input, shape index: {}]   ;;  %s6080_s16 = inlined_call_operand.vmem [shape: f32[2,1,128], index: 16, kind: input, shape index: {}]   ;;  %s6081_s17 = inlined_call_operand.vmem [shape: bf16[2,128,32], index: 17, kind: input, shape index: {}]   ;;  %s6082_s18 = inlined_call_operand.vmem [shape: f32[2,1,32], index: 18, kind: input, shape index: {}]   ;;  %s6083_s19 = inlined_call_operand.vmem [shape: f32[1,32], index: 19, kind: input, shape index: {}]   ;;  %s6084_s20 = inlined_call_operand.vmem [shape: f32[1,32], index: 20, kind: input, shape index: {}]   ;;  %s6085_s21 = inlined_call_operand.vmem [shape: f32[2,16,32], index: 21, kind: output, shape index: {}]  }
   0x1   :  { %6111 = sst [smem:[#allocation21_spill]] %s6064_s0 }
   0x2   :  { %6112 = sst [smem:[#allocation22_spill]] %s6065_s1 }
   0x3   :  { %6113 = sst [smem:[#allocation23_spill]] %s6066_s2 }
   0x4   :  { %6114 = sst [smem:[#allocation24_spill]] %s6067_s3 }
   0x5   :  { %6115 = sst [smem:[#allocation25_spill]] %s6068_s4 }
   0x6   :  { %6116 = sst [smem:[#allocation26_spill]] %s6069_s5 }
   0x7   :  { %6117 = sst [smem:[#allocation27_spill]] %s6070_s6 }
   0x8   :  { %6118 = sst [smem:[#allocation28_spill]] %s6074_s10 }
   0x9   :  { %6119 = sst [smem:[#allocation29_spill]] %s6079_s15 }
   0xa   :  { %6120 = sst [smem:[#allocation30_spill]] %s6080_s16 }
   0xb   :  { %6121 = sst [smem:[#allocation31_spill]] %s6081_s17 }
   0xc   :  { %6122 = sst [smem:[#allocation32_spill]] %s6082_s18 }
   0xd   :  { %6123 = sst [smem:[#allocation33_spill]] %s6083_s19 }
   0xe   :  { %6124 = sst [smem:[#allocation34_spill]] %s6084_s20 }
   0xf   :  { %6125 = sst [smem:[#allocation35_spill]] %s6085_s21 }
  0x10   :  { %26 = vsyncpa [#allocation3], 0 }
  0x11   :  { %28 = vsyncpa [#allocation3 + $0x1], 0 }
  0x12   :  { %29 = vsyncpa [#allocation5], 0 }
  0x13   :  { %30 = vsyncpa [#allocation8], 0 }
  0x14   :  { %31 = vsyncpa [#allocation11], 0 }
  0x15   :  { %32 = vsyncpa [#allocation14], 0  ;;  %s5116_s2 = smov 0   ;;  %s5118_s25 = smov 0  }
  0x16   :  { %s5120_s26 = smov 0   ;;  %s5122_s27 = smov 0  }
  0x17 LB: > { %s4981_s3 = smov [#allocation4]   ;;  %s5137_s29 = sadd.s32 4294967295, %s4979_s27   ;;  %s4979_s27 = sphi %s5122_s27, %s6166_s27   ;;  %s4975_s26 = sphi %s5120_s26, %s6165_s26   ;;  %s4971_s25 = sphi %s5118_s25, %s6164_s25   ;;  %s4967_s2 = sphi %s5116_s2, %s6163_s2  }
  0x18   : > { %s527_s28 = sshll.u32 %s4981_s3, 4  ;;  %p3797_p0 = scmp.ge.s32.totalorder %s4979_s27, 1  ;;  %s5142_s28 = int_to_ptr.vmem [resolvable:$true] %s527_s28 }
  0x19   : > { %p6097_p1 = scmp.eq.s32.totalorder %s5137_s29, 0  ;;  %p515_p2 = scmp.lt.s32.totalorder %s4979_s27, 3 }
  0x1a   : > { %s4982_s4 = smov [#allocation7]   ;;  %s4983_s22 = smov [#allocation10]  }
  0x1b   : > { %p5144_p3 = pnand %p3797_p0, %p515_p2  ;;  %s563_s30 = sshll.u32 %s4982_s4, 4  ;;  %s5156_s30 = int_to_ptr.vmem [resolvable:$true] %s563_s30 }
  0x1c   : > { %s5158_s23 = sshll.u32 %s4983_s22, 4  ;;  %s6128_s3 = sld [smem:[#allocation22_spill]]  ;;  %s587_s23 = int_to_ptr.vmem [resolvable:$true] %s5158_s23 }
  0x1d   : > { %s6126_s0 = scalar_select %p5144_p3, 1, 0 }
  0x1e   : > { %p4454_p4 = pneg %p5144_p3 }
  0x20   : > { %p5152_p5 = pnand %p4454_p4, %p6097_p1 }
  0x22   : > { %s4675_s21 = scalar_lea.hbm %s6128_s3, 384  ;;  %p5168_p7 = pneg %p5152_p5 }
  0x23   : > { %p4676_p6 = scmp.ne.s32.totalorder %s6128_s3, %s4675_s21  ;;  %p4682_p10 = scmp.lt.u32.totalorder %s4675_s21, %s6128_s3 }
  0x25   : > { %p4678_p8 = pnand %p5168_p7, %p4676_p6 }
  0x27   : > { %p4679_p9 = pneg %p4678_p8 }
  0x29   : > { %p4684_p11 = pnand %p4682_p10, %p4679_p9 }
  0x2b   : > { %4687 = shalt.err (!%p4684_p11)
}
  0x2c   : > { %s4688_s19 = scalar_lea.vmem %s5142_s28, 384  ;;  %p4696_p2 = scmp.lt.s32.totalorder %s5142_s28, %s5142_s28 }
  0x2d   : > { %p4689_p12 = scmp.ne.s32.totalorder %s5142_s28, %s4688_s19  ;;  %p4697_p4 = scmp.lt.s32.totalorder %s4688_s19, %s4688_s19 }
  0x2f   : > { %p4691_p13 = pnand %p4689_p12, %p5168_p7  ;;  %p4698_p6 = por %p4697_p4, %p4696_p2 }
  0x31   : > { %p4692_p0 = pneg %p4691_p13 }
  0x33   : > { %p4699_p8 = pnand %p4698_p6, %p4692_p0 }
  0x35   : > { %4702 = shalt.err (!%p4699_p8)
}
  0x36   : > { %s6099_s20 = smov 128   ;;  %s6100_s18 = smov 8  }
  0x37   : > { %4457 = dma.hbm_to_vmem [thread:$0]  (!%p5152_p5), %s6128_s3, 384, %s5142_s28, [#allocation5], %s6099_s20, %s6099_s20, %s6100_s18  }
  0x38   : > { %s6130_s6 = sld [smem:[#allocation27_spill]] }
  0x3e   : > { %s4703_s19 = scalar_lea.hbm %s6130_s6, 16 }
  0x3f   : > { %p4704_p9 = scmp.ne.s32.totalorder %s6130_s6, %s4703_s19  ;;  %p4710_p12 = scmp.lt.u32.totalorder %s4703_s19, %s6130_s6 }
  0x41   : > { %p4706_p10 = pnand %p4704_p9, %p5168_p7 }
  0x43   : > { %p4707_p11 = pneg %p4706_p10 }
  0x45   : > { %p4712_p13 = pnand %p4710_p12, %p4707_p11 }
  0x47   : > { %4715 = shalt.err (!%p4712_p13)
}
  0x48   : > { %s4716_s28 = scalar_lea.vmem %s5156_s30, 16  ;;  %s4723_s10 = scalar_lea.vmem %s5156_s30, 32 }
  0x49   : > { %p4717_p0 = scmp.ne.s32.totalorder %s5156_s30, %s4716_s28  ;;  %p4724_p6 = scmp.lt.s32.totalorder %s5156_s30, %s5156_s30 }
  0x4a   : > { %p4725_p8 = scmp.lt.s32.totalorder %s4723_s10, %s4716_s28 }
  0x4b   : > { %p4719_p2 = pnand %p4717_p0, %p5168_p7 }
  0x4c   : > { %p4726_p9 = por %p4725_p8, %p4724_p6 }
  0x4d   : > { %p4720_p4 = pneg %p4719_p2 }
  0x4f   : > { %p4727_p10 = pnand %p4726_p9, %p4720_p4 }
  0x51   : > { %4730 = shalt.err (!%p4727_p10)
}
  0x52   : > { %4463 = dma.hbm_to_vmem [thread:$0]  (!%p5152_p5), %s6130_s6, 16, %s5156_s30, [#allocation8]  }
  0x53   : > { %s4731_s1 = scalar_lea.hbm %s6072_s8, 32 }
  0x54   : > { %p4732_p11 = scmp.ne.s32.totalorder %s6072_s8, %s4731_s1  ;;  %p4738_p0 = scmp.lt.u32.totalorder %s4731_s1, %s6072_s8 }
  0x56   : > { %p4734_p12 = pnand %p4732_p11, %p5168_p7 }
  0x58   : > { %p4735_p13 = pneg %p4734_p12 }
  0x5a   : > { %p4740_p2 = pnand %p4738_p0, %p4735_p13 }
  0x5c   : > { %4743 = shalt.err (!%p4740_p2)
}
  0x5d   : > { %s4744_s10 = scalar_lea.vmem %s587_s23, 32  ;;  %p4752_p9 = scmp.lt.s32.totalorder %s587_s23, %s587_s23 }
  0x5e   : > { %p4745_p4 = scmp.ne.s32.totalorder %s587_s23, %s4744_s10  ;;  %p4753_p10 = scmp.lt.s32.totalorder %s4744_s10, %s4744_s10 }
  0x60   : > { %p4747_p6 = pnand %p4745_p4, %p5168_p7  ;;  %p4754_p1 = por %p4753_p10, %p4752_p9 }
  0x62   : > { %p4748_p8 = pneg %p4747_p6 }
  0x64   : > { %p4755_p3 = pnand %p4754_p1, %p4748_p8 }
  0x66   : > { %4758 = shalt.err (!%p4755_p3)
}
  0x67   : > { %s6102_s30 = smov 16   ;;  %s6104_s15 = smov 1  }
  0x68   : > { %4469 = dma.hbm_to_vmem [thread:$0]  (!%p5152_p5), %s6072_s8, 32, %s587_s23, [#allocation11], %s6102_s30, %s6102_s30, %s6104_s15  }
  0x69   : > { %s4988_s21 = smov [#allocation13]   ;;  %s4989_s24 = smov [#allocation6]  }
  0x6a   : > { %s615_s1 = sshll.u32 %s4988_s21, 4  ;;  %s549_s22 = sshll.u32 %s4989_s24, 4  ;;  %s616_s1 = int_to_ptr.vmem [resolvable:$true] %s615_s1  ;;  %s550_s22 = int_to_ptr.vmem [resolvable:$true] %s549_s22 }
  0x6b   : > { %s4759_s10 = scalar_lea.hbm %s6075_s11, 512 }
  0x6c   : > { %p4760_p1 = scmp.ne.s32.totalorder %s6075_s11, %s4759_s10  ;;  %p4766_p12 = scmp.lt.u32.totalorder %s4759_s10, %s6075_s11 }
  0x6e   : > { %p4762_p3 = pnand %p4760_p1, %p5168_p7 }
  0x70   : > { %p4763_p11 = pneg %p4762_p3 }
  0x72   : > { %p4768_p13 = pnand %p4766_p12, %p4763_p11 }
  0x74   : > { %4771 = shalt.err (!%p4768_p13)
}
  0x75   : > { %s4772_s23 = scalar_lea.vmem %s616_s1, 512  ;;  %p4780_p6 = scmp.lt.s32.totalorder %s616_s1, %s616_s1 }
  0x76   : > { %p4773_p0 = scmp.ne.s32.totalorder %s616_s1, %s4772_s23  ;;  %p4781_p8 = scmp.lt.s32.totalorder %s4772_s23, %s4772_s23 }
  0x78   : > { %p4775_p2 = pnand %p4773_p0, %p5168_p7  ;;  %p4782_p9 = por %p4781_p8, %p4780_p6 }
  0x7a   : > { %p4776_p4 = pneg %p4775_p2 }
  0x7c   : > { %p4783_p10 = pnand %p4782_p9, %p4776_p4 }
  0x7e   : > { %4786 = shalt.err (!%p4783_p10)
}
  0x7f   : > { %s6106_s20 = smov 64   ;;  %s4991_s18 = smov 4  }
  0x80   : > { %4475 = dma.hbm_to_vmem [thread:$0]  (!%p5152_p5), %s6075_s11, 512, %s616_s1, [#allocation14], %s6106_s20, %s6106_s20, %s4991_s18  }
  0x81   : > { %s6131_s21 = sld [smem:[#allocation26_spill]] }
  0x87   : > { %s4787_s24 = scalar_lea.hbm %s6131_s21, 256 }
  0x88   : > { %p4788_p1 = scmp.ne.s32.totalorder %s6131_s21, %s4787_s24  ;;  %p4794_p12 = scmp.lt.u32.totalorder %s4787_s24, %s6131_s21 }
  0x8a   : > { %p4790_p3 = pnand %p4788_p1, %p5168_p7 }
  0x8c   : > { %p4791_p11 = pneg %p4790_p3 }
  0x8e   : > { %p4796_p13 = pnand %p4794_p12, %p4791_p11 }
  0x90   : > { %4799 = shalt.err (!%p4796_p13)
}
  0x91   : > { %s4800_s6 = scalar_lea.vmem %s550_s22, 256  ;;  %p4808_p6 = scmp.lt.s32.totalorder %s550_s22, %s550_s22 }
  0x92   : > { %p4801_p0 = scmp.ne.s32.totalorder %s550_s22, %s4800_s6  ;;  %p4809_p8 = scmp.lt.s32.totalorder %s4800_s6, %s4800_s6 }
  0x94   : > { %p4803_p2 = pnand %p4801_p0, %p5168_p7  ;;  %p4810_p9 = por %p4809_p8, %p4808_p6 }
  0x96   : > { %p4804_p4 = pneg %p4803_p2 }
  0x98   : > { %p4811_p10 = pnand %p4810_p9, %p4804_p4 }
  0x9a   : > { %4814 = shalt.err (!%p4811_p10)
}
  0x9b   : > { %4460 = dma.hbm_to_vmem [thread:$0]  (!%p5152_p5), %s6131_s21, 256, %s550_s22, [#allocation5], %s6106_s20, %s6106_s20, %s4991_s18  }
  0x9c   : > { %s4992_s16 = smov [#allocation9]   ;;  %s4993_s24 = smov [#allocation12]  }
  0x9d   : > { %s573_s17 = sshll.u32 %s4992_s16, 4  ;;  %s599_s19 = sshll.u32 %s4993_s24, 4  ;;  %s574_s17 = int_to_ptr.vmem [resolvable:$true] %s573_s17  ;;  %s600_s19 = int_to_ptr.vmem [resolvable:$true] %s599_s19 }
  0x9e   : > { %s4815_s23 = scalar_lea.hbm %s6071_s7, 32 }
  0x9f   : > { %p4816_p1 = scmp.ne.s32.totalorder %s6071_s7, %s4815_s23  ;;  %p4822_p12 = scmp.lt.u32.totalorder %s4815_s23, %s6071_s7 }
  0xa1   : > { %p4818_p3 = pnand %p4816_p1, %p5168_p7 }
  0xa3   : > { %p4819_p11 = pneg %p4818_p3 }
  0xa5   : > { %p4824_p13 = pnand %p4822_p12, %p4819_p11 }
  0xa7   : > { %4827 = shalt.err (!%p4824_p13)
}
  0xa8   : > { %s4828_s22 = scalar_lea.vmem %s574_s17, 32  ;;  %p4836_p6 = scmp.lt.s32.totalorder %s574_s17, %s574_s17 }
  0xa9   : > { %p4829_p0 = scmp.ne.s32.totalorder %s574_s17, %s4828_s22  ;;  %p4837_p8 = scmp.lt.s32.totalorder %s4828_s22, %s4828_s22 }
  0xab   : > { %p4831_p2 = pnand %p4829_p0, %p5168_p7  ;;  %p4838_p9 = por %p4837_p8, %p4836_p6 }
  0xad   : > { %p4832_p4 = pneg %p4831_p2 }
  0xaf   : > { %p4839_p10 = pnand %p4838_p9, %p4832_p4 }
  0xb1   : > { %4842 = shalt.err (!%p4839_p10)
}
  0xb2   : > { %s6132_s30 = smov 1   ;;  %s6133_s3 = smov 16  }
  0xb3   : > { %4466 = dma.hbm_to_vmem [thread:$0]  (!%p5152_p5), %s6071_s7, 32, %s574_s17, [#allocation8], %s6133_s3, %s6133_s3, %s6132_s30  }
  0xb4   : > { %s4843_s10 = scalar_lea.hbm %s6073_s9, 32 }
  0xb5   : > { %p4844_p1 = scmp.ne.s32.totalorder %s6073_s9, %s4843_s10  ;;  %p4850_p12 = scmp.lt.u32.totalorder %s4843_s10, %s6073_s9 }
  0xb7   : > { %p4846_p3 = pnand %p4844_p1, %p5168_p7 }
  0xb9   : > { %p4847_p11 = pneg %p4846_p3 }
  0xbb   : > { %p4852_p13 = pnand %p4850_p12, %p4847_p11 }
  0xbd   : > { %4855 = shalt.err (!%p4852_p13)
}
  0xbe   : > { %s4856_s15 = scalar_lea.vmem %s600_s19, 32  ;;  %p4864_p6 = scmp.lt.s32.totalorder %s600_s19, %s600_s19 }
  0xbf   : > { %p4857_p0 = scmp.ne.s32.totalorder %s600_s19, %s4856_s15  ;;  %p4865_p8 = scmp.lt.s32.totalorder %s4856_s15, %s4856_s15 }
  0xc1   : > { %p4859_p2 = pnand %p4857_p0, %p5168_p7  ;;  %p4866_p9 = por %p4865_p8, %p4864_p6 }
  0xc3   : > { %p4860_p4 = pneg %p4859_p2 }
  0xc5   : > { %p4867_p10 = pnand %p4866_p9, %p4860_p4 }
  0xc7   : > { %4870 = shalt.err (!%p4867_p10)
}
  0xc8   : > { %4472 = dma.hbm_to_vmem [thread:$0]  (!%p5152_p5), %s6073_s9, 32, %s600_s19, [#allocation11], %s6133_s3, %s6133_s3, %s6132_s30  }
  0xc9   : > { %s4994_s24 = smov [#allocation15]   ;;  %s4871_s6 = scalar_lea.hbm %s6077_s13, 512 }
  0xca   : > { %s631_s28 = sshll.u32 %s4994_s24, 4  ;;  %p4872_p1 = scmp.ne.s32.totalorder %s6077_s13, %s4871_s6  ;;  %s632_s28 = int_to_ptr.vmem [resolvable:$true] %s631_s28 }
  0xcb   : > { %p4878_p12 = scmp.lt.u32.totalorder %s4871_s6, %s6077_s13 }
  0xcc   : > { %p4874_p3 = pnand %p4872_p1, %p5168_p7 }
  0xce   : > { %p4875_p11 = pneg %p4874_p3 }
  0xd0   : > { %p4880_p13 = pnand %p4878_p12, %p4875_p11 }
  0xd2   : > { %4883 = shalt.err (!%p4880_p13)
}
  0xd3   : > { %s4884_s19 = scalar_lea.vmem %s632_s28, 512  ;;  %p4892_p6 = scmp.lt.s32.totalorder %s632_s28, %s632_s28 }
  0xd4   : > { %p4885_p0 = scmp.ne.s32.totalorder %s632_s28, %s4884_s19  ;;  %p4893_p8 = scmp.lt.s32.totalorder %s4884_s19, %s4884_s19 }
  0xd6   : > { %p4887_p2 = pnand %p4885_p0, %p5168_p7  ;;  %p4894_p9 = por %p4893_p8, %p4892_p6 }
  0xd8   : > { %p4888_p4 = pneg %p4887_p2 }
  0xda   : > { %p4895_p10 = pnand %p4894_p9, %p4888_p4 }
  0xdc   : > { %4898 = shalt.err (!%p4895_p10)
}
  0xdd   : > { %s6134_s30 = smov 64   ;;  %s5344_s5 = sadd.s32 1, %s4979_s27  }
  0xde   : > { %4478 = dma.hbm_to_vmem [thread:$0]  (!%p5152_p5), %s6077_s13, 512, %s632_s28, [#allocation14], %s6134_s30, %s6134_s30, %s4991_s18  }
  0xdf   : > { %s45_s4 = sadd.s32 1, %s4975_s26  ;;  %s42_s17 = ssub.s32 %s4979_s27, %s5344_s5 }
  0xe0   : > { %p52_p7 = scmp.ne.s32.totalorder %s4975_s26, %s4971_s25  ;;  %p43_p1 = scmp.eq.s32.totalorder %s42_s17, 0 }
  0xe1   : > { %p53_p3 = scmp.eq.s32.totalorder %s4979_s27, 0  ;;  %p58_p11 = scmp.ne.s32.totalorder %s4971_s25, %s4967_s2 }
  0xe2   : > { %p4491_p12 = scmp.lt.s32.totalorder %s4979_s27, 2  ;;  %p6135_p0 = scmp.eq.s32.totalorder %s5137_s29, 0 }
  0xe3   : > { %s5356_s16 = scalar_select %p43_p1, %s4975_s26, %s45_s4  }
  0xe4   : > { %p54_p13 = por %p53_p3, %p52_p7  ;;  %p5360_p2 = por %p6135_p0, %p58_p11 }
  0xe5   : > { %s666_s10 = sand.u32 1, %s4975_s26   ;;  %s4019_s18 = sshll.u32 %s4979_s27, 8 }
  0xe6   : > { %s3807_s28 = sshll.u32 %s666_s10, 4  ;;  %s6137_s1 = sld [smem:[#allocation21_spill]] }
  0xe7   : > { %s670_s2 = scalar_lea.vmem [#allocation2], %s3807_s28  ;;  %p5371_p5 = pnand %p4491_p12, %p54_p13 }
  0xe8   : > { %s677_s15 = sshll.u32 %s670_s2, 4  ;;  %s5377_s27 = scalar_lea.sflag [#allocation3], %s666_s10  ;;  %s5375_s15 = int_to_ptr.vmem [resolvable:$true] %s677_s15 }
  0xe9   : > { %p4901_p6 = pneg %p5371_p5 }
  0xec   : > { %s5369_s22 = scalar_lea.hbm %s6137_s1, %s4019_s18  ;;  %s4904_s4 = scalar_lea.hbm %s6137_s1, 512 }
  0xed   : > { %s4899_s30 = scalar_lea.hbm %s5369_s22, 256  ;;  %p4905_p10 = scmp.lt.u32.totalorder %s5369_s22, %s6137_s1 }
  0xee   : > { %p4900_p4 = scmp.ne.s32.totalorder %s5369_s22, %s4899_s30  ;;  %p4906_p7 = scmp.lt.u32.totalorder %s4904_s4, %s4899_s30 }
  0xef   : > { %p4908_p3 = scmp.lt.u32.totalorder %s4899_s30, %s5369_s22 }
  0xf0   : > { %p4902_p8 = pnand %p4901_p6, %p4900_p4  ;;  %p4907_p1 = por %p4906_p7, %p4905_p10 }
  0xf2   : > { %p4903_p9 = pneg %p4902_p8  ;;  %p4909_p11 = por %p4908_p3, %p4907_p1 }
  0xf4   : > { %p4910_p12 = pnand %p4909_p11, %p4903_p9 }
  0xf6   : > { %4913 = shalt.err (!%p4910_p12)
}
  0xf7   : > { %s4914_s10 = scalar_lea.vmem %s5375_s15, 256  ;;  %s4995_s28 = smov [#allocation2]  }
  0xf8   : > { %p4915_p13 = scmp.ne.s32.totalorder %s5375_s15, %s4914_s10  ;;  %s4919_s23 = sshll.u32 %s4995_s28, 4  ;;  %s4920_s23 = int_to_ptr.vmem [resolvable:$false] %s4919_s23 }
  0xf9   : > { %s4921_s6 = scalar_lea.vmem %s4920_s23, 512  ;;  %p4922_p8 = scmp.lt.s32.totalorder %s5375_s15, %s4920_s23 }
  0xfa   : > { %p4917_p0 = pnand %p4915_p13, %p4901_p6  ;;  %p4923_p10 = scmp.lt.s32.totalorder %s4921_s6, %s4914_s10 }
  0xfc   : > { %p4918_p4 = pneg %p4917_p0  ;;  %p4924_p7 = por %p4923_p10, %p4922_p8 }
  0xfe   : > { %p4925_p1 = pnand %p4924_p7, %p4918_p4 }
 0x100   : > { %4928 = shalt.err (!%p4925_p1)
}
 0x101   : > { %s6139_s2 = smov 8   ;;  %s6140_s30 = smov 128  }
 0x102   : > { %4482 = dma.hbm_to_vmem [thread:$0]  (!%p5371_p5), %s5369_s22, 256, %s5375_s15, %s5377_s27, %s6140_s30, %s6140_s30, %s6139_s2  }
 0x103   : > { %p6141_p6 = scmp.ne.s32.totalorder %s6126_s0, 0 }
 0x104   : > { %s691_s20 = sand.u32 (!%p6141_p6), 1, %s4971_s25  }
 0x105   : > { %689 = sbr.rel (%p6141_p6) target bundleno = 7836 (0x1e9c), region = 104  ;;  %s5411_s3 = sshll.u32 (!%p6141_p6), %s691_s20, 4 }
 0x106   : > { %s692_s4 = scalar_lea.sflag (!%p6141_p6), [#allocation3], %s691_s20  ;;  %s695_s17 = scalar_lea.vmem (!%p6141_p6), [#allocation2], %s5411_s3 }
 0x10c   : > { %4946 = dma.done.wait (%p5360_p2), %s692_s4, 256  }
 0x10d   : > { %4948 = vsyncadd (%p5360_p2), %s692_s4, 4294967040  ;;  %p6142_p9 = scmp.eq.s32.totalorder %s5137_s29, 0 }
 0x10f   : > { %4950 = dma.done.wait (%p6142_p9), [#allocation5], 640   ;;  %p6143_p5 = pmov %p6142_p9 }
 0x111   : > { %4952 = vsyncadd (%p6143_p5), [#allocation5], 4294966656  ;;  %p6144_p3 = pmov %p6143_p5 }
 0x113   : > { %4954 = dma.done.wait (%p6144_p3), [#allocation8], 48   ;;  %p6145_p11 = pmov %p6144_p3 }
 0x114   : > { %p6146_p12 = pmov %p6144_p3 }
 0x115   : > { %4956 = vsyncadd (%p6145_p11), [#allocation8], 4294967248 }
 0x116   : > { %4958 = dma.done.wait (%p6146_p12), [#allocation11], 64   ;;  %p6147_p13 = pmov %p6144_p3 }
 0x117   : > { %p6148_p2 = pmov %p6144_p3 }
 0x118   : > { %4960 = vsyncadd (%p6147_p13), [#allocation11], 4294967232 }
 0x119   : > { %4962 = dma.done.wait (%p6148_p2), [#allocation14], 1024   ;;  %p6149_p0 = pmov %p6148_p2 }
 0x11a   : > { %v815_v0 = vlaneseq  ;;  %v4996_v1 = vmov 0.0   ;;  %vm4997_vm0 = vmmov 0   ;;  %vm799_vm1 = vcmask 130048   ;;  %s6150_s22 = sld [smem:[#allocation23_spill]]  ;;  %v795_v6 = vld [vmem:[%s695_s17] sm:$0xff]  ;;  %v796_v7 = vld [vmem:[%s695_s17 + $0x8] sm:$0xff] }
 0x11b   : > { %4964 = vsyncadd (%p6149_p0), [#allocation14], 4294966272  ;;  %4129 = vmatprep.subr.bf16.mxu0 %v4996_v1  ;;  %4135 = vmatprep.subr.bf16.mxu1 %v4996_v1  ;;  %v838_v8 = vrot.slane %v795_v6, 7  ;;  %v839_v9 = vrot.slane %v796_v7, 7  ;;  %v818_v10 = vrot.slane %v795_v6, 6  ;;  %v819_v11 = vrot.slane %v796_v7, 6 }
 0x11c   : > { %4131 = vmatprep.mubr.msk.bf16.mxu0 %vm4997_vm0, %v4996_v1  ;;  %4137 = vmatprep.mubr.msk.bf16.mxu1 %vm4997_vm0, %v4996_v1  ;;  %v5441_v2 = vshrl.u32 %v815_v0, 7  ;;  %v1015_v12 = vrot.slane %v795_v6, 1  ;;  %v1016_v20 = vrot.slane %v796_v7, 1  ;;  %v1088_v21 = vrot.slane %v795_v6, 2  ;;  %s6151_s20 = sld [smem:[#allocation24_spill]]  ;;  %s6152_s18 = sld [smem:[#allocation25_spill]] }
 0x11d   : > { %v1089_v25 = vrot.slane %v796_v7, 2  ;;  %v797_v26 = vand.u32 2147483647, %v795_v6  ;;  %v798_v28 = vand.u32 2147483647, %v796_v7  ;;  %v959_v36 = vpack.c.bf16 %v796_v7, %v795_v6  ;;  %s5000_s24 = smov 80  }
 0x11e   : > { %v5444_v3 = vadd.s32 8, %v5441_v2  ;;  %vm840_vm2 = vcmp.lt.s32.totalorder %v5441_v2, 1  ;;  %vm843_vm3 = vcmp.ge.s32.totalorder %v5441_v2, 1  ;;  %vm820_vm4 = vcmp.lt.s32.totalorder %v5441_v2, 2  ;;  %s5001_s15 = smov 96   ;;  %s5002_s19 = smov 112  }
 0x11f   : > { %vm823_vm5 = vcmp.ge.s32.totalorder %v5441_v2, 2  ;;  %vm1017_vm6 = vcmp.lt.s32.totalorder %v5441_v2, 7  ;;  %vm1090_vm8 = vcmp.lt.s32.totalorder %v5441_v2, 6  ;;  %v841_v13 = vsel %vm840_vm2, %v838_v8, %v839_v9  ;;  %s5003_s27 = smov 64   ;;  %s6108_s10 = smov 48  }
 0x120   : > { %v4568_v4 = vld [vmem:[%s6150_s22 + $0x8] sm:$0xff]   ;;  %v4569_v5 = vld [vmem:[%s6150_s22] sm:$0xff]   ;;  %vm1023_vm7 = vcmp.lt.s32.totalorder %v5444_v3, 15  ;;  %vm1096_vm9 = vcmp.lt.s32.totalorder %v5444_v3, 14  ;;  %v842_v14 = vsel %vm840_vm2, %v839_v9, %v838_v8  ;;  %v821_v15 = vsel %vm820_vm4, %v818_v10, %v819_v11  ;;  %v4570_v19 = vld [vmem:[%s6150_s22 + $0x10] sm:$0xff]   ;;  %s6107_s28 = smov 16  }
 0x121   : > { %4130 = vmatpush3.bf16.msra.mxu0 %v4568_v4  ;;  %4136 = vmatpush3.bf16.msra.mxu1 %v4569_v5  ;;  %v822_v16 = vsel %vm820_vm4, %v819_v11, %v818_v10  ;;  %v853_v17 = vsel %vm843_vm3, %v842_v14, 0.0  ;;  %v4571_v24 = vld [vmem:[%s6150_s22 + $0x18] sm:$0xff]   ;;  %v1019_v27 = vsel %vm1017_vm6, %v1016_v20, %v1015_v12  ;;  %v1092_v30 = vsel %vm1090_vm8, %v1089_v25, %v1088_v21  ;;  %v4572_v35 = vld [vmem:[%s6150_s22 + $0x20] sm:$0xff]   ;;  %s6153_s3 = sld [smem:[#allocation29_spill]]  ;;  %s6154_s6 = sld [smem:[#allocation31_spill]] }
 0x122   : > { %4141 = vmatprep.subr.bf16.mxu0 %v4996_v1  ;;  %4147 = vmatprep.subr.bf16.mxu1 %v4996_v1  ;;  %v833_v18 = vsel %vm823_vm5, %v822_v16, 0.0  ;;  %v855_v22 = vpack.c.bf16 %v841_v13, %v853_v17  ;;  %v1031_v29 = vsel %vm1023_vm7, %v1019_v27, 0.0  ;;  %v800_v31 = vsel %vm799_vm1, %v797_v26, 0.0  ;;  %v4573_v40 = vld [vmem:[%s6151_s20 + $0x10] sm:$0xff]   ;;  %v4574_v41 = vld [vmem:[%s6151_s20] sm:$0xff]   ;;  %v4575_v42 = vld [vmem:[%s6151_s20 + $0x18] sm:$0xff]  }
 0x123   : > { %v835_v23 = vpack.c.bf16 %v821_v15, %v833_v18  ;;  %v1018_v32 = vsel %vm1017_vm6, %v1015_v12, %v1016_v20  ;;  %v1104_v33 = vsel %vm1096_vm9, %v1092_v30, 0.0  ;;  %v803_v34 = vsel %vm799_vm1, %v798_v28, 0.0  ;;  %801 = vadd.xlane.f32.xlu0 %v800_v31  ;;  %v4576_v43 = vld [vmem:[%s6151_s20 + $0x8] sm:$0xff]   ;;  %v3842_v8 = vld [vmem:[%s6152_s18] ss:$0 sm:$0xff]  ;;  %s6155_s4 = sld [smem:[#allocation28_spill]] }
 0x124   : > { %4132 = vmatmul.mubr.msk.bf16.vlgmr.msra.gmra.mrb[0].mxu0 %vm799_vm1, %v855_v22  ;;  %v1032_v37 = vpack.c.bf16 %v1031_v29, %v1018_v32  ;;  %v1091_v38 = vsel %vm1090_vm8, %v1088_v21, %v1089_v25  ;;  %vm1212_vm12 = vcmask 261120   ;;  %s6156_s30 = sld [smem:[#allocation30_spill]]  ;;  %p786_p4 = scmp.lt.s32.totalorder %s5137_s29, 1 }
 0x125   : > { %4138 = vmatmul.mubr.msk.bf16.vlgmr.msra.gmra.mrb[0].mxu1 %vm799_vm1, %v835_v23  ;;  %4142 = vmatpush3.bf16.msra.mxu0 %v4570_v19  ;;  %v1105_v39 = vpack.c.bf16 %v1104_v33, %v1091_v38  ;;  %s6160_s17 = sld [smem:[#allocation33_spill]]  ;;  %s6161_s23 = sld [smem:[#allocation34_spill]] }
 0x126   : > { %4143 = vmatprep.mubr.msk.bf16.mxu0 %vm4997_vm0, %v4996_v1  ;;  %4148 = vmatpush3.bf16.msra.mxu1 %v4571_v24  ;;  %s6168_s29 = smov (!%p786_p4, %s5137_s29), 1  ;;  %s6162_s1 = sld [smem:[#allocation35_spill]] }
 0x127   : > { %4149 = vmatprep.mubr.msk.bf16.mxu1 %vm4997_vm0, %v4996_v1  ;;  %4153 = vmatprep.subr.bf16.mxu0 %v4996_v1 }
 0x128   : > { %4159 = vmatprep.subr.bf16.mxu1 %v4996_v1  ;;  %804 = vadd.xlane.f32.xlu0 %v803_v34 }
 0x12c   : > { %4144 = vmatmul.mubr.msk.bf16.vlgmr.msra.gmra.mrb[4].mxu0 %vm799_vm1, %v959_v36 }
 0x12d   : > { %4150 = vmatmul.mubr.msk.bf16.vlgmr.msra.gmra.mrb[4].mxu1 %vm799_vm1, %v1032_v37  ;;  %4154 = vmatpush3.bf16.msra.mxu0 %v4572_v35 }
 0x12e   : > { %4155 = vmatprep.mubr.msk.bf16.mxu0 %vm4997_vm0, %v4996_v1  ;;  %4167 = vmatprep.subr.bf16.mxu0 %v4996_v1 }
 0x12f   : > { %4163 = vmatprep.mubr.msk.bf16.mxu1 %vm4997_vm0, %v4996_v1  ;;  %4160 = vmatpush3.bf16.msra.mxu1 %v4573_v40 }
 0x130   : > { %4161 = vmatprep.subr.bf16.mxu1 %v4996_v1 }
 0x133   : > { %4162 = vmatpush3.bf16.msra.mxu1 %v4575_v42  ;;  %v4577_v42 = vld [vmem:[%s6151_s20 + $0x20] sm:$0xff]  }
 0x134   : > { %4156 = vmatmul.mubr.msk.bf16.vlgmr.msra.gmra.mrb[8].mxu0 %vm799_vm1, %v1105_v39  ;;  %4175 = vmatprep.subr.bf16.mxu1 %v4996_v1 }
 0x135   : > { %4171 = vmatprep.mubr.msk.bf16.mxu0 %vm4997_vm0, %v4996_v1  ;;  %4168 = vmatpush3.bf16.msra.mxu0 %v4574_v41 }
 0x136   : > { %4169 = vmatprep.subr.bf16.mxu0 %v4996_v1 }
 0x139   : > { %4170 = vmatpush3.bf16.msra.mxu0 %v4576_v43  ;;  %v4578_v43 = vld [vmem:[%s6151_s20 + $0x30] sm:$0xff]  }
 0x13a   : > { %4183 = vmatprep.subr.bf16.mxu0 %v4996_v1 }
 0x1b0   : > { %v802_v54 = vpop.xlane.xlu0 %801 }
 0x1b1   : > { %vm806_vm10 = vcmp.eq.f32.partialorder %v802_v54, 0.0  ;;  %v4580_v54 = vld [vmem:[%s6151_s20 + $0x38] sm:$0xff]  }
 0x1b2   : > { %v5535_v16 = vsel %vm806_vm10, 1.0, %v4996_v1 }
 0x1b3   : > { %v5541_v22 = vsub.f32 1.0, %v5535_v16 }
 0x1b5   : > { %v805_v7 = vpop.xlane.xlu0 %804 }
 0x1b6   : > { %vm807_vm11 = vcmp.eq.f32.partialorder %v805_v7, 0.0 }
 0x1b7   : > { %v5538_v17 = vsel %vm807_vm11, 1.0, %v4996_v1 }
 0x1b8   : > { %v5544_v23 = vsub.f32 1.0, %v5538_v17 }
 0x1f7   : > { %v902_v44 = vpop.f32.mrb[0].mxu0 }
 0x1f8   : > { %v952_v45 = vpop.f32.mrb[0].mxu1  ;;  %v4133_v47 = vpop.f32.mrb[1].mxu0 }
 0x1f9   : > { %v953_v46 = vadd.f32 %v952_v45, %v902_v44  ;;  %v4139_v48 = vpop.f32.mrb[1].mxu1  ;;  %v905_v49 = vpop.f32.mrb[2].mxu0 }
 0x1fa   : > { %v955_v50 = vpop.f32.mrb[2].mxu1  ;;  %v4134_v52 = vpop.f32.mrb[3].mxu0 }
 0x1fb   : > { %v956_v51 = vadd.f32 %v955_v50, %v905_v49  ;;  %v4140_v53 = vpop.f32.mrb[3].mxu1 }
 0x1fc   : > { %v4579_v53 = vld [vmem:[%s6151_s20 + $0x28] sm:$0xff]  }
 0x1ff   : > { %v1006_v55 = vpop.f32.mrb[4].mxu0 }
 0x200   : > { %v1079_v56 = vpop.f32.mrb[4].mxu1  ;;  %v1013_v57 = vadd.f32 %v1006_v55, %v953_v46  ;;  %v4145_v58 = vpop.f32.mrb[5].mxu0 }
 0x201   : > { %v4151_v59 = vpop.f32.mrb[5].mxu1  ;;  %v1009_v60 = vpop.f32.mrb[6].mxu0  ;;  %v4583_v58 = vld [vmem:[%s6151_s20 + $0x60] sm:$0xff]  }
 0x202   : > { %v1082_v61 = vpop.f32.mrb[6].mxu1  ;;  %v1014_v62 = vadd.f32 %v1009_v60, %v956_v51  ;;  %v1086_v63 = vadd.f32 %v1079_v56, %v1013_v57  ;;  %v4146_v4 = vpop.f32.mrb[7].mxu0  ;;  %v4581_v56 = vld [vmem:[%s6151_s20 + $0x40] sm:$0xff]   ;;  %v4582_v57 = vld [vmem:[%s6151_s20 + $0x48] sm:$0xff]   ;;  %v4584_v59 = vld [vmem:[%s6151_s20 + $0x50] sm:$0xff]  }
 0x203   : > { %v4152_v5 = vpop.f32.mrb[7].mxu1  ;;  %v4585_v60 = vld [vmem:[%s6151_s20 + $0x68] sm:$0xff]  }
 0x204   : > { %v1087_v6 = vadd.f32 %v1082_v61, %v1014_v62  ;;  %v4586_v61 = vld [vmem:[%s6151_s20 + $0x58] sm:$0xff]  }
 0x207   : > { %v1152_v9 = vpop.f32.mrb[8].mxu0 }
 0x208   : > { %v1159_v10 = vadd.f32 %v1152_v9, %v1086_v63  ;;  %v4157_v11 = vpop.f32.mrb[9].mxu0 }
 0x209   : > { %v1155_v12 = vpop.f32.mrb[10].mxu0 }
 0x20a   : > { %v1167_v13 = vadd.f32 %v3842_v8, %v1159_v10  ;;  %v1160_v14 = vadd.f32 %v1155_v12, %v1087_v6  ;;  %v4158_v15 = vpop.f32.mrb[11].mxu0 }
 0x20c   : > { %v1169_v18 = vmax.f32 %v1167_v13, 0.0  ;;  %v1168_v19 = vadd.f32 %v3842_v8, %v1160_v14 }
 0x20e   : > { %v1171_v20 = vmul.f32 0.999995, %v1169_v18  ;;  %v1170_v21 = vmax.f32 %v1168_v19, 0.0 }
 0x210   : > { %v1172_v24 = vmul.f32 0.999995, %v1170_v21  ;;  %v1173_v25 = vmul.f32 %v1171_v20, %v5541_v22 }
 0x212   : > { %v1174_v26 = vmul.f32 %v1172_v24, %v5544_v23  ;;  %v1188_v27 = vrot.slane %v1173_v25, 7  ;;  %v1177_v28 = vrot.slane %v1173_v25, 6  ;;  %v1377_v33 = vrot.slane %v1173_v25, 1 }
 0x213   : > { %v1447_v34 = vrot.slane %v1173_v25, 2 }
 0x214   : > { %v1189_v29 = vrot.slane %v1174_v26, 7  ;;  %v1178_v30 = vrot.slane %v1174_v26, 6  ;;  %v1313_v31 = vpack.c.bf16 %v1174_v26, %v1173_v25  ;;  %v1378_v32 = vrot.slane %v1174_v26, 1 }
 0x215   : > { %v1448_v35 = vrot.slane %v1174_v26, 2 }
 0x216   : > { %v1190_v36 = vsel %vm840_vm2, %v1188_v27, %v1189_v29  ;;  %v1191_v37 = vsel %vm840_vm2, %v1189_v29, %v1188_v27  ;;  %v1179_v38 = vsel %vm820_vm4, %v1177_v28, %v1178_v30  ;;  %v1180_v39 = vsel %vm820_vm4, %v1178_v30, %v1177_v28  ;;  %v3875_v28 = vld [vmem:[%s6152_s18 + $0x1] ss:$0 sm:$0xff] }
 0x217   : > { %v1192_v40 = vsel %vm843_vm3, %v1191_v37, 0.0  ;;  %v1181_v41 = vsel %vm823_vm5, %v1180_v39, 0.0  ;;  %v1379_v44 = vsel %vm1017_vm6, %v1377_v33, %v1378_v32  ;;  %v1380_v45 = vsel %vm1017_vm6, %v1378_v32, %v1377_v33 }
 0x218   : > { %v1194_v46 = vpack.c.bf16 %v1190_v36, %v1192_v40  ;;  %v1183_v47 = vpack.c.bf16 %v1179_v38, %v1181_v41  ;;  %v1382_v48 = vsel %vm1023_vm7, %v1380_v45, 0.0  ;;  %v1449_v49 = vsel %vm1090_vm8, %v1447_v34, %v1448_v35 }
 0x219   : > { %v1383_v50 = vpack.c.bf16 %v1382_v48, %v1379_v44  ;;  %v1450_v51 = vsel %vm1090_vm8, %v1448_v35, %v1447_v34 }
 0x21a   : > { %4164 = vmatmul.mubr.msk.bf16.vlgmr.msra.gmra.mrb[8].mxu1 %vm1212_vm12, %v1194_v46  ;;  %4172 = vmatmul.mubr.msk.bf16.vlgmr.msra.gmra.mrb[12].mxu0 %vm1212_vm12, %v1183_v47  ;;  %v1452_v52 = vsel %vm1096_vm9, %v1450_v51, 0.0 }
 0x21b   : > { %4176 = vmatpush3.bf16.msra.mxu1 %v4577_v42  ;;  %4184 = vmatpush3.bf16.msra.mxu0 %v4578_v43  ;;  %v1453_v55 = vpack.c.bf16 %v1452_v52, %v1449_v49 }
 0x21c   : > { %4177 = vmatprep.subr.bf16.mxu1 %v4996_v1  ;;  %4185 = vmatprep.subr.bf16.mxu0 %v4996_v1 }
 0x21d   : > { %4179 = vmatprep.mubr.msk.bf16.mxu1 %vm4997_vm0, %v4996_v1  ;;  %4187 = vmatprep.mubr.msk.bf16.mxu0 %vm4997_vm0, %v4996_v1 }
 0x21f   : > { %4178 = vmatpush3.bf16.msra.mxu1 %v4579_v53  ;;  %4186 = vmatpush3.bf16.msra.mxu0 %v4580_v54 }
 0x220   : > { %4191 = vmatprep.subr.bf16.mxu1 %v4996_v1  ;;  %4199 = vmatprep.subr.bf16.mxu0 %v4996_v1 }
 0x222   : > { %4180 = vmatmul.mubr.msk.bf16.vlgmr.msra.gmra.mrb[12].mxu1 %vm1212_vm12, %v1313_v31  ;;  %4188 = vmatmul.mubr.msk.bf16.vlgmr.msra.gmra.mrb[16].mxu0 %vm1212_vm12, %v1383_v50 }
 0x223   : > { %4192 = vmatpush3.bf16.msra.mxu1 %v4581_v56  ;;  %4195 = vmatprep.mubr.msk.bf16.mxu1 %vm4997_vm0, %v4996_v1 }
 0x224   : > { %4193 = vmatprep.subr.bf16.mxu1 %v4996_v1  ;;  %4203 = vmatprep.mubr.msk.bf16.mxu0 %vm4997_vm0, %v4996_v1 }
 0x225   : > { %4200 = vmatpush3.bf16.msra.mxu0 %v4583_v58  ;;  %v4587_v58 = vld [vmem:[%s6151_s20 + $0x70] sm:$0xff]  }
 0x226   : > { %4201 = vmatprep.subr.bf16.mxu0 %v4996_v1 }
 0x227   : > { %4194 = vmatpush3.bf16.msra.mxu1 %v4582_v57 }
 0x228   : > { %4207 = vmatprep.subr.bf16.mxu1 %v4996_v1 }
 0x229   : > { %4202 = vmatpush3.bf16.msra.mxu0 %v4585_v60 }
 0x22a   : > { %4196 = vmatmul.mubr.msk.bf16.vlgmr.msra.gmra.mrb[16].mxu1 %vm1212_vm12, %v1453_v55  ;;  %4215 = vmatprep.subr.bf16.mxu0 %v4996_v1 }
 0x22b   : > { %4211 = vmatprep.mubr.msk.bf16.mxu1 %vm4997_vm0, %v4996_v1  ;;  %4208 = vmatpush3.bf16.msra.mxu1 %v4584_v59  ;;  %v4588_v59 = vld [vmem:[%s6151_s20 + $0x80] sm:$0xff]  }
 0x22c   : > { %4209 = vmatprep.subr.bf16.mxu1 %v4996_v1 }
 0x22f   : > { %4210 = vmatpush3.bf16.msra.mxu1 %v4586_v61 }
 0x230   : > { %4223 = vmatprep.subr.bf16.mxu1 %v4996_v1 }
 0x2ed   : > { %v1250_v62 = vpop.f32.mrb[8].mxu1  ;;  %v1306_v63 = vpop.f32.mrb[12].mxu0 }
 0x2ee   : > { %v1307_v4 = vadd.f32 %v1306_v63, %v1250_v62  ;;  %v4165_v5 = vpop.f32.mrb[9].mxu1  ;;  %v4173_v6 = vpop.f32.mrb[13].mxu0 }
 0x2ef   : > { %v1253_v7 = vpop.f32.mrb[10].mxu1  ;;  %v1309_v8 = vpop.f32.mrb[14].mxu0 }
 0x2f0   : > { %v1310_v9 = vadd.f32 %v1309_v8, %v1253_v7  ;;  %v4166_v10 = vpop.f32.mrb[11].mxu1  ;;  %v4174_v11 = vpop.f32.mrb[15].mxu0 }
 0x2f1   : > { %v4590_v10 = vld [vmem:[%s6151_s20 + $0x88] sm:$0xff]  }
 0x2f5   : > { %v1368_v12 = vpop.f32.mrb[12].mxu1  ;;  %v1438_v13 = vpop.f32.mrb[16].mxu0 }
 0x2f6   : > { %v1375_v14 = vadd.f32 %v1368_v12, %v1307_v4  ;;  %v4181_v15 = vpop.f32.mrb[13].mxu1  ;;  %v4189_v18 = vpop.f32.mrb[17].mxu0  ;;  %v4591_v12 = vld [vmem:[%s6151_s20 + $0x90] sm:$0xff]  }
 0x2f7   : > { %v1371_v19 = vpop.f32.mrb[14].mxu1  ;;  %v1441_v20 = vpop.f32.mrb[18].mxu0  ;;  %v4594_v15 = vld [vmem:[#allocation6 + $0x8] sm:$0xff]  }
 0x2f8   : > { %v1445_v21 = vadd.f32 %v1438_v13, %v1375_v14  ;;  %v1376_v24 = vadd.f32 %v1371_v19, %v1310_v9  ;;  %v4182_v25 = vpop.f32.mrb[15].mxu1  ;;  %v4190_v26 = vpop.f32.mrb[19].mxu0  ;;  %v4589_v9 = vld [vmem:[%s6151_s20 + $0x78] sm:$0xff]  }
 0x2f9   : > { %v4592_v13 = vld [vmem:[%s6151_s20 + $0x98] sm:$0xff]  }
 0x2fa   : > { %v1446_v27 = vadd.f32 %v1441_v20, %v1376_v24  ;;  %v4593_v14 = vld [vmem:[#allocation6] sm:$0xff]  }
 0x2fd   : > { %v1508_v29 = vpop.f32.mrb[16].mxu1 }
 0x2fe   : > { %v1515_v30 = vadd.f32 %v1508_v29, %v1445_v21  ;;  %v4197_v31 = vpop.f32.mrb[17].mxu1 }
 0x2ff   : > { %v1511_v32 = vpop.f32.mrb[18].mxu1 }
 0x300   : > { %v1523_v33 = vadd.f32 %v3875_v28, %v1515_v30  ;;  %v1516_v34 = vadd.f32 %v1511_v32, %v1446_v27  ;;  %v4198_v35 = vpop.f32.mrb[19].mxu1 }
 0x302   : > { %v1525_v36 = vmax.f32 %v1523_v33, 0.0  ;;  %v1524_v37 = vadd.f32 %v3875_v28, %v1516_v34 }
 0x304   : > { %v1527_v38 = vmul.f32 0.999995, %v1525_v36  ;;  %v1526_v39 = vmax.f32 %v1524_v37, 0.0 }
 0x306   : > { %v1529_v40 = vmul.f32 %v1527_v38, %v5541_v22  ;;  %v1528_v41 = vmul.f32 0.999995, %v1526_v39 }
 0x308   : > { %v1530_v42 = vmul.f32 %v1528_v41, %v5544_v23  ;;  %v1545_v43 = vrot.slane %v1529_v40, 7  ;;  %v1533_v44 = vrot.slane %v1529_v40, 6  ;;  %v1733_v49 = vrot.slane %v1529_v40, 1 }
 0x309   : > { %v1803_v50 = vrot.slane %v1529_v40, 2 }
 0x30a   : > { %v1546_v45 = vrot.slane %v1530_v42, 7  ;;  %v1534_v46 = vrot.slane %v1530_v42, 6  ;;  %v1669_v47 = vpack.c.bf16 %v1530_v42, %v1529_v40  ;;  %v1734_v48 = vrot.slane %v1530_v42, 1 }
 0x30b   : > { %v1804_v51 = vrot.slane %v1530_v42, 2  ;;  %v3912_v42 = vld [vmem:[%s6152_s18 + $0x2] ss:$0 sm:$0xff] }
 0x30c   : > { %v1547_v52 = vsel %vm840_vm2, %v1545_v43, %v1546_v45  ;;  %v1548_v53 = vsel %vm840_vm2, %v1546_v45, %v1545_v43  ;;  %v1535_v54 = vsel %vm820_vm4, %v1533_v44, %v1534_v46  ;;  %v1536_v55 = vsel %vm820_vm4, %v1534_v46, %v1533_v44 }
 0x30d   : > { %v1549_v56 = vsel %vm843_vm3, %v1548_v53, 0.0  ;;  %v1537_v57 = vsel %vm823_vm5, %v1536_v55, 0.0  ;;  %v1735_v60 = vsel %vm1017_vm6, %v1733_v49, %v1734_v48  ;;  %v1736_v61 = vsel %vm1017_vm6, %v1734_v48, %v1733_v49 }
 0x30e   : > { %v1551_v62 = vpack.c.bf16 %v1547_v52, %v1549_v56  ;;  %v1539_v63 = vpack.c.bf16 %v1535_v54, %v1537_v57  ;;  %v1738_v4 = vsel %vm1023_vm7, %v1736_v61, 0.0  ;;  %v1805_v5 = vsel %vm1090_vm8, %v1803_v50, %v1804_v51 }
 0x30f   : > { %v1739_v6 = vpack.c.bf16 %v1738_v4, %v1735_v60  ;;  %v1806_v7 = vsel %vm1090_vm8, %v1804_v51, %v1803_v50  ;;  %vm2171_vm2 = vcmask 7168   ;;  %vm2088_vm5 = vcmask 1040384  }
 0x310   : > { %4204 = vmatmul.mubr.msk.bf16.vlgmr.msra.gmra.mrb[20].mxu0 %vm1212_vm12, %v1551_v62  ;;  %4212 = vmatmul.mubr.msk.bf16.vlgmr.msra.gmra.mrb[20].mxu1 %vm1212_vm12, %v1539_v63  ;;  %v1808_v8 = vsel %vm1096_vm9, %v1806_v7, 0.0  ;;  %vm4415_vm4 = vmpackc.low %vm2171_vm2, %vm2171_vm2  ;;  %vm2081_vm7 = vcmask 138240  }
 0x311   : > { %4216 = vmatpush3.bf16.msra.mxu0 %v4587_v58  ;;  %4224 = vmatpush3.bf16.msra.mxu1 %v4588_v59  ;;  %v1809_v11 = vpack.c.bf16 %v1808_v8, %v1805_v5  ;;  %v3913_v58 = vld [vmem:[#allocation7] ss:$0 sm:$0xff] }
 0x312   : > { %4217 = vmatprep.subr.bf16.mxu0 %v4996_v1  ;;  %4225 = vmatprep.subr.bf16.mxu1 %v4996_v1 }
 0x313   : > { %4219 = vmatprep.mubr.msk.bf16.mxu0 %vm4997_vm0, %v4996_v1  ;;  %4227 = vmatprep.mubr.msk.bf16.mxu1 %vm4997_vm0, %v4996_v1 }
 0x315   : > { %4218 = vmatpush3.bf16.msra.mxu0 %v4589_v9  ;;  %4226 = vmatpush3.bf16.msra.mxu1 %v4590_v10 }
 0x316   : > { %4231 = vmatprep.subr.bf16.mxu0 %v4996_v1  ;;  %4239 = vmatprep.subr.bf16.mxu1 %v4996_v1 }
 0x318   : > { %4220 = vmatmul.mubr.msk.bf16.vlgmr.msra.gmra.mrb[24].mxu0 %vm1212_vm12, %v1669_v47  ;;  %4228 = vmatmul.mubr.msk.bf16.vlgmr.msra.gmra.mrb[24].mxu1 %vm1212_vm12, %v1739_v6 }
 0x319   : > { %4232 = vmatpush3.bf16.msra.mxu0 %v4591_v12  ;;  %4235 = vmatprep.mubr.msk.bf16.mxu0 %vm4997_vm0, %v4996_v1 }
 0x31a   : > { %4233 = vmatprep.subr.bf16.mxu0 %v4996_v1  ;;  %4243 = vmatprep.mubr.msk.bf16.mxu1 %vm4997_vm0, %v4996_v1 }
 0x31b   : > { %4240 = vmatpush3.bf16.msra.mxu1 %v4593_v14 }
 0x31c   : > { %4241 = vmatprep.subr.bf16.mxu1 %v4996_v1 }
 0x31d   : > { %4234 = vmatpush3.bf16.msra.mxu0 %v4592_v13 }
 0x31f   : > { %4242 = vmatpush3.bf16.msra.mxu1 %v4594_v15 }
 0x320   : > { %4236 = vmatmul.mubr.msk.bf16.vlgmr.msra.gmra.mrb[28].mxu0 %vm1212_vm12, %v1809_v11  ;;  %v1974_v11 = vand.u32 127, %v815_v0 }
 0x322   : > { %vm1975_vm13 = vcmp.ge.s32.totalorder %v5441_v2, %v1974_v11  ;;  %vm1976_vm3 = vcmp.ge.s32.totalorder %v5444_v3, %v1974_v11 }
 0x3e3   : > { %v1606_v18 = vpop.f32.mrb[20].mxu0  ;;  %v1662_v19 = vpop.f32.mrb[20].mxu1 }
 0x3e4   : > { %v1663_v20 = vadd.f32 %v1662_v19, %v1606_v18  ;;  %v4205_v21 = vpop.f32.mrb[21].mxu0  ;;  %v4213_v24 = vpop.f32.mrb[21].mxu1  ;;  %v3920_v19 = vsel %vm1976_vm3, 1.0, %v4996_v1 }
 0x3e5   : > { %v1609_v25 = vpop.f32.mrb[22].mxu0  ;;  %v1665_v26 = vpop.f32.mrb[22].mxu1  ;;  %v792_v21 = vld [vmem:[#allocation4] sm:$0xff]  ;;  %v793_v24 = vld [vmem:[#allocation4 + $0x8] sm:$0xff] }
 0x3e6   : > { %v1666_v27 = vadd.f32 %v1665_v26, %v1609_v25  ;;  %v4206_v28 = vpop.f32.mrb[23].mxu0  ;;  %v4214_v29 = vpop.f32.mrb[23].mxu1  ;;  %v4410_v3 = vpack.c.bf16 %v793_v24, %v792_v21 }
 0x3e7   : > { %v794_v29 = vld [vmem:[#allocation4 + $0x10] sm:$0x1] }
 0x3e8   : > { %4411 = vmatprep.subr.bf16.mxu1 %v4410_v3 }
 0x3eb   : > { %v1724_v30 = vpop.f32.mrb[24].mxu0  ;;  %v1794_v31 = vpop.f32.mrb[24].mxu1 }
 0x3ec   : > { %v1731_v32 = vadd.f32 %v1724_v30, %v1663_v20  ;;  %v4221_v33 = vpop.f32.mrb[25].mxu0  ;;  %v4229_v34 = vpop.f32.mrb[25].mxu1  ;;  %v4998_v20 = vmov 0   ;;  %v2064_v30 = vcvt.s32.f32 %v1974_v11 }
 0x3ed   : > { %v1727_v35 = vpop.f32.mrb[26].mxu0  ;;  %v1797_v36 = vpop.f32.mrb[26].mxu1  ;;  %4557 = vset.pattern.permute.xlu1 %v4998_v20  ;;  %4556 = vset.pattern.permute.xlu0 %v4998_v20 }
 0x3ee   : > { %v1801_v37 = vadd.f32 %v1794_v31, %v1731_v32  ;;  %v1732_v38 = vadd.f32 %v1727_v35, %v1666_v27  ;;  %v4222_v39 = vpop.f32.mrb[27].mxu0  ;;  %v4230_v40 = vpop.f32.mrb[27].mxu1 }
 0x3f0   : > { %v1802_v41 = vadd.f32 %v1797_v36, %v1732_v38 }
 0x3f3   : > { %v1864_v43 = vpop.f32.mrb[28].mxu0 }
 0x3f4   : > { %v1871_v44 = vadd.f32 %v1864_v43, %v1801_v37  ;;  %v4237_v45 = vpop.f32.mrb[29].mxu0 }
 0x3f5   : > { %v1867_v46 = vpop.f32.mrb[30].mxu0 }
 0x3f6   : > { %v1879_v47 = vadd.f32 %v3912_v42, %v1871_v44  ;;  %v1872_v48 = vadd.f32 %v1867_v46, %v1802_v41  ;;  %v4238_v49 = vpop.f32.mrb[31].mxu0 }
 0x3f8   : > { %v1881_v50 = vmax.f32 %v1879_v47, 0.0  ;;  %v1880_v51 = vadd.f32 %v3912_v42, %v1872_v48 }
 0x3fa   : > { %v1883_v52 = vmul.f32 0.999995, %v1881_v50  ;;  %v1882_v53 = vmax.f32 %v1880_v51, 0.0 }
 0x3fc   : > { %v1884_v54 = vmul.f32 0.999995, %v1882_v53  ;;  %v1885_v55 = vmul.f32 %v1883_v52, %v5541_v22  ;;  %v4999_v53 = vmov 1.0  }
 0x3fe   : > { %v1886_v56 = vmul.f32 %v1884_v54, %v5544_v23  ;;  %v4595_v54 = vld [vmem:[#allocation13] sm:$0xff]  }
 0x400   : > { %v1887_v57 = vpack.c.bf16 %v1886_v56, %v1885_v55  ;;  %v4596_v55 = vld [vmem:[#allocation13 + $0x8] sm:$0xff]  }
 0x402   : > { %4244 = vmatmul.mubr.msk.bf16.vlgmr.msra.gmra.mrb[28].mxu1 %vm1212_vm12, %v1887_v57 }
 0x403   : > { %4413 = vmatpush3.bf16.msra.mxu1 %v4410_v3 }
 0x404   : > { %4258 = vmatprep.subr.msk.mxu1 %vm2088_vm5, %v794_v29 }
 0x407   : > { %4259 = vmatpush3.msk.msra.mxu1 %vm2088_vm5, %v794_v29 }
 0x408   : > { %4284 = vmatprep.subr.bf16.mxu1 %v4996_v1 }
 0x4d5   : > { %v1948_v59 = vpop.f32.mrb[28].mxu1 }
 0x4d6   : > { %v1949_v60 = vadd.f32 %v3913_v58, %v1948_v59  ;;  %v4245_v61 = vpop.f32.mrb[29].mxu1 }
 0x4d7   : > { %v1951_v62 = vpop.f32.mrb[30].mxu1 }
 0x4d8   : > { %v5700_v63 = vmul.f32 %v1949_v60, %v5541_v22  ;;  %v1952_v4 = vadd.f32 %v3913_v58, %v1951_v62  ;;  %v4246_v5 = vpop.f32.mrb[31].mxu1  ;;  %v3919_v22 = vsel %vm1975_vm13, 1.0, %v4996_v1 }
 0x4d9   : > { %4251 = vmatprep.mubr.msk.f32.mxu0 %vm799_vm1, %v3919_v22 }
 0x4da   : > { %v1956_v6 = vmul.f32 %v1952_v4, %v5544_v23  ;;  %v1957_v7 = vand.u32 2147483647, %v5700_v63  ;;  %v3932_v4 = vld [vmem:[#allocation9] ss:$0 sm:$0xff] }
 0x4dc   : > { %v1959_v8 = vsel %vm1212_vm12, %v1957_v7, 0.0  ;;  %v1958_v9 = vand.u32 2147483647, %v1956_v6 }
 0x4dd   : > { %1960 = vadd.xlane.f32.xlu1 %v1959_v8  ;;  %v3933_v8 = vld [vmem:[#allocation10] ss:$0 sm:$0xff] }
 0x4de   : > { %v1962_v10 = vsel %vm1212_vm12, %v1958_v9, 0.0 }
 0x4e1   : > { %1963 = vadd.xlane.f32.xlu1 %v1962_v10 }
 0x56a   : > { %v1961_v12 = vpop.xlane.xlu1 %1960 }
 0x56b   : > { %vm1965_vm14 = vcmp.eq.f32.partialorder %v1961_v12, 0.0 }
 0x56c   : > { %v3917_v23 = vsel %vm1965_vm14, 1.0, %v4996_v1 }
 0x56d   : > { %v5712_v15 = vsub.f32 1.0, %v3917_v23 }
 0x56e   : > { %v1964_v13 = vpop.xlane.xlu1 %1963 }
 0x56f   : > { %vm1966_vm15 = vcmp.eq.f32.partialorder %v1964_v13, 0.0  ;;  %v3934_v13 = vld [vmem:[%s6076_s12] ss:$0 sm:$0xff] }
 0x570   : > { %v3918_v14 = vsel %vm1966_vm15, 1.0, %v4996_v1 }
 0x571   : > { %v5714_v18 = vsub.f32 1.0, %v3918_v14  ;;  %v4414_v2 = vpack.c.bf16 %v3918_v14, %v3917_v23 }
 0x573   : > { %v4406_v0 = vpack.c.bf16 %v5714_v18, %v5712_v15 }
 0x575   : > { %4407 = vmatprep.subr.bf16.mxu0 %v4406_v0 }
 0x576   : > { %4409 = vmatpush3.bf16.msra.mxu0 %v4406_v0 }
 0x577   : > { %4416 = vmatprep.subr.msk.bf16.mxu0 %vm4415_vm4, %v4414_v2 }
 0x579   : > { %4252 = vmatmul.mubr.msk.f32.vlgmr.msra.gmra.mrb[32].mxu0 %vm799_vm1, %v3920_v19 }
 0x57a   : > { %4267 = vmatprep.mubr.msk.f32.mxu0 %vm2171_vm2, %v4999_v53 }
 0x57f   : > { %4419 = vmatpush3.bf16.xpose.msk.msra.mxu0 %vm4415_vm4, %v4414_v2 }
 0x580   : > { %4270 = vmatprep.subr.bf16.mxu0 %v4996_v1 }
 0x586   : > { %4268 = vmatmul.mubr.msk.f32.vlgmr.msra.gmra.mrb[34].mxu0 %vm2171_vm2, %v4999_v53 }
 0x587   : > { %4271 = vmatpush3.bf16.msra.mxu0 %v4595_v54  ;;  %4274 = vmatprep.mubr.msk.bf16.mxu0 %vm4997_vm0, %v4996_v1 }
 0x588   : > { %4272 = vmatprep.subr.bf16.mxu0 %v4996_v1 }
 0x58b   : > { %4273 = vmatpush3.bf16.msra.mxu0 %v4596_v55 }
 0x58c   : > { %4278 = vmatprep.subr.bf16.mxu0 %v4996_v1 }
 0x64c   : > { %v4253_v25 = vpop.f32.mrb[32].mxu0 }
 0x64d   : > { %v2063_v26 = vmul.f32 %v4253_v25, %v5714_v18  ;;  %v2053_v27 = vpop.f32.mrb[33].mxu0 }
 0x64e   : > { %v2062_v28 = vmul.f32 %v2053_v27, %v5712_v15 }
 0x64f   : > { %2072 = vperm.xlu1 %4557, %v2063_v26  }
 0x650   : > { %2067 = vperm.xlu0 %4556, %v2062_v28  }
 0x659   : > { %v4269_v12 = vpop.f32.mrb[34].mxu0 }
 0x65a   : > { %v2247_v23 = vpop.f32.mrb[35].mxu0 }
 0x65b   : > { %v5777_v29 = vmul.f32 -1e+09, %v2247_v23 }
 0x6ce   : > { %v2073_v31 = vpop.permute.xlu1 %2072 }
 0x6cf   : > { %vm2076_vm6 = vcmp.eq.f32.partialorder %v2064_v30, %v2073_v31  ;;  %v2068_v32 = vpop.permute.xlu0 %2067  ;;  %v5779_v31 = vmul.f32 -1e+09, %v4269_v12 }
 0x6d0   : > { %vm2075_vm8 = vcmp.eq.f32.partialorder %v2064_v30, %v2068_v32  ;;  %v3924_v34 = vsel %vm2076_vm6, 1.0, %v4996_v1 }
 0x6d1   : > { %v3923_v33 = vsel %vm2075_vm8, 1.0, %v4996_v1 }
 0x6d2   : > { %4260 = vmatprep.mubr.msk.f32.mxu1 %vm2081_vm7, %v3923_v33 }
 0x6d3   : > { %4261 = vmatmul.mubr.msk.f32.vlgmr.msra.gmra.mrb[32].mxu1 %vm2081_vm7, %v3924_v34 }
 0x6d4   : > { %4286 = vmatprep.mubr.msk.bf16.mxu1 %vm4997_vm0, %v4996_v1 }
 0x7a6   : > { %v4262_v35 = vpop.f32.mrb[32].mxu1 }
 0x7a7   : > { %v2168_v36 = vadd.f32 %v4262_v35, %v1956_v6  ;;  %v2158_v37 = vpop.f32.mrb[33].mxu1 }
 0x7a8   : > { %v2167_v38 = vadd.f32 %v2158_v37, %v5700_v63 }
 0x7a9   : > { %v5733_v39 = vmul.f32 %v2168_v36, %v5714_v18 }
 0x7aa   : > { %v5736_v40 = vmul.f32 %v2167_v38, %v5712_v15 }
 0x7ab   : > { %v2263_v41 = vsel %vm1212_vm12, %v5733_v39, 0.0 }
 0x7ac   : > { %2264 = vadd.xlane.f32.xlu0 %v2263_v41  ;;  %v2260_v42 = vsel %vm1212_vm12, %v5736_v40, 0.0 }
 0x7ad   : > { %2261 = vadd.xlane.f32.xlu1 %v2260_v42 }
 0x839   : > { %v2265_v43 = vpop.xlane.xlu0 %2264 }
 0x83a   : > { %v2268_v44 = vmul.f32 0.03125, %v2265_v43  ;;  %v2262_v45 = vpop.xlane.xlu1 %2261 }
 0x83b   : > { %v2267_v46 = vmul.f32 0.03125, %v2262_v45 }
 0x83c   : > { %v2270_v47 = vsub.f32 %v5733_v39, %v2268_v44 }
 0x83d   : > { %v2269_v48 = vsub.f32 %v5736_v40, %v2267_v46 }
 0x83e   : > { %v2272_v51 = vmul.f32 %v2270_v47, %v2270_v47 }
 0x83f   : > { %v2271_v49 = vmul.f32 %v2269_v48, %v2269_v48 }
 0x840   : > { %v2276_v52 = vsel %vm1212_vm12, %v2272_v51, 0.0 }
 0x841   : > { %v2273_v50 = vsel %vm1212_vm12, %v2271_v49, 0.0 }
 0x842   : > { %2274 = vadd.xlane.f32.xlu1 %v2273_v50 }
 0x846   : > { %2277 = vadd.xlane.f32.xlu1 %v2276_v52 }
 0x8cf   : > { %v2275_v56 = vpop.xlane.xlu1 %2274 }
 0x8d0   : > { %v2279_v57 = vmul.f32 0.03125, %v2275_v56 }
 0x8d2   : > { %v2281_v58 = vadd.f32 1e-05, %v2279_v57 }
 0x8d3   : > { %v2278_v59 = vpop.xlane.xlu1 %2277 }
 0x8d4   : > { %4623 = vrsqrt.f32 %v2281_v58  ;;  %v2280_v60 = vmul.f32 0.03125, %v2278_v59 }
 0x8d6   : > { %v2282_v61 = vadd.f32 1e-05, %v2280_v60 }
 0x8d8   : > { %4625 = vrsqrt.f32 %v2282_v61 }
 0x8de   : > { %v4624_v62 = vpop.eup %4623 }
 0x8df   : > { %v2285_v63 = vmul.f32 %v4624_v62, %v2269_v48 }
 0x8e1   : > { %v2293_v6 = vmul.f32 %v3932_v4, %v2285_v63 }
 0x8e2   : > { %v4626_v5 = vpop.eup %4625 }
 0x8e3   : > { %v2286_v7 = vmul.f32 %v4626_v5, %v2270_v47  ;;  %v2301_v10 = vadd.f32 %v3933_v8, %v2293_v6 }
 0x8e5   : > { %v2294_v9 = vmul.f32 %v3932_v4, %v2286_v7 }
 0x8e7   : > { %v2302_v11 = vadd.f32 %v3933_v8, %v2294_v9 }
 0x8e9   : > { %v2303_v22 = vpack.c.bf16 %v2302_v11, %v2301_v10 }
 0x8eb   : > { %4275 = vmatmul.mubr.msk.bf16.vlgmr.msra.gmra.mrb[36].mxu0 %vm1212_vm12, %v2303_v22 }
 0x8ec   : > { %4280 = vmatprep.mubr.msk.bf16.mxu0 %vm4997_vm0, %v4996_v1 }
 0x9be   : > { %v2369_v14 = vpop.f32.mrb[36].mxu0 }
 0x9bf   : > { %v4276_v0 = vpop.f32.mrb[37].mxu0  ;;  %v2370_v19 = vadd.f32 %v3934_v13, %v2369_v14 }
 0x9c0   : > { %v2372_v2 = vpop.f32.mrb[38].mxu0 }
 0x9c1   : > { %v2373_v20 = vadd.f32 %v3934_v13, %v2372_v2  ;;  %v4277_v21 = vpop.f32.mrb[39].mxu0 }
 0x9c3   : > { %v5758_v24 = vpack.c.bf16 %v2373_v20, %v2370_v19 }
 0x9c5   : > { %2499 = vrot.lane.b32.xlu0 %v5758_v24, %s5000_s24  ;;  %2378 = vrot.lane.b32.xlu1 %v5758_v24, %s5001_s15 }
 0x9c9   : > { %2497 = vrot.lane.b32.xlu1 %v5758_v24, %s5002_s19 }
 0xa37   : > { %v2379_v3 = vpop.permute.xlu1 %2378  ;;  %v2500_v26 = vpop.permute.xlu0 %2499 }
 0xa38   : > { %v2384_v25 = vsel %vm799_vm1, %v2379_v3, 0  ;;  %v2505_v27 = vsel %vm799_vm1, %v2500_v26, 0  ;;  %v4597_v26 = vld [vmem:[#allocation15] sm:$0xff]  }
 0xa39   : > { %4279 = vmatpush3.bf16.xpose.msra.mxu0 %v2384_v25 }
 0xa3a   : > { %4290 = vmatprep.subr.bf16.mxu0 %v4996_v1 }
 0xa3b   : > { %v2498_v28 = vpop.permute.xlu1 %2497 }
 0xa40   : > { %4281 = vmatmul.mubr.msk.bf16.vlgmr.msra.gmra.mrb[40].mxu0 %vm799_vm1, %v5758_v24 }
 0xa41   : > { %4291 = vmatpush3.bf16.xpose.msra.mxu0 %v2505_v27  ;;  %4292 = vmatprep.mubr.msk.bf16.mxu0 %vm4997_vm0, %v4996_v1 }
 0xa42   : > { %4302 = vmatprep.subr.bf16.mxu0 %v4996_v1 }
 0xa48   : > { %4293 = vmatmul.mubr.msk.bf16.vlgmr.msra.gmra.mrb[44].mxu0 %vm799_vm1, %v2498_v28 }
 0xa49   : > { %4306 = vmatprep.mubr.msk.bf16.mxu0 %vm4997_vm0, %v4996_v1  ;;  %4303 = vmatpush3.bf16.msra.mxu0 %v4597_v26 }
 0xa4a   : > { %4304 = vmatprep.subr.bf16.mxu0 %v4996_v1 }
 0xb13   : > { %v2420_v30 = vpop.f32.mrb[40].mxu0 }
 0xb14   : > { %v2421_v32 = vadd.f32 %v2420_v30, %v5777_v29  ;;  %v4282_v33 = vpop.f32.mrb[41].mxu0 }
 0xb15   : > { %v2423_v34 = vpop.f32.mrb[42].mxu0  ;;  %v4598_v33 = vld [vmem:[#allocation15 + $0x8] sm:$0xff]  }
 0xb16   : > { %v2424_v35 = vadd.f32 %v2423_v34, %v5779_v31  ;;  %v4283_v36 = vpop.f32.mrb[43].mxu0  ;;  %v2427_v37 = vsel %vm799_vm1, %v2421_v32, -inf  ;;  %4305 = vmatpush3.bf16.msra.mxu0 %v4598_v33 }
 0xb17   : > { %2428 = vmax.xlane.f32.xlu1 %v2427_v37  ;;  %4318 = vmatprep.subr.bf16.mxu0 %v4996_v1 }
 0xb18   : > { %v2430_v38 = vsel %vm799_vm1, %v2424_v35, -inf }
 0xb19   : > { %2431 = vmax.xlane.f32.xlu0 %v2430_v38 }
 0xb1b   : > { %v2541_v41 = vpop.f32.mrb[44].mxu0 }
 0xb1c   : > { %v2542_v42 = vadd.f32 %v2541_v41, %v5777_v29  ;;  %v4294_v43 = vpop.f32.mrb[45].mxu0 }
 0xb1d   : > { %v2544_v44 = vpop.f32.mrb[46].mxu0 }
 0xb1e   : > { %v2545_v45 = vadd.f32 %v2544_v44, %v5779_v31  ;;  %v4295_v46 = vpop.f32.mrb[47].mxu0  ;;  %v2548_v47 = vsel %vm799_vm1, %v2542_v42, -inf }
 0xb1f   : > { %2549 = vmax.xlane.f32.xlu1 %v2548_v47  ;;  %v3942_v47 = vld [vmem:[%s6078_s14] ss:$0 sm:$0xff] }
 0xb20   : > { %v2551_v48 = vsel %vm799_vm1, %v2545_v45, -inf }
 0xb23   : > { %2552 = vmax.xlane.f32.xlu1 %v2551_v48 }
 0xba4   : > { %v2429_v49 = vpop.xlane.xlu1 %2428 }
 0xba5   : > { %v2433_v50 = vsub.f32 %v2421_v32, %v2429_v49 }
 0xba6   : > { %v2432_v51 = vpop.xlane.xlu0 %2431 }
 0xba7   : > { %v2435_v52 = vmul.f32 1.442695, %v2433_v50  ;;  %v2434_v53 = vsub.f32 %v2424_v35, %v2432_v51 }
 0xba9   : > { %4627 = vpow2.f32 %v2435_v52  ;;  %v2437_v54 = vmul.f32 1.442695, %v2434_v53 }
 0xbab   : > { %4629 = vpow2.f32 %v2437_v54 }
 0xbac   : > { %v2550_v55 = vpop.xlane.xlu1 %2549 }
 0xbad   : > { %v2554_v56 = vsub.f32 %v2542_v42, %v2550_v55 }
 0xbaf   : > { %v2556_v57 = vmul.f32 1.442695, %v2554_v56 }
 0xbb0   : > { %v2553_v58 = vpop.xlane.xlu1 %2552 }
 0xbb1   : > { %4631 = vpow2.f32 %v2556_v57  ;;  %v2555_v59 = vsub.f32 %v2545_v45, %v2553_v58 }
 0xbb3   : > { %v4628_v60 = vpop.eup %4627  ;;  %v2558_v61 = vmul.f32 1.442695, %v2555_v59 }
 0xbb4   : > { %v2439_v62 = vsel %vm799_vm1, %v4628_v60, 0.0 }
 0xbb5   : > { %v4630_v63 = vpop.eup %4629  ;;  %4633 = vpow2.f32 %v2558_v61  ;;  %2440 = vadd.xlane.f32.xlu1 %v2439_v62 }
 0xbb6   : > { %v2442_v4 = vsel %vm799_vm1, %v4630_v63, 0.0 }
 0xbb7   : > { %2443 = vadd.xlane.f32.xlu0 %v2442_v4 }
 0xbbb   : > { %v4632_v5 = vpop.eup %4631 }
 0xbbc   : > { %v2560_v6 = vsel %vm799_vm1, %v4632_v5, 0.0 }
 0xbbd   : > { %2561 = vadd.xlane.f32.xlu1 %v2560_v6 }
 0xbbf   : > { %v4634_v7 = vpop.eup %4633 }
 0xbc0   : > { %v2563_v8 = vsel %vm799_vm1, %v4634_v7, 0.0 }
 0xbc1   : > { %2564 = vadd.xlane.f32.xlu0 %v2563_v8  ;;  %v4599_v8 = vld [vmem:[%s6153_s3] sm:$0xff]  }
 0xbce   : > { %2450 = vrot.lane.b32.xlu1 %v5758_v24, %s5003_s27 }
 0xbd7   : > { %2571 = vrot.lane.b32.xlu0 %v5758_v24, %s6108_s10  ;;  %s6157_s10 = sld [smem:[#allocation32_spill]] }
 0xc42   : > { %v2441_v9 = vpop.xlane.xlu1 %2440 }
 0xc43   : > { %4635 = vrcp.f32 %v2441_v9  ;;  %v4600_v9 = vld [vmem:[%s6153_s3 + $0x8] sm:$0xff]  }
 0xc44   : > { %v2444_v10 = vpop.xlane.xlu0 %2443 }
 0xc45   : > { %4637 = vrcp.f32 %v2444_v10  ;;  %v4601_v10 = vld [vmem:[%s6154_s6] sm:$0xff]  }
 0xc4a   : > { %v2562_v11 = vpop.xlane.xlu1 %2561 }
 0xc4b   : > { %4639 = vrcp.f32 %v2562_v11  ;;  %v4602_v11 = vld [vmem:[%s6154_s6 + $0x8] sm:$0xff]  }
 0xc4d   : > { %v4636_v22 = vpop.eup %4635 }
 0xc4e   : > { %v2565_v12 = vpop.xlane.xlu0 %2564  ;;  %v2451_v23 = vpop.permute.xlu1 %2450  ;;  %v2447_v14 = vmul.f32 %v4636_v22, %v4628_v60  ;;  %v4603_v22 = vld [vmem:[%s6154_s6 + $0x10] sm:$0xff]  }
 0xc4f   : > { %v4638_v13 = vpop.eup %4637  ;;  %4641 = vrcp.f32 %v2565_v12  ;;  %4285 = vmatpush3.bf16.msra.mxu1 %v2451_v23  ;;  %v4604_v12 = vld [vmem:[%s6154_s6 + $0x18] sm:$0xff]   ;;  %v4605_v23 = vld [vmem:[%s6154_s6 + $0x20] sm:$0xff]  }
 0xc50   : > { %v2448_v0 = vmul.f32 %v4638_v13, %v4630_v63  ;;  %4296 = vmatprep.subr.bf16.mxu1 %v4996_v1  ;;  %v4606_v13 = vld [vmem:[%s6154_s6 + $0x28] sm:$0xff]  }
 0xc52   : > { %v2572_v2 = vpop.permute.xlu0 %2571  ;;  %v2449_v19 = vpack.c.bf16 %v2448_v0, %v2447_v14 }
 0xc54   : > { %4287 = vmatmul.mubr.msk.bf16.vlgmr.msra.gmra.mrb[36].mxu1 %vm799_vm1, %v2449_v19 }
 0xc55   : > { %4297 = vmatpush3.bf16.msra.mxu1 %v2572_v2  ;;  %4298 = vmatprep.mubr.msk.bf16.mxu1 %vm4997_vm0, %v4996_v1  ;;  %v4640_v20 = vpop.eup %4639 }
 0xc56   : > { %4310 = vmatprep.subr.bf16.mxu1 %v4996_v1  ;;  %v2568_v24 = vmul.f32 %v4640_v20, %v4632_v5 }
 0xc59   : > { %v4642_v21 = vpop.eup %4641 }
 0xc5a   : > { %v2569_v3 = vmul.f32 %v4642_v21, %v4634_v7 }
 0xc5c   : > { %v2570_v25 = vpack.c.bf16 %v2569_v3, %v2568_v24  ;;  %v3946_v3 = vld [vmem:[#allocation12] ss:$0 sm:$0xff] }
 0xc5e   : > { %4299 = vmatmul.mubr.msk.bf16.vlgmr.msra.gmra.mrb[40].mxu1 %vm799_vm1, %v2570_v25 }
 0xc5f   : > { %4314 = vmatprep.mubr.msk.bf16.mxu1 %vm4997_vm0, %v4996_v1  ;;  %4311 = vmatpush3.bf16.msra.mxu1 %v4599_v8 }
 0xc60   : > { %4312 = vmatprep.subr.bf16.mxu1 %v4996_v1 }
 0xc63   : > { %4313 = vmatpush3.bf16.msra.mxu1 %v4600_v9 }
 0xc64   : > { %4338 = vmatprep.subr.bf16.mxu1 %v4996_v1 }
 0xd27   : > { %v2490_v27 = vpop.f32.mrb[36].mxu1 }
 0xd28   : > { %v4288_v28 = vpop.f32.mrb[37].mxu1 }
 0xd29   : > { %v2493_v30 = vpop.f32.mrb[38].mxu1 }
 0xd2a   : > { %v4289_v32 = vpop.f32.mrb[39].mxu1 }
 0xd31   : > { %v2611_v34 = vpop.f32.mrb[40].mxu1 }
 0xd32   : > { %v4300_v35 = vpop.f32.mrb[41].mxu1 }
 0xd33   : > { %v2614_v36 = vpop.f32.mrb[42].mxu1 }
 0xd34   : > { %v4558_v37 = vpack.i.bf16 %v2614_v36, %v2611_v34  ;;  %v4301_v38 = vpop.f32.mrb[43].mxu1  ;;  %v4607_v36 = vld [vmem:[%s6154_s6 + $0x30] sm:$0xff]  }
 0xd35   : > { %v3948_v38 = vld [vmem:[%s6156_s30] ss:$0 sm:$0xff] }
 0xd36   : > { %4559 = vrot.lane.b32.xlu1 %v4558_v37, %s6107_s28  ;;  %v4608_v37 = vld [vmem:[%s6154_s6 + $0x38] sm:$0xff]  }
 0xda8   : > { %v4560_v41 = vpop.permute.xlu1 %4559 }
 0xda9   : > { %v4562_v42 = vunpack.i.h.bf16 %v4560_v41  ;;  %v4561_v43 = vunpack.i.l.bf16 %v4560_v41 }
 0xdab   : > { %v2627_v44 = vsel %vm799_vm1, %v2493_v30, %v4562_v42  ;;  %v2626_v45 = vsel %vm799_vm1, %v2490_v27, %v4561_v43  ;;  %v3947_v30 = vld [vmem:[%s6155_s4] ss:$0 sm:$0xff] }
 0xdac   : > { %v2628_v46 = vpack.c.bf16 %v2627_v44, %v2626_v45 }
 0xdae   : > { %4307 = vmatmul.mubr.msk.bf16.vlgmr.msra.gmra.mrb[48].mxu0 %vm1212_vm12, %v2628_v46 }
 0xdaf   : > { %4334 = vmatprep.mubr.msk.bf16.mxu0 %vm4997_vm0, %v4996_v1  ;;  %4319 = vmatpush3.bf16.msra.mxu0 %v4601_v10 }
 0xdb0   : > { %4320 = vmatprep.subr.bf16.mxu0 %v4996_v1 }
 0xdb3   : > { %4321 = vmatpush3.bf16.msra.mxu0 %v4602_v11  ;;  %v4609_v11 = vld [vmem:[#allocation13 + $0x10] sm:$0xff]  }
 0xdb4   : > { %4322 = vmatprep.subr.bf16.mxu0 %v4996_v1 }
 0xdb7   : > { %4323 = vmatpush3.bf16.msra.mxu0 %v4603_v22  ;;  %v4610_v22 = vld [vmem:[#allocation13 + $0x18] sm:$0xff]  }
 0xdb8   : > { %4324 = vmatprep.subr.bf16.mxu0 %v4996_v1 }
 0xdbb   : > { %4325 = vmatpush3.bf16.msra.mxu0 %v4604_v12 }
 0xdbc   : > { %4326 = vmatprep.subr.bf16.mxu0 %v4996_v1 }
 0xdbf   : > { %4327 = vmatpush3.bf16.msra.mxu0 %v4605_v23 }
 0xdc0   : > { %4328 = vmatprep.subr.bf16.mxu0 %v4996_v1 }
 0xdc3   : > { %4329 = vmatpush3.bf16.msra.mxu0 %v4606_v13 }
 0xdc4   : > { %4330 = vmatprep.subr.bf16.mxu0 %v4996_v1 }
 0xdc7   : > { %4331 = vmatpush3.bf16.msra.mxu0 %v4607_v36 }
 0xdc8   : > { %4332 = vmatprep.subr.bf16.mxu0 %v4996_v1 }
 0xdcb   : > { %4333 = vmatpush3.bf16.msra.mxu0 %v4608_v37 }
 0xdcc   : > { %4364 = vmatprep.subr.bf16.mxu0 %v4996_v1 }
 0xe81   : > { %v2684_v48 = vpop.f32.mrb[48].mxu0 }
 0xe82   : > { %v2685_v49 = vadd.f32 %v3942_v47, %v2684_v48  ;;  %v4308_v50 = vpop.f32.mrb[49].mxu0 }
 0xe83   : > { %v2687_v51 = vpop.f32.mrb[50].mxu0  ;;  %v3952_v50 = vld [vmem:[%s6157_s10] ss:$0 sm:$0xff] }
 0xe84   : > { %v2691_v52 = vadd.f32 %v2685_v49, %v5736_v40  ;;  %v2688_v53 = vadd.f32 %v3942_v47, %v2687_v51  ;;  %v4309_v54 = vpop.f32.mrb[51].mxu0 }
 0xe86   : > { %v5818_v55 = vmul.f32 %v2691_v52, %v5712_v15  ;;  %v2692_v56 = vadd.f32 %v2688_v53, %v5733_v39 }
 0xe88   : > { %v5822_v57 = vmul.f32 %v2692_v56, %v5714_v18  ;;  %v2697_v58 = vsel %vm1212_vm12, %v5818_v55, 0.0 }
 0xe89   : > { %2698 = vadd.xlane.f32.xlu1 %v2697_v58 }
 0xe8a   : > { %v2700_v59 = vsel %vm1212_vm12, %v5822_v57, 0.0 }
 0xe8b   : > { %2701 = vadd.xlane.f32.xlu0 %v2700_v59 }
 0xf16   : > { %v2699_v60 = vpop.xlane.xlu1 %2698 }
 0xf17   : > { %v2703_v40 = vmul.f32 0.03125, %v2699_v60 }
 0xf18   : > { %v2702_v61 = vpop.xlane.xlu0 %2701 }
 0xf19   : > { %v2705_v62 = vsub.f32 %v5818_v55, %v2703_v40  ;;  %v2704_v63 = vmul.f32 0.03125, %v2702_v61 }
 0xf1b   : > { %v2706_v4 = vsub.f32 %v5822_v57, %v2704_v63  ;;  %v2707_v39 = vmul.f32 %v2705_v62, %v2705_v62 }
 0xf1d   : > { %v2709_v5 = vsel %vm1212_vm12, %v2707_v39, 0.0  ;;  %v2708_v6 = vmul.f32 %v2706_v4, %v2706_v4 }
 0xf1e   : > { %2710 = vadd.xlane.f32.xlu0 %v2709_v5 }
 0xf1f   : > { %v2712_v7 = vsel %vm1212_vm12, %v2708_v6, 0.0 }
 0xf20   : > { %2713 = vadd.xlane.f32.xlu1 %v2712_v7 }
 0xfab   : > { %v2711_v14 = vpop.xlane.xlu0 %2710 }
 0xfac   : > { %v2715_v0 = vmul.f32 0.03125, %v2711_v14 }
 0xfad   : > { %v2714_v2 = vpop.xlane.xlu1 %2713 }
 0xfae   : > { %v2717_v19 = vadd.f32 1e-05, %v2715_v0  ;;  %v2716_v20 = vmul.f32 0.03125, %v2714_v2 }
 0xfb0   : > { %4643 = vrsqrt.f32 %v2717_v19  ;;  %v2718_v21 = vadd.f32 1e-05, %v2716_v20  ;;  %v3961_v20 = vld [vmem:[#allocation9 + $0x1] ss:$0 sm:$0xff] }
 0xfb2   : > { %4645 = vrsqrt.f32 %v2718_v21 }
 0xfba   : > { %v4644_v24 = vpop.eup %4643 }
 0xfbb   : > { %v2721_v25 = vmul.f32 %v4644_v24, %v2705_v62 }
 0xfbc   : > { %v4646_v26 = vpop.eup %4645 }
 0xfbd   : > { %v2729_v27 = vmul.f32 %v3946_v3, %v2721_v25  ;;  %v2722_v28 = vmul.f32 %v4646_v26, %v2706_v4  ;;  %v3962_v26 = vld [vmem:[#allocation10 + $0x1] ss:$0 sm:$0xff] }
 0xfbf   : > { %v2730_v32 = vmul.f32 %v3946_v3, %v2722_v28  ;;  %v2737_v33 = vadd.f32 %v3947_v30, %v2729_v27 }
 0xfc1   : > { %v2738_v34 = vadd.f32 %v3947_v30, %v2730_v32 }
 0xfc3   : > { %v2739_v35 = vpack.c.bf16 %v2738_v34, %v2737_v33  ;;  %v3965_v33 = vld [vmem:[%s6076_s12 + $0x1] ss:$0 sm:$0xff] }
 0xfc5   : > { %4315 = vmatmul.mubr.msk.bf16.vlgmr.msra.gmra.mrb[44].mxu1 %vm1212_vm12, %v2739_v35 }
 0xfc6   : > { %4342 = vmatprep.mubr.msk.bf16.mxu1 %vm4997_vm0, %v4996_v1  ;;  %4339 = vmatpush3.bf16.msra.mxu1 %v4609_v11 }
 0xfc7   : > { %4340 = vmatprep.subr.bf16.mxu1 %v4996_v1 }
 0xfca   : > { %4341 = vmatpush3.bf16.msra.mxu1 %v4610_v22 }
 0xfcb   : > { %4346 = vmatprep.subr.bf16.mxu1 %v4996_v1 }
0x1098   : > { %v2817_v41 = vpop.f32.mrb[44].mxu1 }
0x1099   : > { %v2818_v42 = vadd.f32 %v3948_v38, %v2817_v41  ;;  %v4316_v43 = vpop.f32.mrb[45].mxu1 }
0x109a   : > { %v2820_v44 = vpop.f32.mrb[46].mxu1 }
0x109b   : > { %v2821_v45 = vadd.f32 %v3948_v38, %v2820_v44  ;;  %v4317_v46 = vpop.f32.mrb[47].mxu1  ;;  %v2824_v47 = vmax.f32 %v2818_v42, 0.0 }
0x109d   : > { %v2825_v48 = vmax.f32 %v2821_v45, 0.0 }
0x109f   : > { %v2826_v49 = vpack.c.bf16 %v2825_v48, %v2824_v47 }
0x10a1   : > { %4335 = vmatmul.mubr.bf16.vlgmr.msra.gmra.mrb[52].mxu0 %v2826_v49 }
0x10a2   : > { %4366 = vmatprep.mubr.msk.bf16.mxu0 %vm4997_vm0, %v4996_v1 }
0x1174   : > { %v2915_v51 = vpop.f32.mrb[52].mxu0 }
0x1175   : > { %v2916_v52 = vadd.f32 %v3952_v50, %v2915_v51  ;;  %v4336_v53 = vpop.f32.mrb[53].mxu0 }
0x1176   : > { %v2918_v54 = vpop.f32.mrb[54].mxu0 }
0x1177   : > { %v2922_v56 = vadd.f32 %v2916_v52, %v5818_v55  ;;  %v2919_v58 = vadd.f32 %v3952_v50, %v2918_v54  ;;  %v4337_v59 = vpop.f32.mrb[55].mxu0 }
0x1179   : > { %v5888_v60 = vmul.f32 %v2922_v56, %v5712_v15  ;;  %v2923_v40 = vadd.f32 %v2919_v58, %v5822_v57 }
0x117b   : > { %v5892_v61 = vmul.f32 %v2923_v40, %v5714_v18  ;;  %v2930_v62 = vsel %vm1212_vm12, %v5888_v60, 0.0 }
0x117c   : > { %2931 = vadd.xlane.f32.xlu0 %v2930_v62 }
0x117d   : > { %v2933_v63 = vsel %vm1212_vm12, %v5892_v61, 0.0 }
0x117e   : > { %2934 = vadd.xlane.f32.xlu1 %v2933_v63 }
0x1209   : > { %v2932_v4 = vpop.xlane.xlu0 %2931 }
0x120a   : > { %v2936_v55 = vmul.f32 0.03125, %v2932_v4 }
0x120b   : > { %v2935_v39 = vpop.xlane.xlu1 %2934 }
0x120c   : > { %v2938_v5 = vsub.f32 %v5888_v60, %v2936_v55  ;;  %v2937_v6 = vmul.f32 0.03125, %v2935_v39 }
0x120e   : > { %v2939_v7 = vsub.f32 %v5892_v61, %v2937_v6  ;;  %v2940_v57 = vmul.f32 %v2938_v5, %v2938_v5 }
0x1210   : > { %v2942_v8 = vsel %vm1212_vm12, %v2940_v57, 0.0  ;;  %v2941_v9 = vmul.f32 %v2939_v7, %v2939_v7 }
0x1211   : > { %2943 = vadd.xlane.f32.xlu0 %v2942_v8 }
0x1212   : > { %v2945_v10 = vsel %vm1212_vm12, %v2941_v9, 0.0 }
0x1213   : > { %2946 = vadd.xlane.f32.xlu1 %v2945_v10 }
0x129e   : > { %v2944_v12 = vpop.xlane.xlu0 %2943 }
0x129f   : > { %v2948_v23 = vmul.f32 0.03125, %v2944_v12 }
0x12a0   : > { %v2947_v13 = vpop.xlane.xlu1 %2946 }
0x12a1   : > { %v2950_v14 = vadd.f32 1e-05, %v2948_v23  ;;  %v2949_v0 = vmul.f32 0.03125, %v2947_v13 }
0x12a3   : > { %4647 = vrsqrt.f32 %v2950_v14  ;;  %v2951_v2 = vadd.f32 1e-05, %v2949_v0 }
0x12a5   : > { %4649 = vrsqrt.f32 %v2951_v2 }
0x12ad   : > { %v4648_v19 = vpop.eup %4647 }
0x12ae   : > { %v2954_v21 = vmul.f32 %v4648_v19, %v2938_v5 }
0x12af   : > { %v4650_v24 = vpop.eup %4649 }
0x12b0   : > { %v2962_v3 = vmul.f32 %v3961_v20, %v2954_v21  ;;  %v2955_v25 = vmul.f32 %v4650_v24, %v2939_v7 }
0x12b2   : > { %v2963_v27 = vmul.f32 %v3961_v20, %v2955_v25  ;;  %v2970_v28 = vadd.f32 %v3962_v26, %v2962_v3 }
0x12b4   : > { %v2971_v30 = vadd.f32 %v3962_v26, %v2963_v27 }
0x12b6   : > { %v2972_v32 = vpack.c.bf16 %v2971_v30, %v2970_v28 }
0x12b8   : > { %4343 = vmatmul.mubr.msk.bf16.vlgmr.msra.gmra.mrb[48].mxu1 %vm1212_vm12, %v2972_v32 }
0x12b9   : > { %4348 = vmatprep.mubr.msk.bf16.mxu1 %vm4997_vm0, %v4996_v1 }
0x138b   : > { %v3042_v34 = vpop.f32.mrb[48].mxu1 }
0x138c   : > { %v4344_v35 = vpop.f32.mrb[49].mxu1  ;;  %v3043_v37 = vadd.f32 %v3965_v33, %v3042_v34 }
0x138d   : > { %v3045_v36 = vpop.f32.mrb[50].mxu1 }
0x138e   : > { %v3046_v38 = vadd.f32 %v3965_v33, %v3045_v36  ;;  %v4345_v41 = vpop.f32.mrb[51].mxu1 }
0x1390   : > { %v5910_v42 = vpack.c.bf16 %v3046_v38, %v3043_v37 }
0x1392   : > { %3051 = vrot.lane.b32.xlu0 %v5910_v42, %s5001_s15  ;;  %s6159_s15 = smov 16  }
0x1396   : > { %3172 = vrot.lane.b32.xlu0 %v5910_v42, %s5000_s24  ;;  %s6158_s24 = smov 48  }
0x139a   : > { %3170 = vrot.lane.b32.xlu0 %v5910_v42, %s5002_s19 }
0x1404   : > { %v3052_v43 = vpop.permute.xlu0 %3051 }
0x1405   : > { %v3057_v44 = vsel %vm799_vm1, %v3052_v43, 0 }
0x1406   : > { %4347 = vmatpush3.bf16.xpose.msra.mxu1 %v3057_v44 }
0x1407   : > { %4352 = vmatprep.subr.bf16.mxu1 %v4996_v1 }
0x1408   : > { %v3173_v10 = vpop.permute.xlu0 %3172 }
0x1409   : > { %v3178_v22 = vsel %vm799_vm1, %v3173_v10, 0 }
0x140c   : > { %v3171_v12 = vpop.permute.xlu0 %3170 }
0x140d   : > { %4349 = vmatmul.mubr.msk.bf16.vlgmr.msra.gmra.mrb[52].mxu1 %vm799_vm1, %v5910_v42 }
0x140e   : > { %4354 = vmatprep.mubr.msk.bf16.mxu1 %vm4997_vm0, %v4996_v1 }
0x14e0   : > { %v3093_v45 = vpop.f32.mrb[52].mxu1 }
0x14e1   : > { %v3094_v46 = vadd.f32 %v3093_v45, %v5777_v29  ;;  %v4350_v47 = vpop.f32.mrb[53].mxu1 }
0x14e2   : > { %v3096_v48 = vpop.f32.mrb[54].mxu1 }
0x14e3   : > { %v3097_v49 = vadd.f32 %v3096_v48, %v5779_v31  ;;  %v4351_v50 = vpop.f32.mrb[55].mxu1  ;;  %v3100_v51 = vsel %vm799_vm1, %v3094_v46, -inf  ;;  %v4611_v48 = vld [vmem:[#allocation15 + $0x10] sm:$0xff]  }
0x14e4   : > { %3101 = vmax.xlane.f32.xlu1 %v3100_v51 }
0x14e5   : > { %v3103_v52 = vsel %vm799_vm1, %v3097_v49, -inf }
0x14e8   : > { %3104 = vmax.xlane.f32.xlu1 %v3103_v52 }
0x1571   : > { %v3102_v53 = vpop.xlane.xlu1 %3101 }
0x1572   : > { %v3106_v54 = vsub.f32 %v3094_v46, %v3102_v53 }
0x1574   : > { %v3108_v56 = vmul.f32 1.442695, %v3106_v54 }
0x1575   : > { %v3105_v58 = vpop.xlane.xlu1 %3104 }
0x1576   : > { %4651 = vpow2.f32 %v3108_v56  ;;  %v3107_v59 = vsub.f32 %v3097_v49, %v3105_v58 }
0x1578   : > { %v3110_v40 = vmul.f32 1.442695, %v3107_v59 }
0x157a   : > { %4653 = vpow2.f32 %v3110_v40 }
0x1580   : > { %v4652_v62 = vpop.eup %4651 }
0x1581   : > { %v3112_v63 = vsel %vm799_vm1, %v4652_v62, 0.0 }
0x1582   : > { %3113 = vadd.xlane.f32.xlu1 %v3112_v63  ;;  %v3973_v63 = vld [vmem:[%s6078_s14 + $0x1] ss:$0 sm:$0xff] }
0x1584   : > { %v4654_v4 = vpop.eup %4653 }
0x1585   : > { %v3115_v55 = vsel %vm799_vm1, %v4654_v4, 0.0 }
0x1586   : > { %3116 = vadd.xlane.f32.xlu1 %v3115_v55 }
0x1597   : > { %3123 = vrot.lane.b32.xlu1 %v5910_v42, %s5003_s27 }
0x160f   : > { %v3114_v39 = vpop.xlane.xlu1 %3113 }
0x1610   : > { %4655 = vrcp.f32 %v3114_v39 }
0x1613   : > { %v3117_v5 = vpop.xlane.xlu1 %3116 }
0x1614   : > { %4657 = vrcp.f32 %v3117_v5 }
0x1617   : > { %v3124_v6 = vpop.permute.xlu1 %3123 }
0x1618   : > { %4353 = vmatpush3.bf16.msra.mxu1 %v3124_v6 }
0x1619   : > { %4358 = vmatprep.subr.bf16.mxu1 %v4996_v1 }
0x161a   : > { %v4656_v7 = vpop.eup %4655 }
0x161b   : > { %v3120_v8 = vmul.f32 %v4656_v7, %v4652_v62 }
0x161e   : > { %v4658_v57 = vpop.eup %4657 }
0x161f   : > { %v3121_v9 = vmul.f32 %v4658_v57, %v4654_v4 }
0x1621   : > { %v3122_v11 = vpack.c.bf16 %v3121_v9, %v3120_v8 }
0x1623   : > { %4355 = vmatmul.mubr.msk.bf16.vlgmr.msra.gmra.mrb[56].mxu1 %vm799_vm1, %v3122_v11 }
0x1624   : > { %4359 = vmatpush3.bf16.xpose.msra.mxu1 %v3178_v22  ;;  %4360 = vmatprep.mubr.msk.bf16.mxu1 %vm4997_vm0, %v4996_v1 }
0x1625   : > { %4370 = vmatprep.subr.bf16.mxu1 %v4996_v1 }
0x162b   : > { %4361 = vmatmul.mubr.msk.bf16.vlgmr.msra.gmra.mrb[60].mxu1 %vm799_vm1, %v3171_v12 }
0x162c   : > { %4374 = vmatprep.mubr.msk.bf16.mxu1 %vm4997_vm0, %v4996_v1  ;;  %4371 = vmatpush3.bf16.msra.mxu1 %v4611_v48 }
0x162d   : > { %4372 = vmatprep.subr.bf16.mxu1 %v4996_v1 }
0x16f6   : > { %v3163_v23 = vpop.f32.mrb[56].mxu1 }
0x16f7   : > { %v4356_v13 = vpop.f32.mrb[57].mxu1 }
0x16f8   : > { %v3166_v14 = vpop.f32.mrb[58].mxu1 }
0x16f9   : > { %v4357_v0 = vpop.f32.mrb[59].mxu1 }
0x16fe   : > { %v3214_v2 = vpop.f32.mrb[60].mxu1 }
0x16ff   : > { %v3215_v19 = vadd.f32 %v3214_v2, %v5777_v29  ;;  %v4362_v20 = vpop.f32.mrb[61].mxu1 }
0x1700   : > { %v3217_v21 = vpop.f32.mrb[62].mxu1 }
0x1701   : > { %v3218_v24 = vadd.f32 %v3217_v21, %v5779_v31  ;;  %v4363_v3 = vpop.f32.mrb[63].mxu1  ;;  %v3221_v25 = vsel %vm799_vm1, %v3215_v19, -inf  ;;  %v4613_v21 = vld [vmem:[%s6153_s3 + $0x10] sm:$0xff]  }
0x1702   : > { %3222 = vmax.xlane.f32.xlu0 %v3221_v25  ;;  %v4615_v3 = vld [vmem:[%s6154_s6 + $0x40] sm:$0xff]   ;;  %v4616_v25 = vld [vmem:[%s6154_s6 + $0x48] sm:$0xff]  }
0x1703   : > { %v3224_v26 = vsel %vm799_vm1, %v3218_v24, -inf }
0x1704   : > { %3225 = vmax.xlane.f32.xlu1 %v3224_v26  ;;  %v4617_v26 = vld [vmem:[%s6154_s6 + $0x50] sm:$0xff]  }
0x178f   : > { %v3223_v27 = vpop.xlane.xlu0 %3222 }
0x1790   : > { %v3227_v28 = vsub.f32 %v3215_v19, %v3223_v27  ;;  %v4618_v27 = vld [vmem:[%s6154_s6 + $0x58] sm:$0xff]  }
0x1791   : > { %v3226_v30 = vpop.xlane.xlu1 %3225 }
0x1792   : > { %v3229_v32 = vmul.f32 1.442695, %v3227_v28  ;;  %v3228_v33 = vsub.f32 %v3218_v24, %v3226_v30  ;;  %v4614_v24 = vld [vmem:[%s6153_s3 + $0x18] sm:$0xff]   ;;  %v4619_v28 = vld [vmem:[%s6154_s6 + $0x60] sm:$0xff]   ;;  %v4620_v30 = vld [vmem:[%s6154_s6 + $0x68] sm:$0xff]  }
0x1794   : > { %4659 = vpow2.f32 %v3229_v32  ;;  %v3231_v34 = vmul.f32 1.442695, %v3228_v33 }
0x1796   : > { %4661 = vpow2.f32 %v3231_v34 }
0x179e   : > { %v4660_v29 = vpop.eup %4659 }
0x179f   : > { %v3233_v35 = vsel %vm799_vm1, %v4660_v29, 0.0 }
0x17a0   : > { %v4662_v36 = vpop.eup %4661  ;;  %3234 = vadd.xlane.f32.xlu0 %v3233_v35 }
0x17a1   : > { %v3236_v31 = vsel %vm799_vm1, %v4662_v36, 0.0 }
0x17a4   : > { %3237 = vadd.xlane.f32.xlu0 %v3236_v31 }
0x17ba   : > { %3244 = vrot.lane.b32.xlu0 %v5910_v42, %s6158_s24  ;;  %v4612_v42 = vld [vmem:[#allocation15 + $0x18] sm:$0xff]   ;;  %s4020_s24 = sshll.u32 %s6168_s29, 4 }
0x17bb   : > { %4373 = vmatpush3.bf16.msra.mxu1 %v4612_v42  ;;  %s790_s3 = scalar_lea.vmem %s6162_s1, %s4020_s24 }
0x17bc   : > { %4386 = vmatprep.subr.bf16.mxu1 %v4996_v1 }
0x182d   : > { %v3235_v37 = vpop.xlane.xlu0 %3234 }
0x182e   : > { %4663 = vrcp.f32 %v3235_v37  ;;  %v3978_v37 = vld [vmem:[#allocation12 + $0x1] ss:$0 sm:$0xff] }
0x1831   : > { %v3238_v38 = vpop.xlane.xlu0 %3237 }
0x1832   : > { %4665 = vrcp.f32 %v3238_v38 }
0x1835   : > { %v3245_v41 = vpop.permute.xlu0 %3244 }
0x1836   : > { %4365 = vmatpush3.bf16.msra.mxu0 %v3245_v41 }
0x1837   : > { %4378 = vmatprep.subr.bf16.mxu0 %v4996_v1 }
0x1838   : > { %v4664_v43 = vpop.eup %4663 }
0x1839   : > { %v3241_v45 = vmul.f32 %v4664_v43, %v4660_v29 }
0x183c   : > { %v4666_v44 = vpop.eup %4665 }
0x183d   : > { %v3242_v46 = vmul.f32 %v4666_v44, %v4662_v36 }
0x183f   : > { %v3243_v47 = vpack.c.bf16 %v3242_v46, %v3241_v45  ;;  %v3979_v45 = vld [vmem:[%s6155_s4 + $0x1] ss:$0 sm:$0xff] }
0x1841   : > { %4367 = vmatmul.mubr.msk.bf16.vlgmr.msra.gmra.mrb[56].mxu0 %vm799_vm1, %v3243_v47 }
0x1842   : > { %4382 = vmatprep.mubr.msk.bf16.mxu0 %vm4997_vm0, %v4996_v1  ;;  %4379 = vmatpush3.bf16.msra.mxu0 %v4613_v21 }
0x1843   : > { %4380 = vmatprep.subr.bf16.mxu0 %v4996_v1 }
0x1846   : > { %4381 = vmatpush3.bf16.msra.mxu0 %v4614_v24 }
0x1914   : > { %v3284_v49 = vpop.f32.mrb[56].mxu0 }
0x1915   : > { %v4368_v50 = vpop.f32.mrb[57].mxu0 }
0x1916   : > { %v3287_v51 = vpop.f32.mrb[58].mxu0  ;;  %v4622_v50 = vld [vmem:[%s6154_s6 + $0x78] sm:$0xff]  }
0x1917   : > { %v4563_v52 = vpack.i.bf16 %v3287_v51, %v3284_v49  ;;  %v4369_v53 = vpop.f32.mrb[59].mxu0  ;;  %v4621_v49 = vld [vmem:[%s6154_s6 + $0x70] sm:$0xff]   ;;  %v4002_v51 = vld [vmem:[%s6156_s30 + $0x1] ss:$0 sm:$0xff] }
0x1919   : > { %4564 = vrot.lane.b32.xlu1 %v4563_v52, %s6159_s15 }
0x198b   : > { %v4565_v54 = vpop.permute.xlu1 %4564 }
0x198c   : > { %v4567_v56 = vunpack.i.h.bf16 %v4565_v54  ;;  %v4566_v58 = vunpack.i.l.bf16 %v4565_v54 }
0x198e   : > { %v3300_v59 = vsel %vm799_vm1, %v3166_v14, %v4567_v56  ;;  %v3299_v40 = vsel %vm799_vm1, %v3163_v23, %v4566_v58 }
0x198f   : > { %v3301_v62 = vpack.c.bf16 %v3300_v59, %v3299_v40 }
0x1991   : > { %4375 = vmatmul.mubr.msk.bf16.vlgmr.msra.gmra.mrb[64].mxu1 %vm1212_vm12, %v3301_v62 }
0x1992   : > { %4402 = vmatprep.mubr.msk.bf16.mxu1 %vm4997_vm0, %v4996_v1  ;;  %4387 = vmatpush3.bf16.msra.mxu1 %v4615_v3 }
0x1993   : > { %4388 = vmatprep.subr.bf16.mxu1 %v4996_v1 }
0x1996   : > { %4389 = vmatpush3.bf16.msra.mxu1 %v4616_v25 }
0x1997   : > { %4390 = vmatprep.subr.bf16.mxu1 %v4996_v1 }
0x199a   : > { %4391 = vmatpush3.bf16.msra.mxu1 %v4617_v26 }
0x199b   : > { %4392 = vmatprep.subr.bf16.mxu1 %v4996_v1 }
0x199e   : > { %4393 = vmatpush3.bf16.msra.mxu1 %v4618_v27  ;;  %v4015_v27 = vld [vmem:[%s6160_s17] ss:$0 sm:$0xff] }
0x199f   : > { %4394 = vmatprep.subr.bf16.mxu1 %v4996_v1 }
0x19a2   : > { %4395 = vmatpush3.bf16.msra.mxu1 %v4619_v28 }
0x19a3   : > { %4396 = vmatprep.subr.bf16.mxu1 %v4996_v1 }
0x19a6   : > { %4397 = vmatpush3.bf16.msra.mxu1 %v4620_v30 }
0x19a7   : > { %4398 = vmatprep.subr.bf16.mxu1 %v4996_v1 }
0x19aa   : > { %4399 = vmatpush3.bf16.msra.mxu1 %v4621_v49 }
0x19ab   : > { %4400 = vmatprep.subr.bf16.mxu1 %v4996_v1  ;;  %v4006_v1 = vld [vmem:[%s6157_s10 + $0x1] ss:$0 sm:$0xff] }
0x19ae   : > { %4401 = vmatpush3.bf16.msra.mxu1 %v4622_v50 }
0x1a64   : > { %v3357_v4 = vpop.f32.mrb[64].mxu1 }
0x1a65   : > { %v3358_v55 = vadd.f32 %v3973_v63, %v3357_v4  ;;  %v4376_v39 = vpop.f32.mrb[65].mxu1 }
0x1a66   : > { %v3360_v5 = vpop.f32.mrb[66].mxu1 }
0x1a67   : > { %v3364_v6 = vadd.f32 %v3358_v55, %v5888_v60  ;;  %v3361_v7 = vadd.f32 %v3973_v63, %v3360_v5  ;;  %v4377_v57 = vpop.f32.mrb[67].mxu1 }
0x1a69   : > { %v5966_v8 = vmul.f32 %v3364_v6, %v5712_v15  ;;  %v3365_v9 = vadd.f32 %v3361_v7, %v5892_v61 }
0x1a6b   : > { %v5970_v10 = vmul.f32 %v3365_v9, %v5714_v18  ;;  %v3372_v11 = vsel %vm1212_vm12, %v5966_v8, 0.0 }
0x1a6c   : > { %3373 = vadd.xlane.f32.xlu1 %v3372_v11 }
0x1a6d   : > { %v3375_v22 = vsel %vm1212_vm12, %v5970_v10, 0.0 }
0x1a6e   : > { %3376 = vadd.xlane.f32.xlu0 %v3375_v22 }
0x1af9   : > { %v3374_v12 = vpop.xlane.xlu1 %3373 }
0x1afa   : > { %v3378_v60 = vmul.f32 0.03125, %v3374_v12 }
0x1afb   : > { %v3377_v23 = vpop.xlane.xlu0 %3376 }
0x1afc   : > { %v3380_v13 = vsub.f32 %v5966_v8, %v3378_v60  ;;  %v3379_v14 = vmul.f32 0.03125, %v3377_v23 }
0x1afe   : > { %v3381_v0 = vsub.f32 %v5970_v10, %v3379_v14  ;;  %v3382_v61 = vmul.f32 %v3380_v13, %v3380_v13 }
0x1b00   : > { %v3384_v2 = vsel %vm1212_vm12, %v3382_v61, 0.0  ;;  %v3383_v19 = vmul.f32 %v3381_v0, %v3381_v0 }
0x1b01   : > { %3385 = vadd.xlane.f32.xlu0 %v3384_v2 }
0x1b02   : > { %v3387_v20 = vsel %vm1212_vm12, %v3383_v19, 0.0 }
0x1b03   : > { %3388 = vadd.xlane.f32.xlu1 %v3387_v20 }
0x1b8e   : > { %v3386_v32 = vpop.xlane.xlu0 %3385 }
0x1b8f   : > { %v3390_v33 = vmul.f32 0.03125, %v3386_v32  ;;  %v4016_v32 = vld [vmem:[%s6161_s23] ss:$0 sm:$0xff] }
0x1b90   : > { %v3389_v34 = vpop.xlane.xlu1 %3388 }
0x1b91   : > { %v3392_v29 = vadd.f32 1e-05, %v3390_v33  ;;  %v3391_v35 = vmul.f32 0.03125, %v3389_v34 }
0x1b93   : > { %4667 = vrsqrt.f32 %v3392_v29  ;;  %v3393_v36 = vadd.f32 1e-05, %v3391_v35 }
0x1b95   : > { %4669 = vrsqrt.f32 %v3393_v36 }
0x1b9d   : > { %v4668_v31 = vpop.eup %4667 }
0x1b9e   : > { %v3396_v38 = vmul.f32 %v4668_v31, %v3380_v13 }
0x1b9f   : > { %v4670_v41 = vpop.eup %4669 }
0x1ba0   : > { %v3404_v43 = vmul.f32 %v3978_v37, %v3396_v38  ;;  %v3397_v44 = vmul.f32 %v4670_v41, %v3381_v0 }
0x1ba2   : > { %v3405_v46 = vmul.f32 %v3978_v37, %v3397_v44  ;;  %v3412_v47 = vadd.f32 %v3979_v45, %v3404_v43 }
0x1ba4   : > { %v3413_v48 = vadd.f32 %v3979_v45, %v3405_v46 }
0x1ba6   : > { %v3414_v42 = vpack.c.bf16 %v3413_v48, %v3412_v47 }
0x1ba8   : > { %4383 = vmatmul.mubr.msk.bf16.vlgmr.msra.gmra.mrb[60].mxu0 %vm1212_vm12, %v3414_v42 }
0x1c7b   : > { %v3496_v52 = vpop.f32.mrb[60].mxu0 }
0x1c7c   : > { %v3497_v53 = vadd.f32 %v4002_v51, %v3496_v52  ;;  %v4384_v54 = vpop.f32.mrb[61].mxu0 }
0x1c7d   : > { %v3499_v56 = vpop.f32.mrb[62].mxu0 }
0x1c7e   : > { %v3500_v58 = vadd.f32 %v4002_v51, %v3499_v56  ;;  %v4385_v59 = vpop.f32.mrb[63].mxu0  ;;  %v3503_v40 = vmax.f32 %v3497_v53, 0.0 }
0x1c80   : > { %v3504_v62 = vmax.f32 %v3500_v58, 0.0 }
0x1c82   : > { %v3505_v63 = vpack.c.bf16 %v3504_v62, %v3503_v40 }
0x1c84   : > { %4403 = vmatmul.mubr.bf16.vlgmr.msra.gmra.mrb[68].mxu1 %v3505_v63 }
0x1d57   : > { %v3594_v4 = vpop.f32.mrb[68].mxu1 }
0x1d58   : > { %v3595_v55 = vadd.f32 %v4006_v1, %v3594_v4  ;;  %v4404_v39 = vpop.f32.mrb[69].mxu1 }
0x1d59   : > { %v3597_v5 = vpop.f32.mrb[70].mxu1 }
0x1d5a   : > { %v3601_v6 = vadd.f32 %v3595_v55, %v5966_v8  ;;  %v3598_v7 = vadd.f32 %v4006_v1, %v3597_v5  ;;  %v4405_v57 = vpop.f32.mrb[71].mxu1 }
0x1d5c   : > { %v3602_v9 = vadd.f32 %v3598_v7, %v5970_v10  ;;  %v3603_v11 = vmul.f32 %v3601_v6, %v5712_v15 }
0x1d5e   : > { %v3607_v22 = vsel %vm1212_vm12, %v3603_v11, 0.0  ;;  %v3604_v12 = vmul.f32 %v3602_v9, %v5714_v18 }
0x1d5f   : > { %3608 = vadd.xlane.f32.xlu0 %v3607_v22 }
0x1d60   : > { %v3610_v60 = vsel %vm1212_vm12, %v3604_v12, 0.0 }
0x1d61   : > { %3611 = vadd.xlane.f32.xlu1 %v3610_v60 }
0x1dec   : > { %v3609_v23 = vpop.xlane.xlu0 %3608 }
0x1ded   : > { %v3613_v13 = vmul.f32 0.03125, %v3609_v23 }
0x1dee   : > { %v3612_v14 = vpop.xlane.xlu1 %3611 }
0x1def   : > { %v3615_v0 = vsub.f32 %v3603_v11, %v3613_v13  ;;  %v3614_v61 = vmul.f32 0.03125, %v3612_v14 }
0x1df1   : > { %v3616_v8 = vsub.f32 %v3604_v12, %v3614_v61  ;;  %v3617_v2 = vmul.f32 %v3615_v0, %v3615_v0 }
0x1df3   : > { %v3619_v10 = vsel %vm1212_vm12, %v3617_v2, 0.0  ;;  %v3618_v15 = vmul.f32 %v3616_v8, %v3616_v8 }
0x1df4   : > { %3620 = vadd.xlane.f32.xlu0 %v3619_v10 }
0x1df5   : > { %v3622_v19 = vsel %vm1212_vm12, %v3618_v15, 0.0 }
0x1df6   : > { %3623 = vadd.xlane.f32.xlu1 %v3622_v19 }
0x1e81   : > { %v3621_v18 = vpop.xlane.xlu0 %3620 }
0x1e82   : > { %v3625_v20 = vmul.f32 0.03125, %v3621_v18 }
0x1e83   : > { %v3624_v21 = vpop.xlane.xlu1 %3623 }
0x1e84   : > { %v3627_v24 = vadd.f32 1e-05, %v3625_v20  ;;  %v3626_v3 = vmul.f32 0.03125, %v3624_v21 }
0x1e86   : > { %4671 = vrsqrt.f32 %v3627_v24  ;;  %v3628_v25 = vadd.f32 1e-05, %v3626_v3 }
0x1e88   : > { %4673 = vrsqrt.f32 %v3628_v25 }
0x1e90   : > { %v4672_v26 = vpop.eup %4671 }
0x1e91   : > { %v3631_v28 = vmul.f32 %v4672_v26, %v3615_v0 }
0x1e92   : > { %v4674_v30 = vpop.eup %4673 }
0x1e93   : > { %v3639_v33 = vmul.f32 %v4015_v27, %v3631_v28  ;;  %v3632_v34 = vmul.f32 %v4674_v30, %v3616_v8 }
0x1e95   : > { %v3647_v29 = vadd.f32 %v4016_v32, %v3639_v33  ;;  %v3640_v35 = vmul.f32 %v4015_v27, %v3632_v34 }
0x1e97   : > { %v3649_v36 = vmul.f32 %v5535_v16, %v3647_v29  ;;  %v3648_v31 = vadd.f32 %v4016_v32, %v3640_v35 }
0x1e99   : > { %3651 = vst.msk [vmem:[%s790_s3] sm:$0xff] %vm1212_vm12, %v3649_v36  ;;  %v3650_v37 = vmul.f32 %v5538_v17, %v3648_v31 }
0x1e9b   : > { %3652 = vst.msk [vmem:[%s790_s3 + $0x8] sm:$0xff] %vm1212_vm12, %v3650_v37 }
0x1e9c PF: > { %p35_p8 = scmp.ge.s32.totalorder %s5344_s5, 4   ;;  %s6163_s2 = smov %s4971_s25 }
0x1e9d   : > { %s6164_s25 = smov %s4975_s26  ;;  %s6165_s26 = smov %s5356_s16 }
0x1e9e   : > { %s6166_s27 = smov %s5344_s5  ;;  %37 = sbr.rel (!%p35_p8) target bundleno = 23 (0x17), region = 203 }
0x1ea5   :  { %3674 = vsyncpa [#allocation3], 1 }
0x1ea6   :  { %3676 = vsyncpa [#allocation3 + $0x1], 1 }
0x1ea7   :  { %3677 = vsyncpa [#allocation5], 1 }
0x1ea8   :  { %3678 = vsyncpa [#allocation8], 1 }
0x1ea9   :  { %3679 = vsyncpa [#allocation11], 1 }
0x1eaa   :  { %3680 = vsyncpa [#allocation14], 1 }

// kernel: transformer_asr_forward.3
= control target key start
LH: loop header
LB: loop body
LE: loop exit
PB: predicated region body
PF: predicated region fallthrough
CT: control target
= control target key end

     0   :  { %s5093_s0 = inlined_call_operand.vmem [shape: f32[2,8,32], index: 0, kind: input, shape index: {}]   ;;  %s5094_s1 = inlined_call_operand.vmem [shape: f32[2,16,32], index: 1, kind: input, shape index: {}]   ;;  %s5095_s2 = inlined_call_operand.vmem [shape: f32[9,32], index: 2, kind: input, shape index: {}]   ;;  %s5096_s3 = inlined_call_operand.vmem [shape: f32[2,1,32], index: 3, kind: input, shape index: {}]   ;;  %s5097_s4 = inlined_call_operand.vmem [shape: f32[2,1,32], index: 4, kind: input, shape index: {}]   ;;  %s5098_s5 = inlined_call_operand.vmem [shape: f32[2,1,32], index: 5, kind: input, shape index: {}]   ;;  %s5099_s6 = inlined_call_operand.vmem [shape: f32[2,1,32], index: 6, kind: input, shape index: {}]   ;;  %s5100_s7 = inlined_call_operand.vmem [shape: f32[2,1,32], index: 7, kind: input, shape index: {}]   ;;  %s5101_s8 = inlined_call_operand.vmem [shape: f32[2,1,32], index: 8, kind: input, shape index: {}]   ;;  %s5102_s9 = inlined_call_operand.vmem [shape: bf16[2,32,96], index: 9, kind: input, shape index: {}]   ;;  %s5103_s10 = inlined_call_operand.vmem [shape: f32[2,1,96], index: 10, kind: input, shape index: {}]   ;;  %s5104_s11 = inlined_call_operand.vmem [shape: bf16[2,32,32], index: 11, kind: input, shape index: {}]   ;;  %s5105_s12 = inlined_call_operand.vmem [shape: f32[2,1,32], index: 12, kind: input, shape index: {}]   ;;  %s5106_s13 = inlined_call_operand.vmem [shape: bf16[2,32,32], index: 13, kind: input, shape index: {}]   ;;  %s5107_s14 = inlined_call_operand.vmem [shape: f32[2,1,32], index: 14, kind: input, shape index: {}]   ;;  %s5108_s15 = inlined_call_operand.vmem [shape: bf16[2,32,64], index: 15, kind: input, shape index: {}]   ;;  %s5109_s16 = inlined_call_operand.vmem [shape: f32[2,1,64], index: 16, kind: input, shape index: {}]   ;;  %s5110_s17 = inlined_call_operand.vmem [shape: bf16[2,32,32], index: 17, kind: input, shape index: {}]   ;;  %s5111_s18 = inlined_call_operand.vmem [shape: f32[2,1,32], index: 18, kind: input, shape index: {}]   ;;  %s5112_s19 = inlined_call_operand.vmem [shape: bf16[2,32,128], index: 19, kind: input, shape index: {}]   ;;  %s5113_s20 = inlined_call_operand.vmem [shape: f32[2,1,128], index: 20, kind: input, shape index: {}]   ;;  %s5114_s21 = inlined_call_operand.vmem [shape: bf16[2,128,32], index: 21, kind: input, shape index: {}]   ;;  %s5115_s22 = inlined_call_operand.vmem [shape: f32[2,1,32], index: 22, kind: input, shape index: {}]   ;;  %s5116_s23 = inlined_call_operand.vmem [shape: f32[1,32], index: 23, kind: input, shape index: {}]   ;;  %s5117_s24 = inlined_call_operand.vmem [shape: f32[1,32], index: 24, kind: input, shape index: {}]   ;;  %s5118_s25 = inlined_call_operand.vmem [shape: bf16[32,16], index: 25, kind: input, shape index: {}]   ;;  %s5119_s26 = inlined_call_operand.hbm [shape: f32[2,8,16], index: 26, kind: output, shape index: {0}]   ;;  %s5120_s27 = inlined_call_operand.vmem [shape: f32[2,2,2,8,16], index: 27, kind: output, shape index: {1}]  }
   0x1   :  { %5160 = sst [smem:[#allocation14_spill]] %s5093_s0 }
   0x2   :  { %5161 = sst [smem:[#allocation15_spill]] %s5094_s1 }
   0x3   :  { %5162 = sst [smem:[#allocation16_spill]] %s5095_s2 }
   0x4   :  { %5163 = sst [smem:[#allocation17_spill]] %s5096_s3 }
   0x5   :  { %5164 = sst [smem:[#allocation18_spill]] %s5097_s4 }
   0x6   :  { %5165 = sst [smem:[#allocation19_spill]] %s5098_s5 }
   0x7   :  { %5166 = sst [smem:[#allocation20_spill]] %s5099_s6 }
   0x8   :  { %5167 = sst [smem:[#allocation21_spill]] %s5100_s7 }
   0x9   :  { %5168 = sst [smem:[#allocation22_spill]] %s5101_s8 }
   0xa   :  { %5169 = sst [smem:[#allocation23_spill]] %s5102_s9 }
   0xb   :  { %5170 = sst [smem:[#allocation24_spill]] %s5103_s10 }
   0xc   :  { %5171 = sst [smem:[#allocation25_spill]] %s5104_s11 }
   0xd   :  { %5172 = sst [smem:[#allocation26_spill]] %s5112_s19 }
   0xe   :  { %5173 = sst [smem:[#allocation27_spill]] %s5116_s23 }
   0xf   :  { %5174 = sst [smem:[#allocation28_spill]] %s5117_s24 }
  0x10   :  { %5175 = sst [smem:[#allocation29_spill]] %s5118_s25 }
  0x11   :  { %5176 = sst [smem:[#allocation30_spill]] %s5119_s26 }
  0x12   :  { %5177 = sst [smem:[#allocation31_spill]] %s5120_s27 }
  0x13   :  { %33 = vsyncpa [#allocation3], 0 }
  0x14   :  { %35 = vsyncpa [#allocation3 + $0x1], 0  ;;  %s4454_s7 = smov 0   ;;  %s4456_s4 = smov 0  }
  0x15   :  { %s4458_s8 = smov 0   ;;  %s4460_s30 = smov 0  }
  0x16 LB: > { %5178 = sst [smem:[#allocation5_spill]] %s4287_s7  ;;  %s4475_s9 = sadd.s32 4294967295, %s4299_s30   ;;  %s4299_s30 = sphi %s4460_s30, %s5223_s30   ;;  %s4295_s8 = sphi %s4458_s8, %s5226_s8   ;;  %s4291_s4 = sphi %s4456_s4, %s5225_s4   ;;  %s4287_s7 = sphi %s4454_s7, %s5224_s7  }
  0x17   : > { %5179 = sst [smem:[#allocation6_spill]] %s4291_s4  ;;  %s3542_s5 = sadd.s32 4294967294, %s4299_s30  }
  0x18   : > { %5180 = sst [smem:[#allocation7_spill]] %s4295_s8  ;;  %s4479_s28 = sadd.s32 1, %s4299_s30  }
  0x19   : > { %5181 = sst [smem:[#allocation8_spill]] %s4299_s30  ;;  %s604_s0 = sadd.s32 1, %s4295_s8 }
  0x1a   : > { %5182 = sst [smem:[#allocation9_spill]] %s4475_s9  ;;  %s601_s10 = ssub.s32 %s4299_s30, %s4479_s28 }
  0x1b   : > { %5183 = sst [smem:[#allocation10_spill]] %s4479_s28  ;;  %p614_p0 = scmp.ne.s32.totalorder %s4295_s8, %s4291_s4 }
  0x1c   : > { %p602_p1 = scmp.eq.s32.totalorder %s601_s10, 0  ;;  %p615_p2 = scmp.eq.s32.totalorder %s4475_s9, 1 }
  0x1d   : > { %p620_p3 = scmp.ne.s32.totalorder %s4291_s4, %s4287_s7  ;;  %p621_p4 = scmp.eq.s32.totalorder %s3542_s5, 1 }
  0x1e   : > { %s4490_s29 = scalar_select %p602_p1, %s4295_s8, %s604_s0  }
  0x1f   : > { %p4492_p5 = por %p615_p2, %p614_p0  ;;  %p4496_p6 = por %p621_p4, %p620_p3 }
  0x20   : > { %5184 = sst [smem:[#allocation11_spill]] %s4490_s29  ;;  %p3545_p7 = scmp.ge.s32.totalorder %s4299_s30, 1 }
  0x21   : > { %s5185_s1 = scalar_select %p4492_p5, 1, 0 }
  0x22   : > { %s5187_s6 = scalar_select %p4496_p6, 1, 0 }
  0x23   : > { %5186 = sst [smem:[#allocation12_spill]] %s5185_s1  ;;  %p752_p8 = scmp.lt.s32.totalorder %s4299_s30, 3 }
  0x24   : > { %5188 = sst [smem:[#allocation13_spill]] %s5187_s6 }
  0x25   : > { %p753_p9 = pnand %p3545_p7, %p752_p8 }
  0x26   : > { %p833_p10 = scmp.lt.s32.totalorder (!%p753_p9), %s4475_s9, 1  ;;  %v4301_v0 = vmov (!%p753_p9), 0.0   ;;  %s5189_s0 = sld [smem:[#allocation14_spill]] (!%p753_p9)  ;;  %vm861_vm0 = vcmask (!%p753_p9), 261120   ;;  %vm4302_vm1 = vmmov (!%p753_p9), 0   ;;  %v850_v4 = vlaneseq (!%p753_p9) }
  0x27   : > { %756 = sbr.rel (%p753_p9) target bundleno = 10253 (0x280d), region = 124  ;;  %3825 = vmatprep.subr.mxu0 (!%p753_p9), %v4301_v0  ;;  %3827 = vmatprep.mubr.msk.f32.mxu0 (!%p753_p9), %vm4302_vm1, %v4301_v0  ;;  %vm883_vm2 = vcmask (!%p753_p9), 7168   ;;  %v4303_v10 = vmov (!%p753_p9), 1.0   ;;  %vm1042_vm5 = vcmask (!%p753_p9), 64512   ;;  %v4304_v12 = vmov (!%p753_p9), 0   ;;  %s5190_s5 = sld [smem:[#allocation16_spill]] (!%p753_p9) }
  0x28   : > { %3834 = vmatprep.mubr.msk.f32.mxu1 (!%p753_p9), %vm4302_vm1, %v4301_v0  ;;  %v851_v6 = vshrl.u32 (!%p753_p9), %v850_v4, 7  ;;  %v853_v7 = vand.u32 (!%p753_p9), 127, %v850_v4  ;;  %4148 = vset.pattern.permute.xlu0 (!%p753_p9), %v4304_v12  ;;  %vm1130_vm6 = vcmask (!%p753_p9), 1040384   ;;  %v4305_v15 = vmov (!%p753_p9), 0.0|0.0   ;;  %s5192_s28 = sld [smem:[#allocation17_spill]] (!%p753_p9)  ;;  %s5193_s6 = sld [smem:[#allocation18_spill]] (!%p753_p9)  ;;  %vm4091_vm15 = vmpackc.low (!%p753_p9), %vm883_vm2, %vm883_vm2 }
  0x29   : > { %vm4306_vm7 = vmmov (!%p753_p9), 1   ;;  %4089 = vmatprep.subr.bf16.mxu1 (!%p753_p9), %v4305_v15  ;;  %vm1126_vm10 = vcmask (!%p753_p9), 72704   ;;  %s5194_s7 = sld [smem:[#allocation24_spill]] (!%p753_p9)  ;;  %s5142_s8 = smov (!%p753_p9), 96   ;;  %vm1311_vm12 = vcmask (!%p753_p9), 130048  }
  0x2a   : > { %vm1039_vm4 = vcmp.ge.s32.totalorder (!%p753_p9), %v851_v6, %v853_v7  ;;  %vm4095_vm8 = vmpackc.low (!%p753_p9), %vm1130_vm6, %vm4306_vm7  ;;  %vm854_vm9 = vcmp.gt.s32.totalorder (!%p753_p9), %v853_v7, %v851_v6  ;;  %v1117_v25 = vcvt.s32.f32 (!%p753_p9), %v853_v7  ;;  %s5138_s29 = smov (!%p753_p9), 80   ;;  %s5198_s30 = sld [smem:[#allocation19_spill]] (!%p753_p9) }
  0x2b   : > { %v3560_v11 = vsel (!%p753_p9), %vm1039_vm4, 1.0, %v4301_v0  ;;  %v855_v17 = vsel (!%p753_p9), %vm854_vm9, -1e+09, %v4301_v0  ;;  %s5200_s24 = sld [smem:[#allocation20_spill]] (!%p753_p9)  ;;  %s5202_s27 = sld [smem:[#allocation31_spill]] (!%p753_p9) }
  0x2c   : > { %s5206_s19 = sld [smem:[#allocation26_spill]] (!%p753_p9)  ;;  %s5214_s4 = sld [smem:[#allocation6_spill]] (!%p753_p9) }
  0x2d   : > { %v848_v13 = vld [vmem:[%s5190_s5] sm:$0xff] (!%p753_p9)  ;;  %v849_v14 = vld [vmem:[%s5190_s5 + $0x8] sm:$0x1] (!%p753_p9)  ;;  %s5212_s3 = sld [smem:[#allocation26_spill]] (!%p753_p9)  ;;  %s5217_s25 = sld [smem:[#allocation28_spill]] (!%p753_p9) }
  0x2e   : > { %s4505_s11 = scalar_select %p833_p10, %s4475_s9, 1  ;;  %v4094_v16 = vpack.c.bf16 %v849_v14, %v848_v13  ;;  %v3565_v43 = vld [vmem:[%s5192_s28] ss:$0 sm:$0xff] }
  0x2f   : > { %v3566_v45 = vld [vmem:[%s5193_s6] ss:$0 sm:$0xff]  ;;  %s5195_s26 = smov %s5194_s7  ;;  %s5215_s9 = sld [smem:[#allocation9_spill]] }
  0x30   : > { %s3547_s2 = sshll.u32 %s4505_s11, 3  ;;  %v3567_v49 = vld [vmem:[%s5194_s7] ss:$0 sm:$0xff]  ;;  %s3724_s7 = sshll.u32 %s4505_s11, 4 }
  0x31   : > { %s836_s10 = scalar_lea.vmem %s5189_s0, %s3547_s2  ;;  %s5191_s0 = sld [smem:[#allocation23_spill]] }
  0x32   : > { %v856_v1 = vld [vmem:[%s836_s10] sm:$0xff]  ;;  %s5146_s2 = smov 112   ;;  %s5196_s10 = sld [smem:[#allocation15_spill]] }
  0x33   : > { %v860_v2 = vand.u32 2147483647, %v856_v1  ;;  %s5199_s1 = smov %s5198_s30 }
  0x35   : > { %v862_v3 = vsel %vm861_vm0, %v860_v2, 0.0 }
  0x36   : > { %863 = vadd.xlane.f32.xlu0 %v862_v3 }
  0x37   : > { %v4149_v37 = vld [vmem:[%s5191_s0] sm:$0xff]   ;;  %v4150_v38 = vld [vmem:[%s5191_s0 + $0x8] sm:$0xff]  }
  0xc3   : > { %v864_v5 = vpop.xlane.xlu0 %863 }
  0xc4   : > { %vm865_vm3 = vcmp.eq.f32.partialorder %v864_v5, 0.0 }
  0xc5   : > { %v3552_v8 = vsel %vm865_vm3, 1.0, %v4301_v0  ;;  %vm1375_vm3 = vcmask 1043456  }
  0xc6   : > { %3826 = vmatpush3.xpose.msk.msra.mxu0 %vm883_vm2, %v3552_v8  ;;  %v868_v9 = vsub.f32 1.0, %v3552_v8 }
  0xc7   : > { %3837 = vmatprep.subr.mxu0 %v4301_v0 }
  0xc9   : > { %3828 = vmatmul.mubr.msk.f32.vlgmr.msra.gmra.mrb[0].mxu0 %vm883_vm2, %v4303_v10 }
  0xca   : > { %3838 = vmatpush3.msra.mxu0 %v868_v9  ;;  %3839 = vmatprep.mubr.msk.f32.mxu0 %vm4302_vm1, %v4301_v0 }
  0xcb   : > { %4093 = vmatprep.subr.bf16.mxu0 %v4305_v15 }
  0xcd   : > { %3840 = vmatmul.mubr.msk.f32.vlgmr.msra.gmra.mrb[2].mxu0 %vm1042_vm5, %v3560_v11 }
  0xce   : > { %3846 = vmatprep.mubr.msk.f32.mxu0 %vm4302_vm1, %v4301_v0  ;;  %4096 = vmatpush3.bf16.msk.msra.mxu0 %vm4095_vm8, %v4094_v16 }
  0xcf   : > { %3849 = vmatprep.subr.bf16.mxu0 %v4301_v0 }
 0x19c   : > { %v956_v18 = vpop.f32.mrb[0].mxu0 }
 0x19d   : > { %v960_v19 = vmul.f32 -1e+09, %v956_v18  ;;  %v3829_v20 = vpop.f32.mrb[1].mxu0 }
 0x19f   : > { %v4535_v21 = vadd.f32 %v960_v19, %v855_v17 }
 0x1a0   : > { %v1112_v22 = vpop.f32.mrb[2].mxu0 }
 0x1a1   : > { %v1116_v23 = vmul.f32 %v1112_v22, %v868_v9  ;;  %v3841_v24 = vpop.f32.mrb[3].mxu0 }
 0x1a3   : > { %1120 = vperm.xlu0 %4148, %v1116_v23  }
 0x222   : > { %v1121_v26 = vpop.permute.xlu0 %1120 }
 0x223   : > { %vm1123_vm11 = vcmp.eq.f32.partialorder %v1117_v25, %v1121_v26 }
 0x224   : > { %v3562_v27 = vsel %vm1123_vm11, 1.0, %v4301_v0 }
 0x225   : > { %3847 = vmatmul.mubr.msk.f32.vlgmr.msra.gmra.mrb[4].mxu0 %vm1126_vm10, %v3562_v27 }
 0x226   : > { %3853 = vmatprep.mubr.msk.bf16.mxu0 %vm4302_vm1, %v4301_v0  ;;  %3850 = vmatpush3.bf16.msra.mxu0 %v4149_v37 }
 0x227   : > { %3851 = vmatprep.subr.bf16.mxu0 %v4301_v0 }
 0x22a   : > { %3852 = vmatpush3.bf16.msra.mxu0 %v4150_v38 }
 0x22b   : > { %3857 = vmatprep.subr.bf16.mxu0 %v4301_v0 }
 0x2f8   : > { %v1200_v28 = vpop.f32.mrb[4].mxu0 }
 0x2f9   : > { %v4540_v29 = vadd.f32 %v1200_v28, %v856_v1  ;;  %v3848_v30 = vpop.f32.mrb[5].mxu0 }
 0x2fb   : > { %v1207_v31 = vsel %vm861_vm0, %v4540_v29, 0.0 }
 0x2fc   : > { %1208 = vadd.xlane.f32.xlu1 %v1207_v31 }
 0x389   : > { %v1209_v32 = vpop.xlane.xlu1 %1208 }
 0x38a   : > { %v1211_v33 = vmul.f32 0.03125, %v1209_v32 }
 0x38c   : > { %v1212_v34 = vsub.f32 %v4540_v29, %v1211_v33 }
 0x38e   : > { %v1213_v35 = vmul.f32 %v1212_v34, %v1212_v34 }
 0x390   : > { %v1214_v36 = vsel %vm861_vm0, %v1213_v35, 0.0 }
 0x391   : > { %1215 = vadd.xlane.f32.xlu1 %v1214_v36 }
 0x41e   : > { %v1216_v39 = vpop.xlane.xlu1 %1215 }
 0x41f   : > { %v1217_v40 = vmul.f32 0.03125, %v1216_v39 }
 0x421   : > { %v1218_v41 = vadd.f32 1e-05, %v1217_v40 }
 0x423   : > { %4191 = vrsqrt.f32 %v1218_v41 }
 0x42d   : > { %v4192_v42 = vpop.eup %4191 }
 0x42e   : > { %v1220_v44 = vmul.f32 %v4192_v42, %v1212_v34 }
 0x430   : > { %v1227_v46 = vmul.f32 %v3565_v43, %v1220_v44 }
 0x432   : > { %v1234_v47 = vadd.f32 %v3566_v45, %v1227_v46 }
 0x434   : > { %v1235_v48 = vpack.c.bf16 %v1234_v47, %v1234_v47 }
 0x436   : > { %3854 = vmatmul.mubr.msk.bf16.vlgmr.msra.gmra.mrb[8].mxu0 %vm861_vm0, %v1235_v48 }
 0x437   : > { %3859 = vmatprep.mubr.msk.bf16.mxu0 %vm4302_vm1, %v4301_v0 }
 0x509   : > { %v1301_v50 = vpop.f32.mrb[8].mxu0 }
 0x50a   : > { %v1302_v51 = vadd.f32 %v3567_v49, %v1301_v50  ;;  %v3855_v52 = vpop.f32.mrb[9].mxu0 }
 0x50b   : > { %v1304_v53 = vpop.f32.mrb[10].mxu0 }
 0x50c   : > { %v4566_v54 = vpack.c.bf16 %v1302_v51, %v1302_v51  ;;  %v3856_v55 = vpop.f32.mrb[11].mxu0 }
 0x50e   : > { %1309 = vrot.lane.b32.xlu1 %v4566_v54, %s5142_s8  ;;  %s5144_s8 = smov 16  }
 0x512   : > { %1421 = vrot.lane.b32.xlu1 %v4566_v54, %s5138_s29  ;;  %s841_s29 = scalar_lea.vmem %s5196_s10, %s3724_s7  ;;  %s5140_s7 = smov 48  }
 0x513   : > { %v857_v11 = vld [vmem:[%s841_s29] sm:$0xff]  ;;  %v858_v14 = vld [vmem:[%s841_s29 + $0x8] sm:$0xff]  ;;  %s5141_s29 = smov 64   ;;  %s5197_s10 = sld [smem:[#allocation25_spill]] }
 0x514   : > { %v869_v12 = vand.u32 2147483647, %v857_v11  ;;  %v870_v15 = vand.u32 2147483647, %v858_v14  ;;  %v4595_v17 = vpack.c.bf16 %v858_v14, %v857_v11  ;;  %v4156_v14 = vld [vmem:[%s5106_s13 + $0x8] sm:$0xff]  }
 0x516   : > { %1419 = vrot.lane.b32.xlu1 %v4566_v54, %s5146_s2  ;;  %v871_v13 = vsel %vm861_vm0, %v869_v12, 0.0  ;;  %v874_v16 = vsel %vm861_vm0, %v870_v15, 0.0  ;;  %v4153_v12 = vld [vmem:[%s5108_s15] sm:$0xff]  }
 0x519   : > { %v4151_v48 = vld [vmem:[%s5197_s10] sm:$0xff]   ;;  %v4152_v49 = vld [vmem:[%s5197_s10 + $0x8] sm:$0xff]  }
 0x580   : > { %v1310_v56 = vpop.permute.xlu1 %1309 }
 0x581   : > { %v1316_v57 = vsel %vm1311_vm12, %v1310_v56, 0 }
 0x582   : > { %3858 = vmatpush3.bf16.xpose.msra.mxu0 %v1316_v57 }
 0x583   : > { %3869 = vmatprep.subr.bf16.mxu0 %v4301_v0 }
 0x584   : > { %v1422_v58 = vpop.permute.xlu1 %1421 }
 0x585   : > { %v1427_v59 = vsel %vm1311_vm12, %v1422_v58, 0 }
 0x588   : > { %v1420_v60 = vpop.permute.xlu1 %1419 }
 0x589   : > { %3860 = vmatmul.mubr.msk.bf16.vlgmr.msra.gmra.mrb[12].mxu0 %vm1311_vm12, %v4566_v54 }
 0x58a   : > { %3870 = vmatpush3.bf16.xpose.msra.mxu0 %v1427_v59  ;;  %3871 = vmatprep.mubr.msk.bf16.mxu0 %vm4302_vm1, %v4301_v0 }
 0x58b   : > { %3881 = vmatprep.subr.bf16.mxu0 %v4301_v0 }
 0x591   : > { %3872 = vmatmul.mubr.msk.bf16.vlgmr.msra.gmra.mrb[16].mxu0 %vm1311_vm12, %v1420_v60 }
 0x592   : > { %3885 = vmatprep.mubr.msk.bf16.mxu0 %vm4302_vm1, %v4301_v0  ;;  %3882 = vmatpush3.bf16.msra.mxu0 %v4151_v48 }
 0x593   : > { %3883 = vmatprep.subr.bf16.mxu0 %v4301_v0 }
 0x596   : > { %3884 = vmatpush3.bf16.msra.mxu0 %v4152_v49 }
 0x597   : > { %3897 = vmatprep.subr.bf16.mxu0 %v4301_v0 }
 0x65c   : > { %v1352_v61 = vpop.f32.mrb[12].mxu0 }
 0x65d   : > { %v1353_v62 = vadd.f32 %v1352_v61, %v4535_v21  ;;  %v3861_v63 = vpop.f32.mrb[13].mxu0  ;;  %v3575_v61 = vld [vmem:[%s5105_s12] ss:$0 sm:$0xff] }
 0x65e   : > { %v1355_v1 = vpop.f32.mrb[14].mxu0 }
 0x65f   : > { %v3862_v2 = vpop.f32.mrb[15].mxu0  ;;  %v1358_v3 = vsel %vm1042_vm5, %v1353_v62, -inf }
 0x660   : > { %1359 = vmax.xlane.f32.xlu1 %v1358_v3 }
 0x664   : > { %v1463_v4 = vpop.f32.mrb[16].mxu0  ;;  %872 = vadd.xlane.f32.xlu1 %v871_v13  ;;  %v4155_v13 = vld [vmem:[%s5106_s13] sm:$0xff]  }
 0x665   : > { %v1464_v5 = vadd.f32 %v1463_v4, %v4535_v21  ;;  %v3873_v6 = vpop.f32.mrb[17].mxu0 }
 0x666   : > { %v1466_v7 = vpop.f32.mrb[18].mxu0 }
 0x667   : > { %v3874_v8 = vpop.f32.mrb[19].mxu0  ;;  %v1469_v9 = vsel %vm1042_vm5, %v1464_v5, -inf }
 0x668   : > { %1470 = vmax.xlane.f32.xlu0 %v1469_v9  ;;  %875 = vadd.xlane.f32.xlu1 %v874_v16 }
 0x6ed   : > { %v1360_v18 = vpop.xlane.xlu1 %1359 }
 0x6ee   : > { %v1361_v19 = vsub.f32 %v1353_v62, %v1360_v18 }
 0x6f0   : > { %v1362_v20 = vmul.f32 1.442695, %v1361_v19 }
 0x6f1   : > { %v873_v27 = vpop.xlane.xlu1 %872 }
 0x6f2   : > { %4193 = vpow2.f32 %v1362_v20  ;;  %vm877_vm13 = vcmp.eq.f32.partialorder %v873_v27, 0.0  ;;  %v3579_v20 = vld [vmem:[%s5198_s30] ss:$0 sm:$0xff]  ;;  %s5201_s30 = smov 112  }
 0x6f3   : > { %v3553_v28 = vsel %vm877_vm13, 1.0, %v4301_v0  ;;  %v3585_v27 = vld [vmem:[%s5109_s16] ss:$0 sm:$0xff] }
 0x6f5   : > { %v1471_v22 = vpop.xlane.xlu0 %1470  ;;  %v876_v30 = vpop.xlane.xlu1 %875 }
 0x6f6   : > { %v1472_v23 = vsub.f32 %v1464_v5, %v1471_v22  ;;  %vm878_vm14 = vcmp.eq.f32.partialorder %v876_v30, 0.0 }
 0x6f7   : > { %v3554_v33 = vsel %vm878_vm14, 1.0, %v4301_v0 }
 0x6f8   : > { %v1473_v24 = vmul.f32 1.442695, %v1472_v23  ;;  %v4090_v34 = vpack.c.bf16 %v3554_v33, %v3553_v28  ;;  %v3580_v23 = vld [vmem:[%s5200_s24] ss:$0 sm:$0xff] }
 0x6fa   : > { %4195 = vpow2.f32 %v1473_v24  ;;  %4092 = vmatpush3.bf16.xpose.msk.msra.mxu1 %vm4091_vm15, %v4090_v34 }
 0x6fb   : > { %3863 = vmatprep.subr.bf16.mxu1 %v4301_v0 }
 0x6fc   : > { %v4194_v25 = vpop.eup %4193 }
 0x6fd   : > { %v1364_v26 = vsel %vm1042_vm5, %v4194_v25, 0.0 }
 0x6fe   : > { %1365 = vadd.xlane.f32.xlu1 %v1364_v26 }
 0x701   : > { %3835 = vmatmul.mubr.msk.f32.vlgmr.msra.gmra.mrb[0].mxu1 %vm883_vm2, %v4303_v10 }
 0x702   : > { %3865 = vmatprep.mubr.msk.bf16.mxu1 %vm4302_vm1, %v4301_v0 }
 0x704   : > { %v4196_v31 = vpop.eup %4195 }
 0x705   : > { %v1475_v32 = vsel %vm1042_vm5, %v4196_v31, 0.0 }
 0x706   : > { %1476 = vadd.xlane.f32.xlu0 %v1475_v32 }
 0x70f   : > { %1370 = vrot.lane.b32.xlu1 %v4566_v54, %s5141_s29  ;;  %s5204_s29 = smov 80  }
 0x71c   : > { %1481 = vrot.lane.b32.xlu0 %v4566_v54, %s5140_s7  ;;  %s5207_s7 = sld [smem:[#allocation21_spill]] }
 0x722   : > { %s5208_s23 = smov %s5207_s7 }
 0x78b   : > { %v1366_v35 = vpop.xlane.xlu1 %1365 }
 0x78c   : > { %4197 = vrcp.f32 %v1366_v35 }
 0x78f   : > { %v1371_v36 = vpop.permute.xlu1 %1370 }
 0x790   : > { %v1377_v37 = vsel %vm1375_vm3, %v1371_v36, 0 }
 0x791   : > { %3864 = vmatpush3.bf16.msra.mxu1 %v1377_v37  ;;  %v3581_v37 = vld [vmem:[%s5107_s14] ss:$0 sm:$0xff] }
 0x792   : > { %3875 = vmatprep.subr.bf16.mxu1 %v4301_v0 }
 0x793   : > { %v1477_v38 = vpop.xlane.xlu0 %1476 }
 0x794   : > { %4199 = vrcp.f32 %v1477_v38 }
 0x796   : > { %v4198_v39 = vpop.eup %4197 }
 0x797   : > { %v1368_v10 = vmul.f32 %v4198_v39, %v4194_v25  ;;  %v1482_v40 = vpop.permute.xlu0 %1481 }
 0x798   : > { %v1487_v42 = vsel %vm1375_vm3, %v1482_v40, 0 }
 0x799   : > { %v1369_v41 = vpack.c.bf16 %v1368_v10, %v1368_v10 }
 0x79b   : > { %3866 = vmatmul.mubr.msk.bf16.vlgmr.msra.gmra.mrb[4].mxu1 %vm1042_vm5, %v1369_v41 }
 0x79c   : > { %3876 = vmatpush3.bf16.msra.mxu1 %v1487_v42  ;;  %3877 = vmatprep.mubr.msk.bf16.mxu1 %vm4302_vm1, %v4301_v0 }
 0x79d   : > { %3889 = vmatprep.subr.bf16.mxu1 %v4301_v0 }
 0x79e   : > { %v4200_v43 = vpop.eup %4199 }
 0x79f   : > { %v1479_v44 = vmul.f32 %v4200_v43, %v4196_v31 }
 0x7a1   : > { %v1480_v45 = vpack.c.bf16 %v1479_v44, %v1479_v44 }
 0x7a3   : > { %3878 = vmatmul.mubr.msk.bf16.vlgmr.msra.gmra.mrb[8].mxu1 %vm1042_vm5, %v1480_v45 }
 0x7a4   : > { %3893 = vmatprep.mubr.msk.bf16.mxu1 %vm4302_vm1, %v4301_v0  ;;  %3890 = vmatpush3.bf16.msra.mxu1 %v4155_v13 }
 0x7a5   : > { %3891 = vmatprep.subr.bf16.mxu1 %v4301_v0 }
 0x7a8   : > { %3892 = vmatpush3.bf16.msra.mxu1 %v4156_v14 }
 0x7a9   : > { %3905 = vmatprep.subr.bf16.mxu1 %v4301_v0 }
 0x7d4   : > { %v4622_v46 = vpop.f32.mrb[0].mxu1 }
 0x7d5   : > { %v3836_v47 = vpop.f32.mrb[1].mxu1 }
 0x7d6   : > { %v4696_v47 = vmul.f32 -1e+09, %v4622_v46 }
 0x86e   : > { %v1413_v50 = vpop.f32.mrb[4].mxu1 }
 0x86f   : > { %v3867_v51 = vpop.f32.mrb[5].mxu1 }
 0x870   : > { %v1416_v52 = vpop.f32.mrb[6].mxu1 }
 0x871   : > { %v3868_v53 = vpop.f32.mrb[7].mxu1 }
 0x876   : > { %v1523_v54 = vpop.f32.mrb[8].mxu1 }
 0x877   : > { %1530 = vrot.lane.b32.xlu1 %v1523_v54, %s5144_s8  ;;  %v3879_v55 = vpop.f32.mrb[9].mxu1  ;;  %s3725_s8 = sshll.u32 %s4505_s11, 5  ;;  %s5203_s11 = smov 96  }
 0x878   : > { %v1526_v56 = vpop.f32.mrb[10].mxu1  ;;  %s4701_s5 = scalar_lea.vmem %s5202_s27, %s3725_s8  ;;  %s5205_s27 = smov 16  }
 0x879   : > { %v3880_v57 = vpop.f32.mrb[11].mxu1  ;;  %s5211_s8 = smov 48  }
 0x8e9   : > { %v1531_v58 = vpop.permute.xlu1 %1530 }
 0x8ea   : > { %v1533_v59 = vsel %vm1311_vm12, %v1413_v50, %v1531_v58 }
 0x8eb   : > { %v1534_v60 = vpack.c.bf16 %v1533_v59, %v1533_v59 }
 0x8ed   : > { %3886 = vmatmul.mubr.msk.bf16.vlgmr.msra.gmra.mrb[20].mxu0 %vm861_vm0, %v1534_v60 }
 0x8ee   : > { %3901 = vmatprep.mubr.msk.bf16.mxu0 %vm4302_vm1, %v4301_v0  ;;  %3898 = vmatpush3.bf16.msra.mxu0 %v4153_v12 }
 0x8ef   : > { %3899 = vmatprep.subr.bf16.mxu0 %v4301_v0 }
 0x9c0   : > { %v1590_v62 = vpop.f32.mrb[20].mxu0 }
 0x9c1   : > { %v1591_v63 = vadd.f32 %v3575_v61, %v1590_v62  ;;  %v3887_v1 = vpop.f32.mrb[21].mxu0 }
 0x9c2   : > { %v1593_v2 = vpop.f32.mrb[22].mxu0 }
 0x9c3   : > { %v4641_v3 = vadd.f32 %v1591_v63, %v4540_v29  ;;  %v3888_v4 = vpop.f32.mrb[23].mxu0  ;;  %v4154_v29 = vld [vmem:[%s5108_s15 + $0x8] sm:$0xff]  }
 0x9c4   : > { %3900 = vmatpush3.bf16.msra.mxu0 %v4154_v29 }
 0x9c5   : > { %v1599_v5 = vsel %vm861_vm0, %v4641_v3, 0.0  ;;  %3911 = vmatprep.subr.bf16.mxu0 %v4301_v0 }
 0x9c6   : > { %1600 = vadd.xlane.f32.xlu1 %v1599_v5 }
 0x9c7   : > { %3902 = vmatmul.mubr.msk.bf16.vlgmr.msra.gmra.mrb[24].mxu0 %vm861_vm0, %v4595_v17 }
 0x9c8   : > { %3913 = vmatprep.mubr.msk.bf16.mxu0 %vm4302_vm1, %v4301_v0 }
 0xa53   : > { %v1601_v6 = vpop.xlane.xlu1 %1600 }
 0xa54   : > { %v1602_v7 = vmul.f32 0.03125, %v1601_v6 }
 0xa56   : > { %v1603_v8 = vsub.f32 %v4641_v3, %v1602_v7 }
 0xa58   : > { %v1604_v9 = vmul.f32 %v1603_v8, %v1603_v8 }
 0xa5a   : > { %v1605_v11 = vsel %vm861_vm0, %v1604_v9, 0.0 }
 0xa5b   : > { %1606 = vadd.xlane.f32.xlu0 %v1605_v11 }
 0xa9a   : > { %v1759_v28 = vpop.f32.mrb[24].mxu0 }
 0xa9b   : > { %v1760_v30 = vadd.f32 %v3585_v27, %v1759_v28  ;;  %v3903_v31 = vpop.f32.mrb[25].mxu0 }
 0xa9c   : > { %v1762_v32 = vpop.f32.mrb[26].mxu0 }
 0xa9d   : > { %v1763_v33 = vadd.f32 %v3585_v27, %v1762_v32  ;;  %v3904_v34 = vpop.f32.mrb[27].mxu0 }
 0xa9f   : > { %v1766_v35 = vpack.c.bf16 %v1763_v33, %v1760_v30  ;;  %v3594_v33 = vld [vmem:[%s5111_s18] ss:$0 sm:$0xff] }
 0xaa1   : > { %1876 = vrot.lane.b32.xlu0 %v1766_v35, %s5201_s30  ;;  %v1771_v36 = vsel %vm1311_vm12, %v1766_v35, 0 }
 0xae8   : > { %v1607_v15 = vpop.xlane.xlu0 %1606 }
 0xae9   : > { %v1608_v16 = vmul.f32 0.03125, %v1607_v15 }
 0xaeb   : > { %v1609_v18 = vadd.f32 1e-05, %v1608_v16 }
 0xaed   : > { %4201 = vrsqrt.f32 %v1609_v18  ;;  %v4157_v18 = vld [vmem:[%s5110_s17] sm:$0xff]  }
 0xaf7   : > { %v4202_v19 = vpop.eup %4201 }
 0xaf8   : > { %v1611_v22 = vmul.f32 %v4202_v19, %v1603_v8 }
 0xafa   : > { %v1618_v24 = vmul.f32 %v3579_v20, %v1611_v22 }
 0xafc   : > { %v1625_v25 = vadd.f32 %v3580_v23, %v1618_v24  ;;  %v4158_v24 = vld [vmem:[%s5110_s17 + $0x8] sm:$0xff]  }
 0xafe   : > { %v1626_v26 = vpack.c.bf16 %v1625_v25, %v1625_v25 }
 0xb00   : > { %3894 = vmatmul.mubr.msk.bf16.vlgmr.msra.gmra.mrb[12].mxu1 %vm861_vm0, %v1626_v26 }
 0xb01   : > { %3907 = vmatprep.mubr.msk.bf16.mxu1 %vm4302_vm1, %v4301_v0  ;;  %3906 = vmatpush3.bf16.xpose.msra.mxu1 %v1771_v36 }
 0xb02   : > { %3917 = vmatprep.subr.bf16.mxu1 %v4301_v0 }
 0xb13   : > { %v1877_v39 = vpop.permute.xlu0 %1876 }
 0xb14   : > { %v1882_v44 = vsel %vm1311_vm12, %v1877_v39, 0 }
 0xbd3   : > { %v1697_v38 = vpop.f32.mrb[12].mxu1 }
 0xbd4   : > { %v1698_v10 = vadd.f32 %v3581_v37, %v1697_v38  ;;  %v3895_v40 = vpop.f32.mrb[13].mxu1 }
 0xbd5   : > { %v1700_v41 = vpop.f32.mrb[14].mxu1 }
 0xbd6   : > { %v1703_v42 = vpack.c.bf16 %v1698_v10, %v1698_v10  ;;  %v3896_v43 = vpop.f32.mrb[15].mxu1 }
 0xbd8   : > { %1874 = vrot.lane.b32.xlu1 %v1703_v42, %s5201_s30  ;;  %3908 = vmatmul.mubr.msk.bf16.vlgmr.msra.gmra.mrb[16].mxu1 %vm1311_vm12, %v1703_v42 }
 0xbd9   : > { %3918 = vmatpush3.bf16.xpose.msra.mxu1 %v1882_v44  ;;  %3919 = vmatprep.mubr.msk.bf16.mxu1 %vm4302_vm1, %v4301_v0 }
 0xbda   : > { %3929 = vmatprep.subr.bf16.mxu1 %v4301_v0 }
 0xc4a   : > { %v1875_v45 = vpop.permute.xlu1 %1874 }
 0xc4b   : > { %3920 = vmatmul.mubr.msk.bf16.vlgmr.msra.gmra.mrb[20].mxu1 %vm1311_vm12, %v1875_v45  ;;  %v4159_v45 = vld [vmem:[%s5206_s19] sm:$0xff]  }
 0xc4c   : > { %3933 = vmatprep.mubr.msk.bf16.mxu1 %vm4302_vm1, %v4301_v0  ;;  %3930 = vmatpush3.bf16.msra.mxu1 %v4157_v18 }
 0xc4d   : > { %3931 = vmatprep.subr.bf16.mxu1 %v4301_v0 }
 0xc50   : > { %3932 = vmatpush3.bf16.msra.mxu1 %v4158_v24 }
 0xc51   : > { %3945 = vmatprep.subr.bf16.mxu1 %v4301_v0 }
 0xcab   : > { %v1807_v48 = vpop.f32.mrb[16].mxu1 }
 0xcac   : > { %v1808_v49 = vadd.f32 %v1807_v48, %v4696_v47  ;;  %v3909_v50 = vpop.f32.mrb[17].mxu1  ;;  %v4161_v48 = vld [vmem:[%s5114_s21] sm:$0xff]  }
 0xcad   : > { %v1810_v51 = vpop.f32.mrb[18].mxu1  ;;  %v4163_v50 = vld [vmem:[%s5114_s21 + $0x10] sm:$0xff]  }
 0xcae   : > { %1813 = vst.msk [vmem:[%s4701_s5] sm:$0xff] %vm1311_vm12, %v1808_v49  ;;  %v3910_v52 = vpop.f32.mrb[19].mxu1  ;;  %v1814_v53 = vsel %vm1311_vm12, %v1808_v49, -inf  ;;  %v4164_v51 = vld [vmem:[%s5114_s21 + $0x18] sm:$0xff]  }
 0xcaf   : > { %1815 = vmax.xlane.f32.xlu1 %v1814_v53  ;;  %v4165_v52 = vld [vmem:[%s5114_s21 + $0x20] sm:$0xff]   ;;  %v4166_v53 = vld [vmem:[%s5114_s21 + $0x28] sm:$0xff]  }
 0xd1e   : > { %v1918_v46 = vpop.f32.mrb[20].mxu1 }
 0xd1f   : > { %v1919_v54 = vadd.f32 %v1918_v46, %v4696_v47  ;;  %v3921_v55 = vpop.f32.mrb[21].mxu1 }
 0xd20   : > { %v1921_v56 = vpop.f32.mrb[22].mxu1 }
 0xd21   : > { %3592 = vst.msk [vmem:[%s4701_s5 + $0x8] sm:$0xff] %vm1311_vm12, %v1919_v54  ;;  %v3922_v57 = vpop.f32.mrb[23].mxu1  ;;  %v1926_v58 = vsel %vm1311_vm12, %v1919_v54, -inf }
 0xd22   : > { %1927 = vmax.xlane.f32.xlu0 %v1926_v58  ;;  %v3598_v57 = vld [vmem:[%s5207_s7] ss:$0 sm:$0xff]  ;;  %s5210_s7 = smov 64  }
 0xd3c   : > { %v1816_v59 = vpop.xlane.xlu1 %1815 }
 0xd3d   : > { %v1817_v60 = vsub.f32 %v1808_v49, %v1816_v59  ;;  %v4162_v49 = vld [vmem:[%s5114_s21 + $0x8] sm:$0xff]  }
 0xd3f   : > { %v1818_v61 = vmul.f32 1.442695, %v1817_v60 }
 0xd41   : > { %4203 = vpow2.f32 %v1818_v61 }
 0xd4b   : > { %v4204_v62 = vpop.eup %4203 }
 0xd4c   : > { %v1820_v63 = vsel %vm1311_vm12, %v4204_v62, 0.0 }
 0xd4d   : > { %1821 = vadd.xlane.f32.xlu0 %v1820_v63  ;;  %v4167_v63 = vld [vmem:[%s5114_s21 + $0x30] sm:$0xff]  }
 0xd63   : > { %1827 = vrot.lane.b32.xlu0 %v1766_v35, %s5203_s11 }
 0xdaf   : > { %v1928_v1 = vpop.xlane.xlu0 %1927 }
 0xdb0   : > { %v1929_v2 = vsub.f32 %v1919_v54, %v1928_v1  ;;  %v4168_v1 = vld [vmem:[%s5114_s21 + $0x38] sm:$0xff]  }
 0xdb2   : > { %v1930_v4 = vmul.f32 1.442695, %v1929_v2  ;;  %v3600_v2 = vld [vmem:[%s5113_s20] ss:$0 sm:$0xff] }
 0xdb4   : > { %4205 = vpow2.f32 %v1930_v4 }
 0xdbe   : > { %v4206_v5 = vpop.eup %4205 }
 0xdbf   : > { %v1932_v6 = vsel %vm1311_vm12, %v4206_v5, 0.0 }
 0xdc0   : > { %1933 = vadd.xlane.f32.xlu1 %v1932_v6 }
 0xdd1   : > { %1938 = vrot.lane.b32.xlu1 %v1766_v35, %s5204_s29 }
 0xdda   : > { %v1822_v7 = vpop.xlane.xlu0 %1821 }
 0xddb   : > { %4207 = vrcp.f32 %v1822_v7 }
 0xdde   : > { %v1828_v8 = vpop.permute.xlu0 %1827 }
 0xddf   : > { %3912 = vmatpush3.bf16.msra.mxu0 %v1828_v8 }
 0xde0   : > { %3923 = vmatprep.subr.bf16.mxu0 %v4301_v0 }
 0xde5   : > { %v4208_v9 = vpop.eup %4207 }
 0xde6   : > { %v1824_v11 = vmul.f32 %v4208_v9, %v4204_v62 }
 0xde8   : > { %v1825_v12 = vpack.c.bf16 %v1824_v11, %v1824_v11 }
 0xdea   : > { %3914 = vmatmul.mubr.msk.bf16.vlgmr.msra.gmra.mrb[28].mxu0 %vm1311_vm12, %v1825_v12  ;;  %v3604_v12 = vld [vmem:[%s5115_s22] ss:$0 sm:$0xff] }
 0xdeb   : > { %3925 = vmatprep.mubr.msk.bf16.mxu0 %vm4302_vm1, %v4301_v0 }
 0xe4d   : > { %v1934_v29 = vpop.xlane.xlu1 %1933 }
 0xe4e   : > { %4209 = vrcp.f32 %v1934_v29 }
 0xe51   : > { %v1939_v13 = vpop.permute.xlu1 %1938 }
 0xe52   : > { %3924 = vmatpush3.bf16.msra.mxu0 %v1939_v13 }
 0xe53   : > { %3937 = vmatprep.subr.bf16.mxu0 %v4301_v0 }
 0xe58   : > { %v4210_v14 = vpop.eup %4209 }
 0xe59   : > { %v1936_v15 = vmul.f32 %v4210_v14, %v4206_v5 }
 0xe5b   : > { %v1937_v16 = vpack.c.bf16 %v1936_v15, %v1936_v15 }
 0xe5d   : > { %3926 = vmatmul.mubr.msk.bf16.vlgmr.msra.gmra.mrb[32].mxu0 %vm1311_vm12, %v1937_v16 }
 0xe5e   : > { %3941 = vmatprep.mubr.msk.bf16.mxu0 %vm4302_vm1, %v4301_v0  ;;  %3938 = vmatpush3.bf16.msra.mxu0 %v4159_v45 }
 0xe5f   : > { %3939 = vmatprep.subr.bf16.mxu0 %v4301_v0 }
 0xebd   : > { %v1867_v19 = vpop.f32.mrb[28].mxu0 }
 0xebe   : > { %v3915_v20 = vpop.f32.mrb[29].mxu0 }
 0xebf   : > { %v1870_v22 = vpop.f32.mrb[30].mxu0 }
 0xec0   : > { %v3916_v23 = vpop.f32.mrb[31].mxu0 }
 0xf30   : > { %v1978_v25 = vpop.f32.mrb[32].mxu0 }
 0xf31   : > { %1985 = vrot.lane.b32.xlu1 %v1978_v25, %s5205_s27  ;;  %v3927_v26 = vpop.f32.mrb[33].mxu0 }
 0xf32   : > { %v1981_v27 = vpop.f32.mrb[34].mxu0  ;;  %v4169_v26 = vld [vmem:[%s5191_s0 + $0x10] sm:$0xff]  }
 0xf33   : > { %v3928_v28 = vpop.f32.mrb[35].mxu0  ;;  %v4170_v27 = vld [vmem:[%s5191_s0 + $0x18] sm:$0xff]   ;;  %s3721_s0 = sshll.u32 %s5215_s9, 7  ;;  %s4313_s9 = smov [#allocation2]  }
 0xfa3   : > { %v1986_v30 = vpop.permute.xlu1 %1985 }
 0xfa4   : > { %v1988_v31 = vsel %vm1311_vm12, %v1867_v19, %v1986_v30 }
 0xfa5   : > { %v1989_v32 = vpack.c.bf16 %v1988_v31, %v1988_v31 }
 0xfa7   : > { %3934 = vmatmul.mubr.msk.bf16.vlgmr.msra.gmra.mrb[24].mxu1 %vm861_vm0, %v1989_v32 }
 0xfa8   : > { %3961 = vmatprep.mubr.msk.bf16.mxu1 %vm4302_vm1, %v4301_v0  ;;  %3946 = vmatpush3.bf16.msra.mxu1 %v4161_v48 }
 0xfa9   : > { %3947 = vmatprep.subr.bf16.mxu1 %v4301_v0 }
 0xfac   : > { %3948 = vmatpush3.bf16.msra.mxu1 %v4162_v49 }
 0xfad   : > { %3949 = vmatprep.subr.bf16.mxu1 %v4301_v0 }
 0xfb0   : > { %3950 = vmatpush3.bf16.msra.mxu1 %v4163_v50 }
 0xfb1   : > { %3951 = vmatprep.subr.bf16.mxu1 %v4301_v0 }
 0xfb4   : > { %3952 = vmatpush3.bf16.msra.mxu1 %v4164_v51 }
 0xfb5   : > { %3953 = vmatprep.subr.bf16.mxu1 %v4301_v0 }
 0xfb8   : > { %3954 = vmatpush3.bf16.msra.mxu1 %v4165_v52 }
 0xfb9   : > { %3955 = vmatprep.subr.bf16.mxu1 %v4301_v0 }
 0xfbc   : > { %3956 = vmatpush3.bf16.msra.mxu1 %v4166_v53 }
 0xfbd   : > { %3957 = vmatprep.subr.bf16.mxu1 %v4301_v0 }
 0xfc0   : > { %3958 = vmatpush3.bf16.msra.mxu1 %v4167_v63 }
 0xfc1   : > { %3959 = vmatprep.subr.bf16.mxu1 %v4301_v0 }
 0xfc4   : > { %3960 = vmatpush3.bf16.msra.mxu1 %v4168_v1 }
 0xfc5   : > { %3991 = vmatprep.subr.bf16.mxu1 %v4301_v0 }
0x107a   : > { %v2045_v34 = vpop.f32.mrb[24].mxu1 }
0x107b   : > { %v2046_v35 = vadd.f32 %v3594_v33, %v2045_v34  ;;  %v3935_v36 = vpop.f32.mrb[25].mxu1  ;;  %v3615_v33 = vld [vmem:[%s5192_s28 + $0x1] ss:$0 sm:$0xff] }
0x107c   : > { %v2048_v37 = vpop.f32.mrb[26].mxu1 }
0x107d   : > { %v4740_v38 = vadd.f32 %v2046_v35, %v4641_v3  ;;  %v3936_v39 = vpop.f32.mrb[27].mxu1  ;;  %v4160_v3 = vld [vmem:[%s5206_s19 + $0x8] sm:$0xff]   ;;  %s5209_s19 = sld [smem:[#allocation22_spill]]  ;;  %v3616_v35 = vld [vmem:[%s5193_s6 + $0x1] ss:$0 sm:$0xff]  ;;  %s4241_s6 = sshll.u32 %s4313_s9, 4  ;;  %s4242_s6 = int_to_ptr.vmem [resolvable:$false] %s4241_s6 }
0x107e   : > { %3940 = vmatpush3.bf16.msra.mxu0 %v4160_v3  ;;  %v3627_v39 = vld [vmem:[%s5195_s26 + $0x1] ss:$0 sm:$0xff] }
0x107f   : > { %v2054_v10 = vsel %vm861_vm0, %v4740_v38, 0.0  ;;  %3965 = vmatprep.subr.bf16.mxu0 %v4301_v0 }
0x1080   : > { %2055 = vadd.xlane.f32.xlu0 %v2054_v10 }
0x1083   : > { %v3599_v59 = vld [vmem:[%s5209_s19] ss:$0 sm:$0xff] }
0x110d   : > { %v2056_v40 = vpop.xlane.xlu0 %2055 }
0x110e   : > { %v2057_v41 = vmul.f32 0.03125, %v2056_v40 }
0x1110   : > { %v2058_v42 = vsub.f32 %v4740_v38, %v2057_v41 }
0x1112   : > { %v2059_v43 = vmul.f32 %v2058_v42, %v2058_v42 }
0x1114   : > { %v2060_v44 = vsel %vm861_vm0, %v2059_v43, 0.0 }
0x1115   : > { %2061 = vadd.xlane.f32.xlu1 %v2060_v44 }
0x11a2   : > { %v2062_v46 = vpop.xlane.xlu1 %2061 }
0x11a3   : > { %v2063_v54 = vmul.f32 0.03125, %v2062_v46 }
0x11a5   : > { %v2064_v55 = vadd.f32 1e-05, %v2063_v54 }
0x11a7   : > { %4211 = vrsqrt.f32 %v2064_v55 }
0x11b1   : > { %v4212_v56 = vpop.eup %4211 }
0x11b2   : > { %v2066_v58 = vmul.f32 %v4212_v56, %v2058_v42 }
0x11b4   : > { %v2073_v60 = vmul.f32 %v3598_v57, %v2066_v58 }
0x11b6   : > { %v2080_v61 = vadd.f32 %v3599_v59, %v2073_v60 }
0x11b8   : > { %v2081_v62 = vpack.c.bf16 %v2080_v61, %v2080_v61 }
0x11ba   : > { %3942 = vmatmul.mubr.msk.bf16.vlgmr.msra.gmra.mrb[36].mxu0 %vm861_vm0, %v2081_v62 }
0x11bb   : > { %3969 = vmatprep.mubr.msk.bf16.mxu0 %vm4302_vm1, %v4301_v0  ;;  %3966 = vmatpush3.bf16.msra.mxu0 %v4169_v26 }
0x11bc   : > { %3967 = vmatprep.subr.bf16.mxu0 %v4301_v0 }
0x11bf   : > { %3968 = vmatpush3.bf16.msra.mxu0 %v4170_v27 }
0x11c0   : > { %3973 = vmatprep.subr.bf16.mxu0 %v4301_v0 }
0x128d   : > { %v2159_v4 = vpop.f32.mrb[36].mxu0 }
0x128e   : > { %v2160_v5 = vadd.f32 %v3600_v2, %v2159_v4  ;;  %v3943_v6 = vpop.f32.mrb[37].mxu0 }
0x128f   : > { %v2162_v7 = vpop.f32.mrb[38].mxu0 }
0x1290   : > { %v2165_v8 = vmax.f32 %v2160_v5, 0.0  ;;  %v3944_v9 = vpop.f32.mrb[39].mxu0 }
0x1292   : > { %v2166_v11 = vpack.c.bf16 %v2165_v8, %v2165_v8 }
0x1294   : > { %3962 = vmatmul.mubr.bf16.vlgmr.msra.gmra.mrb[28].mxu1 %v2166_v11 }
0x1295   : > { %3993 = vmatprep.mubr.msk.bf16.mxu1 %vm4302_vm1, %v4301_v0 }
0x1367   : > { %v2255_v29 = vpop.f32.mrb[28].mxu1 }
0x1368   : > { %v2256_v13 = vadd.f32 %v3604_v12, %v2255_v29  ;;  %v3963_v14 = vpop.f32.mrb[29].mxu1 }
0x1369   : > { %v2258_v15 = vpop.f32.mrb[30].mxu1 }
0x136a   : > { %v4804_v16 = vadd.f32 %v2256_v13, %v4740_v38  ;;  %v3964_v18 = vpop.f32.mrb[31].mxu1 }
0x136c   : > { %v2266_v19 = vsel %vm861_vm0, %v4804_v16, 0.0 }
0x136d   : > { %2267 = vadd.xlane.f32.xlu0 %v2266_v19 }
0x13fa   : > { %v2268_v20 = vpop.xlane.xlu0 %2267 }
0x13fb   : > { %v2269_v22 = vmul.f32 0.03125, %v2268_v20 }
0x13fd   : > { %v2270_v23 = vsub.f32 %v4804_v16, %v2269_v22 }
0x13ff   : > { %v2271_v24 = vmul.f32 %v2270_v23, %v2270_v23 }
0x1401   : > { %v2272_v25 = vsel %vm861_vm0, %v2271_v24, 0.0 }
0x1402   : > { %2273 = vadd.xlane.f32.xlu0 %v2272_v25 }
0x148f   : > { %v2274_v28 = vpop.xlane.xlu0 %2273 }
0x1490   : > { %v2275_v30 = vmul.f32 0.03125, %v2274_v28  ;;  %v4171_v28 = vld [vmem:[%s5197_s10 + $0x10] sm:$0xff]  }
0x1492   : > { %v2276_v31 = vadd.f32 1e-05, %v2275_v30  ;;  %v4172_v30 = vld [vmem:[%s5197_s10 + $0x18] sm:$0xff]  }
0x1494   : > { %4213 = vrsqrt.f32 %v2276_v31 }
0x149e   : > { %v4214_v32 = vpop.eup %4213 }
0x149f   : > { %v2278_v34 = vmul.f32 %v4214_v32, %v2270_v23 }
0x14a1   : > { %v2285_v36 = vmul.f32 %v3615_v33, %v2278_v34 }
0x14a3   : > { %v2292_v37 = vadd.f32 %v3616_v35, %v2285_v36 }
0x14a5   : > { %v2293_v38 = vpack.c.bf16 %v2292_v37, %v2292_v37 }
0x14a7   : > { %3970 = vmatmul.mubr.msk.bf16.vlgmr.msra.gmra.mrb[40].mxu0 %vm861_vm0, %v2293_v38  ;;  %v3635_v38 = vld [vmem:[%s5105_s12 + $0x1] ss:$0 sm:$0xff] }
0x14a8   : > { %3975 = vmatprep.mubr.msk.bf16.mxu0 %vm4302_vm1, %v4301_v0 }
0x157a   : > { %v2363_v10 = vpop.f32.mrb[40].mxu0 }
0x157b   : > { %v2364_v40 = vadd.f32 %v3627_v39, %v2363_v10  ;;  %v3971_v41 = vpop.f32.mrb[41].mxu0 }
0x157c   : > { %v2366_v42 = vpop.f32.mrb[42].mxu0 }
0x157d   : > { %v2369_v43 = vpack.c.bf16 %v2364_v40, %v2364_v40  ;;  %v3972_v44 = vpop.f32.mrb[43].mxu0 }
0x157f   : > { %2371 = vrot.lane.b32.xlu1 %v2369_v43, %s5203_s11 }
0x1583   : > { %2481 = vrot.lane.b32.xlu1 %v2369_v43, %s5204_s29 }
0x1587   : > { %2479 = vrot.lane.b32.xlu1 %v2369_v43, %s5201_s30 }
0x15f1   : > { %v2372_v45 = vpop.permute.xlu1 %2371 }
0x15f2   : > { %v2377_v3 = vsel %vm1311_vm12, %v2372_v45, 0 }
0x15f3   : > { %3974 = vmatpush3.bf16.xpose.msra.mxu0 %v2377_v3 }
0x15f4   : > { %3979 = vmatprep.subr.bf16.mxu0 %v4301_v0 }
0x15f5   : > { %v2482_v63 = vpop.permute.xlu1 %2481 }
0x15f6   : > { %v2487_v2 = vsel %vm1311_vm12, %v2482_v63, 0 }
0x15f9   : > { %v2480_v4 = vpop.permute.xlu1 %2479 }
0x15fa   : > { %3976 = vmatmul.mubr.msk.bf16.vlgmr.msra.gmra.mrb[44].mxu0 %vm1311_vm12, %v2369_v43 }
0x15fb   : > { %3981 = vmatprep.mubr.msk.bf16.mxu0 %vm4302_vm1, %v4301_v0 }
0x16cd   : > { %v2413_v48 = vpop.f32.mrb[44].mxu0 }
0x16ce   : > { %v2414_v49 = vadd.f32 %v2413_v48, %v4535_v21  ;;  %v3977_v50 = vpop.f32.mrb[45].mxu0 }
0x16cf   : > { %v2416_v51 = vpop.f32.mrb[46].mxu0 }
0x16d0   : > { %v3978_v52 = vpop.f32.mrb[47].mxu0  ;;  %v2419_v53 = vsel %vm1042_vm5, %v2414_v49, -inf  ;;  %v4173_v51 = vld [vmem:[%s5108_s15 + $0x10] sm:$0xff]  }
0x16d1   : > { %2420 = vmax.xlane.f32.xlu0 %v2419_v53  ;;  %v4175_v52 = vld [vmem:[%s5106_s13 + $0x10] sm:$0xff]   ;;  %v4176_v53 = vld [vmem:[%s5106_s13 + $0x18] sm:$0xff]  }
0x175e   : > { %v2421_v46 = vpop.xlane.xlu0 %2420 }
0x175f   : > { %v2422_v54 = vsub.f32 %v2414_v49, %v2421_v46 }
0x1761   : > { %v2423_v55 = vmul.f32 1.442695, %v2422_v54 }
0x1763   : > { %4215 = vpow2.f32 %v2423_v55 }
0x176d   : > { %v4216_v56 = vpop.eup %4215 }
0x176e   : > { %v2425_v57 = vsel %vm1042_vm5, %v4216_v56, 0.0 }
0x176f   : > { %2426 = vadd.xlane.f32.xlu0 %v2425_v57 }
0x1785   : > { %2431 = vrot.lane.b32.xlu0 %v2369_v43, %s5210_s7 }
0x17fc   : > { %v2427_v58 = vpop.xlane.xlu0 %2426 }
0x17fd   : > { %4217 = vrcp.f32 %v2427_v58  ;;  %v3642_v58 = vld [vmem:[%s5200_s24 + $0x1] ss:$0 sm:$0xff] }
0x1800   : > { %v2432_v59 = vpop.permute.xlu0 %2431 }
0x1801   : > { %v2437_v60 = vsel %vm1375_vm3, %v2432_v59, 0 }
0x1802   : > { %3980 = vmatpush3.bf16.msra.mxu0 %v2437_v60 }
0x1803   : > { %3985 = vmatprep.subr.bf16.mxu0 %v4301_v0 }
0x1807   : > { %v4218_v61 = vpop.eup %4217 }
0x1808   : > { %v2429_v62 = vmul.f32 %v4218_v61, %v4216_v56  ;;  %v3641_v56 = vld [vmem:[%s5199_s1 + $0x1] ss:$0 sm:$0xff] }
0x180a   : > { %v2430_v1 = vpack.c.bf16 %v2429_v62, %v2429_v62  ;;  %v3662_v62 = vld [vmem:[%s5109_s16 + $0x1] ss:$0 sm:$0xff] }
0x180c   : > { %3982 = vmatmul.mubr.msk.bf16.vlgmr.msra.gmra.mrb[48].mxu0 %vm1042_vm5, %v2430_v1 }
0x180d   : > { %3986 = vmatpush3.bf16.xpose.msra.mxu0 %v2487_v2  ;;  %3987 = vmatprep.mubr.msk.bf16.mxu0 %vm4302_vm1, %v4301_v0 }
0x180e   : > { %3997 = vmatprep.subr.bf16.mxu0 %v4301_v0 }
0x1814   : > { %3988 = vmatmul.mubr.msk.bf16.vlgmr.msra.gmra.mrb[52].mxu0 %vm1311_vm12, %v2480_v4 }
0x1815   : > { %4001 = vmatprep.mubr.msk.bf16.mxu0 %vm4302_vm1, %v4301_v0  ;;  %3998 = vmatpush3.bf16.msra.mxu0 %v4171_v28 }
0x1816   : > { %3999 = vmatprep.subr.bf16.mxu0 %v4301_v0 }
0x1819   : > { %4000 = vmatpush3.bf16.msra.mxu0 %v4172_v30 }
0x181a   : > { %4013 = vmatprep.subr.bf16.mxu0 %v4301_v0 }
0x18df   : > { %v2473_v5 = vpop.f32.mrb[48].mxu0 }
0x18e0   : > { %v3983_v6 = vpop.f32.mrb[49].mxu0 }
0x18e1   : > { %v2476_v7 = vpop.f32.mrb[50].mxu0 }
0x18e2   : > { %v3984_v8 = vpop.f32.mrb[51].mxu0 }
0x18e7   : > { %v2523_v9 = vpop.f32.mrb[52].mxu0 }
0x18e8   : > { %v2524_v11 = vadd.f32 %v2523_v9, %v4535_v21  ;;  %v3989_v12 = vpop.f32.mrb[53].mxu0  ;;  %v3658_v9 = vld [vmem:[%s5107_s14 + $0x1] ss:$0 sm:$0xff] }
0x18e9   : > { %v2526_v29 = vpop.f32.mrb[54].mxu0 }
0x18ea   : > { %v3990_v13 = vpop.f32.mrb[55].mxu0  ;;  %v2529_v14 = vsel %vm1042_vm5, %v2524_v11, -inf }
0x18eb   : > { %2530 = vmax.xlane.f32.xlu1 %v2529_v14 }
0x18fc   : > { %2541 = vrot.lane.b32.xlu1 %v2369_v43, %s5211_s8 }
0x1978   : > { %v2531_v15 = vpop.xlane.xlu1 %2530 }
0x1979   : > { %v2532_v18 = vsub.f32 %v2524_v11, %v2531_v15 }
0x197b   : > { %v2533_v19 = vmul.f32 1.442695, %v2532_v18 }
0x197c   : > { %v2542_v20 = vpop.permute.xlu1 %2541 }
0x197d   : > { %4219 = vpow2.f32 %v2533_v19  ;;  %v2547_v22 = vsel %vm1375_vm3, %v2542_v20, 0 }
0x197e   : > { %3992 = vmatpush3.bf16.msra.mxu1 %v2547_v22 }
0x197f   : > { %4005 = vmatprep.subr.bf16.mxu1 %v4301_v0 }
0x1987   : > { %v4220_v23 = vpop.eup %4219 }
0x1988   : > { %v2535_v21 = vsel %vm1042_vm5, %v4220_v23, 0.0 }
0x1989   : > { %2536 = vadd.xlane.f32.xlu0 %v2535_v21 }
0x1a16   : > { %v2537_v24 = vpop.xlane.xlu0 %2536 }
0x1a17   : > { %4221 = vrcp.f32 %v2537_v24 }
0x1a21   : > { %v4222_v25 = vpop.eup %4221 }
0x1a22   : > { %v2539_v26 = vmul.f32 %v4222_v25, %v4220_v23 }
0x1a24   : > { %v2540_v27 = vpack.c.bf16 %v2539_v26, %v2539_v26 }
0x1a26   : > { %3994 = vmatmul.mubr.msk.bf16.vlgmr.msra.gmra.mrb[32].mxu1 %vm1042_vm5, %v2540_v27 }
0x1a27   : > { %4009 = vmatprep.mubr.msk.bf16.mxu1 %vm4302_vm1, %v4301_v0  ;;  %4006 = vmatpush3.bf16.msra.mxu1 %v4175_v52 }
0x1a28   : > { %4007 = vmatprep.subr.bf16.mxu1 %v4301_v0 }
0x1a2b   : > { %4008 = vmatpush3.bf16.msra.mxu1 %v4176_v53  ;;  %v4177_v53 = vld [vmem:[%s5110_s17 + $0x10] sm:$0xff]  }
0x1a2c   : > { %4021 = vmatprep.subr.bf16.mxu1 %v4301_v0 }
0x1af9   : > { %v2583_v31 = vpop.f32.mrb[32].mxu1 }
0x1afa   : > { %2590 = vrot.lane.b32.xlu0 %v2583_v31, %s5205_s27  ;;  %v3995_v32 = vpop.f32.mrb[33].mxu1 }
0x1afb   : > { %v2586_v33 = vpop.f32.mrb[34].mxu1 }
0x1afc   : > { %v3996_v34 = vpop.f32.mrb[35].mxu1 }
0x1b6c   : > { %v2591_v35 = vpop.permute.xlu0 %2590 }
0x1b6d   : > { %v2593_v36 = vsel %vm1311_vm12, %v2473_v5, %v2591_v35 }
0x1b6e   : > { %v2594_v37 = vpack.c.bf16 %v2593_v36, %v2593_v36 }
0x1b70   : > { %4002 = vmatmul.mubr.msk.bf16.vlgmr.msra.gmra.mrb[56].mxu0 %vm861_vm0, %v2594_v37 }
0x1b71   : > { %4017 = vmatprep.mubr.msk.bf16.mxu0 %vm4302_vm1, %v4301_v0  ;;  %4014 = vmatpush3.bf16.msra.mxu0 %v4173_v51 }
0x1b72   : > { %4015 = vmatprep.subr.bf16.mxu0 %v4301_v0 }
0x1c43   : > { %v2650_v39 = vpop.f32.mrb[56].mxu0 }
0x1c44   : > { %v2651_v10 = vadd.f32 %v3635_v38, %v2650_v39  ;;  %v4003_v40 = vpop.f32.mrb[57].mxu0 }
0x1c45   : > { %v2653_v41 = vpop.f32.mrb[58].mxu0 }
0x1c46   : > { %v4878_v42 = vadd.f32 %v2651_v10, %v4804_v16  ;;  %v4004_v43 = vpop.f32.mrb[59].mxu0  ;;  %v4174_v16 = vld [vmem:[%s5108_s15 + $0x18] sm:$0xff]  }
0x1c47   : > { %4016 = vmatpush3.bf16.msra.mxu0 %v4174_v16 }
0x1c48   : > { %v2661_v44 = vsel %vm861_vm0, %v4878_v42, 0.0  ;;  %4027 = vmatprep.subr.bf16.mxu0 %v4301_v0 }
0x1c49   : > { %2662 = vadd.xlane.f32.xlu1 %v2661_v44 }
0x1c4a   : > { %4018 = vmatmul.mubr.msk.bf16.vlgmr.msra.gmra.mrb[60].mxu0 %vm861_vm0, %v4595_v17 }
0x1c4b   : > { %4029 = vmatprep.mubr.msk.bf16.mxu0 %vm4302_vm1, %v4301_v0 }
0x1cd6   : > { %v2663_v45 = vpop.xlane.xlu1 %2662 }
0x1cd7   : > { %v2664_v3 = vmul.f32 0.03125, %v2663_v45 }
0x1cd9   : > { %v2665_v48 = vsub.f32 %v4878_v42, %v2664_v3 }
0x1cdb   : > { %v2666_v49 = vmul.f32 %v2665_v48, %v2665_v48 }
0x1cdd   : > { %v2667_v50 = vsel %vm861_vm0, %v2666_v49, 0.0 }
0x1cde   : > { %2668 = vadd.xlane.f32.xlu0 %v2667_v50 }
0x1d1d   : > { %v2824_v63 = vpop.f32.mrb[60].mxu0 }
0x1d1e   : > { %v2825_v1 = vadd.f32 %v3662_v62, %v2824_v63  ;;  %v4019_v2 = vpop.f32.mrb[61].mxu0 }
0x1d1f   : > { %v2827_v4 = vpop.f32.mrb[62].mxu0 }
0x1d20   : > { %v2828_v5 = vadd.f32 %v3662_v62, %v2827_v4  ;;  %v4020_v6 = vpop.f32.mrb[63].mxu0 }
0x1d22   : > { %v2831_v7 = vpack.c.bf16 %v2828_v5, %v2825_v1  ;;  %v3672_v1 = vld [vmem:[%s5111_s18 + $0x1] ss:$0 sm:$0xff] }
0x1d24   : > { %2942 = vrot.lane.b32.xlu1 %v2831_v7, %s5201_s30  ;;  %v2836_v8 = vsel %vm1311_vm12, %v2831_v7, 0 }
0x1d6b   : > { %v2669_v46 = vpop.xlane.xlu0 %2668 }
0x1d6c   : > { %v2670_v54 = vmul.f32 0.03125, %v2669_v46 }
0x1d6e   : > { %v2671_v17 = vadd.f32 1e-05, %v2670_v54 }
0x1d70   : > { %4223 = vrsqrt.f32 %v2671_v17 }
0x1d7a   : > { %v4224_v55 = vpop.eup %4223 }
0x1d7b   : > { %v2673_v57 = vmul.f32 %v4224_v55, %v2665_v48 }
0x1d7d   : > { %v2680_v59 = vmul.f32 %v3641_v56, %v2673_v57  ;;  %v4178_v56 = vld [vmem:[%s5110_s17 + $0x18] sm:$0xff]  }
0x1d7f   : > { %v2687_v60 = vadd.f32 %v3642_v58, %v2680_v59 }
0x1d81   : > { %v2688_v61 = vpack.c.bf16 %v2687_v60, %v2687_v60 }
0x1d83   : > { %4010 = vmatmul.mubr.msk.bf16.vlgmr.msra.gmra.mrb[36].mxu1 %vm861_vm0, %v2688_v61 }
0x1d84   : > { %4023 = vmatprep.mubr.msk.bf16.mxu1 %vm4302_vm1, %v4301_v0  ;;  %4022 = vmatpush3.bf16.xpose.msra.mxu1 %v2836_v8 }
0x1d85   : > { %4033 = vmatprep.subr.bf16.mxu1 %v4301_v0 }
0x1d96   : > { %v2943_v12 = vpop.permute.xlu1 %2942 }
0x1d97   : > { %v2948_v19 = vsel %vm1311_vm12, %v2943_v12, 0 }
0x1e56   : > { %v2765_v11 = vpop.f32.mrb[36].mxu1 }
0x1e57   : > { %v2766_v29 = vadd.f32 %v3658_v9, %v2765_v11  ;;  %v4011_v13 = vpop.f32.mrb[37].mxu1 }
0x1e58   : > { %v2768_v14 = vpop.f32.mrb[38].mxu1 }
0x1e59   : > { %v2771_v15 = vpack.c.bf16 %v2766_v29, %v2766_v29  ;;  %v4012_v18 = vpop.f32.mrb[39].mxu1 }
0x1e5a   : > { %v4181_v18 = vld [vmem:[%s5114_s21 + $0x40] sm:$0xff]  }
0x1e5b   : > { %2940 = vrot.lane.b32.xlu0 %v2771_v15, %s5201_s30  ;;  %4024 = vmatmul.mubr.msk.bf16.vlgmr.msra.gmra.mrb[40].mxu1 %vm1311_vm12, %v2771_v15  ;;  %v4179_v15 = vld [vmem:[%s5212_s3 + $0x10] sm:$0xff]  }
0x1e5c   : > { %4034 = vmatpush3.bf16.xpose.msra.mxu1 %v2948_v19  ;;  %4035 = vmatprep.mubr.msk.bf16.mxu1 %vm4302_vm1, %v4301_v0  ;;  %v4182_v19 = vld [vmem:[%s5114_s21 + $0x48] sm:$0xff]  }
0x1e5d   : > { %4045 = vmatprep.subr.bf16.mxu1 %v4301_v0 }
0x1ecd   : > { %v2941_v20 = vpop.permute.xlu0 %2940 }
0x1ece   : > { %4036 = vmatmul.mubr.msk.bf16.vlgmr.msra.gmra.mrb[44].mxu1 %vm1311_vm12, %v2941_v20  ;;  %v4183_v20 = vld [vmem:[%s5114_s21 + $0x50] sm:$0xff]  }
0x1ecf   : > { %4049 = vmatprep.mubr.msk.bf16.mxu1 %vm4302_vm1, %v4301_v0  ;;  %4046 = vmatpush3.bf16.msra.mxu1 %v4177_v53 }
0x1ed0   : > { %4047 = vmatprep.subr.bf16.mxu1 %v4301_v0 }
0x1ed3   : > { %4048 = vmatpush3.bf16.msra.mxu1 %v4178_v56 }
0x1ed4   : > { %4061 = vmatprep.subr.bf16.mxu1 %v4301_v0 }
0x1f2e   : > { %v2872_v22 = vpop.f32.mrb[40].mxu1 }
0x1f2f   : > { %v2873_v23 = vadd.f32 %v2872_v22, %v4696_v47  ;;  %v4025_v21 = vpop.f32.mrb[41].mxu1  ;;  %v4184_v22 = vld [vmem:[%s5114_s21 + $0x58] sm:$0xff]  }
0x1f30   : > { %v2875_v24 = vpop.f32.mrb[42].mxu1  ;;  %v4186_v21 = vld [vmem:[%s5114_s21 + $0x68] sm:$0xff]  }
0x1f31   : > { %3667 = vst.msk [vmem:[%s4701_s5 + $0x10] sm:$0xff] %vm1311_vm12, %v2873_v23  ;;  %v4026_v25 = vpop.f32.mrb[43].mxu1  ;;  %v2880_v26 = vsel %vm1311_vm12, %v2873_v23, -inf }
0x1f32   : > { %2881 = vmax.xlane.f32.xlu1 %v2880_v26 }
0x1fa1   : > { %v2984_v27 = vpop.f32.mrb[44].mxu1 }
0x1fa2   : > { %v2985_v28 = vadd.f32 %v2984_v27, %v4696_v47  ;;  %v4037_v30 = vpop.f32.mrb[45].mxu1 }
0x1fa3   : > { %v2987_v31 = vpop.f32.mrb[46].mxu1 }
0x1fa4   : > { %3670 = vst.msk [vmem:[%s4701_s5 + $0x18] sm:$0xff] %vm1311_vm12, %v2985_v28  ;;  %v4038_v32 = vpop.f32.mrb[47].mxu1  ;;  %v2992_v33 = vsel %vm1311_vm12, %v2985_v28, -inf  ;;  %v3679_v31 = vld [vmem:[%s5209_s19 + $0x1] ss:$0 sm:$0xff]  ;;  %s5213_s5 = sld [smem:[#allocation29_spill]] }
0x1fa5   : > { %2993 = vmax.xlane.f32.xlu0 %v2992_v33 }
0x1faa   : > { %v4190_v56 = vld [vmem:[%s5213_s5 + $0x8] sm:$0xff]  }
0x1fbf   : > { %v2882_v34 = vpop.xlane.xlu1 %2881 }
0x1fc0   : > { %v2883_v35 = vsub.f32 %v2873_v23, %v2882_v34  ;;  %v4185_v23 = vld [vmem:[%s5114_s21 + $0x60] sm:$0xff]  }
0x1fc2   : > { %v2884_v36 = vmul.f32 1.442695, %v2883_v35  ;;  %v4187_v35 = vld [vmem:[%s5114_s21 + $0x70] sm:$0xff]  }
0x1fc4   : > { %4225 = vpow2.f32 %v2884_v36  ;;  %v4188_v36 = vld [vmem:[%s5114_s21 + $0x78] sm:$0xff]  }
0x1fce   : > { %v4226_v37 = vpop.eup %4225 }
0x1fcf   : > { %v2886_v38 = vsel %vm1311_vm12, %v4226_v37, 0.0 }
0x1fd0   : > { %2887 = vadd.xlane.f32.xlu1 %v2886_v38 }
0x1fe1   : > { %2893 = vrot.lane.b32.xlu1 %v2831_v7, %s5203_s11  ;;  %s823_s11 = sand.u32 1, %s5214_s4  }
0x1fe2   : > { %s3425_s4 = scalar_lea.sflag [#allocation3], %s823_s11 }
0x2032   : > { %v2994_v39 = vpop.xlane.xlu0 %2993 }
0x2033   : > { %v2995_v47 = vsub.f32 %v2985_v28, %v2994_v39  ;;  %v3678_v28 = vld [vmem:[%s5208_s23 + $0x1] ss:$0 sm:$0xff] }
0x2035   : > { %v2996_v10 = vmul.f32 1.442695, %v2995_v47 }
0x2037   : > { %4227 = vpow2.f32 %v2996_v10 }
0x2041   : > { %v4228_v40 = vpop.eup %4227 }
0x2042   : > { %v2998_v41 = vsel %vm1311_vm12, %v4228_v40, 0.0 }
0x2043   : > { %2999 = vadd.xlane.f32.xlu0 %v2998_v41 }
0x2059   : > { %3004 = vrot.lane.b32.xlu0 %v2831_v7, %s5204_s29  ;;  %s3546_s29 = sshll.u32 %s823_s11, 3 }
0x205a   : > { %s825_s1 = scalar_lea.vmem [#allocation2], %s3546_s29 }
0x205d   : > { %v2888_v43 = vpop.xlane.xlu1 %2887 }
0x205e   : > { %4229 = vrcp.f32 %v2888_v43 }
0x2061   : > { %v2894_v44 = vpop.permute.xlu1 %2893 }
0x2062   : > { %4028 = vmatpush3.bf16.msra.mxu0 %v2894_v44  ;;  %v3706_v44 = vld [vmem:[%s5115_s22 + $0x1] ss:$0 sm:$0xff] }
0x2063   : > { %4039 = vmatprep.subr.bf16.mxu0 %v4301_v0 }
0x2068   : > { %v4230_v45 = vpop.eup %4229 }
0x2069   : > { %v2890_v3 = vmul.f32 %v4230_v45, %v4226_v37  ;;  %v3702_v37 = vld [vmem:[%s5113_s20 + $0x1] ss:$0 sm:$0xff] }
0x206b   : > { %v2891_v48 = vpack.c.bf16 %v2890_v3, %v2890_v3 }
0x206d   : > { %4030 = vmatmul.mubr.msk.bf16.vlgmr.msra.gmra.mrb[64].mxu0 %vm1311_vm12, %v2891_v48 }
0x206e   : > { %4041 = vmatprep.mubr.msk.bf16.mxu0 %vm4302_vm1, %v4301_v0 }
0x20d0   : > { %v3000_v49 = vpop.xlane.xlu0 %2999 }
0x20d1   : > { %4231 = vrcp.f32 %v3000_v49 }
0x20d4   : > { %v3005_v50 = vpop.permute.xlu0 %3004 }
0x20d5   : > { %4040 = vmatpush3.bf16.msra.mxu0 %v3005_v50 }
0x20d6   : > { %4053 = vmatprep.subr.bf16.mxu0 %v4301_v0 }
0x20db   : > { %v4232_v51 = vpop.eup %4231 }
0x20dc   : > { %v3002_v16 = vmul.f32 %v4232_v51, %v4228_v40 }
0x20de   : > { %v3003_v52 = vpack.c.bf16 %v3002_v16, %v3002_v16 }
0x20e0   : > { %4042 = vmatmul.mubr.msk.bf16.vlgmr.msra.gmra.mrb[68].mxu0 %vm1311_vm12, %v3003_v52 }
0x20e1   : > { %4057 = vmatprep.mubr.msk.bf16.mxu0 %vm4302_vm1, %v4301_v0  ;;  %4054 = vmatpush3.bf16.msra.mxu0 %v4179_v15 }
0x20e2   : > { %4055 = vmatprep.subr.bf16.mxu0 %v4301_v0 }
0x2140   : > { %v2933_v46 = vpop.f32.mrb[64].mxu0 }
0x2141   : > { %v4031_v54 = vpop.f32.mrb[65].mxu0 }
0x2142   : > { %v2936_v17 = vpop.f32.mrb[66].mxu0 }
0x2143   : > { %v4032_v55 = vpop.f32.mrb[67].mxu0 }
0x2144   : > { %v4189_v55 = vld [vmem:[%s5213_s5] sm:$0xff]   ;;  %s3443_s5 = sshll.u32 %s825_s1, 4  ;;  %s5052_s5 = int_to_ptr.vmem [resolvable:$true] %s3443_s5 }
0x2145   : > { %p4244_p0 = scmp.lt.s32.totalorder %s5052_s5, %s4242_s6 }
0x21b3   : > { %v3044_v57 = vpop.f32.mrb[68].mxu0 }
0x21b4   : > { %3051 = vrot.lane.b32.xlu1 %v3044_v57, %s5205_s27  ;;  %v4043_v58 = vpop.f32.mrb[69].mxu0  ;;  %s5219_s27 = sld [smem:[#allocation30_spill]] }
0x21b5   : > { %v3047_v59 = vpop.f32.mrb[70].mxu0 }
0x21b6   : > { %v4044_v60 = vpop.f32.mrb[71].mxu0 }
0x21ba   : > { %s5050_s2 = scalar_lea.hbm %s5219_s27, %s3721_s0  ;;  %s4243_s0 = scalar_lea.vmem %s4242_s6, 256 }
0x2226   : > { %v3052_v61 = vpop.permute.xlu1 %3051 }
0x2227   : > { %v3054_v62 = vsel %vm1311_vm12, %v2933_v46, %v3052_v61 }
0x2228   : > { %v3055_v63 = vpack.c.bf16 %v3054_v62, %v3054_v62 }
0x222a   : > { %4050 = vmatmul.mubr.msk.bf16.vlgmr.msra.gmra.mrb[48].mxu1 %vm861_vm0, %v3055_v63  ;;  %v3716_v63 = vld [vmem:[%s5217_s25] ss:$0 sm:$0xff] }
0x222b   : > { %4077 = vmatprep.mubr.msk.bf16.mxu1 %vm4302_vm1, %v4301_v0  ;;  %4062 = vmatpush3.bf16.msra.mxu1 %v4181_v18 }
0x222c   : > { %4063 = vmatprep.subr.bf16.mxu1 %v4301_v0 }
0x222f   : > { %4064 = vmatpush3.bf16.msra.mxu1 %v4182_v19 }
0x2230   : > { %4065 = vmatprep.subr.bf16.mxu1 %v4301_v0 }
0x2233   : > { %4066 = vmatpush3.bf16.msra.mxu1 %v4183_v20 }
0x2234   : > { %4067 = vmatprep.subr.bf16.mxu1 %v4301_v0 }
0x2237   : > { %4068 = vmatpush3.bf16.msra.mxu1 %v4184_v22 }
0x2238   : > { %4069 = vmatprep.subr.bf16.mxu1 %v4301_v0 }
0x223b   : > { %4070 = vmatpush3.bf16.msra.mxu1 %v4185_v23 }
0x223c   : > { %4071 = vmatprep.subr.bf16.mxu1 %v4301_v0 }
0x223f   : > { %4072 = vmatpush3.bf16.msra.mxu1 %v4186_v21 }
0x2240   : > { %4073 = vmatprep.subr.bf16.mxu1 %v4301_v0 }
0x2243   : > { %4074 = vmatpush3.bf16.msra.mxu1 %v4187_v35 }
0x2244   : > { %4075 = vmatprep.subr.bf16.mxu1 %v4301_v0 }
0x2247   : > { %4076 = vmatpush3.bf16.msra.mxu1 %v4188_v36 }
0x22fd   : > { %v3111_v2 = vpop.f32.mrb[48].mxu1 }
0x22fe   : > { %v3112_v4 = vadd.f32 %v3672_v1, %v3111_v2  ;;  %v4051_v5 = vpop.f32.mrb[49].mxu1 }
0x22ff   : > { %v3114_v6 = vpop.f32.mrb[50].mxu1 }
0x2300   : > { %v4968_v7 = vadd.f32 %v3112_v4, %v4878_v42  ;;  %v4052_v8 = vpop.f32.mrb[51].mxu1  ;;  %v4180_v42 = vld [vmem:[%s5212_s3 + $0x18] sm:$0xff]   ;;  %s5216_s3 = sld [smem:[#allocation27_spill]] }
0x2301   : > { %4056 = vmatpush3.bf16.msra.mxu0 %v4180_v42 }
0x2302   : > { %v3122_v9 = vsel %vm861_vm0, %v4968_v7, 0.0  ;;  %4081 = vmatprep.subr.bf16.mxu0 %v4301_v0 }
0x2303   : > { %3123 = vadd.xlane.f32.xlu1 %v3122_v9 }
0x2306   : > { %v3715_v61 = vld [vmem:[%s5216_s3] ss:$0 sm:$0xff]  ;;  %s4237_s3 = scalar_lea.vmem %s5052_s5, 128 }
0x2307   : > { %p4238_p11 = scmp.ne.s32.totalorder %s5052_s5, %s4237_s3  ;;  %p4245_p1 = scmp.lt.s32.totalorder %s4243_s0, %s4237_s3 }
0x2309   : > { %p4239_p12 = pnand %p4238_p11, %p4492_p5  ;;  %p4246_p2 = por %p4245_p1, %p4244_p0 }
0x230b   : > { %p4240_p13 = pneg %p4239_p12 }
0x230d   : > { %p4247_p3 = pnand %p4246_p2, %p4240_p13 }
0x2390   : > { %v3124_v11 = vpop.xlane.xlu1 %3123 }
0x2391   : > { %v3125_v12 = vmul.f32 0.03125, %v3124_v11 }
0x2393   : > { %v3126_v29 = vsub.f32 %v4968_v7, %v3125_v12 }
0x2395   : > { %v3127_v13 = vmul.f32 %v3126_v29, %v3126_v29 }
0x2397   : > { %v3128_v14 = vsel %vm861_vm0, %v3127_v13, 0.0 }
0x2398   : > { %3129 = vadd.xlane.f32.xlu0 %v3128_v14 }
0x2425   : > { %v3130_v24 = vpop.xlane.xlu0 %3129 }
0x2426   : > { %v3131_v25 = vmul.f32 0.03125, %v3130_v24 }
0x2428   : > { %v3132_v26 = vadd.f32 1e-05, %v3131_v25 }
0x242a   : > { %4233 = vrsqrt.f32 %v3132_v26 }
0x2434   : > { %v4234_v27 = vpop.eup %4233 }
0x2435   : > { %v3134_v30 = vmul.f32 %v4234_v27, %v3126_v29 }
0x2437   : > { %v3141_v32 = vmul.f32 %v3678_v28, %v3134_v30 }
0x2439   : > { %v3148_v33 = vadd.f32 %v3679_v31, %v3141_v32 }
0x243b   : > { %v3149_v34 = vpack.c.bf16 %v3148_v33, %v3148_v33 }
0x243d   : > { %4058 = vmatmul.mubr.msk.bf16.vlgmr.msra.gmra.mrb[72].mxu0 %vm861_vm0, %v3149_v34 }
0x243e   : > { %4085 = vmatprep.mubr.msk.bf16.mxu0 %vm4302_vm1, %v4301_v0  ;;  %4082 = vmatpush3.bf16.msra.mxu0 %v4189_v55 }
0x243f   : > { %4083 = vmatprep.subr.bf16.mxu0 %v4301_v0 }
0x2442   : > { %4084 = vmatpush3.bf16.msra.mxu0 %v4190_v56 }
0x2510   : > { %v3231_v38 = vpop.f32.mrb[72].mxu0 }
0x2511   : > { %v3232_v39 = vadd.f32 %v3702_v37, %v3231_v38  ;;  %v4059_v47 = vpop.f32.mrb[73].mxu0 }
0x2512   : > { %v3234_v10 = vpop.f32.mrb[74].mxu0 }
0x2513   : > { %v3237_v40 = vmax.f32 %v3232_v39, 0.0  ;;  %v4060_v41 = vpop.f32.mrb[75].mxu0 }
0x2515   : > { %v3238_v43 = vpack.c.bf16 %v3237_v40, %v3237_v40 }
0x2517   : > { %4078 = vmatmul.mubr.bf16.vlgmr.msra.gmra.mrb[52].mxu1 %v3238_v43 }
0x25ea   : > { %v3327_v45 = vpop.f32.mrb[52].mxu1 }
0x25eb   : > { %v3328_v3 = vadd.f32 %v3706_v44, %v3327_v45  ;;  %v4079_v48 = vpop.f32.mrb[53].mxu1 }
0x25ec   : > { %v3330_v49 = vpop.f32.mrb[54].mxu1 }
0x25ed   : > { %v4080_v50 = vpop.f32.mrb[55].mxu1  ;;  %v3333_v51 = vadd.f32 %v3328_v3, %v4968_v7 }
0x25ef   : > { %v3336_v16 = vsel %vm861_vm0, %v3333_v51, 0.0 }
0x25f0   : > { %3337 = vadd.xlane.f32.xlu0 %v3336_v16 }
0x267d   : > { %v3338_v52 = vpop.xlane.xlu0 %3337 }
0x267e   : > { %v3339_v53 = vmul.f32 0.03125, %v3338_v52 }
0x2680   : > { %v3340_v46 = vsub.f32 %v3333_v51, %v3339_v53 }
0x2682   : > { %v3341_v54 = vmul.f32 %v3340_v46, %v3340_v46 }
0x2684   : > { %v3342_v17 = vsel %vm861_vm0, %v3341_v54, 0.0 }
0x2685   : > { %3343 = vadd.xlane.f32.xlu1 %v3342_v17 }
0x2712   : > { %v3344_v57 = vpop.xlane.xlu1 %3343 }
0x2713   : > { %v3345_v58 = vmul.f32 0.03125, %v3344_v57 }
0x2715   : > { %v3346_v59 = vadd.f32 1e-05, %v3345_v58 }
0x2717   : > { %4235 = vrsqrt.f32 %v3346_v59 }
0x2721   : > { %v4236_v60 = vpop.eup %4235 }
0x2722   : > { %v3348_v62 = vmul.f32 %v4236_v60, %v3340_v46 }
0x2724   : > { %v3355_v1 = vmul.f32 %v3715_v61, %v3348_v62 }
0x2726   : > { %v3362_v2 = vadd.f32 %v3716_v63, %v3355_v1 }
0x2728   : > { %v3363_v4 = vpack.c.bf16 %v3362_v2, %v3362_v2 }
0x272a   : > { %4086 = vmatmul.mubr.msk.bf16.vlgmr.msra.gmra.mrb[76].mxu0 %vm861_vm0, %v3363_v4 }
0x27fd   : > { %v3417_v0 = vpop.f32.mrb[76].mxu0 }
0x27fe   : > { %3423 = vst.msk [vmem:[%s825_s1] sm:$0xff] %vm1311_vm12, %v3417_v0  ;;  %v4087_v5 = vpop.f32.mrb[77].mxu0 }
0x27ff   : > { %v3420_v6 = vpop.f32.mrb[78].mxu0 }
0x2800   : > { %4250 = shalt.err (!%p4247_p3)
}
0x2801   : > { %s4251_s1 = scalar_lea.hbm %s5050_s2, 128  ;;  %s4255_s8 = scalar_lea.hbm %s5219_s27, 256 }
0x2802   : > { %p4252_p4 = scmp.ne.s32.totalorder %s5050_s2, %s4251_s1  ;;  %p4256_p9 = scmp.lt.u32.totalorder %s5050_s2, %s5219_s27 }
0x2803   : > { %p4257_p10 = scmp.lt.u32.totalorder %s4255_s8, %s4251_s1  ;;  %p4259_p12 = scmp.lt.u32.totalorder %s4251_s1, %s5050_s2 }
0x2804   : > { %p4253_p7 = pnand %p4252_p4, %p4492_p5 }
0x2805   : > { %p4258_p11 = por %p4257_p10, %p4256_p9 }
0x2806   : > { %p4254_p8 = pneg %p4253_p7 }
0x2807   : > { %p4260_p13 = por %p4259_p12, %p4258_p11 }
0x2809   : > { %p4261_p0 = pnand %p4260_p13, %p4254_p8 }
0x280b   : > { %4264 = shalt.err (!%p4261_p0)
}
0x280c   : > { %4097 = dma.vmem_to_hbm [thread:$0]  (%p4492_p5), %s5052_s5, 128, %s5050_s2, %s3425_s4   ;;  %v4088_v7 = vpop.f32.mrb[79].mxu0 }
0x280d PF: > { %s5220_s29 = sld [smem:[#allocation8_spill]]  ;;  %s5221_s3 = sld [smem:[#allocation5_spill]] }
0x2813   : > { %p4103_p1 = scmp.ge.s32.totalorder %s5220_s29, 2  ;;  %s3458_s6 = sand.u32 1, %s5221_s3  }
0x2814   : > { %s3459_s0 = scalar_lea.sflag [#allocation3], %s3458_s6 }
0x2815   : > { %p4100_p2 = pnand %p4103_p1, %p4496_p6 }
0x2817   : > { %4282 = dma.done.wait (!%p4100_p2), %s3459_s0, 128  }
0x2818   : > { %4284 = vsyncadd (!%p4100_p2), %s3459_s0, 4294967168  ;;  %s5223_s30 = sld [smem:[#allocation10_spill]]  ;;  %s5224_s7 = sld [smem:[#allocation6_spill]] }
0x2819   : > { %s5225_s4 = sld [smem:[#allocation7_spill]]  ;;  %s5226_s8 = sld [smem:[#allocation11_spill]] }
0x281e   : > { %p38_p3 = scmp.ge.s32.totalorder %s5223_s30, 4  }
0x2820   :  { %40 = sbr.rel (!%p38_p3) target bundleno = 22 (0x16), region = 197 }
0x2827   :  { %3472 = vsyncpa [#allocation3], 1 }
0x2828   :  { %3474 = vsyncpa [#allocation3 + $0x1], 1 }

</bundles_post_ra>
